<compile_context>
chip_gen: v5e
topology: v5e:2x2
jax: 0.10.0
libtpu: 0.0.40
codegen_flags: <defaults>
</compile_context>

<pallas_src>
import jax
import jax.numpy as jnp
from jax.experimental import pallas as pl
from jax.experimental.pallas import tpu as pltpu

TEXT_DIM = 768
FEAT_DIM = 3
HIDDEN_RAW = 800      # 768 + 32 (torch.cat width)
HIDDEN_PAD = 896      # padded to a multiple of 128 lanes
OUT_DIM = 768


# ----------------------------------------------------------------------------
# Pallas kernel: liner_two (folded with liner_one) + ReLU + liner_three
# ----------------------------------------------------------------------------
def _query_head_kernel(text_ref, feat_ref,
                       w2a_ref, w2bp_ref, b2_ref,
                       w3_ref, b3_ref,
                       out_ref):
    # bf16 cast happens IN-kernel: text arrives as f32 straight from the
    # upstream encoder -> no wrapper cast/pad copy through HBM.
    text = text_ref[...].astype(jnp.bfloat16)

    # Big matmul #1 on the MXU: [TB,768]bf16 @ [768,896]bf16 -> f32.
    z = jnp.dot(text, w2a_ref[...], preferred_element_type=jnp.float32)

    # Folded liner_one + feature path: K=3 contraction as VPU broadcast FMAs
    # (a K=3 matmul would waste a full MXU pass; VALU slots are idle here).
    feat = feat_ref[...]              # [TB, 3]   f32
    w2bp = w2bp_ref[...]              # [3, 896]  f32  (= W1 @ W2b, zero-padded)
    z = z + feat[:, 0:1] * w2bp[0:1, :]
    z = z + feat[:, 1:2] * w2bp[1:2, :]
    z = z + feat[:, 2:3] * w2bp[2:3, :]
    z = z + b2_ref[...]               # b2' = b2 + b1 @ W2b (zero-padded)

    # ReLU; Dropout is identity in eval mode.
    a = jnp.maximum(z, 0.0)

    # Big matmul #2 on the MXU: [TB,896]bf16 @ [896,768]bf16 -> f32 (+ b3).
    # Padded rows 800:896 of W3 are zero, so the padding contributes nothing.
    out = jnp.dot(a.astype(jnp.bfloat16), w3_ref[...],
                  preferred_element_type=jnp.float32) + b3_ref[...]
    out_ref[...] = out.astype(out_ref.dtype)   # bf16 store by default


def _pick_block_b(B, max_tb=256):
    """Batch tile: exact single tile for small B (block dim == array dim is
    always legal -> zero pad waste, grid=(1,)), otherwise an MXU-friendly tile
    balancing ragged-tile waste against per-grid-step overhead (~0.35 us)."""
    if B <= max_tb:
        return B
    best_tb, best_cost = None, None
    for tb in (256, 128, 64):                       # multiples of 8 sublanes
        steps = -(-B // tb)
        cost = steps * (tb + 48)                    # 48 "row-equivalents"/step
        if best_cost is None or cost < best_cost:
            best_cost, best_tb = cost, tb
    return best_tb


def query_model_forward(q_text_logit, q_feature, kparams, *,
                        out_dtype=jnp.bfloat16):
    """q_text_logit: [B,768] (BERT pooler_output), q_feature: [B,3] -> [B,768]."""
    B = q_text_logit.shape[0]
    tb = _pick_block_b(B)
    num_tiles = pl.cdiv(B, tb)

    text = q_text_logit.astype(jnp.float32)   # no-op when already f32
    feat = q_feature.astype(jnp.float32)

    w2a, w2bp, b2, w3, b3 = (kparams["w2a"], kparams["w2bp"], kparams["b2"],
                             kparams["w3"], kparams["b3"])

    weight_bytes = (w2a.size * 2 + w3.size * 2
                    + (w2bp.size + b2.size + b3.size) * 4)
    act_bytes = (text.size * 4 + feat.size * 4
                 + B * OUT_DIM * jnp.dtype(out_dtype).itemsize)
    cost = pl.CostEstimate(
        flops=2 * tb * num_tiles * (TEXT_DIM * HIDDEN_PAD + HIDDEN_PAD * OUT_DIM),
        transcendentals=0,
        bytes_accessed=weight_bytes + act_bytes)

    def build(single_buffer_weights):
        def w_spec(shape):
            # Weights stay VMEM-resident across batch tiles (constant block
            # index). Request a single buffer: no useless second copy.
            if single_buffer_weights:
                return pl.BlockSpec(shape, lambda i: (0, 0),
                                    pipeline_mode=pl.Buffered(1))
            return pl.BlockSpec(shape, lambda i: (0, 0))

        return pl.pallas_call(
            _query_head_kernel,
            out_shape=jax.ShapeDtypeStruct((B, OUT_DIM), out_dtype),
            grid=(num_tiles,),
            in_specs=[
                pl.BlockSpec((tb, TEXT_DIM), lambda i: (i, 0)),   # text (f32)
                pl.BlockSpec((tb, FEAT_DIM), lambda i: (i, 0)),   # feature
                w_spec((TEXT_DIM, HIDDEN_PAD)),                   # W2a  (bf16)
                w_spec((FEAT_DIM, HIDDEN_PAD)),                   # W2b' (f32)
                w_spec((1, HIDDEN_PAD)),                          # b2'
                w_spec((HIDDEN_PAD, OUT_DIM)),                    # W3   (bf16)
                w_spec((1, OUT_DIM)),                             # b3
            ],
            out_specs=pl.BlockSpec((tb, OUT_DIM), lambda i: (i, 0)),
            compiler_params=pltpu.CompilerParams(
                # Megacore only shards once num_tiles >= 2 (B >= 2*tb); a
                # single tile keeps the weight fetch to exactly one copy.
                dimension_semantics=("parallel",),
                vmem_limit_bytes=32 * 1024 * 1024),
            cost_estimate=cost,
        )(text, feat, w2a, w2bp, b2, w3, b3)

    try:
        out = build(single_buffer_weights=True)
        return jax.block_until_ready(out)
    except Exception:
        # Fallback for JAX builds without single-buffer pipeline_mode support:
        # default double-buffered (constant-index weights, still DMA'd once).
        return build(single_buffer_weights=False)


# ----------------------------------------------------------------------------
# Parameter init (torch nn.Linear-style) + fold/pad/cast for the kernel
# ----------------------------------------------------------------------------
def init_raw_params(key):
    def linear(key, fan_in, fan_out):
        kw, kb = jax.random.split(key)
        bound = 1.0 / jnp.sqrt(float(fan_in))
        w = jax.random.uniform(kw, (fan_in, fan_out), jnp.float32, -bound, bound)
        b = jax.random.uniform(kb, (1, fan_out), jnp.float32, -bound, bound)
        return w, b

    k1, k2, k3 = jax.random.split(key, 3)
    w1, b1 = linear(k1, FEAT_DIM, 32)            # liner_one
    w2, b2 = linear(k2, HIDDEN_RAW, HIDDEN_RAW)  # liner_two
    w3, b3 = linear(k3, HIDDEN_RAW, OUT_DIM)     # liner_three
    return dict(w1=w1, b1=b1, w2=w2, b2=b2, w3=w3, b3=b3)


def fold_params(raw):
    # Split W2 along its input dim (matches torch.cat([text, liner_one(f)])).
    w2a = raw["w2"][:TEXT_DIM, :]              # [768, 800] hits text logits
    w2b = raw["w2"][TEXT_DIM:, :]              # [ 32, 800] hits liner_one out
    # Exact fold of liner_one into liner_two (no nonlinearity between them).
    w2bp = raw["w1"] @ w2b                     # [3, 800]
    b2p = raw["b2"] + raw["b1"] @ w2b          # [1, 800]
    pad = HIDDEN_PAD - HIDDEN_RAW
    w2a = jnp.pad(w2a, ((0, 0), (0, pad)))
    w2bp = jnp.pad(w2bp, ((0, 0), (0, pad)))
    b2p = jnp.pad(b2p, ((0, 0), (0, pad)))
    w3 = jnp.pad(raw["w3"], ((0, pad), (0, 0)))
    return {
        "w2a": w2a.astype(jnp.bfloat16),
        "w2bp": w2bp.astype(jnp.float32),
        "b2": b2p.astype(jnp.float32),
        "w3": w3.astype(jnp.bfloat16),
        "b3": raw["b3"].astype(jnp.float32),
    }


# Pure-JAX reference with the ORIGINAL module structure (liner_one -> concat
# -> liner_two -> relu -> liner_three). The large weights / text activations
# are bf16-rounded to mirror what the kernel consumes.
def reference_forward(q_text_logit, q_feature, raw):
    text = q_text_logit.astype(jnp.bfloat16).astype(jnp.float32)
    h1 = q_feature @ raw["w1"] + raw["b1"]
    x = jnp.concatenate([text, h1], axis=1)
    w2 = jnp.concatenate(
        [raw["w2"][:TEXT_DIM].astype(jnp.bfloat16).astype(jnp.float32),
         raw["w2"][TEXT_DIM:]], axis=0)
    a = jnp.maximum(x @ w2 + raw["b2"], 0.0)
    w3 = raw["w3"].astype(jnp.bfloat16).astype(jnp.float32)
    return a @ w3 + raw["b3"]


if __name__ == "__main__":
    key = jax.random.PRNGKey(0)
    k_par, k_text, k_feat, k_ids = jax.random.split(key, 4)

    B, SEQ = 2, 8
    raw = init_raw_params(k_par)
    kparams = fold_params(raw)

    # Original module inputs; token ids / attention mask feed the external
    # BERT encoder whose pooler_output is consumed downstream.
    q_text_tokens_ids = jax.random.randint(k_ids, (B, SEQ), 0, 30522, jnp.int32)
    q_text_tokens_amask = jnp.ones((B, SEQ), jnp.int32)

    # BERT pooler_output stand-in and the raw 3-dim query feature.
    q_text_logit = jax.random.normal(k_text, (B, TEXT_DIM), jnp.float32)
    q_feature = jax.random.normal(k_feat, (B, FEAT_DIM), jnp.float32)

    out = query_model_forward(q_text_logit, q_feature, kparams)
    out = jax.block_until_ready(out)

    ref = reference_forward(q_text_logit, q_feature, raw)
    assert out.shape == (B, OUT_DIM)
    out_f32 = out.astype(jnp.float32)
    err = float(jnp.max(jnp.abs(out_f32 - ref)))
    assert jnp.allclose(out_f32, ref, atol=2e-2, rtol=2e-2), err

    print("KERNEL_OK")
</pallas_src>

<mosaic_0001>
module attributes {stable_mosaic.version = 11 : i64} {
  func.func @_query_head_kernel(%arg0: i32, %arg1: memref<2x768xf32, #tpu.memory_space<vmem>>, %arg2: memref<2x3xf32, #tpu.memory_space<vmem>>, %arg3: memref<768x896xbf16, #tpu.memory_space<vmem>>, %arg4: memref<3x896xf32, #tpu.memory_space<vmem>>, %arg5: memref<1x896xf32, #tpu.memory_space<vmem>>, %arg6: memref<896x768xbf16, #tpu.memory_space<vmem>>, %arg7: memref<1x768xf32, #tpu.memory_space<vmem>>, %arg8: memref<2x768xbf16, #tpu.memory_space<vmem>>) attributes {dimension_semantics = [#tpu.dimension_semantics<parallel>], iteration_bounds = array<i64: 1>, scalar_prefetch = 0 : i64, scratch_operands = 0 : i64, tpu.core_type = #tpu.core_type<tc>, window_params = [{transform_indices = @transform_0, window_bounds = array<i64: 2, 768>}, {transform_indices = @transform_1, window_bounds = array<i64: 2, 3>}, {pipeline_mode = #tpu.pipeline_mode<synchronous>, transform_indices = @transform_2, window_bounds = array<i64: 768, 896>}, {pipeline_mode = #tpu.pipeline_mode<synchronous>, transform_indices = @transform_3, window_bounds = array<i64: 3, 896>}, {pipeline_mode = #tpu.pipeline_mode<synchronous>, transform_indices = @transform_4, window_bounds = array<i64: 1, 896>}, {pipeline_mode = #tpu.pipeline_mode<synchronous>, transform_indices = @transform_5, window_bounds = array<i64: 896, 768>}, {pipeline_mode = #tpu.pipeline_mode<synchronous>, transform_indices = @transform_6, window_bounds = array<i64: 1, 768>}, {transform_indices = @transform_7, window_bounds = array<i64: 2, 768>}]} {
    %c0 = arith.constant 0 : index
    %c0_0 = arith.constant 0 : index
    %0 = vector.load %arg1[%c0, %c0_0] : memref<2x768xf32, #tpu.memory_space<vmem>>, vector<2x768xf32>
    %1 = arith.truncf %0 : vector<2x768xf32> to vector<2x768xbf16>
    %c0_1 = arith.constant 0 : index
    %c0_2 = arith.constant 0 : index
    %2 = vector.load %arg3[%c0_1, %c0_2] : memref<768x896xbf16, #tpu.memory_space<vmem>>, vector<768x896xbf16>
    %cst = arith.constant dense<0.000000e+00> : vector<2x896xf32>
    %3 = tpu.matmul %1, %2, %cst {dimension_numbers = #tpu.dot_dimension_numbers<[1], [0], [0], [1], [0, 0, 1, 1], [], []>} : vector<2x768xbf16>, vector<768x896xbf16>, vector<2x896xf32> -> vector<2x896xf32>
    %c0_3 = arith.constant 0 : index
    %c0_4 = arith.constant 0 : index
    %4 = vector.load %arg2[%c0_3, %c0_4] : memref<2x3xf32, #tpu.memory_space<vmem>>, vector<2x3xf32>
    %c0_5 = arith.constant 0 : index
    %c0_6 = arith.constant 0 : index
    %5 = vector.load %arg4[%c0_5, %c0_6] : memref<3x896xf32, #tpu.memory_space<vmem>>, vector<3x896xf32>
    %6 = vector.extract_strided_slice %4 {offsets = [0, 0], sizes = [2, 1], strides = [1, 1]} : vector<2x3xf32> to vector<2x1xf32>
    %7 = vector.extract_strided_slice %5 {offsets = [0, 0], sizes = [1, 896], strides = [1, 1]} : vector<3x896xf32> to vector<1x896xf32>
    %8 = vector.broadcast %6 : vector<2x1xf32> to vector<2x896xf32>
    %9 = vector.broadcast %7 : vector<1x896xf32> to vector<2x896xf32>
    %10 = arith.mulf %8, %9 : vector<2x896xf32>
    %11 = arith.addf %3, %10 : vector<2x896xf32>
    %12 = vector.extract_strided_slice %4 {offsets = [0, 1], sizes = [2, 1], strides = [1, 1]} : vector<2x3xf32> to vector<2x1xf32>
    %13 = vector.extract_strided_slice %5 {offsets = [1, 0], sizes = [1, 896], strides = [1, 1]} : vector<3x896xf32> to vector<1x896xf32>
    %14 = vector.broadcast %12 : vector<2x1xf32> to vector<2x896xf32>
    %15 = vector.broadcast %13 : vector<1x896xf32> to vector<2x896xf32>
    %16 = arith.mulf %14, %15 : vector<2x896xf32>
    %17 = arith.addf %11, %16 : vector<2x896xf32>
    %18 = vector.extract_strided_slice %4 {offsets = [0, 2], sizes = [2, 1], strides = [1, 1]} : vector<2x3xf32> to vector<2x1xf32>
    %19 = vector.extract_strided_slice %5 {offsets = [2, 0], sizes = [1, 896], strides = [1, 1]} : vector<3x896xf32> to vector<1x896xf32>
    %20 = vector.broadcast %18 : vector<2x1xf32> to vector<2x896xf32>
    %21 = vector.broadcast %19 : vector<1x896xf32> to vector<2x896xf32>
    %22 = arith.mulf %20, %21 : vector<2x896xf32>
    %23 = arith.addf %17, %22 : vector<2x896xf32>
    %c0_7 = arith.constant 0 : index
    %c0_8 = arith.constant 0 : index
    %24 = vector.load %arg5[%c0_7, %c0_8] : memref<1x896xf32, #tpu.memory_space<vmem>>, vector<1x896xf32>
    %25 = vector.broadcast %24 : vector<1x896xf32> to vector<2x896xf32>
    %26 = arith.addf %23, %25 : vector<2x896xf32>
    %cst_9 = arith.constant 0.000000e+00 : f32
    %27 = vector.broadcast %cst_9 : f32 to vector<2x896xf32>
    %28 = arith.maximumf %26, %27 : vector<2x896xf32>
    %29 = arith.truncf %28 : vector<2x896xf32> to vector<2x896xbf16>
    %c0_10 = arith.constant 0 : index
    %c0_11 = arith.constant 0 : index
    %30 = vector.load %arg6[%c0_10, %c0_11] : memref<896x768xbf16, #tpu.memory_space<vmem>>, vector<896x768xbf16>
    %cst_12 = arith.constant dense<0.000000e+00> : vector<2x768xf32>
    %31 = tpu.matmul %29, %30, %cst_12 {dimension_numbers = #tpu.dot_dimension_numbers<[1], [0], [0], [1], [0, 0, 1, 1], [], []>} : vector<2x896xbf16>, vector<896x768xbf16>, vector<2x768xf32> -> vector<2x768xf32>
    %c0_13 = arith.constant 0 : index
    %c0_14 = arith.constant 0 : index
    %32 = vector.load %arg7[%c0_13, %c0_14] : memref<1x768xf32, #tpu.memory_space<vmem>>, vector<1x768xf32>
    %33 = vector.broadcast %32 : vector<1x768xf32> to vector<2x768xf32>
    %34 = arith.addf %31, %33 : vector<2x768xf32>
    %35 = arith.truncf %34 : vector<2x768xf32> to vector<2x768xbf16>
    %c0_15 = arith.constant 0 : index
    %c0_16 = arith.constant 0 : index
    %36 = vector.load %arg8[%c0_15, %c0_16] : memref<2x768xbf16, #tpu.memory_space<vmem>>, vector<2x768xbf16>
    tpu.vector_store %arg8[%c0_15, %c0_16], %35 {strides = array<i32>} : memref<2x768xbf16, #tpu.memory_space<vmem>>, vector<2x768xbf16>,
    return
  }
  func.func @transform_0(%arg0: i32) -> (i32, i32) {
    %c0_i32 = arith.constant 0 : i32
    %c0_i32_0 = arith.constant 0 : i32
    return %arg0, %c0_i32 : i32, i32
  }
  func.func @transform_1(%arg0: i32) -> (i32, i32) {
    %c0_i32 = arith.constant 0 : i32
    %c0_i32_0 = arith.constant 0 : i32
    return %arg0, %c0_i32 : i32, i32
  }
  func.func @transform_2(%arg0: i32) -> (i32, i32) {
    %c0_i32 = arith.constant 0 : i32
    %c0_i32_0 = arith.constant 0 : i32
    %c0_i32_1 = arith.constant 0 : i32
    return %c0_i32, %c0_i32_0 : i32, i32
  }
  func.func @transform_3(%arg0: i32) -> (i32, i32) {
    %c0_i32 = arith.constant 0 : i32
    %c0_i32_0 = arith.constant 0 : i32
    %c0_i32_1 = arith.constant 0 : i32
    return %c0_i32, %c0_i32_0 : i32, i32
  }
  func.func @transform_4(%arg0: i32) -> (i32, i32) {
    %c0_i32 = arith.constant 0 : i32
    %c0_i32_0 = arith.constant 0 : i32
    %c0_i32_1 = arith.constant 0 : i32
    return %c0_i32, %c0_i32_0 : i32, i32
  }
  func.func @transform_5(%arg0: i32) -> (i32, i32) {
    %c0_i32 = arith.constant 0 : i32
    %c0_i32_0 = arith.constant 0 : i32
    %c0_i32_1 = arith.constant 0 : i32
    return %c0_i32, %c0_i32_0 : i32, i32
  }
  func.func @transform_6(%arg0: i32) -> (i32, i32) {
    %c0_i32 = arith.constant 0 : i32
    %c0_i32_0 = arith.constant 0 : i32
    %c0_i32_1 = arith.constant 0 : i32
    return %c0_i32, %c0_i32_0 : i32, i32
  }
  func.func @transform_7(%arg0: i32) -> (i32, i32) {
    %c0_i32 = arith.constant 0 : i32
    %c0_i32_0 = arith.constant 0 : i32
    return %arg0, %c0_i32 : i32, i32
  }
}

module attributes {stable_mosaic.version = 11 : i64} {
  func.func @_query_head_kernel(%arg0: i32, %arg1: memref<2x768xf32, #tpu.memory_space<vmem>>, %arg2: memref<2x3xf32, #tpu.memory_space<vmem>>, %arg3: memref<768x896xbf16, #tpu.memory_space<vmem>>, %arg4: memref<3x896xf32, #tpu.memory_space<vmem>>, %arg5: memref<1x896xf32, #tpu.memory_space<vmem>>, %arg6: memref<896x768xbf16, #tpu.memory_space<vmem>>, %arg7: memref<1x768xf32, #tpu.memory_space<vmem>>, %arg8: memref<2x768xbf16, #tpu.memory_space<vmem>>) attributes {dimension_semantics = [#tpu.dimension_semantics<parallel>], iteration_bounds = array<i64: 1>, scalar_prefetch = 0 : i64, scratch_operands = 0 : i64, tpu.core_type = #tpu.core_type<tc>, window_params = [{transform_indices = @transform_0, window_bounds = array<i64: 2, 768>}, {transform_indices = @transform_1, window_bounds = array<i64: 2, 3>}, {pipeline_mode = #tpu.pipeline_mode<synchronous>, transform_indices = @transform_2, window_bounds = array<i64: 768, 896>}, {pipeline_mode = #tpu.pipeline_mode<synchronous>, transform_indices = @transform_3, window_bounds = array<i64: 3, 896>}, {pipeline_mode = #tpu.pipeline_mode<synchronous>, transform_indices = @transform_4, window_bounds = array<i64: 1, 896>}, {pipeline_mode = #tpu.pipeline_mode<synchronous>, transform_indices = @transform_5, window_bounds = array<i64: 896, 768>}, {pipeline_mode = #tpu.pipeline_mode<synchronous>, transform_indices = @transform_6, window_bounds = array<i64: 1, 768>}, {transform_indices = @transform_7, window_bounds = array<i64: 2, 768>}]} {
    %c0 = arith.constant 0 : index
    %c0_0 = arith.constant 0 : index
    %0 = vector.load %arg1[%c0, %c0_0] : memref<2x768xf32, #tpu.memory_space<vmem>>, vector<2x768xf32>
    %1 = arith.truncf %0 : vector<2x768xf32> to vector<2x768xbf16>
    %c0_1 = arith.constant 0 : index
    %c0_2 = arith.constant 0 : index
    %2 = vector.load %arg3[%c0_1, %c0_2] : memref<768x896xbf16, #tpu.memory_space<vmem>>, vector<768x896xbf16>
    %cst = arith.constant dense<0.000000e+00> : vector<2x896xf32>
    %3 = tpu.matmul %1, %2, %cst {dimension_numbers = #tpu.dot_dimension_numbers<[1], [0], [0], [1], [0, 0, 1, 1], [], []>} : vector<2x768xbf16>, vector<768x896xbf16>, vector<2x896xf32> -> vector<2x896xf32>
    %c0_3 = arith.constant 0 : index
    %c0_4 = arith.constant 0 : index
    %4 = vector.load %arg2[%c0_3, %c0_4] : memref<2x3xf32, #tpu.memory_space<vmem>>, vector<2x3xf32>
    %c0_5 = arith.constant 0 : index
    %c0_6 = arith.constant 0 : index
    %5 = vector.load %arg4[%c0_5, %c0_6] : memref<3x896xf32, #tpu.memory_space<vmem>>, vector<3x896xf32>
    %6 = vector.extract_strided_slice %4 {offsets = [0, 0], sizes = [2, 1], strides = [1, 1]} : vector<2x3xf32> to vector<2x1xf32>
    %7 = vector.extract_strided_slice %5 {offsets = [0, 0], sizes = [1, 896], strides = [1, 1]} : vector<3x896xf32> to vector<1x896xf32>
    %8 = vector.broadcast %6 : vector<2x1xf32> to vector<2x896xf32>
    %9 = vector.broadcast %7 : vector<1x896xf32> to vector<2x896xf32>
    %10 = arith.mulf %8, %9 : vector<2x896xf32>
    %11 = arith.addf %3, %10 : vector<2x896xf32>
    %12 = vector.extract_strided_slice %4 {offsets = [0, 1], sizes = [2, 1], strides = [1, 1]} : vector<2x3xf32> to vector<2x1xf32>
    %13 = vector.extract_strided_slice %5 {offsets = [1, 0], sizes = [1, 896], strides = [1, 1]} : vector<3x896xf32> to vector<1x896xf32>
    %14 = vector.broadcast %12 : vector<2x1xf32> to vector<2x896xf32>
    %15 = vector.broadcast %13 : vector<1x896xf32> to vector<2x896xf32>
    %16 = arith.mulf %14, %15 : vector<2x896xf32>
    %17 = arith.addf %11, %16 : vector<2x896xf32>
    %18 = vector.extract_strided_slice %4 {offsets = [0, 2], sizes = [2, 1], strides = [1, 1]} : vector<2x3xf32> to vector<2x1xf32>
    %19 = vector.extract_strided_slice %5 {offsets = [2, 0], sizes = [1, 896], strides = [1, 1]} : vector<3x896xf32> to vector<1x896xf32>
    %20 = vector.broadcast %18 : vector<2x1xf32> to vector<2x896xf32>
    %21 = vector.broadcast %19 : vector<1x896xf32> to vector<2x896xf32>
    %22 = arith.mulf %20, %21 : vector<2x896xf32>
    %23 = arith.addf %17, %22 : vector<2x896xf32>
    %c0_7 = arith.constant 0 : index
    %c0_8 = arith.constant 0 : index
    %24 = vector.load %arg5[%c0_7, %c0_8] : memref<1x896xf32, #tpu.memory_space<vmem>>, vector<1x896xf32>
    %25 = vector.broadcast %24 : vector<1x896xf32> to vector<2x896xf32>
    %26 = arith.addf %23, %25 : vector<2x896xf32>
    %cst_9 = arith.constant 0.000000e+00 : f32
    %27 = vector.broadcast %cst_9 : f32 to vector<2x896xf32>
    %28 = arith.maximumf %26, %27 : vector<2x896xf32>
    %29 = arith.truncf %28 : vector<2x896xf32> to vector<2x896xbf16>
    %c0_10 = arith.constant 0 : index
    %c0_11 = arith.constant 0 : index
    %30 = vector.load %arg6[%c0_10, %c0_11] : memref<896x768xbf16, #tpu.memory_space<vmem>>, vector<896x768xbf16>
    %cst_12 = arith.constant dense<0.000000e+00> : vector<2x768xf32>
    %31 = tpu.matmul %29, %30, %cst_12 {dimension_numbers = #tpu.dot_dimension_numbers<[1], [0], [0], [1], [0, 0, 1, 1], [], []>} : vector<2x896xbf16>, vector<896x768xbf16>, vector<2x768xf32> -> vector<2x768xf32>
    %c0_13 = arith.constant 0 : index
    %c0_14 = arith.constant 0 : index
    %32 = vector.load %arg7[%c0_13, %c0_14] : memref<1x768xf32, #tpu.memory_space<vmem>>, vector<1x768xf32>
    %33 = vector.broadcast %32 : vector<1x768xf32> to vector<2x768xf32>
    %34 = arith.addf %31, %33 : vector<2x768xf32>
    %35 = arith.truncf %34 : vector<2x768xf32> to vector<2x768xbf16>
    %c0_15 = arith.constant 0 : index
    %c0_16 = arith.constant 0 : index
    %36 = vector.load %arg8[%c0_15, %c0_16] : memref<2x768xbf16, #tpu.memory_space<vmem>>, vector<2x768xbf16>
    tpu.vector_store %arg8[%c0_15, %c0_16], %35 {strides = array<i32>} : memref<2x768xbf16, #tpu.memory_space<vmem>>, vector<2x768xbf16>,
    return
  }
  func.func @transform_0(%arg0: i32) -> (i32, i32) {
    %c0_i32 = arith.constant 0 : i32
    %c0_i32_0 = arith.constant 0 : i32
    return %arg0, %c0_i32 : i32, i32
  }
  func.func @transform_1(%arg0: i32) -> (i32, i32) {
    %c0_i32 = arith.constant 0 : i32
    %c0_i32_0 = arith.constant 0 : i32
    return %arg0, %c0_i32 : i32, i32
  }
  func.func @transform_2(%arg0: i32) -> (i32, i32) {
    %c0_i32 = arith.constant 0 : i32
    %c0_i32_0 = arith.constant 0 : i32
    %c0_i32_1 = arith.constant 0 : i32
    return %c0_i32, %c0_i32_0 : i32, i32
  }
  func.func @transform_3(%arg0: i32) -> (i32, i32) {
    %c0_i32 = arith.constant 0 : i32
    %c0_i32_0 = arith.constant 0 : i32
    %c0_i32_1 = arith.constant 0 : i32
    return %c0_i32, %c0_i32_0 : i32, i32
  }
  func.func @transform_4(%arg0: i32) -> (i32, i32) {
    %c0_i32 = arith.constant 0 : i32
    %c0_i32_0 = arith.constant 0 : i32
    %c0_i32_1 = arith.constant 0 : i32
    return %c0_i32, %c0_i32_0 : i32, i32
  }
  func.func @transform_5(%arg0: i32) -> (i32, i32) {
    %c0_i32 = arith.constant 0 : i32
    %c0_i32_0 = arith.constant 0 : i32
    %c0_i32_1 = arith.constant 0 : i32
    return %c0_i32, %c0_i32_0 : i32, i32
  }
  func.func @transform_6(%arg0: i32) -> (i32, i32) {
    %c0_i32 = arith.constant 0 : i32
    %c0_i32_0 = arith.constant 0 : i32
    %c0_i32_1 = arith.constant 0 : i32
    return %c0_i32, %c0_i32_0 : i32, i32
  }
  func.func @transform_7(%arg0: i32) -> (i32, i32) {
    %c0_i32 = arith.constant 0 : i32
    %c0_i32_0 = arith.constant 0 : i32
    return %arg0, %c0_i32 : i32, i32
  }
}

</mosaic_0001>

<bundles_post_ra>
// kernel: tpu_custom_call.1
= control target key start
LH: loop header
LB: loop body
LE: loop exit
PB: predicated region body
PF: predicated region fallthrough
CT: control target
= control target key end

     0   :  { %12 = vsyncpa [#allocation3], 0  ;;  %s9556_s0 = inlined_call_operand.hbm [shape: f32[2,768], index: 0, kind: input, shape index: {}]   ;;  %s9557_s1 = inlined_call_operand.hbm [shape: f32[2,3], index: 1, kind: input, shape index: {}]   ;;  %s9558_s2 = inlined_call_operand.hbm [shape: bf16[768,896], index: 2, kind: input, shape index: {}]   ;;  %s9559_s3 = inlined_call_operand.hbm [shape: f32[3,896], index: 3, kind: input, shape index: {}]   ;;  %s9560_s4 = inlined_call_operand.hbm [shape: f32[1,896], index: 4, kind: input, shape index: {}]   ;;  %s9561_s5 = inlined_call_operand.hbm [shape: bf16[896,768], index: 5, kind: input, shape index: {}]   ;;  %s9562_s6 = inlined_call_operand.hbm [shape: f32[1,768], index: 6, kind: input, shape index: {}]   ;;  %s9563_s7 = inlined_call_operand.hbm [shape: bf16[2,768], index: 7, kind: output, shape index: {}]  }
   0x1   :  { %13 = vsyncpa [#allocation6], 0 }
   0x2   :  { %14 = vsyncpa [#allocation9], 0 }
   0x3   :  { %15 = vsyncpa [#allocation12], 0  ;;  %s33_s26 = sshll.u32 %s9557_s1, 4  ;;  %s34_s26 = int_to_ptr.hbm [resolvable:$true] %s33_s26 }
   0x4   :  { %16 = vsyncpa [#allocation4], 0  ;;  %s9175_s27 = smov [#allocation5]   ;;  %s57_s8 = sshll.u32 %s9559_s3, 4  ;;  %s58_s8 = int_to_ptr.hbm [resolvable:$true] %s57_s8 }
   0x5   :  { %s35_s28 = sshll.u32 %s9175_s27, 4  ;;  %s9176_s9 = smov [#allocation8]   ;;  %s36_s28 = int_to_ptr.vmem [resolvable:$true] %s35_s28 }
   0x6   :  { %38 = dma.hbm_to_vmem [thread:$0]  %s34_s26, 32, %s36_s28, [#allocation6]  }
   0x7   :  { %s59_s10 = sshll.u32 %s9176_s9, 4  ;;  %s78_s13 = sshll.u32 %s9561_s5, 4  ;;  %s60_s10 = int_to_ptr.vmem [resolvable:$true] %s59_s10  ;;  %s79_s13 = int_to_ptr.hbm [resolvable:$true] %s78_s13 }
   0x8   :  { %62 = dma.hbm_to_vmem [thread:$0]  %s58_s8, 448, %s60_s10, [#allocation9]  }
   0x9   :  { %s9177_s1 = smov [#allocation11]   ;;  %s22_s17 = sshll.u32 %s9556_s0, 4  ;;  %s23_s17 = int_to_ptr.hbm [resolvable:$true] %s22_s17 }
   0xa   :  { %s80_s14 = sshll.u32 %s9177_s1, 4  ;;  %s9178_s18 = smov 384   ;;  %s81_s14 = int_to_ptr.vmem [resolvable:$true] %s80_s14 }
   0xb   :  { %s9179_s3 = smov 24   ;;  %s9180_s19 = smov [#allocation2]  }
   0xc   :  { %86 = dma.hbm_to_vmem [thread:$0]  %s79_s13, 43008, %s81_s14, [#allocation12], %s9178_s18, %s9178_s18, %s9179_s3  }
   0xd   :  { %s24_s20 = sshll.u32 %s9180_s19, 4  ;;  %s43_s5 = sshll.u32 %s9558_s2, 4  ;;  %s25_s20 = int_to_ptr.vmem [resolvable:$true] %s24_s20  ;;  %s44_s5 = int_to_ptr.hbm [resolvable:$true] %s43_s5 }
   0xe   :  { %27 = dma.hbm_to_vmem [thread:$0]  %s23_s17, 192, %s25_s20, [#allocation3]  }
   0xf   :  { %s9181_s23 = smov [#allocation7]   ;;  %s68_s0 = sshll.u32 %s9560_s4, 4  ;;  %s69_s0 = int_to_ptr.hbm [resolvable:$true] %s68_s0 }
  0x10   :  { %s45_s24 = sshll.u32 %s9181_s23, 4  ;;  %s9182_s27 = smov 448   ;;  %s46_s24 = int_to_ptr.vmem [resolvable:$true] %s45_s24 }
  0x11   :  { %s9183_s28 = smov 28   ;;  %s9184_s29 = smov [#allocation10]  }
  0x12   :  { %51 = dma.hbm_to_vmem [thread:$0]  %s44_s5, 43008, %s46_s24, [#allocation6], %s9182_s27, %s9182_s27, %s9183_s28  }
  0x13   :  { %s70_s30 = sshll.u32 %s9184_s29, 4  ;;  %s92_s2 = sshll.u32 %s9562_s6, 4  ;;  %s71_s30 = int_to_ptr.vmem [resolvable:$true] %s70_s30  ;;  %s93_s2 = int_to_ptr.hbm [resolvable:$true] %s92_s2 }
  0x14   :  { %73 = dma.hbm_to_vmem [thread:$0]  %s69_s0, 112, %s71_s30, [#allocation9]  }
  0x15   :  { %s9185_s10 = smov [#allocation13]  }
  0x16   :  { %s94_s11 = sshll.u32 %s9185_s10, 4  ;;  %s95_s11 = int_to_ptr.vmem [resolvable:$true] %s94_s11 }
  0x17   :  { %97 = dma.hbm_to_vmem [thread:$0]  %s93_s2, 96, %s95_s11, [#allocation12]  }
  0x18   :  { %9165 = dma.done.wait [#allocation3], 192  }
  0x19   :  { %9166 = vsyncadd [#allocation3], 4294967104 }
  0x1a   :  { %9167 = dma.done.wait [#allocation6], 43040  }
  0x1b   :  { %9168 = vsyncadd [#allocation6], 4294924256 }
  0x1c   :  { %9169 = dma.done.wait [#allocation9], 560  }
  0x1d   :  { %9170 = vsyncadd [#allocation9], 4294966736 }
  0x1e   :  { %9171 = dma.done.wait [#allocation12], 43104  }
  0x1f   :  { %9172 = vsyncadd [#allocation12], 4294924192  ;;  %v5789_v0 = vld [vmem:[#allocation7 + $0x188] sm:$0xf]  ;;  %v8331_v1 = vld [vmem:[#allocation7 + $0x1a0] sm:$0xf0] }
  0x20   :  { %v6013_v2 = vld [vmem:[#allocation7 + $0x348] sm:$0xf]  ;;  %v5790_v3 = vor.u32 %v8331_v1, %v5789_v0  ;;  %v8387_v4 = vld [vmem:[#allocation7 + $0x360] sm:$0xf0]  ;;  %v5761_v11 = vld [vmem:[#allocation7 + $0x150] sm:$0xf] }
  0x21   :  { %v6237_v5 = vld [vmem:[#allocation7 + $0x508] sm:$0xf]  ;;  %v8443_v6 = vld [vmem:[#allocation7 + $0x520] sm:$0xf0]  ;;  %v6014_v7 = vor.u32 %v8387_v4, %v6013_v2  ;;  %v8324_v13 = vld [vmem:[#allocation7 + $0x168] sm:$0xf0] }
  0x22   :  { %v6238_v8 = vor.u32 %v8443_v6, %v6237_v5  ;;  %v6461_v9 = vld [vmem:[#allocation7 + $0x6c8] sm:$0xf]  ;;  %v8499_v10 = vld [vmem:[#allocation7 + $0x6e0] sm:$0xf0]  ;;  %2305 = vmatpush.bf16.msra.mxu0 %v5790_v3  ;;  %v5985_v14 = vld [vmem:[#allocation7 + $0x310] sm:$0xf]  ;;  %v5762_v16 = vor.u32 %v8324_v13, %v5761_v11 }
  0x23   :  { %v6462_v12 = vor.u32 %v8499_v10, %v6461_v9  ;;  %v8380_v15 = vld [vmem:[#allocation7 + $0x328] sm:$0xf0]  ;;  %2318 = vmatpush.bf16.msra.mxu1 %v6014_v7  ;;  %v6209_v18 = vld [vmem:[#allocation7 + $0x4d0] sm:$0xf]  ;;  %v5733_v23 = vld [vmem:[#allocation7 + $0x118] sm:$0xf] }
  0x24   :  { %2331 = vmatpush.bf16.msra.mxu2 %v6238_v8  ;;  %v5986_v17 = vor.u32 %v8380_v15, %v5985_v14  ;;  %v8436_v19 = vld [vmem:[#allocation7 + $0x4e8] sm:$0xf0]  ;;  %v6433_v20 = vld [vmem:[#allocation7 + $0x690] sm:$0xf]  ;;  %v8317_v24 = vld [vmem:[#allocation7 + $0x130] sm:$0xf0] }
  0x25   :  { %2344 = vmatpush.bf16.msra.mxu3 %v6462_v12  ;;  %v6210_v21 = vor.u32 %v8436_v19, %v6209_v18  ;;  %v8492_v22 = vld [vmem:[#allocation7 + $0x6a8] sm:$0xf0]  ;;  %v5957_v26 = vld [vmem:[#allocation7 + $0x2d8] sm:$0xf]  ;;  %v8373_v27 = vld [vmem:[#allocation7 + $0x2f0] sm:$0xf0]  ;;  %v5734_v29 = vor.u32 %v8317_v24, %v5733_v23 }
  0x26   :  { %v6434_v25 = vor.u32 %v8492_v22, %v6433_v20  ;;  %v6181_v28 = vld [vmem:[#allocation7 + $0x498] sm:$0xf]  ;;  %2306 = vmatpush.bf16.msra.mxu0 %v5762_v16  ;;  %v8429_v30 = vld [vmem:[#allocation7 + $0x4b0] sm:$0xf0]  ;;  %v5958_v33 = vor.u32 %v8373_v27, %v5957_v26  ;;  %v5705_v35 = vld [vmem:[#allocation7 + $0xe0] sm:$0xf] }
  0x27   :  { %v6405_v31 = vld [vmem:[#allocation7 + $0x658] sm:$0xf]  ;;  %v8485_v32 = vld [vmem:[#allocation7 + $0x670] sm:$0xf0]  ;;  %2319 = vmatpush.bf16.msra.mxu1 %v5986_v17  ;;  %v6182_v34 = vor.u32 %v8429_v30, %v6181_v28  ;;  %v8310_v36 = vld [vmem:[#allocation7 + $0xf8] sm:$0xf0] }
  0x28   :  { %2332 = vmatpush.bf16.msra.mxu2 %v6210_v21  ;;  %v5929_v37 = vld [vmem:[#allocation7 + $0x2a0] sm:$0xf]  ;;  %v6406_v38 = vor.u32 %v8485_v32, %v6405_v31  ;;  %v8366_v39 = vld [vmem:[#allocation7 + $0x2b8] sm:$0xf0]  ;;  %v5706_v44 = vor.u32 %v8310_v36, %v5705_v35  ;;  %v5677_v47 = vld [vmem:[#allocation7 + $0xa8] sm:$0xf] }
  0x29   :  { %2345 = vmatpush.bf16.msra.mxu3 %v6434_v25  ;;  %v6153_v40 = vld [vmem:[#allocation7 + $0x460] sm:$0xf]  ;;  %v8422_v41 = vld [vmem:[#allocation7 + $0x478] sm:$0xf0]  ;;  %v5930_v45 = vor.u32 %v8366_v39, %v5929_v37  ;;  %v8303_v48 = vld [vmem:[#allocation7 + $0xc0] sm:$0xf0] }
  0x2a   :  { %v6377_v42 = vld [vmem:[#allocation7 + $0x620] sm:$0xf]  ;;  %v8478_v43 = vld [vmem:[#allocation7 + $0x638] sm:$0xf0]  ;;  %2307 = vmatpush.bf16.msra.mxu0 %v5734_v29  ;;  %v6154_v46 = vor.u32 %v8422_v41, %v6153_v40  ;;  %v5901_v49 = vld [vmem:[#allocation7 + $0x268] sm:$0xf]  ;;  %v5678_v56 = vor.u32 %v8303_v48, %v5677_v47 }
  0x2b   :  { %2320 = vmatpush.bf16.msra.mxu1 %v5958_v33  ;;  %v6378_v50 = vor.u32 %v8478_v43, %v6377_v42  ;;  %v8359_v51 = vld [vmem:[#allocation7 + $0x280] sm:$0xf0]  ;;  %v6125_v52 = vld [vmem:[#allocation7 + $0x428] sm:$0xf]  ;;  %v5649_v59 = vld [vmem:[#allocation7 + $0x70] sm:$0xf] }
  0x2c   :  { %2333 = vmatpush.bf16.msra.mxu2 %v6182_v34  ;;  %v8415_v53 = vld [vmem:[#allocation7 + $0x440] sm:$0xf0]  ;;  %v6349_v54 = vld [vmem:[#allocation7 + $0x5e8] sm:$0xf]  ;;  %v5902_v57 = vor.u32 %v8359_v51, %v5901_v49  ;;  %v8296_v60 = vld [vmem:[#allocation7 + $0x88] sm:$0xf0] }
  0x2d   :  { %2346 = vmatpush.bf16.msra.mxu3 %v6406_v38  ;;  %v8471_v55 = vld [vmem:[#allocation7 + $0x600] sm:$0xf0]  ;;  %v6126_v58 = vor.u32 %v8415_v53, %v6125_v52  ;;  %v5873_v61 = vld [vmem:[#allocation7 + $0x230] sm:$0xf]  ;;  %v8352_v63 = vld [vmem:[#allocation7 + $0x248] sm:$0xf0]  ;;  %v5650_v4 = vor.u32 %v8296_v60, %v5649_v59 }
  0x2e   :  { %2308 = vmatpush.bf16.msra.mxu0 %v5706_v44  ;;  %v6350_v62 = vor.u32 %v8471_v55, %v6349_v54  ;;  %v6097_v0 = vld [vmem:[#allocation7 + $0x3f0] sm:$0xf]  ;;  %v8408_v1 = vld [vmem:[#allocation7 + $0x408] sm:$0xf0]  ;;  %v5874_v5 = vor.u32 %v8352_v63, %v5873_v61  ;;  %v5621_v7 = vld [vmem:[#allocation7 + $0x38] sm:$0xf] }
  0x2f   :  { %2321 = vmatpush.bf16.msra.mxu1 %v5930_v45  ;;  %v6321_v2 = vld [vmem:[#allocation7 + $0x5b0] sm:$0xf]  ;;  %v8464_v3 = vld [vmem:[#allocation7 + $0x5c8] sm:$0xf0]  ;;  %v6098_v6 = vor.u32 %v8408_v1, %v6097_v0  ;;  %v8289_v8 = vld [vmem:[#allocation7 + $0x50] sm:$0xf0] }
  0x30   :  { %2334 = vmatpush.bf16.msra.mxu2 %v6154_v46  ;;  %v5845_v9 = vld [vmem:[#allocation7 + $0x1f8] sm:$0xf]  ;;  %v6322_v10 = vor.u32 %v8464_v3, %v6321_v2  ;;  %v8345_v11 = vld [vmem:[#allocation7 + $0x210] sm:$0xf0]  ;;  %v5622_v16 = vor.u32 %v8289_v8, %v5621_v7  ;;  %v5593_v17 = vld [vmem:[#allocation7] sm:$0xf] }
  0x31   :  { %2347 = vmatpush.bf16.msra.mxu3 %v6378_v50  ;;  %v6069_v12 = vld [vmem:[#allocation7 + $0x3b8] sm:$0xf]  ;;  %v8401_v13 = vld [vmem:[#allocation7 + $0x3d0] sm:$0xf0]  ;;  %v8282_v18 = vld [vmem:[#allocation7 + $0x18] sm:$0xf0]  ;;  %v5846_v19 = vor.u32 %v8345_v11, %v5845_v9 }
  0x32   :  { %2309 = vmatpush.bf16.msra.mxu0 %v5678_v56  ;;  %v6293_v14 = vld [vmem:[#allocation7 + $0x578] sm:$0xf]  ;;  %v8457_v15 = vld [vmem:[#allocation7 + $0x590] sm:$0xf0]  ;;  %v6070_v20 = vor.u32 %v8401_v13, %v6069_v12  ;;  %v5817_v21 = vld [vmem:[#allocation7 + $0x1c0] sm:$0xf]  ;;  %v5594_v31 = vor.u32 %v8282_v18, %v5593_v17 }
  0x33   :  { %2322 = vmatpush.bf16.msra.mxu1 %v5902_v57  ;;  %v8338_v22 = vld [vmem:[#allocation7 + $0x1d8] sm:$0xf0]  ;;  %v6041_v23 = vld [vmem:[#allocation7 + $0x380] sm:$0xf]  ;;  %v6294_v24 = vor.u32 %v8457_v15, %v6293_v14  ;;  %v6685_v28 = vld [vmem:[#allocation7 + $0x888] sm:$0xf] }
  0x34   :  { %2335 = vmatpush.bf16.msra.mxu2 %v6126_v58  ;;  %v8394_v25 = vld [vmem:[#allocation7 + $0x398] sm:$0xf0]  ;;  %v6265_v26 = vld [vmem:[#allocation7 + $0x540] sm:$0xf]  ;;  %v8555_v29 = vld [vmem:[#allocation7 + $0x8a0] sm:$0xf0]  ;;  %v5818_v35 = vor.u32 %v8338_v22, %v5817_v21 }
  0x35   :  { %2348 = vmatpush.bf16.msra.mxu3 %v6350_v62  ;;  %v8450_v27 = vld [vmem:[#allocation7 + $0x558] sm:$0xf0]  ;;  %v6909_v30 = vld [vmem:[#allocation7 + $0xa48] sm:$0xf]  ;;  %v8611_v32 = vld [vmem:[#allocation7 + $0xa60] sm:$0xf0]  ;;  %v6042_v36 = vor.u32 %v8394_v25, %v6041_v23  ;;  %v6686_v40 = vor.u32 %v8555_v29, %v6685_v28 }
  0x36   :  { %2310 = vmatpush.bf16.msra.mxu0 %v5650_v4  ;;  %v8328_v33 = vld [vmem:[#allocation7 + $0x18c] sm:$0xf]  ;;  %v5791_v34 = vld [vmem:[#allocation7 + $0x1a4] sm:$0xf0]  ;;  %v6266_v39 = vor.u32 %v8450_v27, %v6265_v26  ;;  %v6910_v41 = vor.u32 %v8611_v32, %v6909_v30  ;;  %v6657_v43 = vld [vmem:[#allocation7 + $0x850] sm:$0xf] }
  0x37   :  { %2323 = vmatpush.bf16.msra.mxu1 %v5874_v5  ;;  %v8384_v37 = vld [vmem:[#allocation7 + $0x34c] sm:$0xf]  ;;  %v6015_v38 = vld [vmem:[#allocation7 + $0x364] sm:$0xf0]  ;;  %v5794_v42 = vor.u32 %v8328_v33, %v5791_v34  ;;  %v6881_v45 = vld [vmem:[#allocation7 + $0xa10] sm:$0xf] }
  0x38   :  { %2336 = vmatpush.bf16.msra.mxu2 %v6098_v6  ;;  %v8548_v44 = vld [vmem:[#allocation7 + $0x868] sm:$0xf0]  ;;  %v6018_v46 = vor.u32 %v8384_v37, %v6015_v38  ;;  %v8321_v48 = vld [vmem:[#allocation7 + $0x154] sm:$0xf]  ;;  %v5763_v49 = vld [vmem:[#allocation7 + $0x16c] sm:$0xf0] }
  0x39   :  { %2349 = vmatpush.bf16.msra.mxu3 %v6322_v10  ;;  %v8604_v47 = vld [vmem:[#allocation7 + $0xa28] sm:$0xf0]  ;;  %v8377_v50 = vld [vmem:[#allocation7 + $0x314] sm:$0xf]  ;;  %v5987_v51 = vld [vmem:[#allocation7 + $0x32c] sm:$0xf0]  ;;  %v6658_v52 = vor.u32 %v8548_v44, %v6657_v43  ;;  %v5766_v54 = vor.u32 %v8321_v48, %v5763_v49 }
  0x3a   :  { %2311 = vmatpush.bf16.msra.mxu0 %v5622_v16  ;;  %v6882_v53 = vor.u32 %v8604_v47, %v6881_v45  ;;  %v6629_v55 = vld [vmem:[#allocation7 + $0x818] sm:$0xf]  ;;  %v8541_v56 = vld [vmem:[#allocation7 + $0x830] sm:$0xf0]  ;;  %v5990_v58 = vor.u32 %v8377_v50, %v5987_v51  ;;  %v8314_v60 = vld [vmem:[#allocation7 + $0x11c] sm:$0xf] }
  0x3b   :  { %2324 = vmatpush.bf16.msra.mxu1 %v5846_v19  ;;  %v6853_v57 = vld [vmem:[#allocation7 + $0x9d8] sm:$0xf]  ;;  %v8597_v59 = vld [vmem:[#allocation7 + $0x9f0] sm:$0xf0]  ;;  %v8370_v62 = vld [vmem:[#allocation7 + $0x2dc] sm:$0xf]  ;;  %v6630_v0 = vor.u32 %v8541_v56, %v6629_v55 }
  0x3c   :  { %2337 = vmatpush.bf16.msra.mxu2 %v6070_v20  ;;  %v5735_v61 = vld [vmem:[#allocation7 + $0x134] sm:$0xf0]  ;;  %v6601_v1 = vld [vmem:[#allocation7 + $0x7e0] sm:$0xf]  ;;  %v6854_v3 = vor.u32 %v8597_v59, %v6853_v57  ;;  %v8534_v5 = vld [vmem:[#allocation7 + $0x7f8] sm:$0xf0] }
  0x3d   :  { %2350 = vmatpush.bf16.msra.mxu3 %v6294_v24  ;;  %v5959_v63 = vld [vmem:[#allocation7 + $0x2f4] sm:$0xf0]  ;;  %v5738_v4 = vor.u32 %v8314_v60, %v5735_v61  ;;  %v6825_v6 = vld [vmem:[#allocation7 + $0x9a0] sm:$0xf]  ;;  %v8590_v8 = vld [vmem:[#allocation7 + $0x9b8] sm:$0xf0]  ;;  %v6602_v14 = vor.u32 %v8534_v5, %v6601_v1 }
  0x3e   :  { %2312 = vmatpush.bf16.msra.mxu0 %v5594_v31  ;;  %v126_v2 = vld [vmem:[#allocation2] sm:$0xff]  ;;  %v5962_v7 = vor.u32 %v8370_v62, %v5959_v63  ;;  %v8307_v9 = vld [vmem:[#allocation7 + $0xe4] sm:$0xf]  ;;  %v5707_v10 = vld [vmem:[#allocation7 + $0xfc] sm:$0xf0]  ;;  %v9186_v11 = vmov 0   ;;  %v6826_v16 = vor.u32 %v8590_v8, %v6825_v6 }
  0x3f   :  { %2325 = vmatpush.bf16.msra.mxu1 %v5818_v35  ;;  %130 = vst [vmem:[#allocation1] ss:$4 sm:$0xff] %v126_v2  ;;  %8966 = vset.pattern.permute.xlu0 %v9186_v11  ;;  %v8363_v12 = vld [vmem:[#allocation7 + $0x2a4] sm:$0xf]  ;;  %v5931_v13 = vld [vmem:[#allocation7 + $0x2bc] sm:$0xf0]  ;;  %v5710_v17 = vor.u32 %v8307_v9, %v5707_v10 }
  0x40   :  { %2338 = vmatpush.bf16.msra.mxu2 %v6042_v36  ;;  %v6573_v15 = vld [vmem:[#allocation7 + $0x7a8] sm:$0xf]  ;;  %v8527_v18 = vld [vmem:[#allocation7 + $0x7c0] sm:$0xf0]  ;;  %v5934_v21 = vor.u32 %v8363_v12, %v5931_v13  ;;  %v8300_v22 = vld [vmem:[#allocation7 + $0xac] sm:$0xf] }
  0x41   :  { %2351 = vmatpush.bf16.msra.mxu3 %v6266_v39  ;;  %v6797_v19 = vld [vmem:[#allocation7 + $0x968] sm:$0xf]  ;;  %v8583_v20 = vld [vmem:[#allocation7 + $0x980] sm:$0xf0]  ;;  %v8356_v24 = vld [vmem:[#allocation7 + $0x26c] sm:$0xf]  ;;  %v6574_v28 = vor.u32 %v8527_v18, %v6573_v15 }
  0x42   :  { %2357 = vmatpush.bf16.msrb.mxu0 %v6686_v40  ;;  %v5679_v23 = vld [vmem:[#allocation7 + $0xc4] sm:$0xf0]  ;;  %v6545_v26 = vld [vmem:[#allocation7 + $0x770] sm:$0xf]  ;;  %v8520_v27 = vld [vmem:[#allocation7 + $0x788] sm:$0xf0]  ;;  %v6798_v29 = vor.u32 %v8583_v20, %v6797_v19 }
  0x43   :  { %2370 = vmatpush.bf16.msrb.mxu1 %v6910_v41  ;;  %v5903_v25 = vld [vmem:[#allocation7 + $0x284] sm:$0xf0]  ;;  %v6769_v30 = vld [vmem:[#allocation7 + $0x930] sm:$0xf]  ;;  %v5682_v33 = vor.u32 %v8300_v22, %v5679_v23  ;;  %v8576_v39 = vld [vmem:[#allocation7 + $0x948] sm:$0xf0] }
  0x44   :  { %2383 = vmatpush.bf16.msrb.mxu2 %v5794_v42  ;;  %v5906_v38 = vor.u32 %v8356_v24, %v5903_v25  ;;  %v8293_v40 = vld [vmem:[#allocation7 + $0x74] sm:$0xf]  ;;  %v5651_v41 = vld [vmem:[#allocation7 + $0x8c] sm:$0xf0]  ;;  %v6517_v47 = vld [vmem:[#allocation7 + $0x738] sm:$0xf]  ;;  %v6770_v49 = vor.u32 %v8576_v39, %v6769_v30 }
  0x45   :  { %2396 = vmatpush.bf16.msrb.mxu3 %v6018_v46  ;;  %v8349_v43 = vld [vmem:[#allocation7 + $0x234] sm:$0xf]  ;;  %v5875_v44 = vld [vmem:[#allocation7 + $0x24c] sm:$0xf0]  ;;  %v6546_v46 = vor.u32 %v8520_v27, %v6545_v26  ;;  %v5654_v50 = vor.u32 %v8293_v40, %v5651_v41  ;;  %v6741_v51 = vld [vmem:[#allocation7 + $0x8f8] sm:$0xf] }
  0x46   :  { %2358 = vmatpush.bf16.msrb.mxu0 %v6658_v52  ;;  %v133_v31 = vld.sshfl [vmem:[#allocation1] sm:$0xff pattern:$0x73625140]  ;;  %v134_v32 = vld.sshfl [vmem:[#allocation1 + $0x8] sm:$0xff pattern:$0x73625140] }
  0x47   :  { %2371 = vmatpush.bf16.msrb.mxu1 %v6882_v53  ;;  %v9251_v34 = vpack.c.bf16 %v133_v31, %v133_v31  ;;  %v9253_v35 = vpack.c.bf16 %v134_v32, %v134_v32  ;;  %v135_v36 = vld.sshfl [vmem:[#allocation1 + $0x10] sm:$0xff pattern:$0x73625140]  ;;  %v136_v37 = vld.sshfl [vmem:[#allocation1 + $0x18] sm:$0xff pattern:$0x73625140] }
  0x48   :  { %2384 = vmatpush.bf16.msrb.mxu2 %v5766_v54  ;;  %v9255_v42 = vpack.c.bf16 %v135_v36, %v135_v36  ;;  %v9259_v45 = vpack.c.bf16 %v136_v37, %v136_v37  ;;  %v8513_v48 = vld [vmem:[#allocation7 + $0x750] sm:$0xf0]  ;;  %v127_v53 = vld [vmem:[#allocation2 + $0x8] sm:$0xf]  ;;  %v5878_v54 = vor.u32 %v8349_v43, %v5875_v44  ;;  %v6489_v59 = vld [vmem:[#allocation7 + $0x700] sm:$0xf] }
  0x49   :  { %2397 = vmatpush.bf16.msrb.mxu3 %v5990_v58  ;;  %2313 = vmatmul.bf16.vlgmr.msra.gmra.mxu0 %v9251_v34  ;;  %v8569_v52 = vld [vmem:[#allocation7 + $0x910] sm:$0xf0]  ;;  %v8286_v55 = vld [vmem:[#allocation7 + $0x3c] sm:$0xf]  ;;  %v5623_v56 = vld [vmem:[#allocation7 + $0x54] sm:$0xf0]  ;;  %v6518_v60 = vor.u32 %v8513_v48, %v6517_v47 }
  0x4a   :  { %2359 = vmatpush.bf16.msrb.mxu0 %v6630_v0  ;;  %2326 = vmatmul.bf16.vlgmr.msra.gmra.mxu1 %v9253_v35  ;;  %132 = vst [vmem:[#allocation1 + $0x20] ss:$4 sm:$0xff] %v127_v53  ;;  %v8342_v57 = vld [vmem:[#allocation7 + $0x1fc] sm:$0xf]  ;;  %v5847_v58 = vld [vmem:[#allocation7 + $0x214] sm:$0xf0]  ;;  %v6742_v0 = vor.u32 %v8569_v52, %v6741_v51  ;;  %v5626_v1 = vor.u32 %v8286_v55, %v5623_v56 }
  0x4b   :  { %2372 = vmatpush.bf16.msrb.mxu1 %v6854_v3  ;;  %2339 = vmatmul.bf16.vlgmr.msra.gmra.mxu2 %v9255_v42  ;;  %v8506_v61 = vld [vmem:[#allocation7 + $0x718] sm:$0xf0]  ;;  %v6713_v62 = vld [vmem:[#allocation7 + $0x8c0] sm:$0xf]  ;;  %v8279_v2 = vld [vmem:[#allocation7 + $0x4] sm:$0xf]  ;;  %v5850_v5 = vor.u32 %v8342_v57, %v5847_v58 }
  0x4c   :  { %2385 = vmatpush.bf16.msrb.mxu2 %v5738_v4  ;;  %2352 = vmatmul.bf16.vlgmr.msra.gmra.mxu3 %v9259_v45  ;;  %v8562_v63 = vld [vmem:[#allocation7 + $0x8d8] sm:$0xf0]  ;;  %v5595_v3 = vld [vmem:[#allocation7 + $0x1c] sm:$0xf0]  ;;  %v8335_v6 = vld [vmem:[#allocation7 + $0x1c4] sm:$0xf]  ;;  %v6490_v12 = vor.u32 %v8506_v61, %v6489_v59 }
  0x4d   :  { %2398 = vmatpush.bf16.msrb.mxu3 %v5962_v7  ;;  %v9263_v4 = vld [vmem:[#allocation5] sm:$0x3]  ;;  %v5819_v7 = vld [vmem:[#allocation7 + $0x1dc] sm:$0xf0]  ;;  %v8440_v8 = vld [vmem:[#allocation7 + $0x50c] sm:$0xf] }
  0x4e   :  { %2360 = vmatpush.bf16.msrb.mxu0 %v6602_v14  ;;  %542 = vperm.xlu0 %8966, %v9263_v4   ;;  %v6239_v9 = vld [vmem:[#allocation7 + $0x524] sm:$0xf0]  ;;  %v8496_v10 = vld [vmem:[#allocation7 + $0x6cc] sm:$0xf]  ;;  %v5822_v20 = vor.u32 %v8335_v6, %v5819_v7  ;;  %v8433_v22 = vld [vmem:[#allocation7 + $0x4d4] sm:$0xf] }
  0x4f   :  { %2373 = vmatpush.bf16.msrb.mxu1 %v6826_v16  ;;  %v6463_v11 = vld [vmem:[#allocation7 + $0x6e4] sm:$0xf0]  ;;  %v8552_v13 = vld [vmem:[#allocation7 + $0x88c] sm:$0xf]  ;;  %v6714_v16 = vor.u32 %v8562_v63, %v6713_v62  ;;  %v6211_v26 = vld [vmem:[#allocation7 + $0x4ec] sm:$0xf0] }
  0x50   :  { %2386 = vmatpush.bf16.msrb.mxu2 %v5710_v17  ;;  %v6687_v14 = vld [vmem:[#allocation7 + $0x8a4] sm:$0xf0]  ;;  %v8608_v15 = vld [vmem:[#allocation7 + $0xa4c] sm:$0xf]  ;;  %v5598_v17 = vor.u32 %v8279_v2, %v5595_v3  ;;  %v6466_v24 = vor.u32 %v8496_v10, %v6463_v11  ;;  %v8489_v27 = vld [vmem:[#allocation7 + $0x694] sm:$0xf]  ;;  %v6214_v39 = vor.u32 %v8433_v22, %v6211_v26 }
  0x51   :  { %2399 = vmatpush.bf16.msrb.mxu3 %v5934_v21  ;;  %v6911_v18 = vld [vmem:[#allocation7 + $0xa64] sm:$0xf0]  ;;  %v6242_v21 = vor.u32 %v8440_v8, %v6239_v9  ;;  %v138_v23 = vld.sshfl [vmem:[#allocation1 + $0x28] sm:$0xff pattern:$0x73625140]  ;;  %v6690_v25 = vor.u32 %v8552_v13, %v6687_v14  ;;  %v9188_v53 = vmov 1  }
  0x52   :  { %2361 = vmatpush.bf16.msrb.mxu0 %v6574_v28  ;;  %v137_v19 = vld.sshfl [vmem:[#allocation1 + $0x20] sm:$0xff pattern:$0x73625140]  ;;  %v6914_v28 = vor.u32 %v8608_v15, %v6911_v18  ;;  %v8545_v30 = vld [vmem:[#allocation7 + $0x854] sm:$0xf]  ;;  %vm5553_vm0 = vcmask 1040384  }
  0x53   :  { %2374 = vmatpush.bf16.msrb.mxu1 %v6798_v29  ;;  %v6435_v29 = vld [vmem:[#allocation7 + $0x6ac] sm:$0xf0]  ;;  %v9266_v32 = vpack.c.bf16 %v137_v19, %v137_v19  ;;  %v8601_v36 = vld [vmem:[#allocation7 + $0xa14] sm:$0xf]  ;;  %v8426_v43 = vld [vmem:[#allocation7 + $0x49c] sm:$0xf] }
  0x54   :  { %2387 = vmatpush.bf16.msrb.mxu2 %v5682_v33  ;;  %v6659_v31 = vld [vmem:[#allocation7 + $0x86c] sm:$0xf0]  ;;  %v9187_v33 = vmov 2   ;;  %v6438_v40 = vor.u32 %v8489_v27, %v6435_v29  ;;  %v6183_v44 = vld [vmem:[#allocation7 + $0x4b4] sm:$0xf0]  ;;  %vm5557_vm1 = vcmask 1041408  }
  0x55   :  { %2400 = vmatpush.bf16.msrb.mxu3 %v5906_v38  ;;  %8968 = vset.pattern.permute.xlu1 %v9187_v33  ;;  %v6883_v37 = vld [vmem:[#allocation7 + $0xa2c] sm:$0xf0]  ;;  %v9269_v38 = vpack.c.bf16 %v138_v23, %v138_v23  ;;  %v6662_v41 = vor.u32 %v8545_v30, %v6659_v31  ;;  %v6407_v48 = vld [vmem:[#allocation7 + $0x674] sm:$0xf0]  ;;  %v8594_v51 = vld [vmem:[#allocation7 + $0x9dc] sm:$0xf] }
  0x56   :  { %2362 = vmatpush.bf16.msrb.mxu0 %v6546_v46  ;;  %v8482_v46 = vld [vmem:[#allocation7 + $0x65c] sm:$0xf]  ;;  %v6886_v47 = vor.u32 %v8601_v36, %v6883_v37  ;;  %v6855_v52 = vld [vmem:[#allocation7 + $0x9f4] sm:$0xf0]  ;;  %8967 = vset.pattern.permute.xlu0 %v9188_v53  ;;  %v8419_v57 = vld [vmem:[#allocation7 + $0x464] sm:$0xf] }
  0x57   :  { %2375 = vmatpush.bf16.msrb.mxu1 %v6770_v49  ;;  %v8538_v49 = vld [vmem:[#allocation7 + $0x81c] sm:$0xf]  ;;  %2852 = vperm.xlu0 %8967, %v9263_v4   ;;  %v6410_v55 = vor.u32 %v8482_v46, %v6407_v48  ;;  %v6155_v58 = vld [vmem:[#allocation7 + $0x47c] sm:$0xf0]  ;;  %v8475_v59 = vld [vmem:[#allocation7 + $0x624] sm:$0xf] }
  0x58   :  { %2388 = vmatpush.bf16.msrb.mxu2 %v5654_v50  ;;  %v6631_v50 = vld [vmem:[#allocation7 + $0x834] sm:$0xf0]  ;;  %v6379_v61 = vld [vmem:[#allocation7 + $0x63c] sm:$0xf0]  ;;  %v8531_v62 = vld [vmem:[#allocation7 + $0x7e4] sm:$0xf]  ;;  %2891 = vperm.xlu1 %8968, %v9263_v4   ;;  %v6158_v2 = vor.u32 %v8419_v57, %v6155_v58 }
  0x59   :  { %2401 = vmatpush.bf16.msrb.mxu3 %v5878_v54  ;;  %v6186_v54 = vor.u32 %v8426_v43, %v6183_v44  ;;  %v6634_v56 = vor.u32 %v8538_v49, %v6631_v50  ;;  %v6603_v63 = vld [vmem:[#allocation7 + $0x7fc] sm:$0xf0]  ;;  %v6382_v3 = vor.u32 %v8475_v59, %v6379_v61  ;;  %v8412_v6 = vld [vmem:[#allocation7 + $0x42c] sm:$0xf]  ;;  %v6127_v7 = vld [vmem:[#allocation7 + $0x444] sm:$0xf0] }
  0x5a   :  { %2363 = vmatpush.bf16.msrb.mxu0 %v6518_v60  ;;  %v6858_v60 = vor.u32 %v8594_v51, %v6855_v52  ;;  %v8468_v8 = vld [vmem:[#allocation7 + $0x5ec] sm:$0xf]  ;;  %v6351_v10 = vld [vmem:[#allocation7 + $0x604] sm:$0xf0]  ;;  %v6130_v14 = vor.u32 %v8412_v6, %v6127_v7  ;;  %v6099_v18 = vld [vmem:[#allocation7 + $0x40c] sm:$0xf0] }
  0x5b   :  { %2376 = vmatpush.bf16.msrb.mxu1 %v6742_v0  ;;  %v8587_v0 = vld [vmem:[#allocation7 + $0x9a4] sm:$0xf]  ;;  %v8524_v11 = vld [vmem:[#allocation7 + $0x7ac] sm:$0xf]  ;;  %v6575_v4 = vld [vmem:[#allocation7 + $0x7c4] sm:$0xf0]  ;;  %v6354_v15 = vor.u32 %v8468_v8, %v6351_v10 }
  0x5c   :  { %2389 = vmatpush.bf16.msrb.mxu2 %v5626_v1  ;;  %v6827_v1 = vld [vmem:[#allocation7 + $0x9bc] sm:$0xf0]  ;;  %v6799_v13 = vld [vmem:[#allocation7 + $0x984] sm:$0xf0]  ;;  %v8461_v19 = vld [vmem:[#allocation7 + $0x5b4] sm:$0xf] }
  0x5d   :  { %2402 = vmatpush.bf16.msrb.mxu3 %v5850_v5  ;;  %v6606_v5 = vor.u32 %v8531_v62, %v6603_v63  ;;  %v6830_v9 = vor.u32 %v8587_v0, %v6827_v1  ;;  %v8517_v22 = vld [vmem:[#allocation7 + $0x774] sm:$0xf]  ;;  %v6547_v23 = vld [vmem:[#allocation7 + $0x78c] sm:$0xf0]  ;;  %v8398_v29 = vld [vmem:[#allocation7 + $0x3bc] sm:$0xf] }
  0x5e   :  { %2364 = vmatpush.bf16.msrb.mxu0 %v6490_v12  ;;  %v8580_v12 = vld [vmem:[#allocation7 + $0x96c] sm:$0xf]  ;;  %v6071_v30 = vld [vmem:[#allocation7 + $0x3d4] sm:$0xf0]  ;;  %v8454_v31 = vld [vmem:[#allocation7 + $0x57c] sm:$0xf] }
  0x5f   :  { %2377 = vmatpush.bf16.msrb.mxu1 %v6714_v16  ;;  %8969 = vset.pattern.permute.xlu0 %v9187_v33  ;;  %v6578_v16 = vor.u32 %v8524_v11, %v6575_v4  ;;  %v6295_v36 = vld [vmem:[#allocation7 + $0x594] sm:$0xf0]  ;;  %v8510_v37 = vld [vmem:[#allocation7 + $0x73c] sm:$0xf]  ;;  %v6074_v43 = vor.u32 %v8398_v29, %v6071_v30  ;;  %v8391_v44 = vld [vmem:[#allocation7 + $0x384] sm:$0xf] }
  0x60   :  { %2390 = vmatpush.bf16.msrb.mxu2 %v5598_v17  ;;  %v8405_v17 = vld [vmem:[#allocation7 + $0x3f4] sm:$0xf]  ;;  %v6043_v46 = vld [vmem:[#allocation7 + $0x39c] sm:$0xf0]  ;;  %v8447_v49 = vld [vmem:[#allocation7 + $0x544] sm:$0xf] }
  0x61   :  { %2403 = vmatpush.bf16.msrb.mxu3 %v5822_v20  ;;  %2365 = vmatmul.bf16.vlgmr.msrb.gmra.mxu0 %v9266_v32  ;;  %v6802_v20 = vor.u32 %v8580_v12, %v6799_v13  ;;  %v6102_v26 = vor.u32 %v8405_v17, %v6099_v18  ;;  %v6267_v50 = vld [vmem:[#allocation7 + $0x55c] sm:$0xf0]  ;;  %v8503_v51 = vld [vmem:[#allocation7 + $0x704] sm:$0xf]  ;;  %v8332_v57 = vld [vmem:[#allocation7 + $0x1a8] sm:$0xf0]  ;;  %v6046_v59 = vor.u32 %v8391_v44, %v6043_v46 }
  0x62   :  { %2409 = vmatpush.bf16.msra.mxu0 %v6242_v21  ;;  %2378 = vmatmul.bf16.vlgmr.msrb.gmra.mxu1 %v9269_v38  ;;  %v6323_v21 = vld [vmem:[#allocation7 + $0x5cc] sm:$0xf0]  ;;  %v6491_v53 = vld [vmem:[#allocation7 + $0x71c] sm:$0xf0]  ;;  %v8444_v62 = vld [vmem:[#allocation7 + $0x528] sm:$0xf0]  ;;  %v6270_v63 = vor.u32 %v8447_v49, %v6267_v50 }
  0x63   :  { %2422 = vmatpush.bf16.msra.mxu1 %v6466_v24  ;;  %2391 = vmatmul.bf16.vlgmr.msrb.gmra.mxu2 %v9251_v34  ;;  %v8573_v24 = vld [vmem:[#allocation7 + $0x934] sm:$0xf]  ;;  %v6326_v27 = vor.u32 %v8461_v19, %v6323_v21  ;;  %v6021_v58 = vld [vmem:[#allocation7 + $0x350] sm:$0xf]  ;;  %v6494_v0 = vor.u32 %v8503_v51, %v6491_v53  ;;  %v5769_v8 = vld [vmem:[#allocation7 + $0x158] sm:$0xf] }
  0x64   :  { %2435 = vmatpush.bf16.msra.mxu2 %v6690_v25  ;;  %2404 = vmatmul.bf16.vlgmr.msrb.gmra.mxu3 %v9253_v35  ;;  %v6771_v25 = vld [vmem:[#allocation7 + $0x94c] sm:$0xf0]  ;;  %v5993_v10 = vld [vmem:[#allocation7 + $0x318] sm:$0xf]  ;;  %v8381_v4 = vld [vmem:[#allocation7 + $0x330] sm:$0xf0] }
  0x65   :  { %2448 = vmatpush.bf16.msra.mxu3 %v6914_v28  ;;  %v6550_v28 = vor.u32 %v8517_v22, %v6547_v23  ;;  %v6774_v33 = vor.u32 %v8573_v24, %v6771_v25  ;;  %v6245_v61 = vld [vmem:[#allocation7 + $0x510] sm:$0xf]  ;;  %v6217_v12 = vld [vmem:[#allocation7 + $0x4d8] sm:$0xf]  ;;  %v8437_v13 = vld [vmem:[#allocation7 + $0x4f0] sm:$0xf0]  ;;  %v5994_v17 = vor.u32 %v8381_v4, %v5993_v10 }
  0x66   :  { %2410 = vmatpush.bf16.msra.mxu0 %v6214_v39  ;;  %v6519_v39 = vld [vmem:[#allocation7 + $0x754] sm:$0xf0]  ;;  %v6469_v1 = vld [vmem:[#allocation7 + $0x6d0] sm:$0xf]  ;;  %v6246_v7 = vor.u32 %v8444_v62, %v6245_v61  ;;  %v6218_v18 = vor.u32 %v8437_v13, %v6217_v12  ;;  %v5741_v19 = vld [vmem:[#allocation7 + $0x120] sm:$0xf] }
  0x67   :  { %2423 = vmatpush.bf16.msra.mxu1 %v6438_v40  ;;  %v8566_v40 = vld [vmem:[#allocation7 + $0x8fc] sm:$0xf]  ;;  %v6522_v48 = vor.u32 %v8510_v37, %v6519_v39  ;;  %v5965_v21 = vld [vmem:[#allocation7 + $0x2e0] sm:$0xf]  ;;  %v8367_v39 = vld [vmem:[#allocation7 + $0x2c0] sm:$0xf0] }
  0x68   :  { %2436 = vmatpush.bf16.msra.mxu2 %v6662_v41  ;;  %v6743_v41 = vld [vmem:[#allocation7 + $0x914] sm:$0xf0]  ;;  %v8374_v23 = vld [vmem:[#allocation7 + $0x2f8] sm:$0xf0]  ;;  %v6189_v24 = vld [vmem:[#allocation7 + $0x4a0] sm:$0xf] }
  0x69   :  { %2449 = vmatpush.bf16.msra.mxu3 %v6886_v47  ;;  %v6298_v47 = vor.u32 %v8454_v31, %v6295_v36  ;;  %v6746_v52 = vor.u32 %v8566_v40, %v6743_v41  ;;  %v8430_v25 = vld [vmem:[#allocation7 + $0x4b8] sm:$0xf0]  ;;  %v5966_v29 = vor.u32 %v8374_v23, %v5965_v21  ;;  %v5713_v31 = vld [vmem:[#allocation7 + $0xe8] sm:$0xf]  ;;  %v8423_v41 = vld [vmem:[#allocation7 + $0x480] sm:$0xf0] }
  0x6a   :  { %2411 = vmatpush.bf16.msra.mxu0 %v6186_v54  ;;  %v8559_v54 = vld [vmem:[#allocation7 + $0x8c4] sm:$0xf]  ;;  %v6190_v30 = vor.u32 %v8430_v25, %v6189_v24  ;;  %v5937_v36 = vld [vmem:[#allocation7 + $0x2a8] sm:$0xf]  ;;  %v5685_v49 = vld [vmem:[#allocation7 + $0xb0] sm:$0xf] }
  0x6b   :  { %2424 = vmatpush.bf16.msra.mxu1 %v6410_v55  ;;  %v6715_v55 = vld [vmem:[#allocation7 + $0x8dc] sm:$0xf0]  ;;  %v6161_v40 = vld [vmem:[#allocation7 + $0x468] sm:$0xf]  ;;  %v8479_v44 = vld [vmem:[#allocation7 + $0x640] sm:$0xf0] }
  0x6c   :  { %2437 = vmatpush.bf16.msra.mxu2 %v6634_v56  ;;  %v5797_v56 = vld [vmem:[#allocation7 + $0x190] sm:$0xf]  ;;  %v8304_v50 = vld [vmem:[#allocation7 + $0xc8] sm:$0xf0]  ;;  %v5657_v61 = vld [vmem:[#allocation7 + $0x78] sm:$0xf] }
  0x6d   :  { %2450 = vmatpush.bf16.msra.mxu3 %v6858_v60  ;;  %v8388_v60 = vld [vmem:[#allocation7 + $0x368] sm:$0xf0]  ;;  %v5909_v51 = vld [vmem:[#allocation7 + $0x270] sm:$0xf]  ;;  %v8297_v62 = vld [vmem:[#allocation7 + $0x90] sm:$0xf0] }
  0x6e   :  { %2412 = vmatpush.bf16.msra.mxu0 %v6158_v2  ;;  %v8500_v2 = vld [vmem:[#allocation7 + $0x6e8] sm:$0xf0]  ;;  %v6022_v6 = vor.u32 %v8388_v60, %v6021_v58  ;;  %v5686_v58 = vor.u32 %v8304_v50, %v5685_v49  ;;  %v5629_v10 = vld [vmem:[#allocation7 + $0x40] sm:$0xf]  ;;  %v8346_v13 = vld [vmem:[#allocation7 + $0x218] sm:$0xf0] }
  0x6f   :  { %2425 = vmatpush.bf16.msra.mxu1 %v6382_v3  ;;  %v6718_v3 = vor.u32 %v8559_v54, %v6715_v55  ;;  %v6470_v11 = vor.u32 %v8500_v2, %v6469_v1  ;;  %v8360_v53 = vld [vmem:[#allocation7 + $0x288] sm:$0xf0]  ;;  %v6133_v54 = vld [vmem:[#allocation7 + $0x430] sm:$0xf]  ;;  %v8353_v1 = vld [vmem:[#allocation7 + $0x250] sm:$0xf0] }
  0x70   :  { %2438 = vmatpush.bf16.msra.mxu2 %v6606_v5  ;;  %v5798_v5 = vor.u32 %v8332_v57, %v5797_v56  ;;  %v8416_v55 = vld [vmem:[#allocation7 + $0x448] sm:$0xf0]  ;;  %v6357_v56 = vld [vmem:[#allocation7 + $0x5f0] sm:$0xf]  ;;  %v6105_v2 = vld [vmem:[#allocation7 + $0x3f8] sm:$0xf] }
  0x71   :  { %2451 = vmatpush.bf16.msra.mxu3 %v6830_v9  ;;  %v8325_v9 = vld [vmem:[#allocation7 + $0x170] sm:$0xf0]  ;;  %v8472_v57 = vld [vmem:[#allocation7 + $0x608] sm:$0xf0]  ;;  %v6134_v60 = vor.u32 %v8416_v55, %v6133_v54  ;;  %v5853_v4 = vld [vmem:[#allocation7 + $0x200] sm:$0xf] }
  0x72   :  { %2413 = vmatpush.bf16.msra.mxu0 %v6130_v14  ;;  %v6441_v14 = vld [vmem:[#allocation7 + $0x698] sm:$0xf]  ;;  %v5854_v21 = vor.u32 %v8346_v13, %v5853_v4  ;;  %v5825_v23 = vld [vmem:[#allocation7 + $0x1c8] sm:$0xf]  ;;  %v8339_v24 = vld [vmem:[#allocation7 + $0x1e0] sm:$0xf0] }
  0x73   :  { %2426 = vmatpush.bf16.msra.mxu1 %v6354_v15  ;;  %v8493_v15 = vld [vmem:[#allocation7 + $0x6b0] sm:$0xf0]  ;;  %v6049_v25 = vld [vmem:[#allocation7 + $0x388] sm:$0xf]  ;;  %vm5560_vm2 = vcmask 1043459   ;;  %vm5564_vm3 = vcmask 1044483  }
  0x74   :  { %2439 = vmatpush.bf16.msra.mxu2 %v6578_v16  ;;  %v5770_v16 = vor.u32 %v8325_v9, %v5769_v8  ;;  %v6442_v22 = vor.u32 %v8493_v15, %v6441_v14  ;;  %v6077_v14 = vld [vmem:[#allocation7 + $0x3c0] sm:$0xf]  ;;  %v8402_v15 = vld [vmem:[#allocation7 + $0x3d8] sm:$0xf0]  ;;  %v8605_v55 = vld [vmem:[#allocation7 + $0xa30] sm:$0xf0] }
  0x75   :  { %2452 = vmatpush.bf16.msra.mxu3 %v6802_v20  ;;  %v8318_v20 = vld [vmem:[#allocation7 + $0x138] sm:$0xf0]  ;;  %v6609_v4 = vld [vmem:[#allocation7 + $0x7e8] sm:$0xf]  ;;  %s9189_s4 = smov [#allocation14]   ;;  %s5578_s1 = sshll.u32 %s9563_s7, 4  ;;  %s5579_s1 = int_to_ptr.hbm [resolvable:$true] %s5578_s1 }
  0x76   :  { %2414 = vmatpush.bf16.msra.mxu0 %v6102_v26  ;;  %v6413_v26 = vld [vmem:[#allocation7 + $0x660] sm:$0xf]  ;;  %v6833_v13 = vld [vmem:[#allocation7 + $0x9a8] sm:$0xf]  ;;  %s5576_s6 = sshll.u32 %s9189_s4, 4  ;;  %vm5567_vm4 = vcmask 1042432   ;;  %s5577_s6 = int_to_ptr.vmem [resolvable:$true] %s5576_s6 }
  0x77   :  { %2427 = vmatpush.bf16.msra.mxu1 %v6326_v27  ;;  %v8486_v27 = vld [vmem:[#allocation7 + $0x678] sm:$0xf0] }
  0x78   :  { %2440 = vmatpush.bf16.msra.mxu2 %v6550_v28  ;;  %v5742_v28 = vor.u32 %v8318_v20, %v5741_v19  ;;  %v6414_v37 = vor.u32 %v8486_v27, %v6413_v26  ;;  %v5601_v19 = vld [vmem:[#allocation7 + $0x8] sm:$0xf]  ;;  %v8283_v20 = vld [vmem:[#allocation7 + $0x20] sm:$0xf0] }
  0x79   :  { %2453 = vmatpush.bf16.msra.mxu3 %v6774_v33  ;;  %v8311_v33 = vld [vmem:[#allocation7 + $0x100] sm:$0xf0] }
  0x7a   :  { %2415 = vmatpush.bf16.msra.mxu0 %v6074_v43  ;;  %v6385_v43 = vld [vmem:[#allocation7 + $0x628] sm:$0xf]  ;;  %v5714_v46 = vor.u32 %v8311_v33, %v5713_v31  ;;  %v8395_v27 = vld [vmem:[#allocation7 + $0x3a0] sm:$0xf0]  ;;  %v8556_v31 = vld [vmem:[#allocation7 + $0x8a8] sm:$0xf0] }
  0x7b   :  { %2428 = vmatpush.bf16.msra.mxu1 %v6298_v47  ;;  %v5938_v47 = vor.u32 %v8367_v39, %v5937_v36  ;;  %v6917_v33 = vld [vmem:[#allocation7 + $0xa50] sm:$0xf]  ;;  %v5602_v36 = vor.u32 %v8283_v20, %v5601_v19  ;;  %v8329_v39 = vld [vmem:[#allocation7 + $0x194] sm:$0xf]  ;;  %v5939_v19 = vld [vmem:[#allocation7 + $0x2c4] sm:$0xf0] }
  0x7c   :  { %2441 = vmatpush.bf16.msra.mxu2 %v6522_v48  ;;  %v6162_v48 = vor.u32 %v8423_v41, %v6161_v40  ;;  %v5799_v40 = vld [vmem:[#allocation7 + $0x1ac] sm:$0xf0]  ;;  %v5826_v41 = vor.u32 %v8339_v24, %v5825_v23  ;;  %v8528_v24 = vld [vmem:[#allocation7 + $0x7c8] sm:$0xf0] }
  0x7d   :  { %2454 = vmatpush.bf16.msra.mxu3 %v6746_v52  ;;  %v6386_v52 = vor.u32 %v8479_v44, %v6385_v43  ;;  %v6050_v43 = vor.u32 %v8395_v27, %v6049_v25  ;;  %v8385_v44 = vld [vmem:[#allocation7 + $0x354] sm:$0xf]  ;;  %v5802_v50 = vor.u32 %v8329_v39, %v5799_v40  ;;  %v6581_v23 = vld [vmem:[#allocation7 + $0x7b0] sm:$0xf]  ;;  %v8584_v27 = vld [vmem:[#allocation7 + $0x988] sm:$0xf0] }
  0x7e   :  { %2416 = vmatpush.bf16.msra.mxu0 %v6046_v59  ;;  %v5910_v59 = vor.u32 %v8360_v53, %v5909_v51  ;;  %v6665_v51 = vld [vmem:[#allocation7 + $0x858] sm:$0xf]  ;;  %v6805_v25 = vld [vmem:[#allocation7 + $0x970] sm:$0xf]  ;;  %v8521_v40 = vld [vmem:[#allocation7 + $0x790] sm:$0xf0] }
  0x7f   :  { %2429 = vmatpush.bf16.msra.mxu1 %v6270_v63  ;;  %v5881_v63 = vld [vmem:[#allocation7 + $0x238] sm:$0xf] }
  0x80   :  { %2442 = vmatpush.bf16.msra.mxu2 %v6494_v0  ;;  %v6358_v0 = vor.u32 %v8472_v57, %v6357_v56  ;;  %v5882_v8 = vor.u32 %v8353_v1, %v5881_v63  ;;  %v6889_v53 = vld [vmem:[#allocation7 + $0xa18] sm:$0xf]  ;;  %v8322_v56 = vld [vmem:[#allocation7 + $0x15c] sm:$0xf]  ;;  %v6637_v63 = vld [vmem:[#allocation7 + $0x820] sm:$0xf] }
  0x81   :  { %2455 = vmatpush.bf16.msra.mxu3 %v6718_v3  ;;  %2417 = vmatmul.bf16.vlgmr.msra.gmra.mxu0 %v9255_v42  ;;  %v8409_v3 = vld [vmem:[#allocation7 + $0x410] sm:$0xf0]  ;;  %v5771_v57 = vld [vmem:[#allocation7 + $0x174] sm:$0xf0]  ;;  %v6861_v1 = vld [vmem:[#allocation7 + $0x9e0] sm:$0xf] }
  0x82   :  { %2461 = vmatpush.bf16.msrb.mxu0 %v5798_v5  ;;  %2430 = vmatmul.bf16.vlgmr.msra.gmra.mxu1 %v9259_v45  ;;  %v6329_v5 = vld [vmem:[#allocation7 + $0x5b8] sm:$0xf]  ;;  %v6106_v9 = vor.u32 %v8409_v3, %v6105_v2  ;;  %v8598_v3 = vld [vmem:[#allocation7 + $0x9f8] sm:$0xf0] }
  0x83   :  { %2474 = vmatpush.bf16.msrb.mxu1 %v6022_v6  ;;  %2443 = vmatmul.bf16.vlgmr.msra.gmra.mxu2 %v9266_v32  ;;  %v8465_v6 = vld [vmem:[#allocation7 + $0x5d0] sm:$0xf0]  ;;  %v6553_v39 = vld [vmem:[#allocation7 + $0x778] sm:$0xf] }
  0x84   :  { %2487 = vmatpush.bf16.msrb.mxu2 %v6246_v7  ;;  %2456 = vmatmul.bf16.vlgmr.msra.gmra.mxu3 %v9269_v38  ;;  %v5658_v7 = vor.u32 %v8297_v62, %v5657_v61  ;;  %v6330_v12 = vor.u32 %v8465_v6, %v6329_v5  ;;  %v6890_v61 = vor.u32 %v8605_v55, %v6889_v53  ;;  %v8315_v5 = vld [vmem:[#allocation7 + $0x124] sm:$0xf]  ;;  %v5743_v6 = vld [vmem:[#allocation7 + $0x13c] sm:$0xf0] }
  0x85   :  { %2500 = vmatpush.bf16.msrb.mxu3 %v6470_v11  ;;  %v8290_v11 = vld [vmem:[#allocation7 + $0x58] sm:$0xf0]  ;;  %v5774_v62 = vor.u32 %v8322_v56, %v5771_v57  ;;  %v6525_v53 = vld [vmem:[#allocation7 + $0x740] sm:$0xf] }
  0x86   :  { %2462 = vmatpush.bf16.msrb.mxu0 %v5770_v16  ;;  %v6301_v16 = vld [vmem:[#allocation7 + $0x580] sm:$0xf]  ;;  %v8570_v57 = vld [vmem:[#allocation7 + $0x918] sm:$0xf0] }
  0x87   :  { %2475 = vmatpush.bf16.msrb.mxu1 %v5994_v17  ;;  %v8458_v17 = vld [vmem:[#allocation7 + $0x598] sm:$0xf0]  ;;  %v6749_v55 = vld [vmem:[#allocation7 + $0x900] sm:$0xf] }
  0x88   :  { %2488 = vmatpush.bf16.msrb.mxu2 %v6218_v18  ;;  %v5630_v18 = vor.u32 %v8290_v11, %v5629_v10  ;;  %v6302_v26 = vor.u32 %v8458_v17, %v6301_v16  ;;  %v6862_v10 = vor.u32 %v8598_v3, %v6861_v1  ;;  %v5746_v11 = vor.u32 %v8315_v5, %v5743_v6  ;;  %v8308_v16 = vld [vmem:[#allocation7 + $0xec] sm:$0xf]  ;;  %v5715_v17 = vld [vmem:[#allocation7 + $0x104] sm:$0xf0]  ;;  %v8563_v5 = vld [vmem:[#allocation7 + $0x8e0] sm:$0xf0] }
  0x89   :  { %2501 = vmatpush.bf16.msrb.mxu3 %v6442_v22  ;;  %v6078_v22 = vor.u32 %v8402_v15, %v6077_v14  ;;  %v8591_v15 = vld [vmem:[#allocation7 + $0x9c0] sm:$0xf0]  ;;  %v6750_v1 = vor.u32 %v8570_v57, %v6749_v55  ;;  %v6721_v3 = vld [vmem:[#allocation7 + $0x8c8] sm:$0xf]  ;;  %v8280_v6 = vld [vmem:[#allocation7 + $0xc] sm:$0xf] }
  0x8a   :  { %2463 = vmatpush.bf16.msrb.mxu0 %v5742_v28  ;;  %v6273_v28 = vld [vmem:[#allocation7 + $0x548] sm:$0xf]  ;;  %v8476_v57 = vld [vmem:[#allocation7 + $0x62c] sm:$0xf] }
  0x8b   :  { %2476 = vmatpush.bf16.msrb.mxu1 %v5966_v29  ;;  %v8451_v29 = vld [vmem:[#allocation7 + $0x560] sm:$0xf0] }
  0x8c   :  { %2489 = vmatpush.bf16.msrb.mxu2 %v6190_v30  ;;  %v6693_v30 = vld [vmem:[#allocation7 + $0x890] sm:$0xf] }
  0x8d   :  { %2502 = vmatpush.bf16.msrb.mxu3 %v6414_v37  ;;  %v8612_v37 = vld [vmem:[#allocation7 + $0xa68] sm:$0xf0] }
  0x8e   :  { %2464 = vmatpush.bf16.msrb.mxu0 %v5714_v46  ;;  %v6023_v46 = vld [vmem:[#allocation7 + $0x36c] sm:$0xf0]  ;;  %v6918_v49 = vor.u32 %v8612_v37, %v6917_v33  ;;  %v6582_v33 = vor.u32 %v8528_v24, %v6581_v23 }
  0x8f   :  { %2477 = vmatpush.bf16.msrb.mxu1 %v5938_v47  ;;  %v6274_v47 = vor.u32 %v8451_v29, %v6273_v28  ;;  %v6026_v54 = vor.u32 %v8385_v44, %v6023_v46  ;;  %v8301_v28 = vld [vmem:[#allocation7 + $0xb4] sm:$0xf]  ;;  %v5687_v29 = vld [vmem:[#allocation7 + $0xcc] sm:$0xf0]  ;;  %v8294_v46 = vld [vmem:[#allocation7 + $0x7c] sm:$0xf] }
  0x90   :  { %2490 = vmatpush.bf16.msrb.mxu2 %v6162_v48  ;;  %v6694_v48 = vor.u32 %v8556_v31, %v6693_v30  ;;  %v8357_v30 = vld [vmem:[#allocation7 + $0x274] sm:$0xf]  ;;  %v5911_v31 = vld [vmem:[#allocation7 + $0x28c] sm:$0xf0]  ;;  %v5690_v37 = vor.u32 %v8301_v28, %v5687_v29  ;;  %v6443_v29 = vld [vmem:[#allocation7 + $0x6b4] sm:$0xf0] }
  0x91   :  { %2503 = vmatpush.bf16.msrb.mxu3 %v6386_v52  ;;  %v8549_v52 = vld [vmem:[#allocation7 + $0x870] sm:$0xf0] }
  0x92   :  { %2465 = vmatpush.bf16.msrb.mxu0 %v5686_v58  ;;  %v8378_v58 = vld [vmem:[#allocation7 + $0x31c] sm:$0xf]  ;;  %v8577_v44 = vld [vmem:[#allocation7 + $0x950] sm:$0xf0] }
  0x93   :  { %2478 = vmatpush.bf16.msrb.mxu1 %v5910_v59  ;;  %v5995_v59 = vld [vmem:[#allocation7 + $0x334] sm:$0xf0] }
  0x94   :  { %2491 = vmatpush.bf16.msrb.mxu2 %v6134_v60  ;;  %v6666_v60 = vor.u32 %v8549_v52, %v6665_v51  ;;  %v5998_v2 = vor.u32 %v8378_v58, %v5995_v59  ;;  %v8287_v58 = vld [vmem:[#allocation7 + $0x44] sm:$0xf]  ;;  %v5631_v59 = vld [vmem:[#allocation7 + $0x5c] sm:$0xf0] }
  0x95   :  { %2504 = vmatpush.bf16.msrb.mxu3 %v6358_v0  ;;  %v8542_v0 = vld [vmem:[#allocation7 + $0x838] sm:$0xf0] }
  0x96   :  { %2466 = vmatpush.bf16.msrb.mxu0 %v5658_v7  ;;  %v8371_v7 = vld [vmem:[#allocation7 + $0x2e4] sm:$0xf] }
  0x97   :  { %2479 = vmatpush.bf16.msrb.mxu1 %v5882_v8  ;;  %v5967_v8 = vld [vmem:[#allocation7 + $0x2fc] sm:$0xf0] }
  0x98   :  { %2492 = vmatpush.bf16.msrb.mxu2 %v6106_v9  ;;  %v6638_v9 = vor.u32 %v8542_v0, %v6637_v63  ;;  %v5970_v14 = vor.u32 %v8371_v7, %v5967_v8  ;;  %v6497_v63 = vld [vmem:[#allocation7 + $0x708] sm:$0xf]  ;;  %v8507_v0 = vld [vmem:[#allocation7 + $0x720] sm:$0xf0] }
  0x99   :  { %2505 = vmatpush.bf16.msrb.mxu3 %v6330_v12  ;;  %v8535_v12 = vld [vmem:[#allocation7 + $0x800] sm:$0xf0]  ;;  %v5603_v8 = vld [vmem:[#allocation7 + $0x24] sm:$0xf0] }
  0x9a   :  { %2467 = vmatpush.bf16.msrb.mxu0 %v5630_v18  ;;  %v8364_v18 = vld [vmem:[#allocation7 + $0x2ac] sm:$0xf]  ;;  %v6610_v20 = vor.u32 %v8535_v12, %v6609_v4  ;;  %v6247_v4 = vld [vmem:[#allocation7 + $0x52c] sm:$0xf0]  ;;  %v8497_v12 = vld [vmem:[#allocation7 + $0x6d4] sm:$0xf] }
  0x9b   :  { %2480 = vmatpush.bf16.msrb.mxu1 %v5854_v21  ;;  %v6834_v21 = vor.u32 %v8591_v15, %v6833_v13  ;;  %v6498_v13 = vor.u32 %v8507_v0, %v6497_v63  ;;  %v8553_v15 = vld [vmem:[#allocation7 + $0x894] sm:$0xf]  ;;  %v8588_v63 = vld [vmem:[#allocation7 + $0x9ac] sm:$0xf]  ;;  %v6835_v0 = vld [vmem:[#allocation7 + $0x9c4] sm:$0xf0] }
  0x9c   :  { %2493 = vmatpush.bf16.msrb.mxu2 %v6078_v22  ;;  %v5718_v22 = vor.u32 %v8308_v16, %v5715_v17  ;;  %v6695_v16 = vld [vmem:[#allocation7 + $0x8ac] sm:$0xf0]  ;;  %v6722_v17 = vor.u32 %v8563_v5, %v6721_v3 }
  0x9d   :  { %2506 = vmatpush.bf16.msrb.mxu3 %v6302_v26  ;;  %v5942_v26 = vor.u32 %v8364_v18, %v5939_v19  ;;  %v5606_v18 = vor.u32 %v8280_v6, %v5603_v8  ;;  %v8609_v19 = vld [vmem:[#allocation7 + $0xa54] sm:$0xf]  ;;  %v6698_v24 = vor.u32 %v8553_v15, %v6695_v16  ;;  %v6135_v6 = vld [vmem:[#allocation7 + $0x44c] sm:$0xf0]  ;;  %v8406_v15 = vld [vmem:[#allocation7 + $0x3fc] sm:$0xf] }
  0x9e   :  { %2468 = vmatpush.bf16.msrb.mxu0 %v5602_v36  ;;  %v6806_v36 = vor.u32 %v8584_v27, %v6805_v25  ;;  %v8434_v25 = vld [vmem:[#allocation7 + $0x4dc] sm:$0xf] }
  0x9f   :  { %2481 = vmatpush.bf16.msrb.mxu1 %v5826_v41  ;;  %v6777_v41 = vld [vmem:[#allocation7 + $0x938] sm:$0xf]  ;;  %v8490_v27 = vld [vmem:[#allocation7 + $0x69c] sm:$0xf] }
  0xa0   :  { %2494 = vmatpush.bf16.msrb.mxu2 %v6050_v43  ;;  %v5914_v43 = vor.u32 %v8357_v30, %v5911_v31  ;;  %v6778_v51 = vor.u32 %v8577_v44, %v6777_v41  ;;  %v8546_v30 = vld [vmem:[#allocation7 + $0x85c] sm:$0xf]  ;;  %v6667_v31 = vld [vmem:[#allocation7 + $0x874] sm:$0xf0]  ;;  %v8427_v41 = vld [vmem:[#allocation7 + $0x4a4] sm:$0xf] }
  0xa1   :  { %2507 = vmatpush.bf16.msrb.mxu3 %v6274_v47  ;;  %2469 = vmatmul.bf16.vlgmr.msrb.gmra.mxu0 %v9251_v34  ;;  %v5659_v47 = vld [vmem:[#allocation7 + $0x94] sm:$0xf0]  ;;  %v8483_v44 = vld [vmem:[#allocation7 + $0x664] sm:$0xf] }
  0xa2   :  { %2513 = vmatpush.bf16.msra.mxu0 %v6694_v48  ;;  %2482 = vmatmul.bf16.vlgmr.msrb.gmra.mxu1 %v9253_v35  ;;  %v8350_v48 = vld [vmem:[#allocation7 + $0x23c] sm:$0xf]  ;;  %v5662_v52 = vor.u32 %v8294_v46, %v5659_v47  ;;  %v6415_v47 = vld [vmem:[#allocation7 + $0x67c] sm:$0xf0] }
  0xa3   :  { %2526 = vmatpush.bf16.msra.mxu1 %v6918_v49  ;;  %2495 = vmatmul.bf16.vlgmr.msrb.gmra.mxu2 %v9255_v42  ;;  %v5883_v49 = vld [vmem:[#allocation7 + $0x254] sm:$0xf0] }
  0xa4   :  { %2539 = vmatpush.bf16.msra.mxu2 %v5802_v50  ;;  %2508 = vmatmul.bf16.vlgmr.msrb.gmra.mxu3 %v9259_v45  ;;  %v6554_v50 = vor.u32 %v8521_v40, %v6553_v39  ;;  %v5886_v56 = vor.u32 %v8350_v48, %v5883_v49  ;;  %v6446_v39 = vor.u32 %v8490_v27, %v6443_v29  ;;  %v8539_v48 = vld [vmem:[#allocation7 + $0x824] sm:$0xf]  ;;  %v6639_v49 = vld [vmem:[#allocation7 + $0x83c] sm:$0xf0] }
  0xa5   :  { %2552 = vmatpush.bf16.msra.mxu3 %v6026_v54  ;;  %v8514_v54 = vld [vmem:[#allocation7 + $0x758] sm:$0xf0]  ;;  %v6670_v40 = vor.u32 %v8546_v30, %v6667_v31  ;;  %v6642_v55 = vor.u32 %v8539_v48, %v6639_v49  ;;  %v8399_v31 = vld [vmem:[#allocation7 + $0x3c4] sm:$0xf]  ;;  %v8392_v48 = vld [vmem:[#allocation7 + $0x38c] sm:$0xf] }
  0xa6   :  { %2514 = vmatpush.bf16.msra.mxu0 %v6666_v60  ;;  %v8343_v60 = vld [vmem:[#allocation7 + $0x204] sm:$0xf]  ;;  %v6051_v49 = vld [vmem:[#allocation7 + $0x3a4] sm:$0xf0] }
  0xa7   :  { %2527 = vmatpush.bf16.msra.mxu1 %v6890_v61  ;;  %v5855_v61 = vld [vmem:[#allocation7 + $0x21c] sm:$0xf0] }
  0xa8   :  { %2540 = vmatpush.bf16.msra.mxu2 %v5774_v62  ;;  %v6526_v62 = vor.u32 %v8514_v54, %v6525_v53  ;;  %v5858_v7 = vor.u32 %v8343_v60, %v5855_v61  ;;  %v8420_v53 = vld [vmem:[#allocation7 + $0x46c] sm:$0xf]  ;;  %v6418_v54 = vor.u32 %v8483_v44, %v6415_v47  ;;  %v6611_v61 = vld [vmem:[#allocation7 + $0x804] sm:$0xf0]  ;;  %v8567_v44 = vld [vmem:[#allocation7 + $0x904] sm:$0xf] }
  0xa9   :  { %2553 = vmatpush.bf16.msra.mxu3 %v5998_v2  ;;  %v5634_v2 = vor.u32 %v8287_v58, %v5631_v59  ;;  %v6387_v58 = vld [vmem:[#allocation7 + $0x644] sm:$0xf0]  ;;  %v8532_v60 = vld [vmem:[#allocation7 + $0x7ec] sm:$0xf] }
  0xaa   :  { %2515 = vmatpush.bf16.msra.mxu0 %v6638_v9  ;;  %v8336_v9 = vld [vmem:[#allocation7 + $0x1cc] sm:$0xf]  ;;  %v6390_v3 = vor.u32 %v8476_v57, %v6387_v58  ;;  %v6614_v5 = vor.u32 %v8532_v60, %v6611_v61  ;;  %v6723_v61 = vld [vmem:[#allocation7 + $0x8e4] sm:$0xf0] }
  0xab   :  { %2528 = vmatpush.bf16.msra.mxu1 %v6862_v10  ;;  %v5827_v10 = vld [vmem:[#allocation7 + $0x1e4] sm:$0xf0]  ;;  %v8560_v60 = vld [vmem:[#allocation7 + $0x8cc] sm:$0xf] }
  0xac   :  { %2541 = vmatpush.bf16.msra.mxu2 %v5746_v11  ;;  %v8441_v11 = vld [vmem:[#allocation7 + $0x514] sm:$0xf] }
  0xad   :  { %2554 = vmatpush.bf16.msra.mxu3 %v5970_v14  ;;  %v6471_v14 = vld [vmem:[#allocation7 + $0x6ec] sm:$0xf0] }
  0xae   :  { %2516 = vmatpush.bf16.msra.mxu0 %v6610_v20  ;;  %v6919_v20 = vld [vmem:[#allocation7 + $0xa6c] sm:$0xf0]  ;;  %v6474_v23 = vor.u32 %v8497_v12, %v6471_v14  ;;  %v8581_v12 = vld [vmem:[#allocation7 + $0x974] sm:$0xf] }
  0xaf   :  { %2529 = vmatpush.bf16.msra.mxu1 %v6834_v21  ;;  %v5830_v21 = vor.u32 %v8336_v9, %v5827_v10  ;;  %v6922_v28 = vor.u32 %v8609_v19, %v6919_v20  ;;  %v6838_v9 = vor.u32 %v8588_v63, %v6835_v0  ;;  %v6359_v10 = vld [vmem:[#allocation7 + $0x60c] sm:$0xf0]  ;;  %v8462_v19 = vld [vmem:[#allocation7 + $0x5bc] sm:$0xf]  ;;  %v5805_v63 = vld [vmem:[#allocation7 + $0x198] sm:$0xf] }
  0xb0   :  { %2542 = vmatpush.bf16.msra.mxu2 %v5718_v22  ;;  %v6250_v22 = vor.u32 %v8441_v11, %v6247_v4  ;;  %v8525_v11 = vld [vmem:[#allocation7 + $0x7b4] sm:$0xf]  ;;  %v6583_v4 = vld [vmem:[#allocation7 + $0x7cc] sm:$0xf0] }
  0xb1   :  { %2555 = vmatpush.bf16.msra.mxu3 %v5942_v26  ;;  %v6219_v26 = vld [vmem:[#allocation7 + $0x4f4] sm:$0xf0]  ;;  %v8333_v0 = vld [vmem:[#allocation7 + $0x1b0] sm:$0xf0] }
  0xb2   :  { %2517 = vmatpush.bf16.msra.mxu0 %v6582_v33  ;;  %v8602_v33 = vld [vmem:[#allocation7 + $0xa1c] sm:$0xf] }
  0xb3   :  { %2530 = vmatpush.bf16.msra.mxu1 %v6806_v36  ;;  %v6891_v36 = vld [vmem:[#allocation7 + $0xa34] sm:$0xf0] }
  0xb4   :  { %2543 = vmatpush.bf16.msra.mxu2 %v5690_v37  ;;  %v6222_v37 = vor.u32 %v8434_v25, %v6219_v26  ;;  %v6894_v46 = vor.u32 %v8602_v33, %v6891_v36  ;;  %v8574_v25 = vld [vmem:[#allocation7 + $0x93c] sm:$0xf]  ;;  %v6779_v26 = vld [vmem:[#allocation7 + $0x954] sm:$0xf0]  ;;  %v6079_v33 = vld [vmem:[#allocation7 + $0x3dc] sm:$0xf0] }
  0xb5   :  { %2556 = vmatpush.bf16.msra.mxu3 %v5914_v43  ;;  %v6191_v43 = vld [vmem:[#allocation7 + $0x4bc] sm:$0xf0]  ;;  %v8455_v36 = vld [vmem:[#allocation7 + $0x584] sm:$0xf]  ;;  %v6082_v47 = vor.u32 %v8399_v31, %v6079_v33 }
  0xb6   :  { %2518 = vmatpush.bf16.msra.mxu0 %v6554_v50  ;;  %v8595_v50 = vld [vmem:[#allocation7 + $0x9e4] sm:$0xf] }
  0xb7   :  { %2531 = vmatpush.bf16.msra.mxu1 %v6778_v51  ;;  %v6863_v51 = vld [vmem:[#allocation7 + $0x9fc] sm:$0xf0] }
  0xb8   :  { %2544 = vmatpush.bf16.msra.mxu2 %v5662_v52  ;;  %v6194_v52 = vor.u32 %v8427_v41, %v6191_v43  ;;  %v6866_v59 = vor.u32 %v8595_v50, %v6863_v51  ;;  %v8511_v41 = vld [vmem:[#allocation7 + $0x744] sm:$0xf]  ;;  %v6527_v43 = vld [vmem:[#allocation7 + $0x75c] sm:$0xf0] }
  0xb9   :  { %2557 = vmatpush.bf16.msra.mxu3 %v5886_v56  ;;  %v6163_v56 = vld [vmem:[#allocation7 + $0x484] sm:$0xf0] }
  0xba   :  { %2519 = vmatpush.bf16.msra.mxu0 %v6526_v62  ;;  %v9290_v62 = vld [vmem:[#allocation8] sm:$0x77] }
  0xbb   :  { %2532 = vmatpush.bf16.msra.mxu1 %v6750_v1  ;;  %v6166_v1 = vor.u32 %v8420_v53, %v6163_v56  ;;  %v549_v8 = vperm.slane %v9290_v62, 0  ;;  %v6530_v53 = vor.u32 %v8511_v41, %v6527_v43  ;;  %v8504_v56 = vld [vmem:[#allocation7 + $0x70c] sm:$0xf]  ;;  %v8375_v43 = vld [vmem:[#allocation7 + $0x300] sm:$0xf0] }
  0xbc   :  { %2545 = vmatpush.bf16.msra.mxu2 %v5634_v2  ;;  %v8413_v2 = vld [vmem:[#allocation7 + $0x434] sm:$0xf] }
  0xbd   :  { %2558 = vmatpush.bf16.msra.mxu3 %v5858_v7  ;;  %v8469_v7 = vld [vmem:[#allocation7 + $0x5f4] sm:$0xf]  ;;  %v6138_v14 = vor.u32 %v8413_v2, %v6135_v6  ;;  %v563_v20 = vperm.slane %v549_v8, 0  ;;  %v6253_v6 = vld [vmem:[#allocation7 + $0x518] sm:$0xf] }
  0xbe   :  { %2520 = vmatpush.bf16.msra.mxu0 %v6498_v13  ;;  %v6807_v13 = vld [vmem:[#allocation7 + $0x98c] sm:$0xf0]  ;;  %v6362_v16 = vor.u32 %v8469_v7, %v6359_v10  ;;  %v8445_v7 = vld [vmem:[#allocation7 + $0x530] sm:$0xf0]  ;;  %v6477_v10 = vld [vmem:[#allocation7 + $0x6d8] sm:$0xf] }
  0xbf   :  { %2533 = vmatpush.bf16.msra.mxu1 %v6722_v17  ;;  %v6586_v17 = vor.u32 %v8525_v11, %v6583_v4  ;;  %v8501_v11 = vld [vmem:[#allocation7 + $0x6f0] sm:$0xf0]  ;;  %v6726_v4 = vor.u32 %v8560_v60, %v6723_v61  ;;  %v6393_v60 = vld [vmem:[#allocation7 + $0x630] sm:$0xf]  ;;  %v8480_v61 = vld [vmem:[#allocation7 + $0x648] sm:$0xf0] }
  0xc0   :  { %2546 = vmatpush.bf16.msra.mxu2 %v5606_v18  ;;  %v6107_v18 = vld [vmem:[#allocation7 + $0x414] sm:$0xf0] }
  0xc1   :  { %2559 = vmatpush.bf16.msra.mxu3 %v5830_v21  ;;  %2521 = vmatmul.bf16.vlgmr.msra.gmra.mxu0 %v9266_v32  ;;  %v6810_v21 = vor.u32 %v8581_v12, %v6807_v13  ;;  %v6110_v27 = vor.u32 %v8406_v15, %v6107_v18  ;;  %v5806_v12 = vor.u32 %v8333_v0, %v5805_v63  ;;  %v5777_v15 = vld [vmem:[#allocation7 + $0x160] sm:$0xf] }
  0xc2   :  { %2565 = vmatpush.bf16.msrb.mxu0 %v6250_v22  ;;  %2534 = vmatmul.bf16.vlgmr.msra.gmra.mxu1 %v9269_v38  ;;  %v6331_v22 = vld [vmem:[#allocation7 + $0x5d4] sm:$0xf0] }
  0xc3   :  { %2578 = vmatpush.bf16.msrb.mxu1 %v6474_v23  ;;  %2547 = vmatmul.bf16.vlgmr.msra.gmra.mxu2 %v9251_v34  ;;  %v8518_v23 = vld [vmem:[#allocation7 + $0x77c] sm:$0xf]  ;;  %v6334_v29 = vor.u32 %v8462_v19, %v6331_v22  ;;  %v6478_v19 = vor.u32 %v8501_v11, %v6477_v10  ;;  %v6394_v10 = vor.u32 %v8480_v61, %v6393_v60  ;;  %v8361_v11 = vld [vmem:[#allocation7 + $0x290] sm:$0xf0]  ;;  %v8452_v60 = vld [vmem:[#allocation7 + $0x568] sm:$0xf0] }
  0xc4   :  { %2591 = vmatpush.bf16.msrb.mxu2 %v6698_v24  ;;  %2560 = vmatmul.bf16.vlgmr.msra.gmra.mxu3 %v9253_v35  ;;  %v6555_v24 = vld [vmem:[#allocation7 + $0x794] sm:$0xf0]  ;;  %v8438_v22 = vld [vmem:[#allocation7 + $0x4f8] sm:$0xf0] }
  0xc5   :  { %2604 = vmatpush.bf16.msrb.mxu3 %v6922_v28  ;;  %v9293_v28 = vpop.permute.xlu0 %542  ;;  %v6558_v30 = vor.u32 %v8518_v23, %v6555_v24  ;;  %v6701_v61 = vld [vmem:[#allocation7 + $0x898] sm:$0xf] }
  0xc6   :  { %2566 = vmatpush.bf16.msrb.mxu0 %v6222_v37  ;;  %v570_v37 = vmul.f32 %v563_v20, %v9293_v28  ;;  %v2314_v50 = vpop.f32.mrf.mxu0  ;;  %v8382_v20 = vld [vmem:[#allocation7 + $0x338] sm:$0xf0] }
  0xc7   :  { %2579 = vmatpush.bf16.msrb.mxu1 %v6446_v39  ;;  %v6782_v39 = vor.u32 %v8574_v25, %v6779_v26  ;;  %v2327_v51 = vpop.f32.mrf.mxu1  ;;  %v6449_v26 = vld [vmem:[#allocation7 + $0x6a0] sm:$0xf] }
  0xc8   :  { %2592 = vmatpush.bf16.msrb.mxu2 %v6670_v40  ;;  %v6303_v40 = vld [vmem:[#allocation7 + $0x59c] sm:$0xf0]  ;;  %v2315_v57 = vadd.f32 %v2314_v50, %v570_v37  ;;  %v8319_v37 = vld [vmem:[#allocation7 + $0x140] sm:$0xf0] }
  0xc9   :  { %2605 = vmatpush.bf16.msrb.mxu3 %v6894_v46  ;;  %v6751_v46 = vld [vmem:[#allocation7 + $0x91c] sm:$0xf0] }
  0xca   :  { %2567 = vmatpush.bf16.msrb.mxu0 %v6194_v52  ;;  %v6306_v52 = vor.u32 %v8455_v36, %v6303_v40  ;;  %v6754_v58 = vor.u32 %v8567_v44, %v6751_v46  ;;  %v2328_v2 = vadd.f32 %v2327_v51, %v2315_v57  ;;  %v5749_v36 = vld [vmem:[#allocation7 + $0x128] sm:$0xf]  ;;  %v8431_v46 = vld [vmem:[#allocation7 + $0x4c0] sm:$0xf0]  ;;  %v8368_v57 = vld [vmem:[#allocation7 + $0x2c8] sm:$0xf0] }
  0xcb   :  { %2580 = vmatpush.bf16.msrb.mxu1 %v6418_v54  ;;  %v8448_v54 = vld [vmem:[#allocation7 + $0x54c] sm:$0xf]  ;;  %v6197_v44 = vld [vmem:[#allocation7 + $0x4a8] sm:$0xf] }
  0xcc   :  { %2593 = vmatpush.bf16.msrb.mxu2 %v6642_v55  ;;  %v6275_v55 = vld [vmem:[#allocation7 + $0x564] sm:$0xf0]  ;;  %v6198_v51 = vor.u32 %v8431_v46, %v6197_v44  ;;  %v8403_v46 = vld [vmem:[#allocation7 + $0x3e0] sm:$0xf0] }
  0xcd   :  { %2606 = vmatpush.bf16.msrb.mxu3 %v6866_v59  ;;  %v6499_v59 = vld [vmem:[#allocation7 + $0x724] sm:$0xf0]  ;;  %v6278_v8 = vor.u32 %v8448_v54, %v6275_v55  ;;  %v5945_v54 = vld [vmem:[#allocation7 + $0x2b0] sm:$0xf] }
  0xce   :  { %2568 = vmatpush.bf16.msrb.mxu0 %v6166_v1  ;;  %v6029_v1 = vld [vmem:[#allocation7 + $0x358] sm:$0xf]  ;;  %v2340_v18 = vpop.f32.mrf.mxu2  ;;  %v2316_v23 = vpop.f32.mrf.mxu0  ;;  %v6085_v44 = vld [vmem:[#allocation7 + $0x3c8] sm:$0xf] }
  0xcf   :  { %2581 = vmatpush.bf16.msrb.mxu1 %v6390_v3  ;;  %v6054_v3 = vor.u32 %v8392_v48, %v6051_v49  ;;  %v2329_v24 = vpop.f32.mrf.mxu1  ;;  %v2341_v25 = vadd.f32 %v2340_v18, %v2328_v2  ;;  %v8487_v48 = vld [vmem:[#allocation7 + $0x680] sm:$0xf0]  ;;  %v5750_v49 = vor.u32 %v8319_v37, %v5749_v36  ;;  %v8354_v23 = vld [vmem:[#allocation7 + $0x258] sm:$0xf0]  ;;  %v5637_v37 = vld [vmem:[#allocation7 + $0x48] sm:$0xf] }
  0xd0   :  { %2594 = vmatpush.bf16.msrb.mxu2 %v6614_v5  ;;  %v8389_v5 = vld [vmem:[#allocation7 + $0x370] sm:$0xf0]  ;;  %v6113_v24 = vld [vmem:[#allocation7 + $0x400] sm:$0xf] }
  0xd1   :  { %2607 = vmatpush.bf16.msrb.mxu3 %v6838_v9  ;;  %v6502_v9 = vor.u32 %v8504_v56, %v6499_v59  ;;  %v6030_v13 = vor.u32 %v8389_v5, %v6029_v1  ;;  %v8424_v59 = vld [vmem:[#allocation7 + $0x488] sm:$0xf0]  ;;  %v5946_v5 = vor.u32 %v8368_v57, %v5945_v54  ;;  %v6086_v54 = vor.u32 %v8403_v46, %v6085_v44 }
  0xd2   :  { %2569 = vmatpush.bf16.msrb.mxu0 %v6138_v14  ;;  %v6254_v14 = vor.u32 %v8445_v7, %v6253_v6  ;;  %v5693_v7 = vld [vmem:[#allocation7 + $0xb8] sm:$0xf]  ;;  %v8396_v57 = vld [vmem:[#allocation7 + $0x3a8] sm:$0xf0] }
  0xd3   :  { %2582 = vmatpush.bf16.msrb.mxu1 %v6362_v16  ;;  %v8326_v16 = vld [vmem:[#allocation7 + $0x178] sm:$0xf0] }
  0xd4   :  { %2595 = vmatpush.bf16.msrb.mxu2 %v6586_v17  ;;  %v6001_v17 = vld [vmem:[#allocation7 + $0x320] sm:$0xf] }
  0xd5   :  { %2608 = vmatpush.bf16.msrb.mxu3 %v6810_v21  ;;  %v6225_v21 = vld [vmem:[#allocation7 + $0x4e0] sm:$0xf]  ;;  %v6002_v31 = vor.u32 %v8382_v20, %v6001_v17  ;;  %v8298_v20 = vld [vmem:[#allocation7 + $0x98] sm:$0xf0] }
  0xd6   :  { %2570 = vmatpush.bf16.msrb.mxu0 %v6110_v27  ;;  %v8494_v27 = vld [vmem:[#allocation7 + $0x6b8] sm:$0xf0]  ;;  %v6226_v33 = vor.u32 %v8438_v22, %v6225_v21  ;;  %v2342_v55 = vpop.f32.mrf.mxu2  ;;  %v5889_v21 = vld [vmem:[#allocation7 + $0x240] sm:$0xf] }
  0xd7   :  { %2583 = vmatpush.bf16.msrb.mxu1 %v6334_v29  ;;  %v5778_v29 = vor.u32 %v8326_v16, %v5777_v15  ;;  %v6450_v41 = vor.u32 %v8494_v27, %v6449_v26  ;;  %v8473_v15 = vld [vmem:[#allocation7 + $0x610] sm:$0xf0]  ;;  %v6337_v26 = vld [vmem:[#allocation7 + $0x5c0] sm:$0xf]  ;;  %v8466_v27 = vld [vmem:[#allocation7 + $0x5d8] sm:$0xf0] }
  0xd8   :  { %2596 = vmatpush.bf16.msrb.mxu2 %v6558_v30  ;;  %v2353_v30 = vpop.f32.mrf.mxu3  ;;  %v8340_v55 = vld [vmem:[#allocation7 + $0x1e8] sm:$0xf0] }
  0xd9   :  { %2609 = vmatpush.bf16.msrb.mxu3 %v6782_v39  ;;  %v5973_v39 = vld [vmem:[#allocation7 + $0x2e8] sm:$0xf]  ;;  %v2354_v40 = vadd.f32 %v2353_v30, %v2341_v25  ;;  %v8410_v25 = vld [vmem:[#allocation7 + $0x418] sm:$0xf0] }
  0xda   :  { %2571 = vmatpush.bf16.msrb.mxu0 %v6082_v47  ;;  %v6421_v47 = vld [vmem:[#allocation7 + $0x668] sm:$0xf]  ;;  %v5974_v50 = vor.u32 %v8375_v43, %v5973_v39  ;;  %v6114_v36 = vor.u32 %v8410_v25, %v6113_v24  ;;  %v8291_v39 = vld [vmem:[#allocation7 + $0x60] sm:$0xf0] }
  0xdb   :  { %2584 = vmatpush.bf16.msrb.mxu1 %v6306_v52  ;;  %v5721_v52 = vld [vmem:[#allocation7 + $0xf0] sm:$0xf]  ;;  %v6422_v56 = vor.u32 %v8487_v48, %v6421_v47  ;;  %v8347_v43 = vld [vmem:[#allocation7 + $0x220] sm:$0xf0]  ;;  %v6309_v47 = vld [vmem:[#allocation7 + $0x588] sm:$0xf] }
  0xdc   :  { %2597 = vmatpush.bf16.msrb.mxu2 %v6530_v53  ;;  %v8312_v53 = vld [vmem:[#allocation7 + $0x108] sm:$0xf0]  ;;  %v8459_v48 = vld [vmem:[#allocation7 + $0x5a0] sm:$0xf0] }
  0xdd   :  { %2610 = vmatpush.bf16.msrb.mxu3 %v6754_v58  ;;  %v6169_v58 = vld [vmem:[#allocation7 + $0x470] sm:$0xf]  ;;  %v5722_v0 = vor.u32 %v8312_v53, %v5721_v52  ;;  %v8379_v25 = vld [vmem:[#allocation7 + $0x324] sm:$0xf] }
  0xde   :  { %2572 = vmatpush.bf16.msrb.mxu0 %v6054_v3  ;;  %v2366_v63 = vpop.f32.mrf.mxu0  ;;  %v6170_v6 = vor.u32 %v8424_v59, %v6169_v58  ;;  %v5833_v52 = vld [vmem:[#allocation7 + $0x1d0] sm:$0xf]  ;;  %v6310_v58 = vor.u32 %v8459_v48, %v6309_v47  ;;  %v8372_v48 = vld [vmem:[#allocation7 + $0x2ec] sm:$0xf] }
  0xdf   :  { %2585 = vmatpush.bf16.msrb.mxu1 %v6278_v8  ;;  %v2367_v1 = vadd.f32 %v2366_v63, %v2354_v40  ;;  %v2379_v2 = vpop.f32.mrf.mxu1  ;;  %v8305_v8 = vld [vmem:[#allocation7 + $0xd0] sm:$0xf0]  ;;  %v5861_v40 = vld [vmem:[#allocation7 + $0x208] sm:$0xf]  ;;  %v6281_v59 = vld [vmem:[#allocation7 + $0x550] sm:$0xf] }
  0xe0   :  { %2598 = vmatpush.bf16.msrb.mxu2 %v6502_v9  ;;  %v2355_v3 = vpop.f32.mrf.mxu3  ;;  %v5917_v9 = vld [vmem:[#allocation7 + $0x278] sm:$0xf]  ;;  %v5694_v16 = vor.u32 %v8305_v8, %v5693_v7  ;;  %v5862_v53 = vor.u32 %v8347_v43, %v5861_v40  ;;  %v8557_v63 = vld [vmem:[#allocation7 + $0x8b0] sm:$0xf0]  ;;  %v8599_v40 = vld [vmem:[#allocation7 + $0xa00] sm:$0xf0] }
  0xe1   :  { %2611 = vmatpush.bf16.msrb.mxu3 %v6726_v4  ;;  %2573 = vmatmul.bf16.vlgmr.msrb.gmra.mxu0 %v9255_v42  ;;  %v6141_v4 = vld [vmem:[#allocation7 + $0x438] sm:$0xf]  ;;  %v5918_v17 = vor.u32 %v8361_v11, %v5917_v9  ;;  %v8330_v3 = vld [vmem:[#allocation7 + $0x19c] sm:$0xf]  ;;  %v5834_v9 = vor.u32 %v8340_v55, %v5833_v52  ;;  %v5751_v43 = vld [vmem:[#allocation7 + $0x144] sm:$0xf0] }
  0xe2   :  { %2617 = vmatpush.bf16.msra.mxu0 %v5806_v12  ;;  %2586 = vmatmul.bf16.vlgmr.msrb.gmra.mxu1 %v9259_v45  ;;  %v8417_v12 = vld [vmem:[#allocation7 + $0x450] sm:$0xf0]  ;;  %v8386_v11 = vld [vmem:[#allocation7 + $0x35c] sm:$0xf]  ;;  %v6841_v55 = vld [vmem:[#allocation7 + $0x9b0] sm:$0xf] }
  0xe3   :  { %2630 = vmatpush.bf16.msra.mxu1 %v6030_v13  ;;  %2599 = vmatmul.bf16.vlgmr.msrb.gmra.mxu2 %v9266_v32  ;;  %v9300_v13 = vadd.f32 %v2379_v2, %v2367_v1  ;;  %v6142_v18 = vor.u32 %v8417_v12, %v6141_v4  ;;  %v8613_v1 = vld [vmem:[#allocation7 + $0xa70] sm:$0xf0]  ;;  %v6031_v4 = vld [vmem:[#allocation7 + $0x374] sm:$0xf0]  ;;  %v6282_v12 = vor.u32 %v8452_v60, %v6281_v59  ;;  %v5723_v59 = vld [vmem:[#allocation7 + $0x10c] sm:$0xf0] }
  0xe4   :  { %2643 = vmatpush.bf16.msra.mxu2 %v6254_v14  ;;  %2612 = vmatmul.bf16.vlgmr.msrb.gmra.mxu3 %v9269_v38  ;;  %v6365_v14 = vld [vmem:[#allocation7 + $0x5f8] sm:$0xf]  ;;  %v8365_v60 = vld [vmem:[#allocation7 + $0x2b4] sm:$0xf] }
  0xe5   :  { %2656 = vmatpush.bf16.msra.mxu3 %v6478_v19  ;;  %v5665_v19 = vld [vmem:[#allocation7 + $0x80] sm:$0xf]  ;;  %v6366_v22 = vor.u32 %v8473_v15, %v6365_v14  ;;  %v6702_v14 = vor.u32 %v8557_v63, %v6701_v61  ;;  %v5947_v61 = vld [vmem:[#allocation7 + $0x2cc] sm:$0xf0] }
  0xe6   :  { %2618 = vmatpush.bf16.msra.mxu0 %v5778_v29  ;;  %v2368_v29 = vpop.f32.mrf.mxu0  ;;  %v5666_v30 = vor.u32 %v8298_v20, %v5665_v19  ;;  %v2392_v7 = vpop.f32.mrf.mxu2  ;;  %v8550_v19 = vld [vmem:[#allocation7 + $0x878] sm:$0xf0]  ;;  %v6897_v20 = vld [vmem:[#allocation7 + $0xa20] sm:$0xf] }
  0xe7   :  { %2631 = vmatpush.bf16.msra.mxu1 %v6002_v31  ;;  %v2381_v31 = vpop.f32.mrf.mxu1 }
  0xe8   :  { %2644 = vmatpush.bf16.msra.mxu2 %v6226_v33  ;;  %v5890_v33 = vor.u32 %v8354_v23, %v5889_v21  ;;  %v2405_v8 = vpop.f32.mrf.mxu3  ;;  %v6034_v21 = vor.u32 %v8386_v11, %v6031_v4  ;;  %v5779_v23 = vld [vmem:[#allocation7 + $0x17c] sm:$0xf0]  ;;  %v8302_v11 = vld [vmem:[#allocation7 + $0xbc] sm:$0xf]  ;;  %v5695_v4 = vld [vmem:[#allocation7 + $0xd4] sm:$0xf0] }
  0xe9   :  { %2657 = vmatpush.bf16.msra.mxu3 %v6450_v41  ;;  %v6338_v41 = vor.u32 %v8466_v27, %v6337_v26  ;;  %v6003_v26 = vld [vmem:[#allocation7 + $0x33c] sm:$0xf0] }
  0xea   :  { %2619 = vmatpush.bf16.msra.mxu0 %v5750_v49  ;;  %v5638_v49 = vor.u32 %v8291_v39, %v5637_v37  ;;  %v6869_v37 = vld [vmem:[#allocation7 + $0x9e8] sm:$0xf]  ;;  %v6006_v39 = vor.u32 %v8379_v25, %v6003_v26  ;;  %v8351_v26 = vld [vmem:[#allocation7 + $0x244] sm:$0xf] }
  0xeb   :  { %2632 = vmatpush.bf16.msra.mxu1 %v5974_v50  ;;  %v5609_v50 = vld [vmem:[#allocation7 + $0x10] sm:$0xf] }
  0xec   :  { %2645 = vmatpush.bf16.msra.mxu2 %v6198_v51  ;;  %v8284_v51 = vld [vmem:[#allocation7 + $0x28] sm:$0xf0] }
  0xed   :  { %2658 = vmatpush.bf16.msra.mxu3 %v6422_v56  ;;  %v6057_v56 = vld [vmem:[#allocation7 + $0x390] sm:$0xf]  ;;  %v5610_v2 = vor.u32 %v8284_v51, %v5609_v50  ;;  %v6870_v51 = vor.u32 %v8599_v40, %v6869_v37  ;;  %v6533_v40 = vld [vmem:[#allocation7 + $0x748] sm:$0xf] }
  0xee   :  { %2620 = vmatpush.bf16.msra.mxu0 %v5722_v0  ;;  %v6925_v0 = vld [vmem:[#allocation7 + $0xa58] sm:$0xf]  ;;  %v2394_v46 = vpop.f32.mrf.mxu2 }
  0xef   :  { %2633 = vmatpush.bf16.msra.mxu1 %v5946_v5  ;;  %v5807_v5 = vld [vmem:[#allocation7 + $0x1b4] sm:$0xf0] }
  0xf0   :  { %2646 = vmatpush.bf16.msra.mxu2 %v6170_v6  ;;  %v550_v6 = vperm.slane %v9290_v62, 4  ;;  %v8606_v62 = vld [vmem:[#allocation7 + $0xa38] sm:$0xf0]  ;;  %v2407_v47 = vpop.f32.mrf.mxu3 }
  0xf1   :  { %2659 = vmatpush.bf16.msra.mxu3 %v6394_v10  ;;  %v6058_v10 = vor.u32 %v8396_v57, %v6057_v56  ;;  %v8592_v57 = vld [vmem:[#allocation7 + $0x9c8] sm:$0xf0]  ;;  %v8571_v47 = vld [vmem:[#allocation7 + $0x920] sm:$0xf0] }
  0xf2   :  { %2621 = vmatpush.bf16.msra.mxu0 %v5694_v16  ;;  %v564_v15 = vperm.slane %v550_v6, 0  ;;  %v6926_v16 = vor.u32 %v8613_v1, %v6925_v0  ;;  %v6589_v6 = vld [vmem:[#allocation7 + $0x7b8] sm:$0xf] }
  0xf3   :  { %2634 = vmatpush.bf16.msra.mxu1 %v5918_v17  ;;  %v5810_v17 = vor.u32 %v8330_v3, %v5807_v5  ;;  %v6842_v3 = vor.u32 %v8592_v57, %v6841_v55  ;;  %v6729_v57 = vld [vmem:[#allocation7 + $0x8d0] sm:$0xf] }
  0xf4   :  { %2647 = vmatpush.bf16.msra.mxu2 %v6142_v18  ;;  %v6673_v18 = vld [vmem:[#allocation7 + $0x860] sm:$0xf]  ;;  %v571_v24 = vmul.f32 %v564_v15, %v9293_v28  ;;  %v5919_v15 = vld [vmem:[#allocation7 + $0x294] sm:$0xf0] }
  0xf5   :  { %2660 = vmatpush.bf16.msra.mxu3 %v6366_v22  ;;  %v8323_v22 = vld [vmem:[#allocation7 + $0x164] sm:$0xf]  ;;  %v6674_v27 = vor.u32 %v8550_v19, %v6673_v18  ;;  %v5698_v18 = vor.u32 %v8302_v11, %v5695_v4  ;;  %v6561_v19 = vld [vmem:[#allocation7 + $0x780] sm:$0xf] }
  0xf6   :  { %2622 = vmatpush.bf16.msra.mxu0 %v5666_v30  ;;  %v2393_v29 = vadd.f32 %v2392_v7, %v571_v24  ;;  %v6898_v30 = vor.u32 %v8606_v62, %v6897_v20  ;;  %v5782_v31 = vor.u32 %v8323_v22, %v5779_v23  ;;  %v8529_v7 = vld [vmem:[#allocation7 + $0x7d0] sm:$0xf0]  ;;  %v8522_v20 = vld [vmem:[#allocation7 + $0x798] sm:$0xf0]  ;;  %v8295_v23 = vld [vmem:[#allocation7 + $0x84] sm:$0xf] }
  0xf7   :  { %2635 = vmatpush.bf16.msra.mxu1 %v5890_v33  ;;  %v6645_v33 = vld [vmem:[#allocation7 + $0x828] sm:$0xf]  ;;  %v8578_v22 = vld [vmem:[#allocation7 + $0x958] sm:$0xf0]  ;;  %v5667_v24 = vld [vmem:[#allocation7 + $0x9c] sm:$0xf0] }
  0xf8   :  { %2648 = vmatpush.bf16.msra.mxu2 %v6114_v36  ;;  %v8543_v36 = vld [vmem:[#allocation7 + $0x840] sm:$0xf0]  ;;  %v2406_v44 = vadd.f32 %v2405_v8, %v2393_v29  ;;  %v6813_v8 = vld [vmem:[#allocation7 + $0x978] sm:$0xf] }
  0xf9   :  { %2661 = vmatpush.bf16.msra.mxu3 %v6338_v41  ;;  %v8316_v41 = vld [vmem:[#allocation7 + $0x12c] sm:$0xf]  ;;  %v6646_v50 = vor.u32 %v8543_v36, %v6645_v33  ;;  %v6562_v33 = vor.u32 %v8522_v20, %v6561_v19  ;;  %v8435_v19 = vld [vmem:[#allocation7 + $0x4e4] sm:$0xf]  ;;  %v6227_v20 = vld [vmem:[#allocation7 + $0x4fc] sm:$0xf0] }
  0xfa   :  { %2623 = vmatpush.bf16.msra.mxu0 %v5638_v49  ;;  %v5975_v49 = vld [vmem:[#allocation7 + $0x304] sm:$0xf0]  ;;  %v5754_v52 = vor.u32 %v8316_v41, %v5751_v43  ;;  %v8515_v41 = vld [vmem:[#allocation7 + $0x760] sm:$0xf0] }
  0xfb   :  { %2636 = vmatpush.bf16.msra.mxu1 %v5862_v53  ;;  %v6617_v53 = vld [vmem:[#allocation7 + $0x7f0] sm:$0xf]  ;;  %v5978_v56 = vor.u32 %v8372_v48, %v5975_v49  ;;  %v6757_v43 = vld [vmem:[#allocation7 + $0x908] sm:$0xf]  ;;  %v8288_v48 = vld [vmem:[#allocation7 + $0x4c] sm:$0xf] }
  0xfc   :  { %2649 = vmatpush.bf16.msra.mxu2 %v6086_v54  ;;  %v8536_v54 = vld [vmem:[#allocation7 + $0x808] sm:$0xf0]  ;;  %v5639_v49 = vld [vmem:[#allocation7 + $0x64] sm:$0xf0]  ;;  %v6758_v55 = vor.u32 %v8571_v47, %v6757_v43 }
  0xfd   :  { %2662 = vmatpush.bf16.msra.mxu3 %v6310_v58  ;;  %v8309_v58 = vld [vmem:[#allocation7 + $0xf4] sm:$0xf]  ;;  %v6618_v0 = vor.u32 %v8536_v54, %v6617_v53  ;;  %v6505_v53 = vld [vmem:[#allocation7 + $0x710] sm:$0xf]  ;;  %v8508_v54 = vld [vmem:[#allocation7 + $0x728] sm:$0xf0] }
  0xfe   :  { %2624 = vmatpush.bf16.msra.mxu0 %v5610_v2  ;;  %v2418_v63 = vpop.f32.mrf.mxu0  ;;  %v5726_v5 = vor.u32 %v8309_v58, %v5723_v59  ;;  %v8564_v58 = vld [vmem:[#allocation7 + $0x8e8] sm:$0xf0]  ;;  %v8281_v59 = vld [vmem:[#allocation7 + $0x14] sm:$0xf] }
  0xff   :  { %2637 = vmatpush.bf16.msra.mxu1 %v5834_v9  ;;  %v2419_v1 = vadd.f32 %v2418_v63, %v2406_v44  ;;  %v2431_v2 = vpop.f32.mrf.mxu1  ;;  %v5950_v9 = vor.u32 %v8365_v60, %v5947_v61  ;;  %v5611_v61 = vld [vmem:[#allocation7 + $0x2c] sm:$0xf0]  ;;  %v8337_v63 = vld [vmem:[#allocation7 + $0x1d4] sm:$0xf]  ;;  %v6730_v11 = vor.u32 %v8564_v58, %v6729_v57  ;;  %v8540_v43 = vld [vmem:[#allocation7 + $0x82c] sm:$0xf] }
 0x100   :  { %2650 = vmatpush.bf16.msra.mxu2 %v6058_v10  ;;  %v8585_v10 = vld [vmem:[#allocation7 + $0x990] sm:$0xf0]  ;;  %v5614_v4 = vor.u32 %v8281_v59, %v5611_v61  ;;  %v8596_v47 = vld [vmem:[#allocation7 + $0x9ec] sm:$0xf]  ;;  %v6395_v58 = vld [vmem:[#allocation7 + $0x64c] sm:$0xf0] }
 0x101   :  { %2663 = vmatpush.bf16.msra.mxu3 %v6282_v12  ;;  %2625 = vmatmul.bf16.vlgmr.msra.gmra.mxu0 %v9251_v34  ;;  %v2432_v12 = vadd.f32 %v2431_v2, %v2419_v1  ;;  %v8442_v2 = vld [vmem:[#allocation7 + $0x51c] sm:$0xf]  ;;  %v8533_v59 = vld [vmem:[#allocation7 + $0x7f4] sm:$0xf] }
 0x102   :  { %2669 = vmatpush.bf16.msrb.mxu0 %v6702_v14  ;;  %2638 = vmatmul.bf16.vlgmr.msra.gmra.mxu1 %v9253_v35  ;;  %v8358_v14 = vld [vmem:[#allocation7 + $0x27c] sm:$0xf]  ;;  %v8589_v61 = vld [vmem:[#allocation7 + $0x9b4] sm:$0xf] }
 0x103   :  { %2682 = vmatpush.bf16.msrb.mxu1 %v6926_v16  ;;  %2651 = vmatmul.bf16.vlgmr.msra.gmra.mxu2 %v9255_v42  ;;  %v6590_v16 = vor.u32 %v8529_v7, %v6589_v6  ;;  %v5922_v62 = vor.u32 %v8358_v14, %v5919_v15  ;;  %v6506_v7 = vor.u32 %v8508_v54, %v6505_v53  ;;  %v6927_v14 = vld [vmem:[#allocation7 + $0xa74] sm:$0xf0]  ;;  %v8421_v53 = vld [vmem:[#allocation7 + $0x474] sm:$0xf]  ;;  %v6171_v54 = vld [vmem:[#allocation7 + $0x48c] sm:$0xf0] }
 0x104   :  { %2695 = vmatpush.bf16.msrb.mxu2 %v5810_v17  ;;  %2664 = vmatmul.bf16.vlgmr.msra.gmra.mxu3 %v9259_v45  ;;  %v6814_v17 = vor.u32 %v8585_v10, %v6813_v8  ;;  %v6479_v8 = vld [vmem:[#allocation7 + $0x6f4] sm:$0xf0] }
 0x105   :  { %2708 = vmatpush.bf16.msrb.mxu3 %v6034_v21  ;;  %v6785_v21 = vld [vmem:[#allocation7 + $0x940] sm:$0xf]  ;;  %v6703_v10 = vld [vmem:[#allocation7 + $0x8b4] sm:$0xf0] }
 0x106   :  { %2670 = vmatpush.bf16.msrb.mxu0 %v6674_v27  ;;  %v2444_v25 = vpop.f32.mrf.mxu2  ;;  %v5891_v27 = vld [vmem:[#allocation7 + $0x25c] sm:$0xf0]  ;;  %v2420_v29 = vpop.f32.mrf.mxu0  ;;  %v6786_v37 = vor.u32 %v8578_v22, %v6785_v21  ;;  %v8491_v21 = vld [vmem:[#allocation7 + $0x6a4] sm:$0xf] }
 0x107   :  { %2683 = vmatpush.bf16.msrb.mxu1 %v6898_v30  ;;  %v2445_v30 = vadd.f32 %v2444_v25, %v2432_v12  ;;  %v2433_v36 = vpop.f32.mrf.mxu1  ;;  %v5894_v46 = vor.u32 %v8351_v26, %v5891_v27  ;;  %v8610_v12 = vld [vmem:[#allocation7 + $0xa5c] sm:$0xf]  ;;  %v6451_v22 = vld [vmem:[#allocation7 + $0x6bc] sm:$0xf0]  ;;  %v8603_v25 = vld [vmem:[#allocation7 + $0xa24] sm:$0xf]  ;;  %v6230_v27 = vor.u32 %v8435_v19, %v6227_v20 }
 0x108   :  { %2696 = vmatpush.bf16.msrb.mxu2 %v5782_v31  ;;  %v2457_v31 = vpop.f32.mrf.mxu3  ;;  %v6899_v26 = vld [vmem:[#allocation7 + $0xa3c] sm:$0xf0]  ;;  %v8428_v29 = vld [vmem:[#allocation7 + $0x4ac] sm:$0xf]  ;;  %v6199_v36 = vld [vmem:[#allocation7 + $0x4c4] sm:$0xf0] }
 0x109   :  { %2709 = vmatpush.bf16.msrb.mxu3 %v6006_v39  ;;  %v5670_v39 = vor.u32 %v8295_v23, %v5667_v24  ;;  %v9308_v44 = vadd.f32 %v2457_v31, %v2445_v30  ;;  %v8547_v23 = vld [vmem:[#allocation7 + $0x864] sm:$0xf]  ;;  %v6675_v24 = vld [vmem:[#allocation7 + $0x87c] sm:$0xf0]  ;;  %v9310_v30 = vld [vmem:[#allocation8 + $0x8] sm:$0x77]  ;;  %v6454_v31 = vor.u32 %v8491_v21, %v6451_v22 }
 0x10a   :  { %2671 = vmatpush.bf16.msrb.mxu0 %v6646_v50  ;;  %v8344_v50 = vld [vmem:[#allocation7 + $0x20c] sm:$0xf]  ;;  %v8407_v20 = vld [vmem:[#allocation7 + $0x404] sm:$0xf]  ;;  %v6115_v21 = vld [vmem:[#allocation7 + $0x41c] sm:$0xf0] }
 0x10b   :  { %2684 = vmatpush.bf16.msrb.mxu1 %v6870_v51  ;;  %v5863_v51 = vld [vmem:[#allocation7 + $0x224] sm:$0xf0] }
 0x10c   :  { %2697 = vmatpush.bf16.msrb.mxu2 %v5754_v52  ;;  %v6534_v52 = vor.u32 %v8515_v41, %v6533_v40  ;;  %v5866_v60 = vor.u32 %v8344_v50, %v5863_v51  ;;  %v6902_v40 = vor.u32 %v8603_v25, %v6899_v26  ;;  %v6423_v41 = vld [vmem:[#allocation7 + $0x684] sm:$0xf0]  ;;  %v6202_v50 = vor.u32 %v8428_v29, %v6199_v36  ;;  %v6563_v25 = vld [vmem:[#allocation7 + $0x79c] sm:$0xf0] }
 0x10d   :  { %2710 = vmatpush.bf16.msrb.mxu3 %v5978_v56  ;;  %v5642_v56 = vor.u32 %v8288_v48, %v5639_v49  ;;  %v6871_v48 = vld [vmem:[#allocation7 + $0xa04] sm:$0xf0]  ;;  %v6787_v29 = vld [vmem:[#allocation7 + $0x95c] sm:$0xf0] }
 0x10e   :  { %2672 = vmatpush.bf16.msrb.mxu0 %v6618_v0  ;;  %v5835_v0 = vld [vmem:[#allocation7 + $0x1ec] sm:$0xf0]  ;;  %v2446_v1 = vpop.f32.mrf.mxu2  ;;  %v6874_v57 = vor.u32 %v8596_v47, %v6871_v48  ;;  %v8456_v47 = vld [vmem:[#allocation7 + $0x58c] sm:$0xf] }
 0x10f   :  { %2685 = vmatpush.bf16.msrb.mxu1 %v6842_v3  ;;  %v6255_v3 = vld [vmem:[#allocation7 + $0x534] sm:$0xf0]  ;;  %v5838_v15 = vor.u32 %v8337_v63, %v5835_v0  ;;  %v6843_v63 = vld [vmem:[#allocation7 + $0x9cc] sm:$0xf0]  ;;  %v6174_v1 = vor.u32 %v8421_v53, %v6171_v54  ;;  %v8568_v53 = vld [vmem:[#allocation7 + $0x90c] sm:$0xf] }
 0x110   :  { %2698 = vmatpush.bf16.msrb.mxu2 %v5726_v5  ;;  %v8498_v5 = vld [vmem:[#allocation7 + $0x6dc] sm:$0xf]  ;;  %v2459_v6 = vpop.f32.mrf.mxu3  ;;  %v6759_v54 = vld [vmem:[#allocation7 + $0x924] sm:$0xf0] }
 0x111   :  { %2711 = vmatpush.bf16.msrb.mxu3 %v5950_v9  ;;  %v8554_v9 = vld [vmem:[#allocation7 + $0x89c] sm:$0xf] }
 0x112   :  { %2673 = vmatpush.bf16.msrb.mxu0 %v6590_v16  ;;  %v6258_v16 = vor.u32 %v8442_v2, %v6255_v3 }
 0x113   :  { %2686 = vmatpush.bf16.msrb.mxu1 %v6814_v17  ;;  %v6482_v17 = vor.u32 %v8498_v5, %v6479_v8  ;;  %v6143_v8 = vld [vmem:[#allocation7 + $0x454] sm:$0xf0] }
 0x114   :  { %2699 = vmatpush.bf16.msrb.mxu2 %v5698_v18  ;;  %v6706_v18 = vor.u32 %v8554_v9, %v6703_v10  ;;  %v8470_v9 = vld [vmem:[#allocation7 + $0x5fc] sm:$0xf]  ;;  %v6846_v10 = vor.u32 %v8589_v61, %v6843_v63  ;;  %v6283_v61 = vld [vmem:[#allocation7 + $0x56c] sm:$0xf0]  ;;  %v8505_v63 = vld [vmem:[#allocation7 + $0x714] sm:$0xf] }
 0x115   :  { %2712 = vmatpush.bf16.msrb.mxu3 %v5922_v62  ;;  %v6930_v62 = vor.u32 %v8610_v12, %v6927_v14  ;;  %v6591_v12 = vld [vmem:[#allocation7 + $0x7d4] sm:$0xf0] }
 0x116   :  { %2674 = vmatpush.bf16.msrb.mxu0 %v6562_v33  ;;  %v6678_v33 = vor.u32 %v8547_v23, %v6675_v24  ;;  %v6339_v23 = vld [vmem:[#allocation7 + $0x5dc] sm:$0xf0]  ;;  %v8519_v24 = vld [vmem:[#allocation7 + $0x784] sm:$0xf] }
 0x117   :  { %2687 = vmatpush.bf16.msrb.mxu1 %v6786_v37  ;;  %v8484_v37 = vld [vmem:[#allocation7 + $0x66c] sm:$0xf] }
 0x118   :  { %2700 = vmatpush.bf16.msrb.mxu2 %v5670_v39  ;;  %v551_v39 = vperm.slane %v9310_v30, 0  ;;  %v6426_v51 = vor.u32 %v8484_v37, %v6423_v41  ;;  %v6118_v37 = vor.u32 %v8407_v20, %v6115_v21  ;;  %v6566_v41 = vor.u32 %v8519_v24, %v6563_v25  ;;  %v8383_v25 = vld [vmem:[#allocation7 + $0x340] sm:$0xf0] }
 0x119   :  { %2713 = vmatpush.bf16.msrb.mxu3 %v5894_v46  ;;  %v6647_v46 = vld [vmem:[#allocation7 + $0x844] sm:$0xf0] }
 0x11a   :  { %2675 = vmatpush.bf16.msrb.mxu0 %v6534_v52  ;;  %v565_v49 = vperm.slane %v551_v39, 0  ;;  %v6650_v52 = vor.u32 %v8540_v43, %v6647_v46  ;;  %v8400_v43 = vld [vmem:[#allocation7 + $0x3cc] sm:$0xf]  ;;  %v6087_v46 = vld [vmem:[#allocation7 + $0x3e4] sm:$0xf0] }
 0x11b   :  { %2688 = vmatpush.bf16.msrb.mxu1 %v6758_v55  ;;  %v8477_v55 = vld [vmem:[#allocation7 + $0x634] sm:$0xf] }
 0x11c   :  { %2701 = vmatpush.bf16.msrb.mxu2 %v5642_v56  ;;  %v572_v56 = vmul.f32 %v565_v49, %v9293_v28  ;;  %v6398_v5 = vor.u32 %v8477_v55, %v6395_v58  ;;  %v6090_v55 = vor.u32 %v8400_v43, %v6087_v46  ;;  %v8376_v46 = vld [vmem:[#allocation7 + $0x308] sm:$0xf0] }
 0x11d   :  { %2714 = vmatpush.bf16.msrb.mxu3 %v5866_v60  ;;  %v6619_v60 = vld [vmem:[#allocation7 + $0x80c] sm:$0xf0] }
 0x11e   :  { %2676 = vmatpush.bf16.msrb.mxu0 %v6506_v7  ;;  %v2470_v0 = vpop.f32.mrf.mxu0  ;;  %v6622_v6 = vor.u32 %v8533_v59, %v6619_v60  ;;  %v8414_v7 = vld [vmem:[#allocation7 + $0x43c] sm:$0xf]  ;;  %v8449_v60 = vld [vmem:[#allocation7 + $0x554] sm:$0xf] }
 0x11f   :  { %2689 = vmatpush.bf16.msrb.mxu1 %v6730_v11  ;;  %v2471_v2 = vadd.f32 %v2470_v0, %v572_v56  ;;  %v2483_v3 = vpop.f32.mrf.mxu1  ;;  %v6367_v11 = vld [vmem:[#allocation7 + $0x614] sm:$0xf0]  ;;  %v8393_v56 = vld [vmem:[#allocation7 + $0x394] sm:$0xf]  ;;  %v6762_v0 = vor.u32 %v8568_v53, %v6759_v54 }
 0x120   :  { %2702 = vmatpush.bf16.msrb.mxu2 %v5614_v4  ;;  %v8526_v4 = vld [vmem:[#allocation7 + $0x7bc] sm:$0xf] }
 0x121   :  { %2715 = vmatpush.bf16.msrb.mxu3 %v5838_v15  ;;  %2677 = vmatmul.bf16.vlgmr.msrb.gmra.mxu0 %v9266_v32  ;;  %v2484_v14 = vadd.f32 %v2483_v3, %v2471_v2  ;;  %v8582_v15 = vld [vmem:[#allocation7 + $0x97c] sm:$0xf]  ;;  %v6594_v19 = vor.u32 %v8526_v4, %v6591_v12  ;;  %v8561_v2 = vld [vmem:[#allocation7 + $0x8d4] sm:$0xf]  ;;  %v6731_v3 = vld [vmem:[#allocation7 + $0x8ec] sm:$0xf0] }
 0x122   :  { %2721 = vmatpush.bf16.msra.mxu0 %v6258_v16  ;;  %2690 = vmatmul.bf16.vlgmr.msrb.gmra.mxu1 %v9269_v38  ;;  %v6815_v16 = vld [vmem:[#allocation7 + $0x994] sm:$0xf0]  ;;  %v6261_v4 = vld [vmem:[#allocation7 + $0x520] sm:$0xf]  ;;  %v8446_v12 = vld [vmem:[#allocation7 + $0x538] sm:$0xf0] }
 0x123   :  { %2734 = vmatpush.bf16.msra.mxu1 %v6482_v17  ;;  %2703 = vmatmul.bf16.vlgmr.msrb.gmra.mxu2 %v9251_v34  ;;  %v6146_v17 = vor.u32 %v8414_v7, %v6143_v8  ;;  %v6818_v22 = vor.u32 %v8582_v15, %v6815_v16  ;;  %v8334_v7 = vld [vmem:[#allocation7 + $0x1b8] sm:$0xf0]  ;;  %v6037_v8 = vld [vmem:[#allocation7 + $0x360] sm:$0xf]  ;;  %v6262_v21 = vor.u32 %v8446_v12, %v6261_v4 }
 0x124   :  { %2747 = vmatpush.bf16.msra.mxu2 %v6706_v18  ;;  %2716 = vmatmul.bf16.vlgmr.msrb.gmra.mxu3 %v9253_v35  ;;  %v6370_v18 = vor.u32 %v8470_v9, %v6367_v11  ;;  %v8390_v11 = vld [vmem:[#allocation7 + $0x378] sm:$0xf0]  ;;  %v6485_v16 = vld [vmem:[#allocation7 + $0x6e0] sm:$0xf] }
 0x125   :  { %2760 = vmatpush.bf16.msra.mxu3 %v6930_v62  ;;  %v8463_v62 = vld [vmem:[#allocation7 + $0x5c4] sm:$0xf]  ;;  %v6038_v20 = vor.u32 %v8390_v11, %v6037_v8  ;;  %v5701_v8 = vld [vmem:[#allocation7 + $0xc0] sm:$0xf]  ;;  %v8362_v4 = vld [vmem:[#allocation7 + $0x298] sm:$0xf0] }
 0x126   :  { %2722 = vmatpush.bf16.msra.mxu0 %v6230_v27  ;;  %v2496_v26 = vpop.f32.mrf.mxu2  ;;  %v8575_v27 = vld [vmem:[#allocation7 + $0x944] sm:$0xf]  ;;  %v6149_v12 = vld [vmem:[#allocation7 + $0x440] sm:$0xf] }
 0x127   :  { %2735 = vmatpush.bf16.msra.mxu1 %v6454_v31  ;;  %v2472_v31 = vpop.f32.mrf.mxu0  ;;  %v2509_v36 = vpop.f32.mrf.mxu3  ;;  %v6790_v49 = vor.u32 %v8575_v27, %v6787_v29  ;;  %v8439_v27 = vld [vmem:[#allocation7 + $0x500] sm:$0xf0]  ;;  %v6457_v29 = vld [vmem:[#allocation7 + $0x6a8] sm:$0xf] }
 0x128   :  { %2748 = vmatpush.bf16.msra.mxu2 %v6678_v33  ;;  %v2497_v33 = vadd.f32 %v2496_v26, %v2484_v14  ;;  %v2485_v39 = vpop.f32.mrf.mxu1  ;;  %v6286_v14 = vor.u32 %v8449_v60, %v6283_v61  ;;  %v6233_v26 = vld [vmem:[#allocation7 + $0x4e8] sm:$0xf]  ;;  %v8495_v31 = vld [vmem:[#allocation7 + $0x6c0] sm:$0xf0]  ;;  %v6177_v60 = vld [vmem:[#allocation7 + $0x478] sm:$0xf] }
 0x129   :  { %2761 = vmatpush.bf16.msra.mxu3 %v6902_v40  ;;  %v6342_v40 = vor.u32 %v8463_v62, %v6339_v23  ;;  %v5785_v62 = vld [vmem:[#allocation7 + $0x168] sm:$0xf]  ;;  %v5757_v39 = vld [vmem:[#allocation7 + $0x130] sm:$0xf]  ;;  %v6458_v43 = vor.u32 %v8495_v31, %v6457_v29  ;;  %v8425_v61 = vld [vmem:[#allocation7 + $0x490] sm:$0xf0] }
 0x12a   :  { %2723 = vmatpush.bf16.msra.mxu0 %v6202_v50  ;;  %v9318_v48 = vadd.f32 %v2509_v36, %v2497_v33  ;;  %v6311_v50 = vld [vmem:[#allocation7 + $0x5a4] sm:$0xf0] }
 0x12b   :  { %2736 = vmatpush.bf16.msra.mxu1 %v6426_v51  ;;  %v8512_v51 = vld [vmem:[#allocation7 + $0x74c] sm:$0xf]  ;;  %v6314_v58 = vor.u32 %v8456_v47, %v6311_v50  ;;  %v6009_v23 = vld [vmem:[#allocation7 + $0x328] sm:$0xf]  ;;  %v6205_v47 = vld [vmem:[#allocation7 + $0x4b0] sm:$0xf] }
 0x12c   :  { %2749 = vmatpush.bf16.msra.mxu2 %v6650_v52  ;;  %v6535_v52 = vld [vmem:[#allocation7 + $0x764] sm:$0xf0]  ;;  %v6010_v36 = vor.u32 %v8383_v25, %v6009_v23  ;;  %v6429_v50 = vld [vmem:[#allocation7 + $0x670] sm:$0xf]  ;;  %v8355_v23 = vld [vmem:[#allocation7 + $0x260] sm:$0xf0] }
 0x12d   :  { %2762 = vmatpush.bf16.msra.mxu3 %v6874_v57  ;;  %v6059_v57 = vld [vmem:[#allocation7 + $0x3ac] sm:$0xf0]  ;;  %v6538_v59 = vor.u32 %v8512_v51, %v6535_v52  ;;  %v8488_v51 = vld [vmem:[#allocation7 + $0x688] sm:$0xf0]  ;;  %v8411_v25 = vld [vmem:[#allocation7 + $0x420] sm:$0xf0] }
 0x12e   :  { %2724 = vmatpush.bf16.msra.mxu0 %v6174_v1  ;;  %v6507_v1 = vld [vmem:[#allocation7 + $0x72c] sm:$0xf0] }
 0x12f   :  { %2737 = vmatpush.bf16.msra.mxu1 %v6398_v5  ;;  %v2498_v5 = vpop.f32.mrf.mxu2  ;;  %v2511_v9 = vpop.f32.mrf.mxu3  ;;  %v6510_v15 = vor.u32 %v8505_v63, %v6507_v1  ;;  %v6401_v63 = vld [vmem:[#allocation7 + $0x638] sm:$0xf] }
 0x130   :  { %2750 = vmatpush.bf16.msra.mxu2 %v6622_v6  ;;  %v5813_v6 = vld [vmem:[#allocation7 + $0x1a0] sm:$0xf]  ;;  %v8306_v9 = vld [vmem:[#allocation7 + $0xd8] sm:$0xf0] }
 0x131   :  { %2763 = vmatpush.bf16.msra.mxu3 %v6846_v10  ;;  %v6062_v10 = vor.u32 %v8393_v56, %v6059_v57  ;;  %v8313_v56 = vld [vmem:[#allocation7 + $0x110] sm:$0xf0]  ;;  %v5953_v57 = vld [vmem:[#allocation7 + $0x2b8] sm:$0xf] }
 0x132   :  { %2725 = vmatpush.bf16.msra.mxu0 %v6146_v17  ;;  %v8502_v17 = vld [vmem:[#allocation7 + $0x6f8] sm:$0xf0] }
 0x133   :  { %2738 = vmatpush.bf16.msra.mxu1 %v6370_v18  ;;  %v6734_v18 = vor.u32 %v8561_v2, %v6731_v3  ;;  %v6486_v24 = vor.u32 %v8502_v17, %v6485_v16  ;;  %v6373_v16 = vld [vmem:[#allocation7 + $0x600] sm:$0xf]  ;;  %v8474_v17 = vld [vmem:[#allocation7 + $0x618] sm:$0xf0] }
 0x134   :  { %2751 = vmatpush.bf16.msra.mxu2 %v6594_v19  ;;  %v5814_v19 = vor.u32 %v8334_v7, %v5813_v6  ;;  %v6178_v7 = vor.u32 %v8425_v61, %v6177_v60  ;;  %v8397_v61 = vld [vmem:[#allocation7 + $0x3b0] sm:$0xf0] }
 0x135   :  { %2764 = vmatpush.bf16.msra.mxu3 %v6818_v22  ;;  %v8327_v22 = vld [vmem:[#allocation7 + $0x180] sm:$0xf0] }
 0x136   :  { %2726 = vmatpush.bf16.msra.mxu0 %v6118_v37  ;;  %v5786_v33 = vor.u32 %v8327_v22, %v5785_v62  ;;  %v6234_v37 = vor.u32 %v8439_v27, %v6233_v26  ;;  %v5897_v62 = vld [vmem:[#allocation7 + $0x248] sm:$0xf]  ;;  %v6374_v22 = vor.u32 %v8474_v17, %v6373_v16  ;;  %v8467_v27 = vld [vmem:[#allocation7 + $0x5e0] sm:$0xf0] }
 0x137   :  { %2739 = vmatpush.bf16.msra.mxu1 %v6342_v40  ;;  %v8320_v40 = vld [vmem:[#allocation7 + $0x148] sm:$0xf0]  ;;  %v6345_v26 = vld [vmem:[#allocation7 + $0x5c8] sm:$0xf] }
 0x138   :  { %2752 = vmatpush.bf16.msra.mxu2 %v6566_v41  ;;  %v5981_v41 = vld [vmem:[#allocation7 + $0x2f0] sm:$0xf]  ;;  %v5758_v52 = vor.u32 %v8320_v40, %v5757_v39  ;;  %v8292_v40 = vld [vmem:[#allocation7 + $0x68] sm:$0xf0] }
 0x139   :  { %2765 = vmatpush.bf16.msra.mxu3 %v6790_v49  ;;  %v8432_v49 = vld [vmem:[#allocation7 + $0x4c8] sm:$0xf0]  ;;  %v5982_v53 = vor.u32 %v8376_v46, %v5981_v41  ;;  %v5645_v39 = vld [vmem:[#allocation7 + $0x50] sm:$0xf] }
 0x13a   :  { %2727 = vmatpush.bf16.msra.mxu0 %v6090_v55  ;;  %v6206_v54 = vor.u32 %v8432_v49, %v6205_v47  ;;  %v5729_v55 = vld [vmem:[#allocation7 + $0xf8] sm:$0xf]  ;;  %v5869_v41 = vld [vmem:[#allocation7 + $0x210] sm:$0xf]  ;;  %v8348_v46 = vld [vmem:[#allocation7 + $0x228] sm:$0xf0] }
 0x13b   :  { %2740 = vmatpush.bf16.msra.mxu1 %v6314_v58  ;;  %v6430_v58 = vor.u32 %v8488_v51, %v6429_v50  ;;  %v5730_v2 = vor.u32 %v8313_v56, %v5729_v55  ;;  %v6093_v47 = vld [vmem:[#allocation7 + $0x3d0] sm:$0xf]  ;;  %v8404_v49 = vld [vmem:[#allocation7 + $0x3e8] sm:$0xf0]  ;;  %v5870_v55 = vor.u32 %v8348_v46, %v5869_v41 }
 0x13c   :  { %2753 = vmatpush.bf16.msra.mxu2 %v6538_v59  ;;  %v8369_v59 = vld [vmem:[#allocation7 + $0x2d0] sm:$0xf0]  ;;  %v6317_v50 = vld [vmem:[#allocation7 + $0x590] sm:$0xf]  ;;  %v8460_v51 = vld [vmem:[#allocation7 + $0x5a8] sm:$0xf0]  ;;  %v6094_v56 = vor.u32 %v8404_v49, %v6093_v47 }
 0x13d   :  { %2766 = vmatpush.bf16.msra.mxu3 %v6762_v0  ;;  %v8481_v0 = vld [vmem:[#allocation7 + $0x650] sm:$0xf0]  ;;  %v5954_v6 = vor.u32 %v8369_v59, %v5953_v57  ;;  %v5841_v57 = vld [vmem:[#allocation7 + $0x1d8] sm:$0xf]  ;;  %v6318_v60 = vor.u32 %v8460_v51, %v6317_v50  ;;  %v6877_v41 = vld [vmem:[#allocation7 + $0x9f0] sm:$0xf] }
 0x13e   :  { %2728 = vmatpush.bf16.msra.mxu0 %v6062_v10  ;;  %v2522_v1 = vpop.f32.mrf.mxu0  ;;  %v5925_v10 = vld [vmem:[#allocation7 + $0x280] sm:$0xf]  ;;  %v6402_v11 = vor.u32 %v8481_v0, %v6401_v63  ;;  %v6065_v59 = vld [vmem:[#allocation7 + $0x398] sm:$0xf]  ;;  %v8453_v0 = vld [vmem:[#allocation7 + $0x570] sm:$0xf0] }
 0x13f   :  { %2741 = vmatpush.bf16.msra.mxu1 %v6286_v14  ;;  %v2523_v3 = vadd.f32 %v2522_v1, %v9318_v48  ;;  %v2535_v5 = vpop.f32.mrf.mxu1  ;;  %v8418_v14 = vld [vmem:[#allocation7 + $0x458] sm:$0xf0]  ;;  %v5926_v48 = vor.u32 %v8362_v4, %v5925_v10  ;;  %v6289_v63 = vld [vmem:[#allocation7 + $0x558] sm:$0xf]  ;;  %v6709_v1 = vld [vmem:[#allocation7 + $0x8a0] sm:$0xf]  ;;  %v6066_v4 = vor.u32 %v8397_v61, %v6065_v59 }
 0x140   :  { %2754 = vmatpush.bf16.msra.mxu2 %v6510_v15  ;;  %v6290_v16 = vor.u32 %v8453_v0, %v6289_v63  ;;  %v8600_v46 = vld [vmem:[#allocation7 + $0xa08] sm:$0xf0]  ;;  %v7057_v47 = vld [vmem:[#allocation11 + $0xf0] sm:$0xf]  ;;  %v6849_v63 = vld [vmem:[#allocation7 + $0x9b8] sm:$0xf]  ;;  %v9335_v0 = vpop.permute.xlu0 %2852 }
 0x141   :  { %2767 = vmatpush.bf16.msra.mxu3 %v6734_v18  ;;  %2729 = vmatmul.bf16.vlgmr.msra.gmra.mxu0 %v9255_v42  ;;  %v9325_v15 = vadd.f32 %v2535_v5, %v2523_v3  ;;  %v5702_v18 = vor.u32 %v8306_v9, %v5701_v8  ;;  %v6933_v3 = vld [vmem:[#allocation7 + $0xa60] sm:$0xf]  ;;  %v8660_v8 = vld [vmem:[#allocation11 + $0x164] sm:$0xf0]  ;;  %v8537_v61 = vld [vmem:[#allocation7 + $0x810] sm:$0xf0] }
 0x142   :  { %2773 = vmatpush.bf16.msrb.mxu0 %v5814_v19  ;;  %2742 = vmatmul.bf16.vlgmr.msra.gmra.mxu1 %v9259_v45  ;;  %v6150_v19 = vor.u32 %v8418_v14, %v6149_v12  ;;  %v7297_v12 = vld [vmem:[#allocation11 + $0x2d0] sm:$0xf]  ;;  %v8708_v14 = vld [vmem:[#allocation11 + $0x2e4] sm:$0xf0] }
 0x143   :  { %2786 = vmatpush.bf16.msrb.mxu1 %v6038_v20  ;;  %2755 = vmatmul.bf16.vlgmr.msra.gmra.mxu2 %v9266_v32  ;;  %v5673_v20 = vld [vmem:[#allocation7 + $0x88] sm:$0xf]  ;;  %v8648_v49 = vld [vmem:[#allocation11 + $0x104] sm:$0xf0] }
 0x144   :  { %2799 = vmatpush.bf16.msrb.mxu2 %v6262_v21  ;;  %2768 = vmatmul.bf16.vlgmr.msra.gmra.mxu3 %v9269_v38  ;;  %v8299_v21 = vld [vmem:[#allocation7 + $0xa0] sm:$0xf0]  ;;  %v7058_v59 = vor.u32 %v8648_v49, %v7057_v47 }
 0x145   :  { %2812 = vmatpush.bf16.msrb.mxu3 %v6486_v24  ;;  %v6121_v24 = vld [vmem:[#allocation7 + $0x408] sm:$0xf]  ;;  %v5674_v31 = vor.u32 %v8299_v21, %v5673_v20  ;;  %v8551_v20 = vld [vmem:[#allocation7 + $0x880] sm:$0xf0] }
 0x146   :  { %2774 = vmatpush.bf16.msrb.mxu0 %v5786_v33  ;;  %v2524_v29 = vpop.f32.mrf.mxu0  ;;  %v9327_v9 = vpop.f32.mrf.mxu2  ;;  %v6905_v21 = vld [vmem:[#allocation7 + $0xa28] sm:$0xf]  ;;  %v8579_v49 = vld [vmem:[#allocation7 + $0x960] sm:$0xf0] }
 0x147   :  { %2787 = vmatpush.bf16.msrb.mxu1 %v6010_v36  ;;  %v2537_v33 = vpop.f32.mrf.mxu1  ;;  %v5898_v36 = vor.u32 %v8355_v23, %v5897_v62  ;;  %v9329_v10 = vpop.f32.mrf.mxu3  ;;  %v7298_v62 = vor.u32 %v8708_v14, %v7297_v12  ;;  %v7081_v23 = vld [vmem:[#allocation11 + $0x120] sm:$0xf]  ;;  %v8702_v29 = vld [vmem:[#allocation11 + $0x2b4] sm:$0xf0] }
 0x148   :  { %2800 = vmatpush.bf16.msrb.mxu2 %v6234_v37  ;;  %v6122_v37 = vor.u32 %v8411_v25, %v6121_v24  ;;  %v8654_v24 = vld [vmem:[#allocation11 + $0x134] sm:$0xf0]  ;;  %v8970_v25 = vld [vmem:[#allocation8] sm:$0x77]  ;;  %v9343_v14 = vpop.permute.xlu1 %2891 }
 0x149   :  { %2813 = vmatpush.bf16.msrb.mxu3 %v6458_v43  ;;  %v6346_v43 = vor.u32 %v8467_v27, %v6345_v26  ;;  %v2855_v26 = vperm.slane %v8970_v25, 1  ;;  %v7273_v27 = vld [vmem:[#allocation11 + $0x2a0] sm:$0xf] }
 0x14a   :  { %2775 = vmatpush.bf16.msrb.mxu0 %v5758_v52  ;;  %v5646_v52 = vor.u32 %v8292_v40, %v5645_v39  ;;  %v6653_v39 = vld [vmem:[#allocation7 + $0x830] sm:$0xf]  ;;  %v8544_v40 = vld [vmem:[#allocation7 + $0x848] sm:$0xf0] }
 0x14b   :  { %2788 = vmatpush.bf16.msrb.mxu1 %v5982_v53  ;;  %v5617_v53 = vld [vmem:[#allocation7 + $0x18] sm:$0xf] }
 0x14c   :  { %2801 = vmatpush.bf16.msrb.mxu2 %v6206_v54  ;;  %v8285_v54 = vld [vmem:[#allocation7 + $0x30] sm:$0xf0] }
 0x14d   :  { %2814 = vmatpush.bf16.msrb.mxu3 %v6430_v58  ;;  %v8341_v58 = vld [vmem:[#allocation7 + $0x1f0] sm:$0xf0]  ;;  %v5618_v5 = vor.u32 %v8285_v54, %v5617_v53  ;;  %v8696_v54 = vld [vmem:[#allocation11 + $0x284] sm:$0xf0] }
 0x14e   :  { %2776 = vmatpush.bf16.msrb.mxu0 %v5730_v2  ;;  %v8558_v2 = vld [vmem:[#allocation7 + $0x8b8] sm:$0xf0]  ;;  %v2550_v50 = vpop.f32.mrf.mxu2  ;;  %v7249_v53 = vld [vmem:[#allocation11 + $0x270] sm:$0xf] }
 0x14f   :  { %2789 = vmatpush.bf16.msrb.mxu1 %v5954_v6  ;;  %v8614_v6 = vld [vmem:[#allocation7 + $0xa78] sm:$0xf0]  ;;  %v6710_v17 = vor.u32 %v8558_v2, %v6709_v1  ;;  %v2563_v51 = vpop.f32.mrf.mxu3  ;;  %v7033_v1 = vld [vmem:[#allocation11 + $0xc0] sm:$0xf] }
 0x150   :  { %2802 = vmatpush.bf16.msrb.mxu2 %v6178_v7  ;;  %v7105_v7 = vld [vmem:[#allocation11 + $0x150] sm:$0xf]  ;;  %v8642_v2 = vld [vmem:[#allocation11 + $0xd4] sm:$0xf0]  ;;  %v6985_v50 = vld [vmem:[#allocation11 + $0x60] sm:$0xf] }
 0x151   :  { %2815 = vmatpush.bf16.msrb.mxu3 %v6402_v11  ;;  %v5842_v11 = vor.u32 %v8341_v58, %v5841_v57  ;;  %v2895_v57 = vperm.slane %v8970_v25, 6  ;;  %v6878_v58 = vor.u32 %v8600_v46, %v6877_v41  ;;  %v6793_v41 = vld [vmem:[#allocation7 + $0x948] sm:$0xf]  ;;  %v8630_v51 = vld [vmem:[#allocation11 + $0x74] sm:$0xf0] }
 0x152   :  { %2777 = vmatpush.bf16.msrb.mxu0 %v5702_v18  ;;  %v6934_v18 = vor.u32 %v8614_v6, %v6933_v3  ;;  %v7225_v3 = vld [vmem:[#allocation11 + $0x240] sm:$0xf] }
 0x153   :  { %2790 = vmatpush.bf16.msrb.mxu1 %v5926_v48  ;;  %v7106_v48 = vor.u32 %v8660_v8, %v7105_v7  ;;  %v2909_v8 = vperm.slane %v2895_v57, 2 }
 0x154   :  { %2803 = vmatpush.bf16.msrb.mxu2 %v6150_v19  ;;  %v6681_v19 = vld [vmem:[#allocation7 + $0x868] sm:$0xf] }
 0x155   :  { %2816 = vmatpush.bf16.msrb.mxu3 %v6374_v22  ;;  %v8607_v22 = vld [vmem:[#allocation7 + $0xa40] sm:$0xf0]  ;;  %v6682_v33 = vor.u32 %v8551_v20, %v6681_v19  ;;  %v6821_v19 = vld [vmem:[#allocation7 + $0x980] sm:$0xf]  ;;  %v2916_v46 = vmul.f32 %v2909_v8, %v9343_v14  ;;  %v8672_v8 = vld [vmem:[#allocation11 + $0x1c4] sm:$0xf0] }
 0x156   :  { %2778 = vmatpush.bf16.msrb.mxu0 %v5674_v31  ;;  %v2856_v31 = vperm.slane %v8970_v25, 5 }
 0x157   :  { %2791 = vmatpush.bf16.msrb.mxu1 %v5898_v36  ;;  %v6906_v36 = vor.u32 %v8607_v22, %v6905_v21  ;;  %v7009_v22 = vld [vmem:[#allocation11 + $0x90] sm:$0xf] }
 0x158   :  { %2804 = vmatpush.bf16.msrb.mxu2 %v6122_v37  ;;  %v7082_v37 = vor.u32 %v8654_v24, %v7081_v23  ;;  %v8636_v23 = vld [vmem:[#allocation11 + $0xa4] sm:$0xf0]  ;;  %v7201_v24 = vld [vmem:[#allocation11 + $0x210] sm:$0xf] }
 0x159   :  { %2817 = vmatpush.bf16.msrb.mxu3 %v6346_v43  ;;  %v7274_v43 = vor.u32 %v8702_v29, %v7273_v27  ;;  %v9346_v27 = vld [vmem:[#allocation10] sm:$0xff] }
 0x15a   :  { %2779 = vmatpush.bf16.msrb.mxu0 %v5646_v52  ;;  %v2869_v52 = vperm.slane %v2855_v26, 1  ;;  %v2931_v57 = vperm.slane %v9346_v27, 0 }
 0x15b   :  { %2792 = vmatpush.bf16.msrb.mxu1 %v5870_v55  ;;  %v2894_v55 = vperm.slane %v8970_v25, 2  ;;  %v8684_v25 = vld [vmem:[#allocation11 + $0x224] sm:$0xf0] }
 0x15c   :  { %2805 = vmatpush.bf16.msrb.mxu2 %v6094_v56  ;;  %v2870_v56 = vperm.slane %v2856_v31, 1  ;;  %v2876_v12 = vmul.f32 %v2869_v52, %v9335_v0  ;;  %v7202_v47 = vor.u32 %v8684_v25, %v7201_v24  ;;  %v8618_v24 = vld [vmem:[#allocation11 + $0x14] sm:$0xf0]  ;;  %v7129_v25 = vld [vmem:[#allocation11 + $0x180] sm:$0xf] }
 0x15d   :  { %2818 = vmatpush.bf16.msrb.mxu3 %v6318_v60  ;;  %v6625_v60 = vld [vmem:[#allocation7 + $0x7f8] sm:$0xf]  ;;  %v2908_v7 = vperm.slane %v2894_v55, 2 }
 0x15e   :  { %2780 = vmatpush.bf16.msrb.mxu0 %v5618_v5  ;;  %v8690_v5 = vld [vmem:[#allocation11 + $0x254] sm:$0xf0]  ;;  %v9338_v6 = vpop.f32.mrf.mxu0  ;;  %v2877_v20 = vmul.f32 %v2870_v56, %v9335_v0 }
 0x15f   :  { %2793 = vmatpush.bf16.msrb.mxu1 %v5842_v11  ;;  %v6626_v11 = vor.u32 %v8537_v61, %v6625_v60  ;;  %v7226_v21 = vor.u32 %v8690_v5, %v7225_v3  ;;  %v2915_v29 = vmul.f32 %v2908_v7, %v9343_v14  ;;  %v6794_v60 = vor.u32 %v8579_v49, %v6793_v41  ;;  %v8572_v3 = vld [vmem:[#allocation7 + $0x928] sm:$0xf0]  ;;  %v6961_v5 = vld [vmem:[#allocation11 + $0x30] sm:$0xf] }
 0x160   :  { %2806 = vmatpush.bf16.msrb.mxu2 %v6066_v4  ;;  %v9340_v4 = vpop.f32.mrf.mxu1  ;;  %v6986_v61 = vor.u32 %v8630_v51, %v6985_v50  ;;  %v7153_v7 = vld [vmem:[#allocation11 + $0x1b0] sm:$0xf] }
 0x161   :  { %2819 = vmatpush.bf16.msrb.mxu3 %v6290_v16  ;;  %2781 = vmatmul.bf16.vlgmr.msrb.gmra.mxu0 %v9251_v34  ;;  %v6654_v34 = vor.u32 %v8544_v40, %v6653_v39  ;;  %v6569_v39 = vld [vmem:[#allocation7 + $0x788] sm:$0xf]  ;;  %v8523_v40 = vld [vmem:[#allocation7 + $0x7a0] sm:$0xf0]  ;;  %v7873_v41 = vld [vmem:[#allocation11 + $0x750] sm:$0xf] }
 0x162   :  { %2825 = vmatpush.bf16.msra.mxu0 %v6710_v17  ;;  %2794 = vmatmul.bf16.vlgmr.msrb.gmra.mxu1 %v9253_v35  ;;  %v7250_v35 = vor.u32 %v8696_v54, %v7249_v53  ;;  %v7034_v17 = vor.u32 %v8642_v2, %v7033_v1  ;;  %v7177_v53 = vld [vmem:[#allocation11 + $0x1e0] sm:$0xf] }
 0x163   :  { %2838 = vmatpush.bf16.msra.mxu1 %v6934_v18  ;;  %2807 = vmatmul.bf16.vlgmr.msrb.gmra.mxu2 %v9255_v42  ;;  %v8593_v42 = vld [vmem:[#allocation7 + $0x9d0] sm:$0xf0]  ;;  %v6597_v18 = vld [vmem:[#allocation7 + $0x7c0] sm:$0xf] }
 0x164   :  { %4996 = vmatpush.bf16.msra.mxu2 %v7106_v48  ;;  %2820 = vmatmul.bf16.vlgmr.msrb.gmra.mxu3 %v9259_v45  ;;  %v552_v45 = vperm.slane %v9310_v30, 4  ;;  %v6850_v16 = vor.u32 %v8593_v42, %v6849_v63  ;;  %v8530_v48 = vld [vmem:[#allocation7 + $0x7d8] sm:$0xf0]  ;;  %v6541_v63 = vld [vmem:[#allocation7 + $0x750] sm:$0xf] }
 0x165   :  { %5009 = vmatpush.bf16.msra.mxu3 %v7298_v62  ;;  %v8586_v62 = vld [vmem:[#allocation7 + $0x998] sm:$0xf0]  ;;  %v6598_v31 = vor.u32 %v8530_v48, %v6597_v18  ;;  %v6765_v42 = vld [vmem:[#allocation7 + $0x910] sm:$0xf] }
 0x166   :  { %2826 = vmatpush.bf16.msra.mxu0 %v6682_v33  ;;  %v566_v26 = vperm.slane %v552_v45, 0  ;;  %v2883_v33 = vadd.f32 %v2876_v12, %v9300_v13  ;;  %v9352_v52 = vpop.f32.mrf.mxu2  ;;  %v8678_v13 = vld [vmem:[#allocation11 + $0x1f4] sm:$0xf0]  ;;  %v2576_v55 = vpop.f32.mrf.mxu0  ;;  %v8624_v45 = vld [vmem:[#allocation11 + $0x44] sm:$0xf0]  ;;  %v6766_v48 = vor.u32 %v8572_v3, %v6765_v42 }
 0x167   :  { %2839 = vmatpush.bf16.msra.mxu1 %v6906_v36  ;;  %v6822_v36 = vor.u32 %v8586_v62, %v6821_v19  ;;  %v9355_v56 = vpop.f32.mrf.mxu3  ;;  %v7178_v2 = vor.u32 %v8678_v13, %v7177_v53  ;;  %v6962_v19 = vor.u32 %v8624_v45, %v6961_v5  ;;  %v6937_v62 = vld [vmem:[#allocation11] sm:$0xf]  ;;  %v7633_v3 = vld [vmem:[#allocation11 + $0x570] sm:$0xf] }
 0x168   :  { %4997 = vmatpush.bf16.msra.mxu2 %v7082_v37  ;;  %v7010_v37 = vor.u32 %v8636_v23, %v7009_v22  ;;  %v573_v54 = vmul.f32 %v566_v26, %v9293_v28  ;;  %v7154_v23 = vor.u32 %v8672_v8, %v7153_v7  ;;  %v8666_v26 = vld [vmem:[#allocation11 + $0x194] sm:$0xf0]  ;;  %v6938_v49 = vor.u32 %v8618_v24, %v6937_v62  ;;  %v7465_v13 = vld [vmem:[#allocation11 + $0x420] sm:$0xf] }
 0x169   :  { %5010 = vmatpush.bf16.msra.mxu3 %v7274_v43  ;;  %v2884_v43 = vadd.f32 %v2877_v20, %v9308_v44  ;;  %v2932_v44 = vperm.slane %v9346_v27, 1  ;;  %v6737_v20 = vld [vmem:[#allocation7 + $0x8d8] sm:$0xf]  ;;  %v7130_v51 = vor.u32 %v8666_v26, %v7129_v25  ;;  %v7417_v62 = vld [vmem:[#allocation11 + $0x3c0] sm:$0xf] }
 0x16a   :  { %2827 = vmatpush.bf16.msra.mxu0 %v6654_v34  ;;  %v6570_v34 = vor.u32 %v8523_v40, %v6569_v39  ;;  %v8804_v40 = vld [vmem:[#allocation11 + $0x5e4] sm:$0xf0]  ;;  %v8786_v24 = vld [vmem:[#allocation11 + $0x554] sm:$0xf0]  ;;  %v7801_v25 = vld [vmem:[#allocation11 + $0x6c0] sm:$0xf] }
 0x16b   :  { %2840 = vmatpush.bf16.msra.mxu1 %v6878_v58  ;;  %v2589_v58 = vpop.f32.mrf.mxu1  ;;  %v2923_v1 = vadd.f32 %v2916_v46, %v2884_v43  ;;  %v8852_v43 = vld [vmem:[#allocation11 + $0x764] sm:$0xf0] }
 0x16c   :  { %4998 = vmatpush.bf16.msra.mxu2 %v7058_v59  ;;  %v2922_v59 = vadd.f32 %v2915_v29, %v2883_v33  ;;  %v8756_v33 = vld [vmem:[#allocation11 + $0x464] sm:$0xf0]  ;;  %v7874_v55 = vor.u32 %v8852_v43, %v7873_v41  ;;  %v7849_v58 = vld [vmem:[#allocation11 + $0x720] sm:$0xf]  ;;  %v9377_v41 = vld [vmem:[#allocation8 + $0x10] sm:$0x77] }
 0x16d   :  { %5011 = vmatpush.bf16.msra.mxu3 %v7250_v35  ;;  %v8516_v35 = vld [vmem:[#allocation7 + $0x768] sm:$0xf0]  ;;  %v2946_v22 = vadd.f32 %v2932_v44, %v2923_v1  ;;  %v7657_v44 = vld [vmem:[#allocation11 + $0x5a0] sm:$0xf] }
 0x16e   :  { %2828 = vmatpush.bf16.msra.mxu0 %v6626_v11  ;;  %v2549_v11 = vadd.f32 %v9327_v9, %v573_v54  ;;  %v6542_v12 = vor.u32 %v8516_v35, %v6541_v63  ;;  %v2945_v18 = vadd.f32 %v2931_v57, %v2922_v59  ;;  %v2602_v29 = vpop.f32.mrf.mxu2  ;;  %v8846_v59 = vld [vmem:[#allocation11 + $0x734] sm:$0xf0]  ;;  %v2857_v35 = vperm.slane %v9310_v30, 1 }
 0x16f   :  { %2841 = vmatpush.bf16.msra.mxu1 %v6850_v16  ;;  %v6513_v16 = vld [vmem:[#allocation7 + $0x718] sm:$0xf]  ;;  %v2953_v50 = vmax.f32 %v2946_v22, 0.0  ;;  %v7850_v8 = vor.u32 %v8846_v59, %v7849_v58  ;;  %v8738_v22 = vld [vmem:[#allocation11 + $0x3d4] sm:$0xf0] }
 0x170   :  { %4999 = vmatpush.bf16.msra.mxu2 %v7034_v17  ;;  %v8509_v17 = vld [vmem:[#allocation7 + $0x730] sm:$0xf0]  ;;  %v2562_v9 = vadd.f32 %v9329_v10, %v2549_v11  ;;  %v2952_v46 = vmax.f32 %v2945_v18, 0.0  ;;  %v8750_v10 = vld [vmem:[#allocation11 + $0x434] sm:$0xf0] }
 0x171   :  { %5012 = vmatpush.bf16.msra.mxu3 %v7226_v21  ;;  %v8565_v21 = vld [vmem:[#allocation7 + $0x8f0] sm:$0xf0]  ;;  %v6514_v39 = vor.u32 %v8509_v17, %v6513_v16  ;;  %v9365_v42 = vpack.c.bf16 %v2953_v50, %v2953_v50  ;;  %v7466_v1 = vor.u32 %v8750_v10, %v7465_v13  ;;  %v8792_v11 = vld [vmem:[#allocation11 + $0x584] sm:$0xf0]  ;;  %v2858_v16 = vperm.slane %v9310_v30, 5 }
 0x172   :  { %2829 = vmatpush.bf16.msra.mxu0 %v6598_v31  ;;  %v7489_v31 = vld [vmem:[#allocation11 + $0x450] sm:$0xf]  ;;  %v2575_v57 = vadd.f32 %v9338_v6, %v2562_v9  ;;  %v9362_v63 = vpack.c.bf16 %v2952_v46, %v2952_v46  ;;  %v8744_v6 = vld [vmem:[#allocation11 + $0x404] sm:$0xf0]  ;;  %v8041_v18 = vld [vmem:[#allocation11 + $0x8a0] sm:$0xf]  ;;  %v7418_v46 = vor.u32 %v8738_v22, %v7417_v62 }
 0x173   :  { %2842 = vmatpush.bf16.msra.mxu1 %v6822_v36  ;;  %v7681_v36 = vld [vmem:[#allocation11 + $0x5d0] sm:$0xf]  ;;  %v7490_v53 = vor.u32 %v8756_v33, %v7489_v31  ;;  %v8840_v17 = vld [vmem:[#allocation11 + $0x704] sm:$0xf0]  ;;  %v2872_v29 = vperm.slane %v2858_v16, 1  ;;  %v2897_v9 = vperm.slane %v9310_v30, 6 }
 0x174   :  { %5000 = vmatpush.bf16.msra.mxu2 %v7010_v37  ;;  %v2615_v37 = vpop.f32.mrf.mxu3  ;;  %v7682_v54 = vor.u32 %v8804_v40, %v7681_v36  ;;  %v2588_v45 = vadd.f32 %v9340_v4, %v2575_v57  ;;  %v8834_v31 = vld [vmem:[#allocation11 + $0x6d4] sm:$0xf0]  ;;  %v8017_v33 = vld [vmem:[#allocation11 + $0x870] sm:$0xf]  ;;  %v8888_v36 = vld [vmem:[#allocation11 + $0x884] sm:$0xf0] }
 0x175   :  { %5013 = vmatpush.bf16.msra.mxu3 %v7202_v47  ;;  %v6738_v47 = vor.u32 %v8565_v21, %v6737_v20  ;;  %v2896_v20 = vperm.slane %v9310_v30, 2  ;;  %v7634_v21 = vor.u32 %v8792_v11, %v7633_v3  ;;  %v7393_v40 = vld [vmem:[#allocation11 + $0x390] sm:$0xf]  ;;  %v8018_v30 = vor.u32 %v8888_v36, %v8017_v33  ;;  %v8828_v57 = vld [vmem:[#allocation11 + $0x6a4] sm:$0xf0] }
 0x176   :  { %2830 = vmatpush.bf16.msra.mxu0 %v6570_v34  ;;  %v8798_v34 = vld [vmem:[#allocation11 + $0x5b4] sm:$0xf0]  ;;  %v2601_v26 = vadd.f32 %v9352_v52, %v2588_v45  ;;  %v7585_v50 = vld [vmem:[#allocation11 + $0x510] sm:$0xf]  ;;  %v8780_v52 = vld [vmem:[#allocation11 + $0x524] sm:$0xf0]  ;;  %v2879_v10 = vmul.f32 %v2872_v29, %v9335_v0 }
 0x177   :  { %2843 = vmatpush.bf16.msra.mxu1 %v6794_v60  ;;  %v8065_v60 = vld [vmem:[#allocation11 + $0x8d0] sm:$0xf]  ;;  %v7658_v7 = vor.u32 %v8798_v34, %v7657_v44  ;;  %v553_v44 = vperm.slane %v9377_v41, 0  ;;  %v7993_v34 = vld [vmem:[#allocation11 + $0x840] sm:$0xf] }
 0x178   :  { %5001 = vmatpush.bf16.msra.mxu2 %v6986_v61  ;;  %v8900_v61 = vld [vmem:[#allocation11 + $0x8e4] sm:$0xf0]  ;;  %v2614_v13 = vadd.f32 %v9355_v56, %v2601_v26  ;;  %v8882_v58 = vld [vmem:[#allocation11 + $0x854] sm:$0xf0]  ;;  %v7969_v16 = vld [vmem:[#allocation11 + $0x810] sm:$0xf] }
 0x179   :  { %5014 = vmatpush.bf16.msra.mxu3 %v7178_v2  ;;  %v7441_v2 = vld [vmem:[#allocation11 + $0x3f0] sm:$0xf]  ;;  %v8066_v5 = vor.u32 %v8900_v61, %v8065_v60  ;;  %v7994_v56 = vor.u32 %v8882_v58, %v7993_v34  ;;  %v8822_v11 = vld [vmem:[#allocation11 + $0x674] sm:$0xf0]  ;;  %v8720_v22 = vld [vmem:[#allocation11 + $0x344] sm:$0xf0] }
 0x17a   :  { %2831 = vmatpush.bf16.msra.mxu0 %v6542_v12  ;;  %v7825_v12 = vld [vmem:[#allocation11 + $0x6f0] sm:$0xf]  ;;  %v7442_v4 = vor.u32 %v8744_v6, %v7441_v2  ;;  %v8726_v2 = vld [vmem:[#allocation11 + $0x374] sm:$0xf0]  ;;  %v7561_v6 = vld [vmem:[#allocation11 + $0x4e0] sm:$0xf]  ;;  %v2886_v3 = vadd.f32 %v2879_v10, %v2614_v13 }
 0x17b   :  { %2844 = vmatpush.bf16.msra.mxu1 %v6766_v48  ;;  %v8894_v48 = vld [vmem:[#allocation11 + $0x8b4] sm:$0xf0]  ;;  %v7345_v62 = vld [vmem:[#allocation11 + $0x330] sm:$0xf]  ;;  %v8768_v29 = vld [vmem:[#allocation11 + $0x4c4] sm:$0xf0] }
 0x17c   :  { %5002 = vmatpush.bf16.msra.mxu2 %v6962_v19  ;;  %v2871_v19 = vperm.slane %v2857_v35, 1  ;;  %v7586_v35 = vor.u32 %v8780_v52, %v7585_v50  ;;  %v7537_v26 = vld [vmem:[#allocation11 + $0x4b0] sm:$0xf]  ;;  %v8816_v33 = vld [vmem:[#allocation11 + $0x644] sm:$0xf0] }
 0x17d   :  { %5015 = vmatpush.bf16.msra.mxu3 %v7154_v23  ;;  %v7609_v23 = vld [vmem:[#allocation11 + $0x540] sm:$0xf]  ;;  %v8762_v13 = vld [vmem:[#allocation11 + $0x494] sm:$0xf0]  ;;  %v7921_v34 = vld [vmem:[#allocation11 + $0x7b0] sm:$0xf] }
 0x17e   :  { %2832 = vmatpush.bf16.msra.mxu0 %v6514_v39  ;;  %v2878_v37 = vmul.f32 %v2871_v19, %v9335_v0  ;;  %v2910_v39 = vperm.slane %v2896_v20, 2  ;;  %v9379_v43 = vpop.f32.mrf.mxu0  ;;  %v7945_v36 = vld [vmem:[#allocation11 + $0x7e0] sm:$0xf]  ;;  %v8864_v58 = vld [vmem:[#allocation11 + $0x7c4] sm:$0xf0] }
 0x17f   :  { %2845 = vmatpush.bf16.msra.mxu1 %v6738_v47  ;;  %v7610_v47 = vor.u32 %v8786_v24, %v7609_v23  ;;  %v7705_v10 = vld [vmem:[#allocation11 + $0x600] sm:$0xf] }
 0x180   :  { %5003 = vmatpush.bf16.msra.mxu2 %v6938_v49  ;;  %v8732_v49 = vld [vmem:[#allocation11 + $0x3a4] sm:$0xf0]  ;;  %v2885_v59 = vadd.f32 %v2878_v37, %v9325_v15  ;;  %v2917_v60 = vmul.f32 %v2910_v39, %v9343_v14  ;;  %v567_v15 = vperm.slane %v553_v44, 0  ;;  %v8870_v37 = vld [vmem:[#allocation11 + $0x7f4] sm:$0xf0] }
 0x181   :  { %5016 = vmatpush.bf16.msra.mxu3 %v7130_v51  ;;  %2833 = vmatmul.bf16.vlgmr.msra.gmra.mxu0 %v9266_v32  ;;  %v8042_v32 = vor.u32 %v8894_v48, %v8041_v18  ;;  %v9381_v51 = vpop.f32.mrf.mxu1  ;;  %v7394_v61 = vor.u32 %v8732_v49, %v7393_v40  ;;  %v2933_v18 = vperm.slane %v9346_v27, 2  ;;  %v7346_v40 = vor.u32 %v8720_v22, %v7345_v62  ;;  %v7513_v49 = vld [vmem:[#allocation11 + $0x480] sm:$0xf]  ;;  %v8645_v22 = vld [vmem:[#allocation11 + $0xf4] sm:$0xf] }
 0x182   :  { %5022 = vmatpush.bf16.msrb.mxu0 %v7490_v53  ;;  %2846 = vmatmul.bf16.vlgmr.msra.gmra.mxu1 %v9269_v38  ;;  %v7826_v38 = vor.u32 %v8840_v17, %v7825_v12  ;;  %v7802_v53 = vor.u32 %v8834_v31, %v7801_v25  ;;  %v8876_v17 = vld [vmem:[#allocation11 + $0x824] sm:$0xf0]  ;;  %v2924_v20 = vadd.f32 %v2917_v60, %v2885_v59  ;;  %v7107_v59 = vld [vmem:[#allocation11 + $0x168] sm:$0xf0]  ;;  %v8705_v60 = vld [vmem:[#allocation11 + $0x2d4] sm:$0xf] }
 0x183   :  { %5035 = vmatpush.bf16.msrb.mxu1 %v7682_v54  ;;  %5004 = vmatmul.bf16.vlgmr.msra.gmra.mxu2 %v9362_v63  ;;  %v2911_v54 = vperm.slane %v2897_v9, 2  ;;  %v7729_v9 = vld [vmem:[#allocation11 + $0x630] sm:$0xf]  ;;  %v574_v31 = vmul.f32 %v567_v15, %v9293_v28  ;;  %v7946_v50 = vor.u32 %v8870_v37, %v7945_v36  ;;  %v8699_v15 = vld [vmem:[#allocation11 + $0x2a4] sm:$0xf] }
 0x184   :  { %5048 = vmatpush.bf16.msrb.mxu2 %v7874_v55  ;;  %5017 = vmatmul.bf16.vlgmr.msra.gmra.mxu3 %v9365_v42  ;;  %v7777_v55 = vld [vmem:[#allocation11 + $0x690] sm:$0xf]  ;;  %v2947_v39 = vadd.f32 %v2933_v18, %v2924_v20  ;;  %v7275_v18 = vld [vmem:[#allocation11 + $0x2b8] sm:$0xf0]  ;;  %v7491_v20 = vld [vmem:[#allocation11 + $0x468] sm:$0xf0] }
 0x185   :  { %5061 = vmatpush.bf16.msrb.mxu3 %v8066_v5  ;;  %v2918_v5 = vmul.f32 %v2911_v54, %v9343_v14  ;;  %v7778_v45 = vor.u32 %v8828_v57, %v7777_v55  ;;  %v8810_v54 = vld [vmem:[#allocation11 + $0x614] sm:$0xf0]  ;;  %v2627_v55 = vadd.f32 %v9379_v43, %v574_v31  ;;  %v8657_v57 = vld [vmem:[#allocation11 + $0x154] sm:$0xf]  ;;  %v7083_v43 = vld [vmem:[#allocation11 + $0x138] sm:$0xf0] }
 0x186   :  { %5023 = vmatpush.bf16.msrb.mxu0 %v7466_v1  ;;  %v7369_v1 = vld [vmem:[#allocation11 + $0x360] sm:$0xf]  ;;  %v9389_v12 = vpop.f32.mrf.mxu2  ;;  %v2628_v48 = vpop.f32.mrf.mxu0  ;;  %v7467_v31 = vld [vmem:[#allocation11 + $0x438] sm:$0xf0]  ;;  %v8639_v36 = vld [vmem:[#allocation11 + $0xc4] sm:$0xf] }
 0x187   :  { %5036 = vmatpush.bf16.msrb.mxu1 %v7658_v7  ;;  %v8774_v7 = vld [vmem:[#allocation11 + $0x4f4] sm:$0xf0]  ;;  %v9392_v19 = vpop.f32.mrf.mxu3  ;;  %v8753_v48 = vld [vmem:[#allocation11 + $0x454] sm:$0xf] }
 0x188   :  { %5049 = vmatpush.bf16.msrb.mxu2 %v7850_v8  ;;  %v7753_v8 = vld [vmem:[#allocation11 + $0x660] sm:$0xf]  ;;  %v7562_v24 = vor.u32 %v8774_v7, %v7561_v6  ;;  %v2954_v6 = vmax.f32 %v2947_v39, 0.0  ;;  %v2640_v7 = vadd.f32 %v9381_v51, %v2627_v55 }
 0x189   :  { %5062 = vmatpush.bf16.msrb.mxu3 %v8042_v32  ;;  %v2641_v23 = vpop.f32.mrf.mxu1  ;;  %v7970_v32 = vor.u32 %v8876_v17, %v7969_v16  ;;  %v7754_v25 = vor.u32 %v8822_v11, %v7753_v8  ;;  %v7110_v8 = vor.u32 %v8657_v57, %v7107_v59  ;;  %v7897_v16 = vld [vmem:[#allocation11 + $0x780] sm:$0xf]  ;;  %v8858_v17 = vld [vmem:[#allocation11 + $0x794] sm:$0xf0]  ;;  %v8681_v59 = vld [vmem:[#allocation11 + $0x214] sm:$0xf] }
 0x18a   :  { %5024 = vmatpush.bf16.msrb.mxu0 %v7442_v4  ;;  %v2934_v4 = vperm.slane %v9346_v27, 3  ;;  %v7494_v23 = vor.u32 %v8753_v48, %v7491_v20 }
 0x18b   :  { %5037 = vmatpush.bf16.msrb.mxu1 %v7634_v21  ;;  %v7370_v21 = vor.u32 %v8726_v2, %v7369_v1  ;;  %v7922_v2 = vor.u32 %v8864_v58, %v7921_v34  ;;  %v8633_v58 = vld [vmem:[#allocation11 + $0x94] sm:$0xf] }
 0x18c   :  { %5050 = vmatpush.bf16.msrb.mxu2 %v7826_v38  ;;  %v2925_v38 = vadd.f32 %v2918_v5, %v2886_v3  ;;  %v7514_v3 = vor.u32 %v8762_v13, %v7513_v49  ;;  %v7706_v5 = vor.u32 %v8810_v54, %v7705_v10 }
 0x18d   :  { %5063 = vmatpush.bf16.msrb.mxu3 %v8018_v30  ;;  %v7538_v30 = vor.u32 %v8768_v29, %v7537_v26  ;;  %v2859_v26 = vperm.slane %v9377_v41, 1  ;;  %v7251_v29 = vld [vmem:[#allocation11 + $0x288] sm:$0xf0] }
 0x18e   :  { %5025 = vmatpush.bf16.msrb.mxu0 %v7418_v46  ;;  %v7321_v46 = vld [vmem:[#allocation11 + $0x300] sm:$0xf]  ;;  %v2948_v52 = vadd.f32 %v2934_v4, %v2925_v38  ;;  %v2654_v44 = vpop.f32.mrf.mxu2  ;;  %v7898_v4 = vor.u32 %v8858_v17, %v7897_v16  ;;  %v2653_v38 = vadd.f32 %v9389_v12, %v2640_v7  ;;  %v6987_v7 = vld [vmem:[#allocation11 + $0x78] sm:$0xf0]  ;;  %v7395_v16 = vld [vmem:[#allocation11 + $0x3a8] sm:$0xf0] }
 0x18f   :  { %5038 = vmatpush.bf16.msrb.mxu1 %v7610_v47  ;;  %v8714_v47 = vld [vmem:[#allocation11 + $0x314] sm:$0xf0]  ;;  %v2873_v49 = vperm.slane %v2859_v26, 1  ;;  %v7155_v26 = vld [vmem:[#allocation11 + $0x1c8] sm:$0xf0] }
 0x190   :  { %5051 = vmatpush.bf16.msrb.mxu2 %v7802_v53  ;;  %v7730_v53 = vor.u32 %v8816_v33, %v7729_v9  ;;  %v7322_v1 = vor.u32 %v8714_v47, %v7321_v46  ;;  %v8747_v9 = vld [vmem:[#allocation11 + $0x424] sm:$0xf]  ;;  %v2898_v33 = vperm.slane %v9377_v41, 2  ;;  %v7035_v46 = vld [vmem:[#allocation11 + $0xd8] sm:$0xf0] }
 0x191   :  { %5064 = vmatpush.bf16.msrb.mxu3 %v7994_v56  ;;  %v2955_v56 = vmax.f32 %v2948_v52, 0.0  ;;  %v7470_v37 = vor.u32 %v8747_v9, %v7467_v31  ;;  %v8687_v47 = vld [vmem:[#allocation11 + $0x244] sm:$0xf]  ;;  %v8741_v52 = vld [vmem:[#allocation11 + $0x3f4] sm:$0xf]  ;;  %v7038_v10 = vor.u32 %v8639_v36, %v7035_v46  ;;  %v2880_v34 = vmul.f32 %v2873_v49, %v9335_v0 }
 0x192   :  { %5026 = vmatpush.bf16.msrb.mxu0 %v7394_v61  ;;  %v7299_v61 = vld [vmem:[#allocation11 + $0x2e8] sm:$0xf0]  ;;  %v7371_v9 = vld [vmem:[#allocation11 + $0x378] sm:$0xf0]  ;;  %v554_v49 = vperm.slane %v9377_v41, 4 }
 0x193   :  { %5039 = vmatpush.bf16.msrb.mxu1 %v7586_v35  ;;  %v2667_v35 = vpop.f32.mrf.mxu3  ;;  %v7302_v11 = vor.u32 %v8705_v60, %v7299_v61  ;;  %v9400_v62 = vpack.c.bf16 %v2955_v56, %v2955_v56  ;;  %v7203_v60 = vld [vmem:[#allocation11 + $0x228] sm:$0xf0]  ;;  %v8735_v61 = vld [vmem:[#allocation11 + $0x3c4] sm:$0xf]  ;;  %v6939_v36 = vld [vmem:[#allocation11 + $0x18] sm:$0xf0] }
 0x194   :  { %5052 = vmatpush.bf16.msrb.mxu2 %v7778_v45  ;;  %v8651_v45 = vld [vmem:[#allocation11 + $0x124] sm:$0xf]  ;;  %v7419_v35 = vld [vmem:[#allocation11 + $0x3d8] sm:$0xf0] }
 0x195   :  { %5065 = vmatpush.bf16.msrb.mxu3 %v7970_v32  ;;  %v7086_v51 = vor.u32 %v8651_v45, %v7083_v43  ;;  %v7278_v32 = vor.u32 %v8699_v15, %v7275_v18  ;;  %v7422_v56 = vor.u32 %v8735_v61, %v7419_v35  ;;  %v7206_v45 = vor.u32 %v8681_v59, %v7203_v60  ;;  %v8627_v43 = vld [vmem:[#allocation11 + $0x64] sm:$0xf]  ;;  %v8729_v15 = vld [vmem:[#allocation11 + $0x394] sm:$0xf]  ;;  %v8233_v35 = vld [vmem:[#allocation11 + $0xa20] sm:$0xf] }
 0x196   :  { %5027 = vmatpush.bf16.msrb.mxu0 %v7370_v21  ;;  %v9398_v21 = vpack.c.bf16 %v2954_v6, %v2954_v6  ;;  %v2935_v6 = vperm.slane %v9346_v27, 4  ;;  %v568_v60 = vperm.slane %v554_v49, 0  ;;  %v8843_v61 = vld [vmem:[#allocation11 + $0x724] sm:$0xf] }
 0x197   :  { %5040 = vmatpush.bf16.msrb.mxu1 %v7562_v24  ;;  %v7059_v24 = vld [vmem:[#allocation11 + $0x108] sm:$0xf0] }
 0x198   :  { %5053 = vmatpush.bf16.msrb.mxu2 %v7754_v25  ;;  %v8693_v25 = vld [vmem:[#allocation11 + $0x274] sm:$0xf]  ;;  %v7062_v12 = vor.u32 %v8645_v22, %v7059_v24 }
 0x199   :  { %5066 = vmatpush.bf16.msrb.mxu3 %v7946_v50  ;;  %v7254_v39 = vor.u32 %v8693_v25, %v7251_v29  ;;  %v7227_v50 = vld [vmem:[#allocation11 + $0x258] sm:$0xf0]  ;;  %v8669_v24 = vld [vmem:[#allocation11 + $0x1b4] sm:$0xf]  ;;  %v8723_v29 = vld [vmem:[#allocation11 + $0x364] sm:$0xf] }
 0x19a   :  { %5028 = vmatpush.bf16.msrb.mxu0 %v7346_v40  ;;  %v2666_v40 = vadd.f32 %v9392_v19, %v2653_v38  ;;  %v7230_v57 = vor.u32 %v8687_v47, %v7227_v50  ;;  %v7011_v19 = vld [vmem:[#allocation11 + $0xa8] sm:$0xf0]  ;;  %v7158_v47 = vor.u32 %v8669_v24, %v7155_v26  ;;  %v8257_v50 = vld [vmem:[#allocation11 + $0xa50] sm:$0xf]  ;;  %v8930_v24 = vld [vmem:[#allocation11 + $0x9d4] sm:$0xf0] }
 0x19b   :  { %5041 = vmatpush.bf16.msrb.mxu1 %v7538_v30  ;;  %v7443_v30 = vld [vmem:[#allocation11 + $0x408] sm:$0xf0] }
 0x19c   :  { %5054 = vmatpush.bf16.msrb.mxu2 %v7730_v53  ;;  %v2912_v53 = vperm.slane %v2898_v33, 2  ;;  %v7446_v54 = vor.u32 %v8741_v52, %v7443_v30  ;;  %v6963_v38 = vld [vmem:[#allocation11 + $0x48] sm:$0xf0]  ;;  %v8615_v33 = vld [vmem:[#allocation11 + $0x4] sm:$0xf] }
 0x19d   :  { %5067 = vmatpush.bf16.msrb.mxu3 %v7922_v2  ;;  %v8948_v52 = vld [vmem:[#allocation11 + $0xa64] sm:$0xf0]  ;;  %v8849_v30 = vld [vmem:[#allocation11 + $0x754] sm:$0xf] }
 0x19e   :  { %5029 = vmatpush.bf16.msrb.mxu0 %v7322_v1  ;;  %v2678_v13 = vpop.f32.mrf.mxu0  ;;  %v2919_v2 = vmul.f32 %v2912_v53, %v9343_v14  ;;  %v8258_v53 = vor.u32 %v8948_v52, %v8257_v50 }
 0x19f   :  { %5042 = vmatpush.bf16.msrb.mxu1 %v7514_v3  ;;  %v2679_v55 = vadd.f32 %v2678_v13, %v2666_v40  ;;  %v2691_v44 = vpop.f32.mrf.mxu1  ;;  %v8717_v13 = vld [vmem:[#allocation11 + $0x334] sm:$0xf] }
 0x1a0   :  { %5055 = vmatpush.bf16.msrb.mxu2 %v7706_v5  ;;  %v7014_v5 = vor.u32 %v8633_v58, %v7011_v19  ;;  %v6942_v19 = vor.u32 %v8615_v33, %v6939_v36  ;;  %v8879_v33 = vld [vmem:[#allocation11 + $0x844] sm:$0xf]  ;;  %v7995_v36 = vld [vmem:[#allocation11 + $0x858] sm:$0xf0] }
 0x1a1   :  { %5030 = vmatmul.bf16.vlgmr.msrb.gmra.mxu0 %v9398_v21  ;;  %5068 = vmatpush.bf16.msrb.mxu3 %v7898_v4  ;;  %v2692_v1 = vadd.f32 %v2691_v44, %v2679_v55  ;;  %v7398_v4 = vor.u32 %v8729_v15, %v7395_v16  ;;  %v8897_v55 = vld [vmem:[#allocation11 + $0x8d4] sm:$0xf]  ;;  %v8936_v15 = vld [vmem:[#allocation11 + $0xa04] sm:$0xf0]  ;;  %v575_v16 = vmul.f32 %v568_v60, %v9293_v28  ;;  %v8867_v60 = vld [vmem:[#allocation11 + $0x7e4] sm:$0xf] }
 0x1a2   :  { %5043 = vmatmul.bf16.vlgmr.msrb.gmra.mxu1 %v9400_v62  ;;  %5074 = vmatpush.bf16.msra.mxu0 %v8258_v53  ;;  %v7998_v50 = vor.u32 %v8879_v33, %v7995_v36  ;;  %v8873_v53 = vld [vmem:[#allocation11 + $0x814] sm:$0xf]  ;;  %v7683_v36 = vld [vmem:[#allocation11 + $0x5e8] sm:$0xf0] }
 0x1a3   :  { %5087 = vmatpush.bf16.msra.mxu1 %v7110_v8  ;;  %v2887_v3 = vadd.f32 %v2880_v34, %v2692_v1  ;;  %v8675_v8 = vld [vmem:[#allocation11 + $0x1e4] sm:$0xf]  ;;  %v8801_v33 = vld [vmem:[#allocation11 + $0x5d4] sm:$0xf] }
 0x1a4   :  { %5100 = vmatpush.bf16.msra.mxu2 %v7302_v11  ;;  %v7179_v11 = vld [vmem:[#allocation11 + $0x1f8] sm:$0xf0] }
 0x1a5   :  { %5113 = vmatpush.bf16.msra.mxu3 %v7494_v23  ;;  %v2926_v17 = vadd.f32 %v2919_v2, %v2887_v3  ;;  %v6990_v23 = vor.u32 %v8627_v43, %v6987_v7  ;;  %v7323_v3 = vld [vmem:[#allocation11 + $0x318] sm:$0xf0] }
 0x1a6   :  { %v9411_v18 = vpop.f32.mrf.mxu2  ;;  %v2680_v48 = vpop.f32.mrf.mxu0  ;;  %v8043_v43 = vld [vmem:[#allocation11 + $0x8b8] sm:$0xf0] }
 0x1a7   :  { %5088 = vmatpush.bf16.msra.mxu1 %v7086_v51  ;;  %v9413_v20 = vpop.f32.mrf.mxu3  ;;  %v2949_v22 = vadd.f32 %v2935_v6, %v2926_v17  ;;  %v7182_v51 = vor.u32 %v8675_v8, %v7179_v11  ;;  %v2693_v25 = vpop.f32.mrf.mxu1  ;;  %v8942_v6 = vld [vmem:[#allocation11 + $0xa34] sm:$0xf0]  ;;  %v8209_v11 = vld [vmem:[#allocation11 + $0x9f0] sm:$0xf] }
 0x1a8   :  { %5101 = vmatpush.bf16.msra.mxu2 %v7278_v32  ;;  %v8621_v32 = vld [vmem:[#allocation11 + $0x34] sm:$0xf]  ;;  %v8234_v7 = vor.u32 %v8942_v6, %v8233_v35  ;;  %v2705_v25 = vadd.f32 %v9411_v18, %v575_v16 }
 0x1a9   :  { %5114 = vmatpush.bf16.msra.mxu3 %v7470_v37  ;;  %v2956_v31 = vmax.f32 %v2949_v22, 0.0  ;;  %v8663_v37 = vld [vmem:[#allocation11 + $0x184] sm:$0xf]  ;;  %v6966_v46 = vor.u32 %v8621_v32, %v6963_v38  ;;  %v7827_v22 = vld [vmem:[#allocation11 + $0x708] sm:$0xf0]  ;;  %v8210_v32 = vor.u32 %v8936_v15, %v8209_v11 }
 0x1aa   :  { %5075 = vmatpush.bf16.msra.mxu0 %v8234_v7  ;;  %v8185_v38 = vld [vmem:[#allocation11 + $0x9c0] sm:$0xf]  ;;  %v8825_v18 = vld [vmem:[#allocation11 + $0x694] sm:$0xf]  ;;  %v7731_v15 = vld [vmem:[#allocation11 + $0x648] sm:$0xf0] }
 0x1ab   :  { %5089 = vmatpush.bf16.msra.mxu1 %v7062_v12  ;;  %v7131_v12 = vld [vmem:[#allocation11 + $0x198] sm:$0xf0]  ;;  %v9415_v40 = vpack.c.bf16 %v2956_v31, %v2956_v31  ;;  %v8861_v16 = vld [vmem:[#allocation11 + $0x7b4] sm:$0xf] }
 0x1ac   :  { %5102 = vmatpush.bf16.msra.mxu2 %v7254_v39  ;;  %v7374_v39 = vor.u32 %v8723_v29, %v7371_v9  ;;  %v7134_v59 = vor.u32 %v8663_v37, %v7131_v12  ;;  %v8831_v9 = vld [vmem:[#allocation11 + $0x6c4] sm:$0xf]  ;;  %v7803_v31 = vld [vmem:[#allocation11 + $0x6d8] sm:$0xf0]  ;;  %v8186_v37 = vor.u32 %v8930_v24, %v8185_v38  ;;  %v8161_v12 = vld [vmem:[#allocation11 + $0x990] sm:$0xf] }
 0x1ad   :  { %5115 = vmatpush.bf16.msra.mxu3 %v7446_v54  ;;  %5056 = vmatmul.bf16.vlgmr.msrb.gmra.mxu2 %v9415_v40  ;;  %v7875_v54 = vld [vmem:[#allocation11 + $0x768] sm:$0xf0]  ;;  %v7806_v49 = vor.u32 %v8831_v9, %v7803_v31  ;;  %v8807_v38 = vld [vmem:[#allocation11 + $0x604] sm:$0xf]  ;;  %v8089_v24 = vld [vmem:[#allocation11 + $0x900] sm:$0xf] }
 0x1ae   :  { %v2706_v44 = vpop.f32.mrf.mxu2  ;;  %v7878_v1 = vor.u32 %v8849_v30, %v7875_v54  ;;  %5076 = vmatpush.bf16.msra.mxu0 %v8210_v32  ;;  %v7779_v30 = vld [vmem:[#allocation11 + $0x6a8] sm:$0xf0]  ;;  %v7707_v31 = vld [vmem:[#allocation11 + $0x618] sm:$0xf0] }
 0x1af   :  { %5090 = vmatpush.bf16.msra.mxu1 %v7038_v10  ;;  %v7347_v10 = vld [vmem:[#allocation11 + $0x348] sm:$0xf0]  ;;  %v2719_v34 = vpop.f32.mrf.mxu3  ;;  %v8918_v44 = vld [vmem:[#allocation11 + $0x974] sm:$0xf0] }
 0x1b0   :  { %5103 = vmatpush.bf16.msra.mxu2 %v7230_v57  ;;  %v8067_v57 = vld [vmem:[#allocation11 + $0x8e8] sm:$0xf0]  ;;  %v7350_v58 = vor.u32 %v8717_v13, %v7347_v10  ;;  %v7782_v34 = vor.u32 %v8825_v18, %v7779_v30  ;;  %v7686_v18 = vor.u32 %v8801_v33, %v7683_v36 }
 0x1b1   :  { %5116 = vmatpush.bf16.msra.mxu3 %v7422_v56  ;;  %v8070_v2 = vor.u32 %v8897_v55, %v8067_v57  ;;  %v8711_v56 = vld [vmem:[#allocation11 + $0x304] sm:$0xf]  ;;  %v7971_v13 = vld [vmem:[#allocation11 + $0x828] sm:$0xf0]  ;;  %v2860_v55 = vperm.slane %v9377_v41, 5  ;;  %v2899_v57 = vperm.slane %v9377_v41, 6 }
 0x1b2   :  { %v7326_v8 = vor.u32 %v8711_v56, %v7323_v3  ;;  %5077 = vmatpush.bf16.msra.mxu0 %v8186_v37  ;;  %v8113_v3 = vld [vmem:[#allocation11 + $0x930] sm:$0xf]  ;;  %v8855_v37 = vld [vmem:[#allocation11 + $0x784] sm:$0xf] }
 0x1b3   :  { %5091 = vmatpush.bf16.msra.mxu1 %v7014_v5  ;;  %v7851_v5 = vld [vmem:[#allocation11 + $0x738] sm:$0xf0]  ;;  %v2913_v56 = vperm.slane %v2899_v57, 2  ;;  %v8795_v57 = vld [vmem:[#allocation11 + $0x5a4] sm:$0xf] }
 0x1b4   :  { %5104 = vmatpush.bf16.msra.mxu2 %v7206_v45  ;;  %v8891_v45 = vld [vmem:[#allocation11 + $0x8a4] sm:$0xf]  ;;  %v7854_v17 = vor.u32 %v8843_v61, %v7851_v5  ;;  %v7947_v61 = vld [vmem:[#allocation11 + $0x7f8] sm:$0xf0]  ;;  %v8912_v5 = vld [vmem:[#allocation11 + $0x944] sm:$0xf0] }
 0x1b5   :  { %5117 = vmatpush.bf16.msra.mxu3 %v7398_v4  ;;  %v8046_v48 = vor.u32 %v8891_v45, %v8043_v43  ;;  %v8837_v4 = vld [vmem:[#allocation11 + $0x6f4] sm:$0xf]  ;;  %v7950_v7 = vor.u32 %v8867_v60, %v7947_v61  ;;  %v2920_v32 = vmul.f32 %v2913_v56, %v9343_v14  ;;  %v7473_v60 = vld [vmem:[#allocation11 + $0x428] sm:$0xf]  ;;  %v8751_v61 = vld [vmem:[#allocation11 + $0x43c] sm:$0xf0] }
 0x1b6   :  { %v7830_v26 = vor.u32 %v8837_v4, %v7827_v22  ;;  %v8114_v4 = vor.u32 %v8912_v5, %v8113_v3  ;;  %v8235_v56 = vld [vmem:[#allocation11 + $0xa38] sm:$0xf0]  ;;  %v7474_v5 = vor.u32 %v8751_v61, %v7473_v60  ;;  %v8915_v61 = vld [vmem:[#allocation11 + $0x964] sm:$0xf] }
 0x1b7   :  { %5092 = vmatpush.bf16.msra.mxu1 %v6990_v23  ;;  %v8885_v23 = vld [vmem:[#allocation11 + $0x874] sm:$0xf] }
 0x1b8   :  { %5105 = vmatpush.bf16.msra.mxu2 %v7182_v51  ;;  %v8019_v51 = vld [vmem:[#allocation11 + $0x888] sm:$0xf0] }
 0x1b9   :  { %5118 = vmatpush.bf16.msra.mxu3 %v7374_v39  ;;  %v8022_v29 = vor.u32 %v8885_v23, %v8019_v51  ;;  %v8924_v39 = vld [vmem:[#allocation11 + $0x9a4] sm:$0xf0]  ;;  %v2936_v51 = vperm.slane %v9346_v27, 5  ;;  %v8709_v27 = vld [vmem:[#allocation11 + $0x2ec] sm:$0xf0] }
 0x1ba   :  { %v8162_v10 = vor.u32 %v8924_v39, %v8161_v12  ;;  %v7899_v12 = vld [vmem:[#allocation11 + $0x798] sm:$0xf0]  ;;  %v7305_v39 = vld [vmem:[#allocation11 + $0x2d8] sm:$0xf] }
 0x1bb   :  { %5093 = vmatpush.bf16.msra.mxu1 %v6966_v46  ;;  %v2718_v46 = vadd.f32 %v9413_v20, %v2705_v25  ;;  %v8137_v20 = vld [vmem:[#allocation11 + $0x960] sm:$0xf]  ;;  %v8906_v25 = vld [vmem:[#allocation11 + $0x914] sm:$0xf0] }
 0x1bc   :  { %5106 = vmatpush.bf16.msra.mxu2 %v7158_v47  ;;  %5078 = vmatpush.bf16.msra.mxu0 %v8162_v10  ;;  %v8138_v35 = vor.u32 %v8918_v44, %v8137_v20  ;;  %v8945_v10 = vld [vmem:[#allocation11 + $0xa54] sm:$0xf]  ;;  %v7306_v20 = vor.u32 %v8709_v27, %v7305_v39  ;;  %v7587_v39 = vld [vmem:[#allocation11 + $0x528] sm:$0xf0]  ;;  %v7401_v27 = vld [vmem:[#allocation11 + $0x398] sm:$0xf] }
 0x1bd   :  { %5119 = vmatpush.bf16.msra.mxu3 %v7350_v58  ;;  %v7974_v58 = vor.u32 %v8873_v53, %v7971_v13  ;;  %v7710_v53 = vor.u32 %v8807_v38, %v7707_v31  ;;  %v7902_v13 = vor.u32 %v8855_v37, %v7899_v12  ;;  %v8691_v38 = vld [vmem:[#allocation11 + $0x25c] sm:$0xf0]  ;;  %v8187_v31 = vld [vmem:[#allocation11 + $0x9d8] sm:$0xf0]  ;;  %v7209_v37 = vld [vmem:[#allocation11 + $0x218] sm:$0xf] }
 0x1be   :  { %v2730_v47 = vpop.f32.mrf.mxu0  ;;  %v8777_v12 = vld [vmem:[#allocation11 + $0x514] sm:$0xf] }
 0x1bf   :  { %5094 = vmatpush.bf16.msra.mxu1 %v6942_v19  ;;  %v2743_v52 = vpop.f32.mrf.mxu1  ;;  %v2731_v54 = vadd.f32 %v2730_v47, %v2718_v46  ;;  %v8819_v19 = vld [vmem:[#allocation11 + $0x664] sm:$0xf]  ;;  %v8090_v46 = vor.u32 %v8906_v25, %v8089_v24  ;;  %v7425_v24 = vld [vmem:[#allocation11 + $0x3c8] sm:$0xf]  ;;  %v8739_v25 = vld [vmem:[#allocation11 + $0x3dc] sm:$0xf0] }
 0x1c0   :  { %5107 = vmatpush.bf16.msra.mxu2 %v7134_v59  ;;  %v7755_v59 = vld [vmem:[#allocation11 + $0x678] sm:$0xf0]  ;;  %5079 = vmatpush.bf16.msra.mxu0 %v8138_v35  ;;  %v7426_v36 = vor.u32 %v8739_v25, %v7425_v24  ;;  %v8759_v24 = vld [vmem:[#allocation11 + $0x484] sm:$0xf] }
 0x1c1   :  { %5120 = vmatpush.bf16.msra.mxu3 %v7326_v8  ;;  %v7758_v43 = vor.u32 %v8819_v19, %v7755_v59  ;;  %v8813_v8 = vld [vmem:[#allocation11 + $0x634] sm:$0xf]  ;;  %v7659_v19 = vld [vmem:[#allocation11 + $0x5b8] sm:$0xf0] }
 0x1c2   :  { %5095 = vmatmul.bf16.vlgmr.msra.gmra.mxu1 %v9362_v63  ;;  %v7662_v35 = vor.u32 %v8795_v57, %v7659_v19  ;;  %v8771_v57 = vld [vmem:[#allocation11 + $0x4e4] sm:$0xf]  ;;  %v7515_v25 = vld [vmem:[#allocation11 + $0x498] sm:$0xf0] }
 0x1c3   :  { %5139 = vmatpush.bf16.msrb.mxu1 %v7878_v1  ;;  %5108 = vmatmul.bf16.vlgmr.msra.gmra.mxu2 %v9365_v42  ;;  %v2744_v1 = vadd.f32 %v2743_v52, %v2731_v54  ;;  %v8259_v54 = vld [vmem:[#allocation11 + $0xa68] sm:$0xf0] }
 0x1c4   :  { %5152 = vmatpush.bf16.msrb.mxu2 %v8070_v2  ;;  %v2874_v2 = vperm.slane %v2860_v55, 1  ;;  %5080 = vmatpush.bf16.msra.mxu0 %v8114_v4 }
 0x1c6   :  { %v2756_v6 = vpop.f32.mrf.mxu2  ;;  %v2732_v11 = vpop.f32.mrf.mxu0  ;;  %v2881_v23 = vmul.f32 %v2874_v2, %v9335_v0  ;;  %v8262_v2 = vor.u32 %v8945_v10, %v8259_v54 }
 0x1c7   :  { %5140 = vmatpush.bf16.msrb.mxu1 %v7854_v17  ;;  %v2757_v41 = vadd.f32 %v2756_v6, %v2744_v1  ;;  %v2769_v45 = vpop.f32.mrf.mxu3  ;;  %v7923_v17 = vld [vmem:[#allocation11 + $0x7c8] sm:$0xf0]  ;;  %v8939_v6 = vld [vmem:[#allocation11 + $0xa24] sm:$0xf]  ;;  %v8745_v11 = vld [vmem:[#allocation11 + $0x40c] sm:$0xf0] }
 0x1c8   :  { %5153 = vmatpush.bf16.msrb.mxu2 %v8046_v48  ;;  %v2745_v48 = vpop.f32.mrf.mxu1  ;;  %v7926_v9 = vor.u32 %v8861_v16, %v7923_v17  ;;  %5081 = vmatpush.bf16.msra.mxu0 %v8090_v46  ;;  %v8238_v16 = vor.u32 %v8939_v6, %v8235_v56  ;;  %v8933_v17 = vld [vmem:[#allocation11 + $0x9f4] sm:$0xf] }
 0x1c9   :  { %v2770_v22 = vadd.f32 %v2769_v45, %v2757_v41  ;;  %v7257_v41 = vld [vmem:[#allocation11 + $0x278] sm:$0xf]  ;;  %v8789_v45 = vld [vmem:[#allocation11 + $0x574] sm:$0xf]  ;;  %v8211_v48 = vld [vmem:[#allocation11 + $0xa08] sm:$0xf0] }
 0x1cb   :  { %5141 = vmatpush.bf16.msrb.mxu1 %v7830_v26  ;;  %v2888_v26 = vadd.f32 %v2881_v23, %v2770_v22  ;;  %v7233_v23 = vld [vmem:[#allocation11 + $0x248] sm:$0xf] }
 0x1cc   :  { %5154 = vmatpush.bf16.msrb.mxu2 %v8022_v29  ;;  %v7734_v29 = vor.u32 %v8813_v8, %v7731_v15  ;;  %5126 = vmatpush.bf16.msrb.mxu0 %v7686_v18  ;;  %v7449_v8 = vld [vmem:[#allocation11 + $0x3f8] sm:$0xf]  ;;  %v7234_v33 = vor.u32 %v8691_v38, %v7233_v23  ;;  %v7137_v23 = vld [vmem:[#allocation11 + $0x188] sm:$0xf]  ;;  %v8667_v38 = vld [vmem:[#allocation11 + $0x19c] sm:$0xf0] }
 0x1cd   :  { %v2927_v47 = vadd.f32 %v2920_v32, %v2888_v26  ;;  %v7450_v22 = vor.u32 %v8745_v11, %v7449_v8  ;;  %v7611_v32 = vld [vmem:[#allocation11 + $0x558] sm:$0xf0]  ;;  %v7353_v8 = vld [vmem:[#allocation11 + $0x338] sm:$0xf]  ;;  %v8721_v11 = vld [vmem:[#allocation11 + $0x34c] sm:$0xf0] }
 0x1ce   :  { %v2758_v52 = vpop.f32.mrf.mxu2 }
 0x1cf   :  { %5142 = vmatpush.bf16.msrb.mxu1 %v7806_v49  ;;  %v7497_v49 = vld [vmem:[#allocation11 + $0x458] sm:$0xf]  ;;  %v2950_v30 = vadd.f32 %v2936_v51, %v2927_v47  ;;  %v2771_v55 = vpop.f32.mrf.mxu3  ;;  %v8783_v51 = vld [vmem:[#allocation11 + $0x544] sm:$0xf]  ;;  %v8685_v47 = vld [vmem:[#allocation11 + $0x22c] sm:$0xf0] }
 0x1d0   :  { %5155 = vmatpush.bf16.msrb.mxu2 %v7998_v50  ;;  %v8757_v50 = vld [vmem:[#allocation11 + $0x46c] sm:$0xf0]  ;;  %5127 = vmatpush.bf16.msrb.mxu0 %v7662_v35  ;;  %v7614_v26 = vor.u32 %v8783_v51, %v7611_v32  ;;  %v9438_v52 = vld [vmem:[#allocation8 + $0x18] sm:$0x7]  ;;  %v7210_v10 = vor.u32 %v8685_v47, %v7209_v37  ;;  %v7185_v55 = vld [vmem:[#allocation11 + $0x1e8] sm:$0xf]  ;;  %v7354_v32 = vor.u32 %v8721_v11, %v7353_v8 }
 0x1d1   :  { %v7498_v44 = vor.u32 %v8757_v50, %v7497_v49  ;;  %v2957_v59 = vmax.f32 %v2950_v30, 0.0  ;;  %v8733_v49 = vld [vmem:[#allocation11 + $0x3ac] sm:$0xf0]  ;;  %v7590_v50 = vor.u32 %v8777_v12, %v7587_v39  ;;  %v8139_v35 = vld [vmem:[#allocation11 + $0x978] sm:$0xf0]  ;;  %v7138_v39 = vor.u32 %v8667_v38, %v7137_v23 }
 0x1d2   :  { %v7402_v54 = vor.u32 %v8733_v49, %v7401_v27  ;;  %v8949_v37 = vld [vmem:[#allocation11 + $0xa6c] sm:$0xf0]  ;;  %v8903_v27 = vld [vmem:[#allocation11 + $0x904] sm:$0xf]  ;;  %v8091_v49 = vld [vmem:[#allocation11 + $0x918] sm:$0xf0] }
 0x1d3   :  { %5143 = vmatpush.bf16.msrb.mxu1 %v7782_v34  ;;  %v7281_v34 = vld [vmem:[#allocation11 + $0x2a8] sm:$0xf]  ;;  %v9429_v1 = vpack.c.bf16 %v2957_v59, %v2957_v59  ;;  %v555_v59 = vperm.slane %v9438_v52, 0  ;;  %v7641_v11 = vld [vmem:[#allocation11 + $0x578] sm:$0xf]  ;;  %v2900_v23 = vperm.slane %v9438_v52, 2 }
 0x1d4   :  { %5156 = vmatpush.bf16.msrb.mxu2 %v7974_v58  ;;  %v8703_v58 = vld [vmem:[#allocation11 + $0x2bc] sm:$0xf0] }
 0x1d5   :  { %v7282_v3 = vor.u32 %v8703_v58, %v7281_v34  ;;  %5069 = vmatmul.bf16.vlgmr.msrb.gmra.mxu3 %v9429_v1  ;;  %v7377_v34 = vld [vmem:[#allocation11 + $0x368] sm:$0xf]  ;;  %v8727_v58 = vld [vmem:[#allocation11 + $0x37c] sm:$0xf0] }
 0x1d6   :  { %5165 = vmatpush.bf16.msrb.mxu3 %v8262_v2  ;;  %v7378_v56 = vor.u32 %v8727_v58, %v7377_v34  ;;  %v8943_v34 = vld [vmem:[#allocation11 + $0xa3c] sm:$0xf0]  ;;  %v8094_v58 = vor.u32 %v8903_v27, %v8091_v49  ;;  %v7593_v49 = vld [vmem:[#allocation11 + $0x518] sm:$0xf] }
 0x1d7   :  { %5144 = vmatpush.bf16.msrb.mxu1 %v7758_v43  ;;  %v7635_v43 = vld [vmem:[#allocation11 + $0x588] sm:$0xf0] }
 0x1d8   :  { %5157 = vmatpush.bf16.msrb.mxu2 %v7950_v7  ;;  %v8697_v7 = vld [vmem:[#allocation11 + $0x28c] sm:$0xf0]  ;;  %v7638_v15 = vor.u32 %v8789_v45, %v7635_v43 }
 0x1d9   :  { %v7258_v4 = vor.u32 %v8697_v7, %v7257_v41  ;;  %v7539_v41 = vld [vmem:[#allocation11 + $0x4c8] sm:$0xf0]  ;;  %v8673_v7 = vld [vmem:[#allocation11 + $0x1cc] sm:$0xf0] }
 0x1da   :  { %5128 = vmatpush.bf16.msrb.mxu0 %v7638_v15  ;;  %5166 = vmatpush.bf16.msrb.mxu3 %v8238_v16  ;;  %v569_v16 = vperm.slane %v555_v59, 0 }
 0x1db   :  { %5145 = vmatpush.bf16.msrb.mxu1 %v7734_v29  ;;  %v8214_v29 = vor.u32 %v8933_v17, %v8211_v48  ;;  %v8142_v48 = vor.u32 %v8915_v61, %v8139_v35  ;;  %v7665_v35 = vld [vmem:[#allocation11 + $0x5a8] sm:$0xf] }
 0x1dc   :  { %5158 = vmatpush.bf16.msrb.mxu2 %v7926_v9  ;;  %v8927_v9 = vld [vmem:[#allocation11 + $0x9c4] sm:$0xf] }
 0x1dd   :  { %v8190_v30 = vor.u32 %v8927_v9, %v8187_v31  ;;  %v8073_v9 = vld [vmem:[#allocation11 + $0x8d8] sm:$0xf]  ;;  %v7518_v31 = vor.u32 %v8759_v24, %v7515_v25  ;;  %v7617_v24 = vld [vmem:[#allocation11 + $0x548] sm:$0xf]  ;;  %v8787_v25 = vld [vmem:[#allocation11 + $0x55c] sm:$0xf0] }
 0x1de   :  { %v9434_v46 = vpop.f32.mrf.mxu0  ;;  %5129 = vmatpush.bf16.msrb.mxu0 %v7614_v26  ;;  %5167 = vmatpush.bf16.msrb.mxu3 %v8214_v29  ;;  %v7329_v26 = vld [vmem:[#allocation11 + $0x308] sm:$0xf]  ;;  %v8715_v29 = vld [vmem:[#allocation11 + $0x31c] sm:$0xf0] }
 0x1df   :  { %5146 = vmatpush.bf16.msrb.mxu1 %v7710_v53  ;;  %v9436_v18 = vpop.f32.mrf.mxu1  ;;  %v8921_v53 = vld [vmem:[#allocation11 + $0x994] sm:$0xf]  ;;  %v7330_v47 = vor.u32 %v8715_v29, %v7329_v26  ;;  %v7977_v26 = vld [vmem:[#allocation11 + $0x818] sm:$0xf] }
 0x1e0   :  { %5159 = vmatpush.bf16.msrb.mxu2 %v7902_v13  ;;  %v8163_v13 = vld [vmem:[#allocation11 + $0x9a8] sm:$0xf0] }
 0x1e1   :  { %v8166_v60 = vor.u32 %v8921_v53, %v8163_v13  ;;  %v7689_v13 = vld [vmem:[#allocation11 + $0x5d8] sm:$0xf] }
 0x1e2   :  { %5147 = vmatmul.bf16.vlgmr.msrb.gmra.mxu1 %v9415_v40  ;;  %5130 = vmatpush.bf16.msrb.mxu0 %v7590_v50 }
 0x1e3   :  { %5191 = vmatpush.bf16.msra.mxu1 %v7306_v20  ;;  %5160 = vmatmul.bf16.vlgmr.msrb.gmra.mxu2 %v9429_v1  ;;  %v7563_v20 = vld [vmem:[#allocation11 + $0x4f8] sm:$0xf0] }
 0x1e4   :  { %5204 = vmatpush.bf16.msra.mxu2 %v7498_v44  ;;  %v8679_v44 = vld [vmem:[#allocation11 + $0x1fc] sm:$0xf0]  ;;  %v7566_v19 = vor.u32 %v8771_v57, %v7563_v20  ;;  %5168 = vmatpush.bf16.msrb.mxu3 %v8190_v30  ;;  %v576_v57 = vmul.f32 %v569_v16, %v9293_v28  ;;  %v8937_v28 = vld [vmem:[#allocation11 + $0xa0c] sm:$0xf0]  ;;  %v8001_v16 = vld [vmem:[#allocation11 + $0x848] sm:$0xf] }
 0x1e5   :  { %v7186_v6 = vor.u32 %v8679_v44, %v7185_v55  ;;  %5121 = vmatmul.bf16.vlgmr.msra.gmra.mxu3 %v9398_v21  ;;  %v8895_v20 = vld [vmem:[#allocation11 + $0x8bc] sm:$0xf0]  ;;  %v8241_v44 = vld [vmem:[#allocation11 + $0xa28] sm:$0xf] }
 0x1e6   :  { %v9441_v2 = vpop.f32.mrf.mxu2  ;;  %v2784_v43 = vpop.f32.mrf.mxu0  ;;  %5131 = vmatpush.bf16.msrb.mxu0 %v7566_v19  ;;  %v2783_v19 = vadd.f32 %v9434_v46, %v576_v57  ;;  %v8242_v61 = vor.u32 %v8943_v34, %v8241_v44  ;;  %v8971_v44 = vld [vmem:[#allocation10] sm:$0xff] }
 0x1e7   :  { %5192 = vmatpush.bf16.msra.mxu1 %v7282_v3  ;;  %v7161_v3 = vld [vmem:[#allocation11 + $0x1b8] sm:$0xf]  ;;  %v9443_v45 = vpop.f32.mrf.mxu3  ;;  %v2797_v17 = vpop.f32.mrf.mxu1  ;;  %v2861_v43 = vperm.slane %v9438_v52, 1  ;;  %v9455_v52 = vld [vmem:[#allocation13] sm:$0x3f]  ;;  %v2937_v34 = vperm.slane %v8971_v44, 6 }
 0x1e8   :  { %5205 = vmatpush.bf16.msra.mxu2 %v7474_v5  ;;  %v8765_v5 = vld [vmem:[#allocation11 + $0x4b4] sm:$0xf]  ;;  %5169 = vmatpush.bf16.msrb.mxu3 %v8166_v60  ;;  %v7162_v51 = vor.u32 %v8673_v7, %v7161_v3  ;;  %v8889_v3 = vld [vmem:[#allocation11 + $0x88c] sm:$0xf0] }
 0x1e9   :  { %v7542_v15 = vor.u32 %v8765_v5, %v7539_v41  ;;  %v8217_v5 = vld [vmem:[#allocation11 + $0x9f8] sm:$0xf]  ;;  %v2796_v41 = vadd.f32 %v9436_v18, %v2783_v19  ;;  %v2875_v18 = vperm.slane %v2861_v43, 1  ;;  %v8649_v44 = vld [vmem:[#allocation11 + $0x10c] sm:$0xf0] }
 0x1ea   :  { %v8218_v8 = vor.u32 %v8937_v28, %v8217_v5  ;;  %v8121_v5 = vld [vmem:[#allocation11 + $0x938] sm:$0xf]  ;;  %v8913_v28 = vld [vmem:[#allocation11 + $0x94c] sm:$0xf0] }
 0x1eb   :  { %5193 = vmatpush.bf16.msra.mxu1 %v7258_v4  ;;  %v8909_v4 = vld [vmem:[#allocation11 + $0x934] sm:$0xf]  ;;  %5132 = vmatpush.bf16.msrb.mxu0 %v7542_v15  ;;  %v8793_v15 = vld [vmem:[#allocation11 + $0x58c] sm:$0xf0]  ;;  %v2809_v17 = vadd.f32 %v9441_v2, %v2796_v41  ;;  %v7113_v43 = vld [vmem:[#allocation11 + $0x158] sm:$0xf] }
 0x1ec   :  { %5206 = vmatpush.bf16.msra.mxu2 %v7450_v22  ;;  %v8115_v22 = vld [vmem:[#allocation11 + $0x948] sm:$0xf0]  ;;  %5170 = vmatpush.bf16.msrb.mxu3 %v8142_v48  ;;  %v8883_v48 = vld [vmem:[#allocation11 + $0x85c] sm:$0xf0]  ;;  %v8925_v2 = vld [vmem:[#allocation11 + $0x9ac] sm:$0xf0] }
 0x1ed   :  { %v8118_v12 = vor.u32 %v8909_v4, %v8115_v22  ;;  %v8193_v4 = vld [vmem:[#allocation11 + $0x9c8] sm:$0xf]  ;;  %v8931_v22 = vld [vmem:[#allocation11 + $0x9dc] sm:$0xf0]  ;;  %v2822_v29 = vadd.f32 %v9443_v45, %v2809_v17  ;;  %v2882_v45 = vmul.f32 %v2875_v18, %v9335_v0 }
 0x1ee   :  { %v2810_v50 = vpop.f32.mrf.mxu2  ;;  %v8194_v38 = vor.u32 %v8931_v22, %v8193_v4  ;;  %v8122_v4 = vor.u32 %v8913_v28, %v8121_v5  ;;  %v7905_v22 = vld [vmem:[#allocation11 + $0x788] sm:$0xf]  ;;  %v8859_v18 = vld [vmem:[#allocation11 + $0x79c] sm:$0xf0] }
 0x1ef   :  { %5194 = vmatpush.bf16.msra.mxu1 %v7234_v33  ;;  %v8901_v33 = vld [vmem:[#allocation11 + $0x8ec] sm:$0xf0]  ;;  %v2823_v55 = vpop.f32.mrf.mxu3  ;;  %5133 = vmatpush.bf16.msrb.mxu0 %v7518_v31  ;;  %v8169_v31 = vld [vmem:[#allocation11 + $0x998] sm:$0xf]  ;;  %v8643_v5 = vld [vmem:[#allocation11 + $0xdc] sm:$0xf0] }
 0x1f0   :  { %5207 = vmatpush.bf16.msra.mxu2 %v7426_v36  ;;  %v8265_v36 = vld [vmem:[#allocation11 + $0xa58] sm:$0xf]  ;;  %v8074_v30 = vor.u32 %v8901_v33, %v8073_v9  ;;  %5171 = vmatpush.bf16.msrb.mxu3 %v8118_v12  ;;  %v8877_v9 = vld [vmem:[#allocation11 + $0x82c] sm:$0xf0]  ;;  %v2914_v12 = vperm.slane %v2900_v23, 2  ;;  %v8170_v27 = vor.u32 %v8925_v2, %v8169_v31  ;;  %v3304_v55 = vperm.slane %v9455_v52, 0 }
 0x1f1   :  { %v8266_v53 = vor.u32 %v8949_v37, %v8265_v36  ;;  %v8781_v50 = vld [vmem:[#allocation11 + $0x52c] sm:$0xf0]  ;;  %v8097_v23 = vld [vmem:[#allocation11 + $0x908] sm:$0xf] }
 0x1f2   :  { %v7089_v2 = vld [vmem:[#allocation11 + $0x128] sm:$0xf] }
 0x1f3   :  { %5195 = vmatpush.bf16.msra.mxu1 %v7210_v10  ;;  %v8805_v10 = vld [vmem:[#allocation11 + $0x5ec] sm:$0xf0] }
 0x1f4   :  { %5208 = vmatpush.bf16.msra.mxu2 %v7402_v54  ;;  %v8049_v54 = vld [vmem:[#allocation11 + $0x8a8] sm:$0xf]  ;;  %v7690_v59 = vor.u32 %v8805_v10, %v7689_v13  ;;  %5172 = vmatpush.bf16.msrb.mxu3 %v8094_v58  ;;  %v8871_v13 = vld [vmem:[#allocation11 + $0x7fc] sm:$0xf0]  ;;  %v7594_v58 = vor.u32 %v8781_v50, %v7593_v49 }
 0x1f5   :  { %v8050_v60 = vor.u32 %v8895_v20, %v8049_v54  ;;  %v8145_v10 = vld [vmem:[#allocation11 + $0x968] sm:$0xf]  ;;  %v8919_v54 = vld [vmem:[#allocation11 + $0x97c] sm:$0xf0]  ;;  %v2921_v20 = vmul.f32 %v2914_v12, %v9343_v14 }
 0x1f6   :  { %v7521_v12 = vld [vmem:[#allocation11 + $0x488] sm:$0xf] }
 0x1f7   :  { %5196 = vmatpush.bf16.msra.mxu1 %v7186_v6  ;;  %v8799_v6 = vld [vmem:[#allocation11 + $0x5bc] sm:$0xf0] }
 0x1f8   :  { %5209 = vmatpush.bf16.msra.mxu2 %v7378_v56  ;;  %v8025_v56 = vld [vmem:[#allocation11 + $0x878] sm:$0xf]  ;;  %5217 = vmatpush.bf16.msra.mxu3 %v7690_v59  ;;  %v7666_v46 = vor.u32 %v8799_v6, %v7665_v35  ;;  %v8146_v59 = vor.u32 %v8919_v54, %v8145_v10  ;;  %v7475_v10 = vld [vmem:[#allocation11 + $0x440] sm:$0xf0]  ;;  %v8796_v54 = vld [vmem:[#allocation11 + $0x5ac] sm:$0xf] }
 0x1f9   :  { %v8026_v7 = vor.u32 %v8889_v3, %v8025_v56  ;;  %v7929_v35 = vld [vmem:[#allocation11 + $0x7b8] sm:$0xf]  ;;  %v8865_v3 = vld [vmem:[#allocation11 + $0x7cc] sm:$0xf0] }
 0x1fb   :  { %5197 = vmatpush.bf16.msra.mxu1 %v7162_v51  ;;  %v7642_v51 = vor.u32 %v8793_v15, %v7641_v11  ;;  %v8661_v11 = vld [vmem:[#allocation11 + $0x16c] sm:$0xf0]  ;;  %v7545_v15 = vld [vmem:[#allocation11 + $0x4b8] sm:$0xf] }
 0x1fc   :  { %5210 = vmatpush.bf16.msra.mxu2 %v7354_v32  ;;  %5218 = vmatpush.bf16.msra.mxu3 %v7666_v46  ;;  %v8002_v32 = vor.u32 %v8883_v48, %v8001_v16  ;;  %v8769_v16 = vld [vmem:[#allocation11 + $0x4cc] sm:$0xf0]  ;;  %v7930_v48 = vor.u32 %v8865_v3, %v7929_v35  ;;  %v7041_v3 = vld [vmem:[#allocation11 + $0xc8] sm:$0xf] }
 0x1fd   :  { %v7546_v31 = vor.u32 %v8769_v16, %v7545_v15  ;;  %v8784_v15 = vld [vmem:[#allocation11 + $0x54c] sm:$0xf]  ;;  %v7619_v16 = vld [vmem:[#allocation11 + $0x560] sm:$0xf0] }
 0x1fe   :  { %v2834_v33 = vpop.f32.mrf.mxu0 }
 0x1ff   :  { %5198 = vmatpush.bf16.msra.mxu1 %v7138_v39  ;;  %v2847_v36 = vpop.f32.mrf.mxu1  ;;  %v2835_v37 = vadd.f32 %v2834_v33, %v2822_v29  ;;  %v7618_v39 = vor.u32 %v8787_v25, %v7617_v24  ;;  %v7114_v24 = vor.u32 %v8661_v11, %v7113_v43  ;;  %v7499_v25 = vld [vmem:[#allocation11 + $0x470] sm:$0xf0]  ;;  %v8655_v33 = vld [vmem:[#allocation11 + $0x13c] sm:$0xf0]  ;;  %v7427_v11 = vld [vmem:[#allocation11 + $0x3e0] sm:$0xf0] }
 0x200   :  { %5211 = vmatpush.bf16.msra.mxu2 %v7330_v47  ;;  %5219 = vmatpush.bf16.msra.mxu3 %v7642_v51  ;;  %v7978_v47 = vor.u32 %v8877_v9, %v7977_v26  ;;  %v8802_v26 = vld [vmem:[#allocation11 + $0x5dc] sm:$0xf]  ;;  %v7691_v29 = vld [vmem:[#allocation11 + $0x5f0] sm:$0xf0] }
 0x201   :  { %v7694_v50 = vor.u32 %v8802_v26, %v7691_v29  ;;  %v7067_v43 = vld [vmem:[#allocation11 + $0x110] sm:$0xf0] }
 0x202   :  { %5199 = vmatmul.bf16.vlgmr.msra.gmra.mxu1 %v9365_v42  ;;  %v7595_v26 = vld [vmem:[#allocation11 + $0x530] sm:$0xf0] }
 0x203   :  { %5243 = vmatpush.bf16.msrb.mxu1 %v8074_v30  ;;  %5212 = vmatmul.bf16.vlgmr.msra.gmra.mxu2 %v9398_v21  ;;  %v7953_v30 = vld [vmem:[#allocation11 + $0x7e8] sm:$0xf] }
 0x204   :  { %5256 = vmatpush.bf16.msrb.mxu2 %v8266_v53  ;;  %v2848_v53 = vadd.f32 %v2847_v36, %v2835_v37  ;;  %5220 = vmatpush.bf16.msra.mxu3 %v7618_v39  ;;  %v7954_v19 = vor.u32 %v8871_v13, %v7953_v30  ;;  %v7906_v36 = vor.u32 %v8859_v18, %v7905_v22  ;;  %v8763_v39 = vld [vmem:[#allocation11 + $0x49c] sm:$0xf0]  ;;  %v8658_v30 = vld [vmem:[#allocation11 + $0x15c] sm:$0xf]  ;;  %v8637_v22 = vld [vmem:[#allocation11 + $0xac] sm:$0xf0] }
 0x205   :  { %v7090_v13 = vor.u32 %v8655_v33, %v7089_v2 }
 0x206   :  { %v2889_v57 = vadd.f32 %v2882_v45, %v2848_v53  ;;  %v5005_v6 = vpop.f32.mrf.mxu2  ;;  %v2836_v46 = vpop.f32.mrf.mxu0  ;;  %v7115_v53 = vld [vmem:[#allocation11 + $0x170] sm:$0xf0]  ;;  %v8748_v45 = vld [vmem:[#allocation11 + $0x42c] sm:$0xf] }
 0x207   :  { %5244 = vmatpush.bf16.msrb.mxu1 %v8050_v60  ;;  %v7569_v60 = vld [vmem:[#allocation11 + $0x4e8] sm:$0xf]  ;;  %v5018_v56 = vpop.f32.mrf.mxu3  ;;  %v5006_v41 = vadd.f32 %v5005_v6, %v3304_v55  ;;  %v2849_v14 = vpop.f32.mrf.mxu1  ;;  %v7667_v55 = vld [vmem:[#allocation11 + $0x5c0] sm:$0xf0]  ;;  %v8790_v6 = vld [vmem:[#allocation11 + $0x57c] sm:$0xf] }
 0x208   :  { %5257 = vmatpush.bf16.msrb.mxu2 %v8242_v61  ;;  %v8775_v61 = vld [vmem:[#allocation11 + $0x4fc] sm:$0xf0]  ;;  %v2928_v0 = vadd.f32 %v2921_v20, %v2889_v57  ;;  %5221 = vmatpush.bf16.msra.mxu3 %v7594_v58  ;;  %v7522_v57 = vor.u32 %v8763_v39, %v7521_v12  ;;  %v7065_v20 = vld [vmem:[#allocation11 + $0xf8] sm:$0xf]  ;;  %v7478_v58 = vor.u32 %v8748_v45, %v7475_v10  ;;  %v8646_v14 = vld [vmem:[#allocation11 + $0xfc] sm:$0xf] }
 0x209   :  { %v9460_v17 = vadd.f32 %v5018_v56, %v5006_v41  ;;  %v7066_v35 = vor.u32 %v8649_v44, %v7065_v20  ;;  %v7643_v56 = vld [vmem:[#allocation11 + $0x590] sm:$0xf0]  ;;  %v8631_v12 = vld [vmem:[#allocation11 + $0x7c] sm:$0xf0]  ;;  %v7571_v45 = vld [vmem:[#allocation11 + $0x500] sm:$0xf0] }
 0x20a   :  { %v7646_v46 = vor.u32 %v8790_v6, %v7643_v56  ;;  %v8628_v44 = vld [vmem:[#allocation11 + $0x6c] sm:$0xf] }
 0x20b   :  { %5245 = vmatpush.bf16.msrb.mxu1 %v8026_v7  ;;  %v2951_v7 = vadd.f32 %v2937_v34, %v2928_v0  ;;  %v7118_v34 = vor.u32 %v8658_v30, %v7115_v53  ;;  %v7451_v0 = vld [vmem:[#allocation11 + $0x410] sm:$0xf0]  ;;  %v7379_v53 = vld [vmem:[#allocation11 + $0x380] sm:$0xf0] }
 0x20c   :  { %5258 = vmatpush.bf16.msrb.mxu2 %v8218_v8  ;;  %v7570_v8 = vor.u32 %v8775_v61, %v7569_v60  ;;  %v7091_v60 = vld [vmem:[#allocation11 + $0x140] sm:$0xf0]  ;;  %v8742_v61 = vld [vmem:[#allocation11 + $0x3fc] sm:$0xf] }
 0x20d   :  { %v2958_v51 = vmax.f32 %v2951_v7, 0.0  ;;  %v7454_v41 = vor.u32 %v8742_v61, %v7451_v0  ;;  %v8736_v7 = vld [vmem:[#allocation11 + $0x3cc] sm:$0xf]  ;;  %v6945_v0 = vld [vmem:[#allocation11 + $0x8] sm:$0xf] }
 0x20e   :  { %5222 = vmatpush.bf16.msra.mxu3 %v7570_v8  ;;  %v7042_v8 = vor.u32 %v8643_v5, %v7041_v3  ;;  %v7430_v18 = vor.u32 %v8736_v7, %v7427_v11  ;;  %v8619_v3 = vld [vmem:[#allocation11 + $0x1c] sm:$0xf0]  ;;  %v7881_v5 = vld [vmem:[#allocation11 + $0x758] sm:$0xf]  ;;  %v8712_v7 = vld [vmem:[#allocation11 + $0x30c] sm:$0xf] }
 0x20f   :  { %5246 = vmatpush.bf16.msrb.mxu1 %v8002_v32  ;;  %v8907_v32 = vld [vmem:[#allocation11 + $0x91c] sm:$0xf0]  ;;  %v9462_v9 = vpack.c.bf16 %v2958_v51, %v2958_v51  ;;  %v8640_v51 = vld [vmem:[#allocation11 + $0xcc] sm:$0xf] }
 0x210   :  { %5259 = vmatpush.bf16.msrb.mxu2 %v8194_v38  ;;  %v8754_v38 = vld [vmem:[#allocation11 + $0x45c] sm:$0xf]  ;;  %v8098_v37 = vor.u32 %v8907_v32, %v8097_v23  ;;  %v7622_v23 = vor.u32 %v8784_v15, %v7619_v16  ;;  %v7043_v32 = vld [vmem:[#allocation11 + $0xe0] sm:$0xf0]  ;;  %v8760_v11 = vld [vmem:[#allocation11 + $0x48c] sm:$0xf]  ;;  %v6946_v16 = vor.u32 %v8619_v3, %v6945_v0 }
 0x211   :  { %5082 = vmatmul.bf16.vlgmr.msra.gmra.mxu0 %v9462_v9  ;;  %5173 = vmatmul.bf16.vlgmr.msrb.gmra.mxu3 %v9462_v9  ;;  %v7502_v49 = vor.u32 %v8754_v38, %v7499_v25  ;;  %v8730_v38 = vld [vmem:[#allocation11 + $0x39c] sm:$0xf]  ;;  %v7523_v15 = vld [vmem:[#allocation11 + $0x4a0] sm:$0xf0]  ;;  %v7835_v0 = vld [vmem:[#allocation11 + $0x710] sm:$0xf0] }
 0x212   :  { %5178 = vmatpush.bf16.msra.mxu0 %v7114_v24  ;;  %5223 = vmatpush.bf16.msra.mxu3 %v7546_v31  ;;  %v7403_v24 = vld [vmem:[#allocation11 + $0x3b0] sm:$0xf0]  ;;  %v8778_v25 = vld [vmem:[#allocation11 + $0x51c] sm:$0xf] }
 0x213   :  { %5247 = vmatpush.bf16.msrb.mxu1 %v7978_v47  ;;  %v5007_v47 = vpop.f32.mrf.mxu2  ;;  %v7406_v39 = vor.u32 %v8730_v38, %v7403_v24  ;;  %v7526_v24 = vor.u32 %v8760_v11, %v7523_v15 }
 0x214   :  { %5260 = vmatpush.bf16.msrb.mxu2 %v8170_v27  ;;  %v5020_v27 = vpop.f32.mrf.mxu3  ;;  %v7598_v47 = vor.u32 %v8778_v25, %v7595_v26  ;;  %v8847_v25 = vld [vmem:[#allocation11 + $0x73c] sm:$0xf0]  ;;  %v8616_v26 = vld [vmem:[#allocation11 + $0xc] sm:$0xf] }
 0x215   :  { %v8634_v27 = vld [vmem:[#allocation11 + $0x9c] sm:$0xf] }
 0x216   :  { %5179 = vmatpush.bf16.msra.mxu0 %v7090_v13  ;;  %5224 = vmatpush.bf16.msra.mxu3 %v7522_v57 }
 0x217   :  { %5248 = vmatpush.bf16.msrb.mxu1 %v7954_v19  ;;  %v7670_v19 = vor.u32 %v8796_v54, %v7667_v55  ;;  %v6969_v54 = vld [vmem:[#allocation11 + $0x38] sm:$0xf]  ;;  %v8625_v55 = vld [vmem:[#allocation11 + $0x4c] sm:$0xf0] }
 0x218   :  { %5261 = vmatpush.bf16.msrb.mxu2 %v8146_v59  ;;  %v8652_v59 = vld [vmem:[#allocation11 + $0x12c] sm:$0xf] }
 0x219   :  { %v7094_v28 = vor.u32 %v8652_v59, %v7091_v60  ;;  %v8766_v59 = vld [vmem:[#allocation11 + $0x4bc] sm:$0xf]  ;;  %v7547_v60 = vld [vmem:[#allocation11 + $0x4d0] sm:$0xf0] }
 0x21a   :  { %5269 = vmatpush.bf16.msrb.mxu3 %v7118_v34  ;;  %5180 = vmatpush.bf16.msra.mxu0 %v7066_v35  ;;  %v6995_v34 = vld [vmem:[#allocation11 + $0x80] sm:$0xf0]  ;;  %v6970_v35 = vor.u32 %v8625_v55, %v6969_v54  ;;  %v8934_v55 = vld [vmem:[#allocation11 + $0x9fc] sm:$0xf] }
 0x21b   :  { %5249 = vmatpush.bf16.msrb.mxu1 %v7930_v48  ;;  %v7070_v48 = vor.u32 %v8646_v14, %v7067_v43  ;;  %v6998_v56 = vor.u32 %v8628_v44, %v6995_v34  ;;  %v8622_v14 = vld [vmem:[#allocation11 + $0x3c] sm:$0xf]  ;;  %v6971_v43 = vld [vmem:[#allocation11 + $0x50] sm:$0xf0]  ;;  %v7859_v54 = vld [vmem:[#allocation11 + $0x740] sm:$0xf0] }
 0x21c   :  { %5262 = vmatpush.bf16.msrb.mxu2 %v8122_v4  ;;  %v7017_v4 = vld [vmem:[#allocation11 + $0x98] sm:$0xf]  ;;  %v7073_v44 = vld [vmem:[#allocation11 + $0x100] sm:$0xf] }
 0x21d   :  { %v7018_v31 = vor.u32 %v8637_v22, %v7017_v4  ;;  %v8267_v4 = vld [vmem:[#allocation11 + $0xa70] sm:$0xf0]  ;;  %v8650_v34 = vld [vmem:[#allocation11 + $0x114] sm:$0xf0] }
 0x21e   :  { %5270 = vmatpush.bf16.msrb.mxu3 %v7094_v28  ;;  %5181 = vmatpush.bf16.msra.mxu0 %v7042_v8  ;;  %v5031_v29 = vpop.f32.mrf.mxu0  ;;  %v8853_v28 = vld [vmem:[#allocation11 + $0x76c] sm:$0xf0]  ;;  %v7331_v8 = vld [vmem:[#allocation11 + $0x320] sm:$0xf0] }
 0x21f   :  { %5250 = vmatpush.bf16.msrb.mxu1 %v7906_v36  ;;  %v5032_v2 = vadd.f32 %v5031_v29, %v9460_v17  ;;  %v5044_v33 = vpop.f32.mrf.mxu1  ;;  %v7046_v36 = vor.u32 %v8640_v51, %v7043_v32  ;;  %v8772_v17 = vld [vmem:[#allocation11 + $0x4ec] sm:$0xf]  ;;  %v7882_v22 = vor.u32 %v8853_v28, %v7881_v5  ;;  %v8662_v51 = vld [vmem:[#allocation11 + $0x174] sm:$0xf0]  ;;  %v7857_v32 = vld [vmem:[#allocation11 + $0x728] sm:$0xf]  ;;  %v7334_v38 = vor.u32 %v8712_v7, %v7331_v8 }
 0x220   :  { %5263 = vmatpush.bf16.msrb.mxu2 %v8098_v37  ;;  %v6993_v37 = vld [vmem:[#allocation11 + $0x68] sm:$0xf]  ;;  %v7574_v20 = vor.u32 %v8772_v17, %v7571_v45  ;;  %v6947_v29 = vld [vmem:[#allocation11 + $0x20] sm:$0xf0]  ;;  %v7049_v5 = vld [vmem:[#allocation11 + $0xd0] sm:$0xf] }
 0x221   :  { %v9469_v30 = vadd.f32 %v5044_v33, %v5032_v2  ;;  %5134 = vmatmul.bf16.vlgmr.msrb.gmra.mxu0 %v9400_v62  ;;  %5225 = vmatmul.bf16.vlgmr.msra.gmra.mxu3 %v9400_v62  ;;  %v6994_v13 = vor.u32 %v8631_v12, %v6993_v37  ;;  %v8850_v2 = vld [vmem:[#allocation11 + $0x75c] sm:$0xf]  ;;  %v8940_v37 = vld [vmem:[#allocation11 + $0xa2c] sm:$0xf]  ;;  %v8243_v12 = vld [vmem:[#allocation11 + $0xa40] sm:$0xf0] }
 0x222   :  { %5251 = vmatmul.bf16.vlgmr.msrb.gmra.mxu1 %v9429_v1  ;;  %5271 = vmatpush.bf16.msrb.mxu3 %v7070_v48  ;;  %v8946_v48 = vld [vmem:[#allocation11 + $0xa5c] sm:$0xf]  ;;  %v8246_v45 = vor.u32 %v8940_v37, %v8243_v12  ;;  %v8644_v28 = vld [vmem:[#allocation11 + $0xe4] sm:$0xf0]  ;;  %v8832_v8 = vld [vmem:[#allocation11 + $0x6cc] sm:$0xf] }
 0x223   :  { %5295 = vmatpush.bf16.msra.mxu1 %v7502_v49  ;;  %5264 = vmatmul.bf16.vlgmr.msrb.gmra.mxu2 %v9462_v9  ;;  %v7019_v49 = vld [vmem:[#allocation11 + $0xb0] sm:$0xf0]  ;;  %v7050_v15 = vor.u32 %v8644_v28, %v7049_v5  ;;  %v8632_v37 = vld [vmem:[#allocation11 + $0x84] sm:$0xf0]  ;;  %v7737_v12 = vld [vmem:[#allocation11 + $0x638] sm:$0xf] }
 0x224   :  { %5308 = vmatpush.bf16.msra.mxu2 %v7694_v50  ;;  %v8724_v50 = vld [vmem:[#allocation11 + $0x36c] sm:$0xf]  ;;  %5182 = vmatpush.bf16.msra.mxu0 %v7018_v31  ;;  %v7022_v10 = vor.u32 %v8634_v27, %v7019_v49  ;;  %v8270_v31 = vor.u32 %v8946_v48, %v8267_v4  ;;  %v7097_v27 = vld [vmem:[#allocation11 + $0x130] sm:$0xf]  ;;  %v8656_v49 = vld [vmem:[#allocation11 + $0x144] sm:$0xf0] }
 0x225   :  { %v7382_v57 = vor.u32 %v8724_v50, %v7379_v53  ;;  %v7833_v50 = vld [vmem:[#allocation11 + $0x6f8] sm:$0xf]  ;;  %v8841_v53 = vld [vmem:[#allocation11 + $0x70c] sm:$0xf0]  ;;  %v8922_v48 = vld [vmem:[#allocation11 + $0x99c] sm:$0xf] }
 0x226   :  { %5272 = vmatpush.bf16.msrb.mxu3 %v7046_v36  ;;  %v5033_v61 = vpop.f32.mrf.mxu0  ;;  %v7883_v36 = vld [vmem:[#allocation11 + $0x770] sm:$0xf0]  ;;  %v6953_v5 = vld [vmem:[#allocation11 + $0x10] sm:$0xf]  ;;  %v8620_v28 = vld [vmem:[#allocation11 + $0x24] sm:$0xf0] }
 0x227   :  { %5296 = vmatpush.bf16.msra.mxu1 %v7478_v58  ;;  %v8718_v58 = vld [vmem:[#allocation11 + $0x33c] sm:$0xf]  ;;  %v5046_v6 = vpop.f32.mrf.mxu1  ;;  %v7886_v17 = vor.u32 %v8850_v2, %v7883_v36  ;;  %v8171_v4 = vld [vmem:[#allocation11 + $0x9b0] sm:$0xf0]  ;;  %v8147_v2 = vld [vmem:[#allocation11 + $0x980] sm:$0xf0] }
 0x228   :  { %5309 = vmatpush.bf16.msra.mxu2 %v7670_v19  ;;  %v7355_v19 = vld [vmem:[#allocation11 + $0x350] sm:$0xf0]  ;;  %5183 = vmatpush.bf16.msra.mxu0 %v6994_v13  ;;  %v8844_v13 = vld [vmem:[#allocation11 + $0x72c] sm:$0xf]  ;;  %v8838_v61 = vld [vmem:[#allocation11 + $0x6fc] sm:$0xf] }
 0x229   :  { %v8928_v6 = vld [vmem:[#allocation11 + $0x9cc] sm:$0xf]  ;;  %v7001_v36 = vld [vmem:[#allocation11 + $0x70] sm:$0xf] }
 0x22a   :  { %5273 = vmatpush.bf16.msrb.mxu3 %v7022_v10  ;;  %v7098_v10 = vor.u32 %v8656_v49, %v7097_v27 }
 0x22b   :  { %5297 = vmatpush.bf16.msra.mxu1 %v7454_v41  ;;  %v7358_v41 = vor.u32 %v8718_v58, %v7355_v19  ;;  %v7809_v58 = vld [vmem:[#allocation11 + $0x6c8] sm:$0xf]  ;;  %v8835_v19 = vld [vmem:[#allocation11 + $0x6dc] sm:$0xf0] }
 0x22c   :  { %5310 = vmatpush.bf16.msra.mxu2 %v7646_v46  ;;  %v7550_v46 = vor.u32 %v8766_v59, %v7547_v60  ;;  %5184 = vmatpush.bf16.msra.mxu0 %v6970_v35  ;;  %v7862_v59 = vor.u32 %v8844_v13, %v7859_v54  ;;  %v7074_v35 = vor.u32 %v8650_v34, %v7073_v44  ;;  %v8123_v13 = vld [vmem:[#allocation11 + $0x950] sm:$0xf0]  ;;  %v6977_v54 = vld [vmem:[#allocation11 + $0x40] sm:$0xf]  ;;  %v7713_v44 = vld [vmem:[#allocation11 + $0x608] sm:$0xf] }
 0x22d   :  { %v7810_v3 = vor.u32 %v8835_v19, %v7809_v58  ;;  %v8811_v34 = vld [vmem:[#allocation11 + $0x61c] sm:$0xf0] }
 0x22e   :  { %5274 = vmatpush.bf16.msrb.mxu3 %v6998_v56  ;;  %v8195_v56 = vld [vmem:[#allocation11 + $0x9e0] sm:$0xf0] }
 0x22f   :  { %5298 = vmatpush.bf16.msra.mxu1 %v7430_v18  ;;  %v6974_v18 = vor.u32 %v8622_v14, %v6971_v43  ;;  %v7838_v14 = vor.u32 %v8838_v61, %v7835_v0  ;;  %v8198_v7 = vor.u32 %v8928_v6, %v8195_v56  ;;  %v8814_v61 = vld [vmem:[#allocation11 + $0x63c] sm:$0xf]  ;;  %v7739_v0 = vld [vmem:[#allocation11 + $0x650] sm:$0xf0]  ;;  %v8904_v6 = vld [vmem:[#allocation11 + $0x90c] sm:$0xf] }
 0x230   :  { %5311 = vmatpush.bf16.msra.mxu2 %v7622_v23  ;;  %v7121_v23 = vld [vmem:[#allocation11 + $0x160] sm:$0xf]  ;;  %5185 = vmatpush.bf16.msra.mxu0 %v6946_v16  ;;  %v5057_v43 = vpop.f32.mrf.mxu2  ;;  %v7811_v16 = vld [vmem:[#allocation11 + $0x6e0] sm:$0xf0] }
 0x231   :  { %v7122_v33 = vor.u32 %v8662_v51, %v7121_v23  ;;  %v9478_v11 = vadd.f32 %v5057_v43, %v9469_v30  ;;  %v8638_v23 = vld [vmem:[#allocation11 + $0xb4] sm:$0xf0]  ;;  %v7787_v30 = vld [vmem:[#allocation11 + $0x6b0] sm:$0xf0]  ;;  %v8099_v56 = vld [vmem:[#allocation11 + $0x920] sm:$0xf0] }
 0x232   :  { %5275 = vmatpush.bf16.msrb.mxu3 %v6974_v18  ;;  %v7025_v18 = vld [vmem:[#allocation11 + $0xa0] sm:$0xf] }
 0x233   :  { %5299 = vmatpush.bf16.msra.mxu1 %v7406_v39  ;;  %v7858_v39 = vor.u32 %v8847_v25, %v7857_v32  ;;  %5186 = vmatmul.bf16.vlgmr.msra.gmra.mxu0 %v9362_v63  ;;  %v7761_v32 = vld [vmem:[#allocation11 + $0x668] sm:$0xf]  ;;  %v8174_v25 = vor.u32 %v8922_v48, %v8171_v4  ;;  %v7889_v43 = vld [vmem:[#allocation11 + $0x760] sm:$0xf]  ;;  %v8700_v48 = vld [vmem:[#allocation11 + $0x2ac] sm:$0xf] }
 0x234   :  { %5312 = vmatpush.bf16.msra.mxu2 %v7598_v47  ;;  %5230 = vmatpush.bf16.msrb.mxu0 %v7882_v22  ;;  %v6950_v47 = vor.u32 %v8616_v26, %v6947_v29  ;;  %v8826_v26 = vld [vmem:[#allocation11 + $0x69c] sm:$0xf]  ;;  %v7026_v29 = vor.u32 %v8638_v23, %v7025_v18  ;;  %v7283_v4 = vld [vmem:[#allocation11 + $0x2c0] sm:$0xf0]  ;;  %v6954_v18 = vor.u32 %v8620_v28, %v6953_v5  ;;  %v8808_v23 = vld [vmem:[#allocation11 + $0x60c] sm:$0xf] }
 0x235   :  { %v7241_v28 = vld [vmem:[#allocation11 + $0x250] sm:$0xf] }
 0x236   :  { %5276 = vmatpush.bf16.msrb.mxu3 %v6950_v47  ;;  %v7790_v47 = vor.u32 %v8826_v26, %v7787_v30  ;;  %v7673_v26 = vld [vmem:[#allocation11 + $0x5b0] sm:$0xf]  ;;  %v8800_v30 = vld [vmem:[#allocation11 + $0x5c4] sm:$0xf0] }
 0x237   :  { %5300 = vmatpush.bf16.msra.mxu1 %v7382_v57  ;;  %v8219_v57 = vld [vmem:[#allocation11 + $0xa10] sm:$0xf0] }
 0x238   :  { %5313 = vmatpush.bf16.msra.mxu2 %v7574_v20  ;;  %5231 = vmatpush.bf16.msrb.mxu0 %v7858_v39  ;;  %v7834_v20 = vor.u32 %v8841_v53, %v7833_v50  ;;  %v8222_v60 = vor.u32 %v8934_v55, %v8219_v57  ;;  %v8817_v39 = vld [vmem:[#allocation11 + $0x64c] sm:$0xf0]  ;;  %v5059_v27 = vpop.f32.mrf.mxu2  ;;  %v8820_v50 = vld [vmem:[#allocation11 + $0x66c] sm:$0xf]  ;;  %v7002_v53 = vor.u32 %v8632_v37, %v7001_v36  ;;  %v8626_v55 = vld [vmem:[#allocation11 + $0x54] sm:$0xf0] }
 0x239   :  { %5277 = vmatmul.bf16.vlgmr.msrb.gmra.mxu3 %v9362_v63  ;;  %v3305_v57 = vperm.slane %v9455_v52, 1  ;;  %v7697_v52 = vld [vmem:[#allocation11 + $0x5e0] sm:$0xf]  ;;  %v8694_v36 = vld [vmem:[#allocation11 + $0x27c] sm:$0xf] }
 0x23a   :  { %5321 = vmatpush.bf16.msra.mxu3 %v7886_v17  ;;  %v7763_v17 = vld [vmem:[#allocation11 + $0x680] sm:$0xf0]  ;;  %v7259_v37 = vld [vmem:[#allocation11 + $0x290] sm:$0xf0]  ;;  %v7289_v27 = vld [vmem:[#allocation11 + $0x2b0] sm:$0xf] }
 0x23b   :  { %5301 = vmatpush.bf16.msra.mxu1 %v7358_v41  ;;  %v7785_v41 = vld [vmem:[#allocation11 + $0x698] sm:$0xf]  ;;  %v7766_v58 = vor.u32 %v8820_v50, %v7763_v17  ;;  %v7649_v50 = vld [vmem:[#allocation11 + $0x580] sm:$0xf] }
 0x23c   :  { %5314 = vmatpush.bf16.msra.mxu2 %v7550_v46  ;;  %5232 = vmatpush.bf16.msrb.mxu0 %v7834_v20  ;;  %v8829_v46 = vld [vmem:[#allocation11 + $0x6ac] sm:$0xf0]  ;;  %v8794_v17 = vld [vmem:[#allocation11 + $0x594] sm:$0xf0] }
 0x23d   :  { %v7786_v22 = vor.u32 %v8829_v46, %v7785_v41 }
 0x23e   :  { %5322 = vmatpush.bf16.msra.mxu3 %v7862_v59  ;;  %v8706_v59 = vld [vmem:[#allocation11 + $0x2dc] sm:$0xf] }
 0x23f   :  { %5302 = vmatpush.bf16.msra.mxu1 %v7334_v38  ;;  %v5096_v51 = vpop.f32.mrf.mxu1  ;;  %v8823_v38 = vld [vmem:[#allocation11 + $0x67c] sm:$0xf0] }
 0x240   :  { %5315 = vmatpush.bf16.msra.mxu2 %v7526_v24  ;;  %5233 = vmatpush.bf16.msrb.mxu0 %v7810_v3  ;;  %v7814_v24 = vor.u32 %v8832_v8, %v7811_v16  ;;  %v7714_v3 = vor.u32 %v8811_v34, %v7713_v44  ;;  %v5097_v41 = vadd.f32 %v5096_v51, %v3305_v57  ;;  %v7265_v34 = vld [vmem:[#allocation11 + $0x280] sm:$0xf] }
 0x241   :  { %v7742_v8 = vor.u32 %v8814_v61, %v7739_v0  ;;  %v8102_v16 = vor.u32 %v8904_v6, %v8099_v56  ;;  %v7817_v61 = vld [vmem:[#allocation11 + $0x6d0] sm:$0xf]  ;;  %v8682_v0 = vld [vmem:[#allocation11 + $0x21c] sm:$0xf]  ;;  %v7211_v6 = vld [vmem:[#allocation11 + $0x230] sm:$0xf0] }
 0x242   :  { %5303 = vmatmul.bf16.vlgmr.msra.gmra.mxu1 %v9398_v21  ;;  %5323 = vmatpush.bf16.msra.mxu3 %v7838_v14  ;;  %v8806_v14 = vld [vmem:[#allocation11 + $0x5f4] sm:$0xf0] }
 0x243   :  { %5347 = vmatpush.bf16.msrb.mxu1 %v8270_v31  ;;  %5316 = vmatmul.bf16.vlgmr.msra.gmra.mxu2 %v9400_v62  ;;  %v8916_v31 = vld [vmem:[#allocation11 + $0x96c] sm:$0xf] }
 0x244   :  { %5360 = vmatpush.bf16.msrb.mxu2 %v7122_v33  ;;  %5234 = vmatpush.bf16.msrb.mxu0 %v7786_v22  ;;  %v7762_v33 = vor.u32 %v8823_v38, %v7761_v32  ;;  %v8150_v49 = vor.u32 %v8916_v31, %v8147_v2  ;;  %v7715_v32 = vld [vmem:[#allocation11 + $0x620] sm:$0xf0]  ;;  %v7698_v38 = vor.u32 %v8806_v14, %v7697_v52  ;;  %v7865_v31 = vld [vmem:[#allocation11 + $0x730] sm:$0xf]  ;;  %v8848_v2 = vld [vmem:[#allocation11 + $0x744] sm:$0xf0] }
 0x245   :  { %v8692_v52 = vld [vmem:[#allocation11 + $0x264] sm:$0xf0]  ;;  %v8782_v14 = vld [vmem:[#allocation11 + $0x534] sm:$0xf0] }
 0x246   :  { %5324 = vmatpush.bf16.msra.mxu3 %v7814_v24  ;;  %v7313_v24 = vld [vmem:[#allocation11 + $0x2e0] sm:$0xf] }
 0x247   :  { %5348 = vmatpush.bf16.msrb.mxu1 %v8246_v45  ;;  %v8910_v45 = vld [vmem:[#allocation11 + $0x93c] sm:$0xf]  ;;  %v5098_v20 = vpop.f32.mrf.mxu1 }
 0x248   :  { %5361 = vmatpush.bf16.msrb.mxu2 %v7098_v10  ;;  %5235 = vmatpush.bf16.msrb.mxu0 %v7762_v33  ;;  %v7738_v10 = vor.u32 %v8817_v39, %v7737_v12  ;;  %v8126_v19 = vor.u32 %v8910_v45, %v8123_v13  ;;  %v7718_v33 = vor.u32 %v8808_v23, %v7715_v32  ;;  %v7841_v45 = vld [vmem:[#allocation11 + $0x700] sm:$0xf]  ;;  %v8842_v13 = vld [vmem:[#allocation11 + $0x714] sm:$0xf0] }
 0x249   :  { %v7674_v39 = vor.u32 %v8800_v30, %v7673_v26  ;;  %v7650_v20 = vor.u32 %v8794_v17, %v7649_v50  ;;  %v7842_v44 = vor.u32 %v8842_v13, %v7841_v45  ;;  %v7217_v23 = vld [vmem:[#allocation11 + $0x220] sm:$0xf]  ;;  %v8686_v32 = vld [vmem:[#allocation11 + $0x234] sm:$0xf0]  ;;  %v8824_v26 = vld [vmem:[#allocation11 + $0x684] sm:$0xf0] }
 0x24a   :  { %5325 = vmatpush.bf16.msra.mxu3 %v7790_v47  ;;  %v7866_v47 = vor.u32 %v8848_v2, %v7865_v31  ;;  %v7163_v30 = vld [vmem:[#allocation11 + $0x1d0] sm:$0xf0]  ;;  %v7218_v2 = vor.u32 %v8686_v32, %v7217_v23  ;;  %v8770_v50 = vld [vmem:[#allocation11 + $0x4d4] sm:$0xf0]  ;;  %v8664_v13 = vld [vmem:[#allocation11 + $0x18c] sm:$0xf] }
 0x24b   :  { %5349 = vmatpush.bf16.msrb.mxu1 %v8222_v60  ;;  %v7307_v60 = vld [vmem:[#allocation11 + $0x2f0] sm:$0xf0]  ;;  %v8818_v17 = vld [vmem:[#allocation11 + $0x654] sm:$0xf0] }
 0x24c   :  { %5362 = vmatpush.bf16.msrb.mxu2 %v7074_v35  ;;  %v6978_v35 = vor.u32 %v8626_v55, %v6977_v54  ;;  %5236 = vmatpush.bf16.msrb.mxu0 %v7738_v10  ;;  %v7310_v46 = vor.u32 %v8706_v59, %v7307_v60  ;;  %v8688_v54 = vld [vmem:[#allocation11 + $0x24c] sm:$0xf]  ;;  %v7235_v55 = vld [vmem:[#allocation11 + $0x260] sm:$0xf0]  ;;  %v8788_v60 = vld [vmem:[#allocation11 + $0x564] sm:$0xf0] }
 0x24d   :  { %v7238_v59 = vor.u32 %v8688_v54, %v7235_v55  ;;  %v8898_v55 = vld [vmem:[#allocation11 + $0x8dc] sm:$0xf]  ;;  %v8653_v32 = vld [vmem:[#allocation11 + $0x134] sm:$0xf] }
 0x24e   :  { %5326 = vmatpush.bf16.msra.mxu3 %v7766_v58  ;;  %v8698_v58 = vld [vmem:[#allocation11 + $0x294] sm:$0xf0] }
 0x24f   :  { %5350 = vmatpush.bf16.msrb.mxu1 %v8198_v7  ;;  %v8854_v7 = vld [vmem:[#allocation11 + $0x774] sm:$0xf0]  ;;  %v7266_v56 = vor.u32 %v8698_v58, %v7265_v34  ;;  %v7529_v58 = vld [vmem:[#allocation11 + $0x490] sm:$0xf] }
 0x250   :  { %5363 = vmatpush.bf16.msrb.mxu2 %v7050_v15  ;;  %v5109_v15 = vpop.f32.mrf.mxu2  ;;  %5237 = vmatpush.bf16.msrb.mxu0 %v7714_v3  ;;  %v7890_v51 = vor.u32 %v8854_v7, %v7889_v43  ;;  %v7793_v43 = vld [vmem:[#allocation11 + $0x6a0] sm:$0xf]  ;;  %v8830_v7 = vld [vmem:[#allocation11 + $0x6b4] sm:$0xf0] }
 0x251   :  { %v9481_v22 = vadd.f32 %v5109_v15, %v5097_v41  ;;  %v7601_v41 = vld [vmem:[#allocation11 + $0x520] sm:$0xf]  ;;  %v8676_v15 = vld [vmem:[#allocation11 + $0x1ec] sm:$0xf]  ;;  %v8674_v34 = vld [vmem:[#allocation11 + $0x1d4] sm:$0xf0] }
 0x252   :  { %5327 = vmatpush.bf16.msra.mxu3 %v7742_v8 }
 0x253   :  { %5351 = vmatpush.bf16.msrb.mxu1 %v8174_v25  ;;  %v8710_v25 = vld [vmem:[#allocation11 + $0x2f4] sm:$0xf0]  ;;  %5238 = vmatmul.bf16.vlgmr.msrb.gmra.mxu0 %v9415_v40 }
 0x254   :  { %5364 = vmatpush.bf16.msrb.mxu2 %v7026_v29  ;;  %5282 = vmatpush.bf16.msra.mxu0 %v7310_v46  ;;  %v7286_v29 = vor.u32 %v8700_v48, %v7283_v4  ;;  %v7314_v12 = vor.u32 %v8710_v25, %v7313_v24  ;;  %v7214_v46 = vor.u32 %v8682_v0, %v7211_v6  ;;  %v8776_v24 = vld [vmem:[#allocation11 + $0x504] sm:$0xf0]  ;;  %v7769_v25 = vld [vmem:[#allocation11 + $0x670] sm:$0xf]  ;;  %v8659_v0 = vld [vmem:[#allocation11 + $0x164] sm:$0xf] }
 0x255   :  { %v7242_v48 = vor.u32 %v8692_v52, %v7241_v28  ;;  %v7602_v4 = vor.u32 %v8782_v14, %v7601_v41  ;;  %v7123_v6 = vld [vmem:[#allocation11 + $0x178] sm:$0xf0]  ;;  %v8892_v52 = vld [vmem:[#allocation11 + $0x8ac] sm:$0xf]  ;;  %v8051_v41 = vld [vmem:[#allocation11 + $0x8c0] sm:$0xf0] }
 0x256   :  { %5328 = vmatpush.bf16.msra.mxu3 %v7718_v33  ;;  %v7315_v28 = vld [vmem:[#allocation11 + $0x2f8] sm:$0xf0]  ;;  %v8054_v23 = vor.u32 %v8892_v52, %v8051_v41 }
 0x257   :  { %5352 = vmatpush.bf16.msrb.mxu1 %v8150_v49  ;;  %v8704_v49 = vld [vmem:[#allocation11 + $0x2c4] sm:$0xf0] }
 0x258   :  { %5365 = vmatpush.bf16.msrb.mxu2 %v7002_v53  ;;  %5283 = vmatpush.bf16.msra.mxu0 %v7286_v29  ;;  %v7262_v53 = vor.u32 %v8694_v36, %v7259_v37  ;;  %v5111_v10 = vpop.f32.mrf.mxu2  ;;  %v7290_v57 = vor.u32 %v8704_v49, %v7289_v27  ;;  %v8670_v29 = vld [vmem:[#allocation11 + $0x1bc] sm:$0xf]  ;;  %v5070_v31 = vpop.f32.mrf.mxu3  ;;  %v7553_v27 = vld [vmem:[#allocation11 + $0x4c0] sm:$0xf] }
 0x259   :  { %5329 = vmatmul.bf16.vlgmr.msra.gmra.mxu3 %v9415_v40  ;;  %v9490_v33 = vadd.f32 %v5070_v31, %v9478_v11  ;;  %v7166_v49 = vor.u32 %v8670_v29, %v7163_v30  ;;  %v7139_v10 = vld [vmem:[#allocation11 + $0x1a0] sm:$0xf0]  ;;  %v8075_v11 = vld [vmem:[#allocation11 + $0x8f0] sm:$0xf0] }
 0x25a   :  { %5373 = vmatpush.bf16.msrb.mxu3 %v7314_v12  ;;  %v7770_v12 = vor.u32 %v8824_v26, %v7769_v25  ;;  %v7291_v25 = vld [vmem:[#allocation11 + $0x2c8] sm:$0xf0]  ;;  %v8886_v26 = vld [vmem:[#allocation11 + $0x87c] sm:$0xf]  ;;  %v8027_v29 = vld [vmem:[#allocation11 + $0x890] sm:$0xf0] }
 0x25b   :  { %5353 = vmatpush.bf16.msrb.mxu1 %v8126_v19  ;;  %v7625_v19 = vld [vmem:[#allocation11 + $0x550] sm:$0xf] }
 0x25c   :  { %5366 = vmatpush.bf16.msrb.mxu2 %v6978_v35  ;;  %5284 = vmatpush.bf16.msra.mxu0 %v7262_v53  ;;  %v8836_v35 = vld [vmem:[#allocation11 + $0x6e4] sm:$0xf0]  ;;  %v7626_v3 = vor.u32 %v8788_v60, %v7625_v19  ;;  %v7745_v53 = vld [vmem:[#allocation11 + $0x640] sm:$0xf]  ;;  %v7142_v19 = vor.u32 %v8664_v13, %v7139_v10  ;;  %v7721_v60 = vld [vmem:[#allocation11 + $0x610] sm:$0xf] }
 0x25d   :  { %v7818_v5 = vor.u32 %v8836_v35, %v7817_v61  ;;  %v8812_v61 = vld [vmem:[#allocation11 + $0x624] sm:$0xf0]  ;;  %v8078_v35 = vor.u32 %v8898_v55, %v8075_v11  ;;  %v8033_v55 = vld [vmem:[#allocation11 + $0x880] sm:$0xf]  ;;  %v8890_v11 = vld [vmem:[#allocation11 + $0x894] sm:$0xf0] }
 0x25e   :  { %5374 = vmatpush.bf16.msrb.mxu3 %v7290_v57  ;;  %v7554_v57 = vor.u32 %v8770_v50, %v7553_v27  ;;  %v7075_v27 = vld [vmem:[#allocation11 + $0x118] sm:$0xf0] }
 0x25f   :  { %5354 = vmatpush.bf16.msrb.mxu1 %v8102_v16  ;;  %v9487_v8 = vpop.f32.mrf.mxu1  ;;  %v7187_v16 = vld [vmem:[#allocation11 + $0x200] sm:$0xf0] }
 0x260   :  { %5367 = vmatpush.bf16.msrb.mxu2 %v6954_v18  ;;  %5285 = vmatpush.bf16.msra.mxu0 %v7238_v59  ;;  %v7794_v18 = vor.u32 %v8830_v7, %v7793_v43  ;;  %v8764_v59 = vld [vmem:[#allocation11 + $0x4a4] sm:$0xf0]  ;;  %v7145_v43 = vld [vmem:[#allocation11 + $0x190] sm:$0xf] }
 0x261   :  { %v7530_v14 = vor.u32 %v8764_v59, %v7529_v58  ;;  %v8668_v7 = vld [vmem:[#allocation11 + $0x1a4] sm:$0xf0]  ;;  %v8689_v58 = vld [vmem:[#allocation11 + $0x254] sm:$0xf]  ;;  %v8874_v59 = vld [vmem:[#allocation11 + $0x81c] sm:$0xf] }
 0x262   :  { %5355 = vmatmul.bf16.vlgmr.msrb.gmra.mxu1 %v9462_v9  ;;  %5375 = vmatpush.bf16.msrb.mxu3 %v7266_v56  ;;  %v8707_v56 = vld [vmem:[#allocation11 + $0x2e4] sm:$0xf] }
 0x263   :  { %5399 = vmatpush.bf16.msra.mxu1 %v7698_v38  ;;  %5368 = vmatmul.bf16.vlgmr.msrb.gmra.mxu2 %v9362_v63  ;;  %v7577_v38 = vld [vmem:[#allocation11 + $0x4f0] sm:$0xf] }
 0x264   :  { %5412 = vmatpush.bf16.msra.mxu2 %v7890_v51  ;;  %5286 = vmatpush.bf16.msra.mxu0 %v7214_v46  ;;  %v7190_v51 = vor.u32 %v8676_v15, %v7187_v16  ;;  %v7578_v37 = vor.u32 %v8776_v24, %v7577_v38  ;;  %v7722_v15 = vor.u32 %v8812_v61, %v7721_v60  ;;  %v7099_v38 = vld [vmem:[#allocation11 + $0x148] sm:$0xf0]  ;;  %v7979_v60 = vld [vmem:[#allocation11 + $0x830] sm:$0xf0] }
 0x265   :  { %v7126_v16 = vor.u32 %v8659_v0, %v7123_v6  ;;  %v7146_v24 = vor.u32 %v8668_v7, %v7145_v43  ;;  %v7102_v31 = vor.u32 %v8653_v32, %v7099_v38  ;;  %v8884_v0 = vld [vmem:[#allocation11 + $0x864] sm:$0xf0]  ;;  %v7955_v43 = vld [vmem:[#allocation11 + $0x800] sm:$0xf0]  ;;  %v7003_v32 = vld [vmem:[#allocation11 + $0x88] sm:$0xf0] }
 0x266   :  { %5376 = vmatpush.bf16.msrb.mxu3 %v7242_v48  ;;  %v9492_v36 = vpop.f32.mrf.mxu2  ;;  %v8081_v48 = vld [vmem:[#allocation11 + $0x8e0] sm:$0xf]  ;;  %v8677_v38 = vld [vmem:[#allocation11 + $0x1f4] sm:$0xf] }
 0x267   :  { %5400 = vmatpush.bf16.msra.mxu1 %v7674_v39  ;;  %v7193_v39 = vld [vmem:[#allocation11 + $0x1f0] sm:$0xf]  ;;  %v5150_v45 = vpop.f32.mrf.mxu1 }
 0x268   :  { %5413 = vmatpush.bf16.msra.mxu2 %v7866_v47  ;;  %v8680_v47 = vld [vmem:[#allocation11 + $0x204] sm:$0xf0]  ;;  %5287 = vmatpush.bf16.msra.mxu0 %v7190_v51  ;;  %v8701_v51 = vld [vmem:[#allocation11 + $0x2b4] sm:$0xf]  ;;  %v8003_v45 = vld [vmem:[#allocation11 + $0x860] sm:$0xf0] }
 0x269   :  { %v7194_v54 = vor.u32 %v8680_v47, %v7193_v39  ;;  %v8030_v39 = vor.u32 %v8886_v26, %v8027_v29  ;;  %v8647_v47 = vld [vmem:[#allocation11 + $0x104] sm:$0xf] }
 0x26a   :  { %5377 = vmatpush.bf16.msrb.mxu3 %v7218_v2  ;;  %v8057_v2 = vld [vmem:[#allocation11 + $0x8b0] sm:$0xf] }
 0x26b   :  { %5401 = vmatpush.bf16.msra.mxu1 %v7650_v20  ;;  %v7746_v20 = vor.u32 %v8818_v17, %v7745_v53  ;;  %v7267_v53 = vld [vmem:[#allocation11 + $0x298] sm:$0xf0]  ;;  %v8880_v17 = vld [vmem:[#allocation11 + $0x84c] sm:$0xf] }
 0x26c   :  { %5414 = vmatpush.bf16.msra.mxu2 %v7842_v44  ;;  %v7169_v44 = vld [vmem:[#allocation11 + $0x1c0] sm:$0xf]  ;;  %5288 = vmatpush.bf16.msra.mxu0 %v7166_v49  ;;  %v8695_v49 = vld [vmem:[#allocation11 + $0x284] sm:$0xf] }
 0x26e   :  { %5378 = vmatpush.bf16.msrb.mxu3 %v7194_v54  ;;  %v5163_v46 = vpop.f32.mrf.mxu2  ;;  %v7078_v54 = vor.u32 %v8647_v47, %v7075_v27  ;;  %v6979_v47 = vld [vmem:[#allocation11 + $0x58] sm:$0xf0]  ;;  %v8671_v27 = vld [vmem:[#allocation11 + $0x1c4] sm:$0xf] }
 0x26f   :  { %5402 = vmatpush.bf16.msra.mxu1 %v7626_v3  ;;  %v5072_v3 = vpop.f32.mrf.mxu3  ;;  %v7219_v46 = vld [vmem:[#allocation11 + $0x238] sm:$0xf0] }
 0x270   :  { %5415 = vmatpush.bf16.msra.mxu2 %v7818_v5  ;;  %v7170_v5 = vor.u32 %v8674_v34, %v7169_v44  ;;  %5289 = vmatpush.bf16.msra.mxu0 %v7142_v19  ;;  %v8641_v44 = vld [vmem:[#allocation11 + $0xd4] sm:$0xf]  ;;  %v7051_v34 = vld [vmem:[#allocation11 + $0xe8] sm:$0xf0]  ;;  %v8635_v3 = vld [vmem:[#allocation11 + $0xa4] sm:$0xf] }
 0x271   :  { %v7243_v19 = vld [vmem:[#allocation11 + $0x268] sm:$0xf0]  ;;  %v7054_v61 = vor.u32 %v8641_v44, %v7051_v34 }
 0x272   :  { %5379 = vmatpush.bf16.msrb.mxu3 %v7170_v5  ;;  %v7246_v6 = vor.u32 %v8689_v58, %v7243_v19  ;;  %v7027_v5 = vld [vmem:[#allocation11 + $0xb8] sm:$0xf0]  ;;  %v6955_v58 = vld [vmem:[#allocation11 + $0x28] sm:$0xf0]  ;;  %v8665_v19 = vld [vmem:[#allocation11 + $0x194] sm:$0xf] }
 0x273   :  { %5403 = vmatpush.bf16.msra.mxu1 %v7602_v4  ;;  %v8902_v4 = vld [vmem:[#allocation11 + $0x8f4] sm:$0xf0]  ;;  %5290 = vmatmul.bf16.vlgmr.msra.gmra.mxu0 %v9365_v42 }
 0x274   :  { %5416 = vmatpush.bf16.msra.mxu2 %v7794_v18  ;;  %5334 = vmatpush.bf16.msrb.mxu0 %v8078_v35  ;;  %v7318_v18 = vor.u32 %v8707_v56, %v7315_v28  ;;  %v8082_v30 = vor.u32 %v8902_v4, %v8081_v48  ;;  %v8009_v35 = vld [vmem:[#allocation11 + $0x850] sm:$0xf]  ;;  %v7982_v56 = vor.u32 %v8874_v59, %v7979_v60  ;;  %v8683_v28 = vld [vmem:[#allocation11 + $0x224] sm:$0xf]  ;;  %v8878_v48 = vld [vmem:[#allocation11 + $0x834] sm:$0xf0] }
 0x275   :  { %v8010_v7 = vor.u32 %v8884_v0, %v8009_v35  ;;  %v7222_v4 = vor.u32 %v8683_v28, %v7219_v46  ;;  %v7147_v59 = vld [vmem:[#allocation11 + $0x1a8] sm:$0xf0]  ;;  %v8899_v35 = vld [vmem:[#allocation11 + $0x8e4] sm:$0xf]  ;;  %v7913_v28 = vld [vmem:[#allocation11 + $0x790] sm:$0xf] }
 0x276   :  { %5380 = vmatpush.bf16.msrb.mxu3 %v7146_v24  ;;  %v8862_v24 = vld [vmem:[#allocation11 + $0x7bc] sm:$0xf] }
 0x277   :  { %5404 = vmatpush.bf16.msra.mxu1 %v7578_v37  ;;  %v8896_v37 = vld [vmem:[#allocation11 + $0x8c4] sm:$0xf0]  ;;  %v5122_v50 = vpop.f32.mrf.mxu3 }
 0x278   :  { %5417 = vmatpush.bf16.msra.mxu2 %v7770_v12  ;;  %5335 = vmatpush.bf16.msrb.mxu0 %v8054_v23  ;;  %v7294_v12 = vor.u32 %v8701_v51, %v7291_v25  ;;  %v9498_v13 = vadd.f32 %v5122_v50, %v9481_v22  ;;  %v8058_v10 = vor.u32 %v8896_v37, %v8057_v2  ;;  %v8629_v23 = vld [vmem:[#allocation11 + $0x74] sm:$0xf]  ;;  %v7195_v51 = vld [vmem:[#allocation11 + $0x208] sm:$0xf0]  ;;  %v7171_v50 = vld [vmem:[#allocation11 + $0x1d8] sm:$0xf0] }
 0x279   :  { %5381 = vmatmul.bf16.vlgmr.msrb.gmra.mxu3 %v9365_v42  ;;  %v8034_v22 = vor.u32 %v8890_v11, %v8033_v55  ;;  %v7931_v25 = vld [vmem:[#allocation11 + $0x7d0] sm:$0xf0]  ;;  %v7006_v29 = vor.u32 %v8629_v23, %v7003_v32  ;;  %v7198_v37 = vor.u32 %v8677_v38, %v7195_v51  ;;  %v7937_v11 = vld [vmem:[#allocation11 + $0x7c0] sm:$0xf]  ;;  %v7174_v44 = vor.u32 %v8671_v27, %v7171_v50  ;;  %v8059_v38 = vld [vmem:[#allocation11 + $0x8c8] sm:$0xf0] }
 0x27a   :  { %5425 = vmatpush.bf16.msra.mxu3 %v8082_v30  ;;  %v7961_v30 = vld [vmem:[#allocation11 + $0x7f0] sm:$0xf]  ;;  %v8893_v23 = vld [vmem:[#allocation11 + $0x8b4] sm:$0xf]  ;;  %v7457_v51 = vld [vmem:[#allocation11 + $0x400] sm:$0xf] }
 0x27b   :  { %5405 = vmatpush.bf16.msra.mxu1 %v7554_v57  ;;  %v7270_v57 = vor.u32 %v8695_v49, %v7267_v53  ;;  %v8856_v53 = vld [vmem:[#allocation11 + $0x78c] sm:$0xf]  ;;  %v8035_v27 = vld [vmem:[#allocation11 + $0x898] sm:$0xf0]  ;;  %v8740_v50 = vld [vmem:[#allocation11 + $0x3e4] sm:$0xf0] }
 0x27c   :  { %5418 = vmatpush.bf16.msra.mxu2 %v7746_v20  ;;  %5336 = vmatpush.bf16.msrb.mxu0 %v8030_v39  ;;  %v8006_v20 = vor.u32 %v8880_v17, %v8003_v45  ;;  %v8623_v39 = vld [vmem:[#allocation11 + $0x44] sm:$0xf] }
 0x27d   :  { %v7907_v17 = vld [vmem:[#allocation11 + $0x7a0] sm:$0xf0]  ;;  %v6982_v55 = vor.u32 %v8623_v39, %v6979_v47  ;;  %v7843_v39 = vld [vmem:[#allocation11 + $0x718] sm:$0xf0] }
 0x27e   :  { %5426 = vmatpush.bf16.msra.mxu3 %v8058_v10  ;;  %v7505_v10 = vld [vmem:[#allocation11 + $0x460] sm:$0xf]  ;;  %v7910_v34 = vor.u32 %v8856_v53, %v7907_v17  ;;  %v8887_v47 = vld [vmem:[#allocation11 + $0x884] sm:$0xf] }
 0x27f   :  { %5406 = vmatpush.bf16.msra.mxu1 %v7530_v14  ;;  %v9501_v52 = vpop.f32.mrf.mxu1  ;;  %v5124_v41 = vpop.f32.mrf.mxu3  ;;  %v8868_v14 = vld [vmem:[#allocation11 + $0x7ec] sm:$0xf] }
 0x280   :  { %5419 = vmatpush.bf16.msra.mxu2 %v7722_v15  ;;  %5337 = vmatpush.bf16.msrb.mxu0 %v8006_v20  ;;  %v7030_v15 = vor.u32 %v8635_v3, %v7027_v5  ;;  %v8617_v20 = vld [vmem:[#allocation11 + $0x14] sm:$0xf]  ;;  %v8752_v3 = vld [vmem:[#allocation11 + $0x444] sm:$0xf0] }
 0x281   :  { %v6958_v5 = vor.u32 %v8617_v20, %v6955_v58  ;;  %v8860_v41 = vld [vmem:[#allocation11 + $0x7a4] sm:$0xf0]  ;;  %v7819_v20 = vld [vmem:[#allocation11 + $0x6e8] sm:$0xf0]  ;;  %v8734_v58 = vld [vmem:[#allocation11 + $0x3b4] sm:$0xf0] }
 0x282   :  { %5407 = vmatmul.bf16.vlgmr.msra.gmra.mxu1 %v9400_v62  ;;  %5427 = vmatpush.bf16.msra.mxu3 %v8034_v22  ;;  %v8851_v22 = vld [vmem:[#allocation11 + $0x764] sm:$0xf]  ;;  %v7914_v32 = vor.u32 %v8860_v41, %v7913_v28  ;;  %v7385_v28 = vld [vmem:[#allocation11 + $0x370] sm:$0xf]  ;;  %v8728_v41 = vld [vmem:[#allocation11 + $0x384] sm:$0xf0] }
 0x283   :  { %5451 = vmatpush.bf16.msrb.mxu1 %v7126_v16  ;;  %5420 = vmatmul.bf16.vlgmr.msra.gmra.mxu2 %v9415_v40  ;;  %v7985_v16 = vld [vmem:[#allocation11 + $0x820] sm:$0xf] }
 0x284   :  { %5464 = vmatpush.bf16.msrb.mxu2 %v7318_v18  ;;  %5338 = vmatpush.bf16.msrb.mxu0 %v7982_v56  ;;  %v7958_v18 = vor.u32 %v8868_v14, %v7955_v43  ;;  %v7986_v26 = vor.u32 %v8878_v48, %v7985_v16  ;;  %v7481_v56 = vld [vmem:[#allocation11 + $0x430] sm:$0xf]  ;;  %v7150_v14 = vor.u32 %v8665_v19, %v7147_v59 }
 0x285   :  { %v7482_v48 = vor.u32 %v8752_v3, %v7481_v56 }
 0x286   :  { %5428 = vmatpush.bf16.msra.mxu3 %v8010_v7  ;;  %v9503_v2 = vpop.f32.mrf.mxu2  ;;  %v8755_v7 = vld [vmem:[#allocation11 + $0x464] sm:$0xf] }
 0x287   :  { %5452 = vmatpush.bf16.msrb.mxu1 %v7102_v31  ;;  %v8872_v31 = vld [vmem:[#allocation11 + $0x804] sm:$0xf0]  ;;  %v5202_v49 = vpop.f32.mrf.mxu1 }
 0x288   :  { %5465 = vmatpush.bf16.msrb.mxu2 %v7294_v12  ;;  %5339 = vmatpush.bf16.msrb.mxu0 %v7958_v18  ;;  %v7934_v12 = vor.u32 %v8862_v24, %v7931_v25  ;;  %v7962_v45 = vor.u32 %v8872_v31, %v7961_v30  ;;  %v7867_v18 = vld [vmem:[#allocation11 + $0x748] sm:$0xf0]  ;;  %v8746_v24 = vld [vmem:[#allocation11 + $0x414] sm:$0xf0]  ;;  %v8062_v31 = vor.u32 %v8893_v23, %v8059_v38  ;;  %v7433_v49 = vld [vmem:[#allocation11 + $0x3d0] sm:$0xf] }
 0x289   :  { %v7483_v30 = vld [vmem:[#allocation11 + $0x448] sm:$0xf0]  ;;  %v8869_v23 = vld [vmem:[#allocation11 + $0x7f4] sm:$0xf]  ;;  %v7361_v38 = vld [vmem:[#allocation11 + $0x340] sm:$0xf] }
 0x28a   :  { %5429 = vmatpush.bf16.msra.mxu3 %v7986_v26 }
 0x28b   :  { %5453 = vmatpush.bf16.msrb.mxu1 %v7078_v54  ;;  %v8758_v54 = vld [vmem:[#allocation11 + $0x474] sm:$0xf0] }
 0x28c   :  { %5466 = vmatpush.bf16.msrb.mxu2 %v7270_v57  ;;  %v8866_v57 = vld [vmem:[#allocation11 + $0x7d4] sm:$0xf0]  ;;  %5340 = vmatpush.bf16.msrb.mxu0 %v7934_v12  ;;  %v7506_v60 = vor.u32 %v8758_v54, %v7505_v10  ;;  %v8839_v12 = vld [vmem:[#allocation11 + $0x704] sm:$0xf]  ;;  %v7459_v54 = vld [vmem:[#allocation11 + $0x418] sm:$0xf0] }
 0x28d   :  { %v7938_v0 = vor.u32 %v8866_v57, %v7937_v11  ;;  %v8743_v10 = vld [vmem:[#allocation11 + $0x404] sm:$0xf]  ;;  %v8038_v11 = vor.u32 %v8887_v47, %v8035_v27  ;;  %v7434_v57 = vor.u32 %v8740_v50, %v7433_v49  ;;  %v7939_v50 = vld [vmem:[#allocation11 + $0x7d8] sm:$0xf0] }
 0x28e   :  { %5430 = vmatpush.bf16.msra.mxu3 %v7962_v45  ;;  %v5215_v46 = vpop.f32.mrf.mxu2  ;;  %v5083_v17 = vpop.f32.mrf.mxu0  ;;  %v7846_v45 = vor.u32 %v8839_v12, %v7843_v39  ;;  %v7462_v19 = vor.u32 %v8743_v10, %v7459_v54  ;;  %v8815_v12 = vld [vmem:[#allocation11 + $0x644] sm:$0xf]  ;;  %v7747_v39 = vld [vmem:[#allocation11 + $0x658] sm:$0xf0]  ;;  %v8273_v10 = vld [vmem:[#allocation11 + $0xa60] sm:$0xf] }
 0x28f   :  { %5454 = vmatpush.bf16.msrb.mxu1 %v7054_v61  ;;  %v7891_v61 = vld [vmem:[#allocation11 + $0x778] sm:$0xf0]  ;;  %v8863_v47 = vld [vmem:[#allocation11 + $0x7c4] sm:$0xf]  ;;  %v8950_v54 = vld [vmem:[#allocation11 + $0xa74] sm:$0xf0] }
 0x290   :  { %5467 = vmatpush.bf16.msrb.mxu2 %v7246_v6  ;;  %v8083_v6 = vld [vmem:[#allocation11 + $0x8f8] sm:$0xf0]  ;;  %5341 = vmatpush.bf16.msrb.mxu0 %v7910_v34  ;;  %v7894_v43 = vor.u32 %v8851_v22, %v7891_v61  ;;  %v7409_v34 = vld [vmem:[#allocation11 + $0x3a0] sm:$0xf]  ;;  %v7435_v22 = vld [vmem:[#allocation11 + $0x3e8] sm:$0xf0] }
 0x291   :  { %v8086_v16 = vor.u32 %v8899_v35, %v8083_v6  ;;  %v7410_v61 = vor.u32 %v8734_v58, %v7409_v34  ;;  %v8827_v35 = vld [vmem:[#allocation11 + $0x6a4] sm:$0xf]  ;;  %v8809_v34 = vld [vmem:[#allocation11 + $0x614] sm:$0xf]  ;;  %v7723_v58 = vld [vmem:[#allocation11 + $0x628] sm:$0xf0] }
 0x292   :  { %5431 = vmatpush.bf16.msra.mxu3 %v7938_v0  ;;  %v7795_v0 = vld [vmem:[#allocation11 + $0x6b8] sm:$0xf0]  ;;  %v8875_v6 = vld [vmem:[#allocation11 + $0x824] sm:$0xf] }
 0x293   :  { %5455 = vmatpush.bf16.msrb.mxu1 %v7030_v15  ;;  %v7507_v15 = vld [vmem:[#allocation11 + $0x478] sm:$0xf0]  ;;  %5342 = vmatmul.bf16.vlgmr.msrb.gmra.mxu0 %v9429_v1 }
 0x294   :  { %5468 = vmatpush.bf16.msrb.mxu2 %v7222_v4  ;;  %5386 = vmatpush.bf16.msra.mxu0 %v7506_v60  ;;  %v8845_v4 = vld [vmem:[#allocation11 + $0x734] sm:$0xf]  ;;  %v7510_v25 = vor.u32 %v8755_v7, %v7507_v15  ;;  %v9514_v3 = vpop.f32.mrf.mxu3  ;;  %v8731_v7 = vld [vmem:[#allocation11 + $0x3a4] sm:$0xf]  ;;  %v7411_v15 = vld [vmem:[#allocation11 + $0x3b8] sm:$0xf0] }
 0x295   :  { %v7870_v26 = vor.u32 %v8845_v4, %v7867_v18  ;;  %v8737_v60 = vld [vmem:[#allocation11 + $0x3d4] sm:$0xf]  ;;  %v7771_v18 = vld [vmem:[#allocation11 + $0x688] sm:$0xf0] }
 0x296   :  { %5432 = vmatpush.bf16.msra.mxu3 %v7914_v32  ;;  %v7438_v46 = vor.u32 %v8737_v60, %v7435_v22  ;;  %v8821_v4 = vld [vmem:[#allocation11 + $0x674] sm:$0xf]  ;;  %v7963_v32 = vld [vmem:[#allocation11 + $0x808] sm:$0xf0] }
 0x297   :  { %5456 = vmatpush.bf16.msrb.mxu1 %v7006_v29  ;;  %v8749_v29 = vld [vmem:[#allocation11 + $0x434] sm:$0xf]  ;;  %v7915_v22 = vld [vmem:[#allocation11 + $0x7a8] sm:$0xf0] }
 0x298   :  { %5469 = vmatpush.bf16.msrb.mxu2 %v7198_v37  ;;  %5387 = vmatpush.bf16.msra.mxu0 %v7482_v48  ;;  %v7458_v37 = vor.u32 %v8746_v24, %v7457_v51  ;;  %v7486_v53 = vor.u32 %v8749_v29, %v7483_v30  ;;  %v7386_v48 = vor.u32 %v8728_v41, %v7385_v28  ;;  %v8722_v51 = vld [vmem:[#allocation11 + $0x354] sm:$0xf0]  ;;  %v7387_v29 = vld [vmem:[#allocation11 + $0x388] sm:$0xf0]  ;;  %v8857_v60 = vld [vmem:[#allocation11 + $0x794] sm:$0xf] }
 0x299   :  { %5433 = vmatmul.bf16.vlgmr.msra.gmra.mxu3 %v9429_v1  ;;  %v7414_v24 = vor.u32 %v8731_v7, %v7411_v15  ;;  %v7339_v28 = vld [vmem:[#allocation11 + $0x328] sm:$0xf0] }
 0x29a   :  { %5477 = vmatpush.bf16.msrb.mxu3 %v7510_v25  ;;  %v7774_v25 = vor.u32 %v8821_v4, %v7771_v18  ;;  %v8938_v4 = vld [vmem:[#allocation11 + $0xa14] sm:$0xf0] }
 0x29b   :  { %5457 = vmatpush.bf16.msrb.mxu1 %v6982_v55  ;;  %v9509_v55 = vadd.f32 %v5083_v17, %v9490_v33  ;;  %v8716_v17 = vld [vmem:[#allocation11 + $0x324] sm:$0xf0] }
 0x29c   :  { %5470 = vmatpush.bf16.msrb.mxu2 %v7174_v44  ;;  %5388 = vmatpush.bf16.msra.mxu0 %v7458_v37  ;;  %v8881_v44 = vld [vmem:[#allocation11 + $0x854] sm:$0xf]  ;;  %v7362_v37 = vor.u32 %v8722_v51, %v7361_v38  ;;  %v5176_v49 = vpop.f32.mrf.mxu3  ;;  %v8251_v38 = vld [vmem:[#allocation11 + $0xa48] sm:$0xf0] }
 0x29d   :  { %v8929_v49 = vld [vmem:[#allocation11 + $0x9d4] sm:$0xf] }
 0x29e   :  { %5478 = vmatpush.bf16.msrb.mxu3 %v7486_v53  ;;  %v7337_v53 = vld [vmem:[#allocation11 + $0x310] sm:$0xf] }
 0x29f   :  { %5458 = vmatpush.bf16.msrb.mxu1 %v6958_v5  ;;  %v9512_v56 = vpop.f32.mrf.mxu1  ;;  %v7987_v5 = vld [vmem:[#allocation11 + $0x838] sm:$0xf0] }
 0x2a0   :  { %5471 = vmatpush.bf16.msrb.mxu2 %v7150_v14  ;;  %5389 = vmatpush.bf16.msra.mxu0 %v7434_v57  ;;  %v5085_v14 = vpop.f32.mrf.mxu0  ;;  %v8719_v57 = vld [vmem:[#allocation11 + $0x344] sm:$0xf] }
 0x2a1   :  { %v8947_v14 = vld [vmem:[#allocation11 + $0xa64] sm:$0xf] }
 0x2a2   :  { %5459 = vmatmul.bf16.vlgmr.msrb.gmra.mxu1 %v9362_v63  ;;  %v8833_v63 = vld [vmem:[#allocation11 + $0x6d4] sm:$0xf]  ;;  %5479 = vmatpush.bf16.msrb.mxu3 %v7462_v19 }
 0x2a3   :  { %5503 = vmatpush.bf16.msra.mxu1 %v7894_v43  ;;  %5472 = vmatmul.bf16.vlgmr.msrb.gmra.mxu2 %v9365_v42  ;;  %v8011_v42 = vld [vmem:[#allocation11 + $0x868] sm:$0xf0]  ;;  %v7822_v59 = vor.u32 %v8833_v63, %v7819_v20  ;;  %v7798_v43 = vor.u32 %v8827_v35, %v7795_v0  ;;  %v7363_v63 = vld [vmem:[#allocation11 + $0x358] sm:$0xf0]  ;;  %v8944_v35 = vld [vmem:[#allocation11 + $0xa44] sm:$0xf0] }
 0x2a4   :  { %5516 = vmatpush.bf16.msra.mxu2 %v8086_v16  ;;  %v8014_v33 = vor.u32 %v8881_v44, %v8011_v42  ;;  %5390 = vmatpush.bf16.msra.mxu0 %v7410_v61  ;;  %v7990_v16 = vor.u32 %v8875_v6, %v7987_v5  ;;  %v7942_v44 = vor.u32 %v8863_v47, %v7939_v50  ;;  %v8249_v61 = vld [vmem:[#allocation11 + $0xa30] sm:$0xf]  ;;  %v8713_v5 = vld [vmem:[#allocation11 + $0x314] sm:$0xf]  ;;  %v5226_v15 = vpop.f32.mrf.mxu3  ;;  %v8926_v47 = vld [vmem:[#allocation11 + $0x9b4] sm:$0xf0] }
 0x2a5   :  { %v7338_v42 = vor.u32 %v8716_v17, %v7337_v53  ;;  %v7726_v6 = vor.u32 %v8809_v34, %v7723_v58  ;;  %v8250_v7 = vor.u32 %v8944_v35, %v8249_v61  ;;  %v8153_v17 = vld [vmem:[#allocation11 + $0x970] sm:$0xf]  ;;  %v8908_v61 = vld [vmem:[#allocation11 + $0x924] sm:$0xf0] }
 0x2a6   :  { %5480 = vmatpush.bf16.msrb.mxu3 %v7438_v46  ;;  %v9516_v30 = vpop.f32.mrf.mxu2  ;;  %v7918_v46 = vor.u32 %v8857_v60, %v7915_v22  ;;  %v8155_v60 = vld [vmem:[#allocation11 + $0x988] sm:$0xf0] }
 0x2a7   :  { %5504 = vmatpush.bf16.msra.mxu1 %v7870_v26  ;;  %v8725_v26 = vld [vmem:[#allocation11 + $0x374] sm:$0xf]  ;;  %v5254_v27 = vpop.f32.mrf.mxu1 }
 0x2a8   :  { %5517 = vmatpush.bf16.msra.mxu2 %v8062_v31  ;;  %5391 = vmatpush.bf16.msra.mxu0 %v7386_v48  ;;  %v7966_v31 = vor.u32 %v8869_v23, %v7963_v32  ;;  %v5135_v20 = vpop.f32.mrf.mxu0  ;;  %v8225_v48 = vld [vmem:[#allocation11 + $0xa00] sm:$0xf]  ;;  %v8941_v32 = vld [vmem:[#allocation11 + $0xa34] sm:$0xf] }
 0x2a9   :  { %v5136_v19 = vadd.f32 %v5135_v20, %v9498_v13 }
 0x2aa   :  { %5481 = vmatpush.bf16.msrb.mxu3 %v7414_v24  ;;  %v8201_v24 = vld [vmem:[#allocation11 + $0x9d0] sm:$0xf] }
 0x2ab   :  { %5505 = vmatpush.bf16.msra.mxu1 %v7846_v45  ;;  %v7390_v45 = vor.u32 %v8725_v26, %v7387_v29  ;;  %v5149_v0 = vadd.f32 %v9487_v8, %v5136_v19  ;;  %v8935_v26 = vld [vmem:[#allocation11 + $0xa04] sm:$0xf]  ;;  %v8227_v29 = vld [vmem:[#allocation11 + $0xa18] sm:$0xf0] }
 0x2ac   :  { %5518 = vmatpush.bf16.msra.mxu2 %v8038_v11  ;;  %v7750_v11 = vor.u32 %v8815_v12, %v7747_v39  ;;  %5392 = vmatpush.bf16.msra.mxu0 %v7362_v37  ;;  %v5228_v12 = vpop.f32.mrf.mxu3  ;;  %v8177_v39 = vld [vmem:[#allocation11 + $0x9a0] sm:$0xf] }
 0x2ad   :  { %v5162_v13 = vadd.f32 %v9492_v36, %v5149_v0  ;;  %v8226_v36 = vor.u32 %v8938_v4, %v8225_v48  ;;  %v8178_v53 = vor.u32 %v8926_v47, %v8177_v39  ;;  %v8773_v39 = vld [vmem:[#allocation11 + $0x4f4] sm:$0xf]  ;;  %v7579_v47 = vld [vmem:[#allocation11 + $0x508] sm:$0xf0] }
 0x2ae   :  { %5482 = vmatpush.bf16.msrb.mxu3 %v7390_v45  ;;  %v5267_v41 = vpop.f32.mrf.mxu2  ;;  %v8920_v45 = vld [vmem:[#allocation11 + $0x984] sm:$0xf0] }
 0x2af   :  { %5506 = vmatpush.bf16.msra.mxu1 %v7822_v59  ;;  %v8274_v59 = vor.u32 %v8950_v54, %v8273_v10  ;;  %v5175_v8 = vadd.f32 %v9514_v3, %v5162_v13  ;;  %v8254_v3 = vor.u32 %v8941_v32, %v8251_v38  ;;  %v8131_v41 = vld [vmem:[#allocation11 + $0x958] sm:$0xf0]  ;;  %v8797_v13 = vld [vmem:[#allocation11 + $0x5b4] sm:$0xf] }
 0x2b0   :  { %5519 = vmatpush.bf16.msra.mxu2 %v8014_v33  ;;  %v7366_v33 = vor.u32 %v8719_v57, %v7363_v63  ;;  %5393 = vmatpush.bf16.msra.mxu0 %v7338_v42  ;;  %v5137_v23 = vpop.f32.mrf.mxu0  ;;  %v8179_v57 = vld [vmem:[#allocation11 + $0x9b8] sm:$0xf0]  ;;  %v8154_v63 = vor.u32 %v8920_v45, %v8153_v17  ;;  %v8914_v42 = vld [vmem:[#allocation11 + $0x954] sm:$0xf0] }
 0x2b1   :  { %v9524_v51 = vpack.c.bf16 %v5175_v8, %v9509_v55  ;;  %v8791_v23 = vld [vmem:[#allocation11 + $0x584] sm:$0xf]  ;;  %v7651_v32 = vld [vmem:[#allocation11 + $0x598] sm:$0xf0] }
 0x2b2   :  { %5483 = vmatpush.bf16.msrb.mxu3 %v7366_v33  ;;  %v8105_v33 = vld [vmem:[#allocation11 + $0x910] sm:$0xf]  ;;  %v7654_v38 = vor.u32 %v8791_v23, %v7651_v32 }
 0x2b3   :  { %5507 = vmatpush.bf16.msra.mxu1 %v7798_v43  ;;  %v8275_v43 = vld [vmem:[#allocation11 + $0xa78] sm:$0xf0]  ;;  %5394 = vmatmul.bf16.vlgmr.msra.gmra.mxu0 %v9398_v21 }
 0x2b4   :  { %5520 = vmatpush.bf16.msra.mxu2 %v7990_v16  ;;  %5438 = vmatpush.bf16.msrb.mxu0 %v8274_v59  ;;  %v7342_v16 = vor.u32 %v8713_v5, %v7339_v28  ;;  %v8278_v18 = vor.u32 %v8947_v14, %v8275_v43  ;;  %v8917_v59 = vld [vmem:[#allocation11 + $0x974] sm:$0xf]  ;;  %v7699_v5 = vld [vmem:[#allocation11 + $0x5f8] sm:$0xf0]  ;;  %v8911_v28 = vld [vmem:[#allocation11 + $0x944] sm:$0xf] }
 0x2b5   :  { %v8134_v43 = vor.u32 %v8911_v28, %v8131_v41 }
 0x2b6   :  { %5484 = vmatpush.bf16.msrb.mxu3 %v7342_v16  ;;  %v8107_v16 = vld [vmem:[#allocation11 + $0x928] sm:$0xf0] }
 0x2b7   :  { %5508 = vmatpush.bf16.msra.mxu1 %v7774_v25  ;;  %v8932_v25 = vld [vmem:[#allocation11 + $0x9e4] sm:$0xf0] }
 0x2b8   :  { %5521 = vmatpush.bf16.msra.mxu2 %v7966_v31  ;;  %5439 = vmatpush.bf16.msrb.mxu0 %v8250_v7  ;;  %v9529_v31 = vld [vmem:[#allocation13] sm:$0x3f]  ;;  %v8202_v37 = vor.u32 %v8932_v25, %v8201_v24  ;;  %v5187_v27 = vpop.f32.mrf.mxu0  ;;  %v7675_v7 = vld [vmem:[#allocation11 + $0x5c8] sm:$0xf0] }
 0x2b9   :  { %5485 = vmatmul.bf16.vlgmr.msrb.gmra.mxu3 %v9398_v21  ;;  %v3306_v55 = vperm.slane %v9529_v31, 2  ;;  %v7678_v4 = vor.u32 %v8797_v13, %v7675_v7  ;;  %v7627_v24 = vld [vmem:[#allocation11 + $0x568] sm:$0xf0] }
 0x2ba   :  { %5529 = vmatpush.bf16.msra.mxu3 %v8278_v18 }
 0x2bb   :  { %5509 = vmatpush.bf16.msra.mxu1 %v7750_v11  ;;  %v5188_v50 = vadd.f32 %v5187_v27, %v3306_v55  ;;  %v8923_v11 = vld [vmem:[#allocation11 + $0x9a4] sm:$0xf] }
 0x2bc   :  { %5522 = vmatpush.bf16.msra.mxu2 %v7942_v44  ;;  %5440 = vmatpush.bf16.msrb.mxu0 %v8226_v36  ;;  %v8129_v44 = vld [vmem:[#allocation11 + $0x940] sm:$0xf]  ;;  %v8182_v34 = vor.u32 %v8923_v11, %v8179_v57  ;;  %v9538_v0 = vpop.f32.mrf.mxu3  ;;  %v8785_v36 = vld [vmem:[#allocation11 + $0x554] sm:$0xf] }
 0x2bd   :  { %v5201_v21 = vadd.f32 %v9501_v52, %v5188_v50  ;;  %v8130_v52 = vor.u32 %v8914_v42, %v8129_v44  ;;  %v7630_v25 = vor.u32 %v8785_v36, %v7627_v24  ;;  %v7555_v50 = vld [vmem:[#allocation11 + $0x4d8] sm:$0xf0] }
 0x2be   :  { %5530 = vmatpush.bf16.msra.mxu3 %v8254_v3  ;;  %v8779_v3 = vld [vmem:[#allocation11 + $0x524] sm:$0xf] }
 0x2bf   :  { %5510 = vmatpush.bf16.msra.mxu1 %v7726_v6  ;;  %v9533_v10 = vpop.f32.mrf.mxu1  ;;  %v5214_v20 = vadd.f32 %v9503_v2, %v5201_v21  ;;  %v8158_v6 = vor.u32 %v8917_v59, %v8155_v60  ;;  %v8803_v2 = vld [vmem:[#allocation11 + $0x5e4] sm:$0xf]  ;;  %v8761_v21 = vld [vmem:[#allocation11 + $0x494] sm:$0xf]  ;;  %v3308_v60 = vperm.slane %v9529_v31, 4 }
 0x2c0   :  { %5523 = vmatpush.bf16.msra.mxu2 %v7918_v46  ;;  %5441 = vmatpush.bf16.msrb.mxu0 %v8202_v37  ;;  %v5189_v19 = vpop.f32.mrf.mxu0  ;;  %v8106_v46 = vor.u32 %v8908_v61, %v8105_v33  ;;  %v7702_v14 = vor.u32 %v8803_v2, %v7699_v5 }
 0x2c1   :  { %v5227_v58 = vadd.f32 %v5226_v15, %v5214_v20  ;;  %v8905_v15 = vld [vmem:[#allocation11 + $0x914] sm:$0xf] }
 0x2c2   :  { %5511 = vmatmul.bf16.vlgmr.msra.gmra.mxu1 %v9415_v40  ;;  %v8230_v40 = vor.u32 %v8935_v26, %v8227_v29  ;;  %v8110_v18 = vor.u32 %v8905_v15, %v8107_v16  ;;  %v7603_v26 = vld [vmem:[#allocation11 + $0x538] sm:$0xf0] }
 0x2c3   :  { %5524 = vmatmul.bf16.vlgmr.msra.gmra.mxu2 %v9429_v1  ;;  %v8203_v1 = vld [vmem:[#allocation11 + $0x9e8] sm:$0xf0]  ;;  %v7606_v37 = vor.u32 %v8779_v3, %v7603_v26 }
 0x2c4   :  { %5531 = vmatpush.bf16.msra.mxu3 %v8230_v40  ;;  %v8206_v54 = vor.u32 %v8929_v49, %v8203_v1  ;;  %5442 = vmatpush.bf16.msrb.mxu0 %v8178_v53  ;;  %v5280_v8 = vpop.f32.mrf.mxu3  ;;  %v7582_v49 = vor.u32 %v8773_v39, %v7579_v47  ;;  %v8767_v1 = vld [vmem:[#allocation11 + $0x4c4] sm:$0xf] }
 0x2c5   :  { %v7558_v17 = vor.u32 %v8767_v1, %v7555_v50 }
 0x2c6   :  { %v9536_v22 = vpop.f32.mrf.mxu2 }
 0x2c7   :  { %v5306_v35 = vpop.f32.mrf.mxu1 }
 0x2c8   :  { %5532 = vmatpush.bf16.msra.mxu3 %v8206_v54  ;;  %5443 = vmatpush.bf16.msrb.mxu0 %v8154_v63  ;;  %v7531_v54 = vld [vmem:[#allocation11 + $0x4a8] sm:$0xf0] }
 0x2c9   :  { %v7534_v57 = vor.u32 %v8761_v21, %v7531_v54 }
 0x2cc   :  { %5533 = vmatpush.bf16.msra.mxu3 %v8182_v34  ;;  %5444 = vmatpush.bf16.msrb.mxu0 %v8130_v52 }
 0x2ce   :  { %v5319_v48 = vpop.f32.mrf.mxu2 }
 0x2d0   :  { %5534 = vmatpush.bf16.msra.mxu3 %v8158_v6  ;;  %5445 = vmatpush.bf16.msrb.mxu0 %v8106_v46  ;;  %v5239_v29 = vpop.f32.mrf.mxu0 }
 0x2d1   :  { %v5240_v55 = vadd.f32 %v5239_v29, %v5227_v58 }
 0x2d3   :  { %5446 = vmatmul.bf16.vlgmr.msrb.gmra.mxu0 %v9462_v9  ;;  %v5253_v40 = vadd.f32 %v9512_v56, %v5240_v55  ;;  %v3307_v56 = vperm.slane %v9529_v31, 3 }
 0x2d4   :  { %5490 = vmatpush.bf16.msra.mxu0 %v7702_v14  ;;  %5535 = vmatpush.bf16.msra.mxu3 %v8134_v43 }
 0x2d5   :  { %v5266_v27 = vadd.f32 %v9516_v30, %v5253_v40  ;;  %v5279_v30 = vadd.f32 %v9538_v0, %v3307_v56 }
 0x2d8   :  { %5491 = vmatpush.bf16.msra.mxu0 %v7678_v4  ;;  %5536 = vmatpush.bf16.msra.mxu3 %v8110_v18  ;;  %v5241_v53 = vpop.f32.mrf.mxu0 }
 0x2db   :  { %5537 = vmatmul.bf16.vlgmr.msra.gmra.mxu3 %v9462_v9 }
 0x2dc   :  { %5492 = vmatpush.bf16.msra.mxu0 %v7654_v38  ;;  %v5330_v11 = vpop.f32.mrf.mxu3 }
 0x2df   :  { %v5356_v12 = vpop.f32.mrf.mxu1 }
 0x2e0   :  { %5493 = vmatpush.bf16.msra.mxu0 %v7630_v25 }
 0x2e4   :  { %5494 = vmatpush.bf16.msra.mxu0 %v7606_v37  ;;  %v5332_v20 = vpop.f32.mrf.mxu3 }
 0x2e6   :  { %v5369_v9 = vpop.f32.mrf.mxu2 }
 0x2e7   :  { %v5358_v45 = vpop.f32.mrf.mxu1  ;;  %v5370_v35 = vadd.f32 %v5369_v9, %v3308_v60 }
 0x2e8   :  { %5495 = vmatpush.bf16.msra.mxu0 %v7582_v49 }
 0x2ec   :  { %5496 = vmatpush.bf16.msra.mxu0 %v7558_v17 }
 0x2ee   :  { %v5371_v63 = vpop.f32.mrf.mxu2 }
 0x2f0   :  { %5497 = vmatpush.bf16.msra.mxu0 %v7534_v57  ;;  %v5291_v44 = vpop.f32.mrf.mxu0 }
 0x2f1   :  { %v5292_v42 = vadd.f32 %v5291_v44, %v5279_v30 }
 0x2f3   :  { %5498 = vmatmul.bf16.vlgmr.msra.gmra.mxu0 %v9400_v62  ;;  %v5305_v34 = vadd.f32 %v9533_v10, %v5292_v42  ;;  %v5548_v10 = vrot.slane %v9524_v51, 3 }
 0x2f5   :  { %v5318_v19 = vadd.f32 %v9536_v22, %v5305_v34  ;;  %v3309_v22 = vperm.slane %v9529_v31, 5  ;;  %v5556_v7 = vsel %vm5553_vm0, %v9524_v51, %v5548_v10 }
 0x2f7   :  { %v5331_v59 = vadd.f32 %v5330_v11, %v5318_v19 }
 0x2f8   :  { %v5293_v52 = vpop.f32.mrf.mxu0 }
 0x2fc   :  { %v5382_v6 = vpop.f32.mrf.mxu3 }
 0x2fd   :  { %v5383_v62 = vadd.f32 %v5382_v6, %v5370_v35 }
 0x2ff   :  { %v5408_v58 = vpop.f32.mrf.mxu1 }
 0x304   :  { %v5384_v5 = vpop.f32.mrf.mxu3 }
 0x306   :  { %v5421_v33 = vpop.f32.mrf.mxu2 }
 0x307   :  { %v5410_v61 = vpop.f32.mrf.mxu1 }
 0x30e   :  { %v5423_v2 = vpop.f32.mrf.mxu2 }
 0x310   :  { %v5343_v28 = vpop.f32.mrf.mxu0 }
 0x311   :  { %v5344_v0 = vadd.f32 %v5343_v28, %v5331_v59 }
 0x313   :  { %v5357_v41 = vadd.f32 %v5356_v12, %v5344_v0 }
 0x315   :  { %v5543_v14 = vpack.c.bf16 %v5357_v41, %v5266_v27 }
 0x317   :  { %v5549_v43 = vrot.slane %v5543_v14, 6  ;;  %v5550_v11 = vrot.slane %v5543_v14, 1 }
 0x318   :  { %v5345_v13 = vpop.f32.mrf.mxu0 }
 0x319   :  { %v5559_v16 = vsel %vm5557_vm1, %v5556_v7, %v5549_v43 }
 0x31c   :  { %v5434_v18 = vpop.f32.mrf.mxu3 }
 0x31f   :  { %v5460_v46 = vpop.f32.mrf.mxu1 }
 0x320   :  { %v5461_v15 = vadd.f32 %v5460_v46, %v3309_v22 }
 0x324   :  { %v5436_v32 = vpop.f32.mrf.mxu3 }
 0x326   :  { %v5473_v48 = vpop.f32.mrf.mxu2 }
 0x327   :  { %v5474_v4 = vadd.f32 %v5473_v48, %v5461_v15  ;;  %v5462_v8 = vpop.f32.mrf.mxu1 }
 0x32e   :  { %v5475_v23 = vpop.f32.mrf.mxu2 }
 0x330   :  { %v5395_v38 = vpop.f32.mrf.mxu0 }
 0x331   :  { %v5396_v36 = vadd.f32 %v5395_v38, %v5383_v62 }
 0x333   :  { %v5409_v24 = vadd.f32 %v5408_v58, %v5396_v36 }
 0x335   :  { %v5422_v3 = vadd.f32 %v5421_v33, %v5409_v24 }
 0x337   :  { %v5435_v31 = vadd.f32 %v5434_v18, %v5422_v3 }
 0x338   :  { %v5397_v26 = vpop.f32.mrf.mxu0 }
 0x33c   :  { %v5486_v37 = vpop.f32.mrf.mxu3 }
 0x33d   :  { %v5487_v49 = vadd.f32 %v5486_v37, %v5474_v4 }
 0x33f   :  { %v5512_v25 = vpop.f32.mrf.mxu1 }
 0x344   :  { %v5488_v51 = vpop.f32.mrf.mxu3 }
 0x346   :  { %v5525_v29 = vpop.f32.mrf.mxu2 }
 0x347   :  { %v5514_v55 = vpop.f32.mrf.mxu1 }
 0x34e   :  { %v5527_v12 = vpop.f32.mrf.mxu2 }
 0x350   :  { %v5447_v39 = vpop.f32.mrf.mxu0 }
 0x351   :  { %v5448_v17 = vadd.f32 %v5447_v39, %v5435_v31 }
 0x358   :  { %v5449_v47 = vpop.f32.mrf.mxu0 }
 0x35e   :  { %v5538_v40 = vpop.f32.mrf.mxu3 }
 0x366   :  { %v5540_v27 = vpop.f32.mrf.mxu3 }
 0x370   :  { %v5499_v1 = vpop.f32.mrf.mxu0 }
 0x371   :  { %v5500_v50 = vadd.f32 %v5499_v1, %v5487_v49 }
 0x373   :  { %v5513_v53 = vadd.f32 %v5512_v25, %v5500_v50 }
 0x375   :  { %v5526_v9 = vadd.f32 %v5525_v29, %v5513_v53 }
 0x377   :  { %v5539_v45 = vadd.f32 %v5538_v40, %v5526_v9 }
 0x378   :  { %v5501_v21 = vpop.f32.mrf.mxu0 }
 0x379   :  { %v5544_v54 = vpack.c.bf16 %v5539_v45, %v5448_v17 }
 0x37b   :  { %v5551_v57 = vrot.slane %v5544_v54, 4  ;;  %v5552_v63 = vrot.slane %v5544_v54, 7 }
 0x37d   :  { %v5563_v20 = vsel %vm5560_vm2, %v5550_v11, %v5551_v57 }
 0x37e   :  { %v5566_v56 = vsel %vm5564_vm3, %v5563_v20, %v5552_v63 }
 0x37f   :  { %v5568_v30 = vsel %vm5567_vm4, %v5559_v16, %v5566_v56 }
 0x380   :  { %5570 = vst [vmem:[#allocation14] sm:$0x3f] %v5568_v30 }
 0x381   :  { %5581 = dma.vmem_to_hbm [thread:$0]  %s5577_s6, 96, %s5579_s1, [#allocation4]  }
 0x382   :  { %9173 = dma.done.wait [#allocation4], 96  }
 0x383   :  { %9174 = vsyncadd [#allocation4], 4294967200 }
 0x384   :  { %5586 = vsyncpa [#allocation3], 1 }
 0x385   :  { %5587 = vsyncpa [#allocation6], 1 }
 0x386   :  { %5588 = vsyncpa [#allocation9], 1 }
 0x387   :  { %5589 = vsyncpa [#allocation12], 1 }
 0x388   :  { %5590 = vsyncpa [#allocation4], 1 }

// kernel: tpu_custom_call.1
= control target key start
LH: loop header
LB: loop body
LE: loop exit
PB: predicated region body
PF: predicated region fallthrough
CT: control target
= control target key end

     0   :  { %12 = vsyncpa [#allocation3], 0  ;;  %s9556_s0 = inlined_call_operand.hbm [shape: f32[2,768], index: 0, kind: input, shape index: {}]   ;;  %s9557_s1 = inlined_call_operand.hbm [shape: f32[2,3], index: 1, kind: input, shape index: {}]   ;;  %s9558_s2 = inlined_call_operand.hbm [shape: bf16[768,896], index: 2, kind: input, shape index: {}]   ;;  %s9559_s3 = inlined_call_operand.hbm [shape: f32[3,896], index: 3, kind: input, shape index: {}]   ;;  %s9560_s4 = inlined_call_operand.hbm [shape: f32[1,896], index: 4, kind: input, shape index: {}]   ;;  %s9561_s5 = inlined_call_operand.hbm [shape: bf16[896,768], index: 5, kind: input, shape index: {}]   ;;  %s9562_s6 = inlined_call_operand.hbm [shape: f32[1,768], index: 6, kind: input, shape index: {}]   ;;  %s9563_s7 = inlined_call_operand.hbm [shape: bf16[2,768], index: 7, kind: output, shape index: {}]  }
   0x1   :  { %13 = vsyncpa [#allocation6], 0 }
   0x2   :  { %14 = vsyncpa [#allocation9], 0 }
   0x3   :  { %15 = vsyncpa [#allocation12], 0  ;;  %s33_s26 = sshll.u32 %s9557_s1, 4  ;;  %s34_s26 = int_to_ptr.hbm [resolvable:$true] %s33_s26 }
   0x4   :  { %16 = vsyncpa [#allocation4], 0  ;;  %s9175_s27 = smov [#allocation5]   ;;  %s57_s8 = sshll.u32 %s9559_s3, 4  ;;  %s58_s8 = int_to_ptr.hbm [resolvable:$true] %s57_s8 }
   0x5   :  { %s35_s28 = sshll.u32 %s9175_s27, 4  ;;  %s9176_s9 = smov [#allocation8]   ;;  %s36_s28 = int_to_ptr.vmem [resolvable:$true] %s35_s28 }
   0x6   :  { %38 = dma.hbm_to_vmem [thread:$0]  %s34_s26, 32, %s36_s28, [#allocation6]  }
   0x7   :  { %s59_s10 = sshll.u32 %s9176_s9, 4  ;;  %s78_s13 = sshll.u32 %s9561_s5, 4  ;;  %s60_s10 = int_to_ptr.vmem [resolvable:$true] %s59_s10  ;;  %s79_s13 = int_to_ptr.hbm [resolvable:$true] %s78_s13 }
   0x8   :  { %62 = dma.hbm_to_vmem [thread:$0]  %s58_s8, 448, %s60_s10, [#allocation9]  }
   0x9   :  { %s9177_s1 = smov [#allocation11]   ;;  %s22_s17 = sshll.u32 %s9556_s0, 4  ;;  %s23_s17 = int_to_ptr.hbm [resolvable:$true] %s22_s17 }
   0xa   :  { %s80_s14 = sshll.u32 %s9177_s1, 4  ;;  %s9178_s18 = smov 384   ;;  %s81_s14 = int_to_ptr.vmem [resolvable:$true] %s80_s14 }
   0xb   :  { %s9179_s3 = smov 24   ;;  %s9180_s19 = smov [#allocation2]  }
   0xc   :  { %86 = dma.hbm_to_vmem [thread:$0]  %s79_s13, 43008, %s81_s14, [#allocation12], %s9178_s18, %s9178_s18, %s9179_s3  }
   0xd   :  { %s24_s20 = sshll.u32 %s9180_s19, 4  ;;  %s43_s5 = sshll.u32 %s9558_s2, 4  ;;  %s25_s20 = int_to_ptr.vmem [resolvable:$true] %s24_s20  ;;  %s44_s5 = int_to_ptr.hbm [resolvable:$true] %s43_s5 }
   0xe   :  { %27 = dma.hbm_to_vmem [thread:$0]  %s23_s17, 192, %s25_s20, [#allocation3]  }
   0xf   :  { %s9181_s23 = smov [#allocation7]   ;;  %s68_s0 = sshll.u32 %s9560_s4, 4  ;;  %s69_s0 = int_to_ptr.hbm [resolvable:$true] %s68_s0 }
  0x10   :  { %s45_s24 = sshll.u32 %s9181_s23, 4  ;;  %s9182_s27 = smov 448   ;;  %s46_s24 = int_to_ptr.vmem [resolvable:$true] %s45_s24 }
  0x11   :  { %s9183_s28 = smov 28   ;;  %s9184_s29 = smov [#allocation10]  }
  0x12   :  { %51 = dma.hbm_to_vmem [thread:$0]  %s44_s5, 43008, %s46_s24, [#allocation6], %s9182_s27, %s9182_s27, %s9183_s28  }
  0x13   :  { %s70_s30 = sshll.u32 %s9184_s29, 4  ;;  %s92_s2 = sshll.u32 %s9562_s6, 4  ;;  %s71_s30 = int_to_ptr.vmem [resolvable:$true] %s70_s30  ;;  %s93_s2 = int_to_ptr.hbm [resolvable:$true] %s92_s2 }
  0x14   :  { %73 = dma.hbm_to_vmem [thread:$0]  %s69_s0, 112, %s71_s30, [#allocation9]  }
  0x15   :  { %s9185_s10 = smov [#allocation13]  }
  0x16   :  { %s94_s11 = sshll.u32 %s9185_s10, 4  ;;  %s95_s11 = int_to_ptr.vmem [resolvable:$true] %s94_s11 }
  0x17   :  { %97 = dma.hbm_to_vmem [thread:$0]  %s93_s2, 96, %s95_s11, [#allocation12]  }
  0x18   :  { %9165 = dma.done.wait [#allocation3], 192  }
  0x19   :  { %9166 = vsyncadd [#allocation3], 4294967104 }
  0x1a   :  { %9167 = dma.done.wait [#allocation6], 43040  }
  0x1b   :  { %9168 = vsyncadd [#allocation6], 4294924256 }
  0x1c   :  { %9169 = dma.done.wait [#allocation9], 560  }
  0x1d   :  { %9170 = vsyncadd [#allocation9], 4294966736 }
  0x1e   :  { %9171 = dma.done.wait [#allocation12], 43104  }
  0x1f   :  { %9172 = vsyncadd [#allocation12], 4294924192  ;;  %v5789_v0 = vld [vmem:[#allocation7 + $0x188] sm:$0xf]  ;;  %v8331_v1 = vld [vmem:[#allocation7 + $0x1a0] sm:$0xf0] }
  0x20   :  { %v6013_v2 = vld [vmem:[#allocation7 + $0x348] sm:$0xf]  ;;  %v5790_v3 = vor.u32 %v8331_v1, %v5789_v0  ;;  %v8387_v4 = vld [vmem:[#allocation7 + $0x360] sm:$0xf0]  ;;  %v5761_v11 = vld [vmem:[#allocation7 + $0x150] sm:$0xf] }
  0x21   :  { %v6237_v5 = vld [vmem:[#allocation7 + $0x508] sm:$0xf]  ;;  %v8443_v6 = vld [vmem:[#allocation7 + $0x520] sm:$0xf0]  ;;  %v6014_v7 = vor.u32 %v8387_v4, %v6013_v2  ;;  %v8324_v13 = vld [vmem:[#allocation7 + $0x168] sm:$0xf0] }
  0x22   :  { %v6238_v8 = vor.u32 %v8443_v6, %v6237_v5  ;;  %v6461_v9 = vld [vmem:[#allocation7 + $0x6c8] sm:$0xf]  ;;  %v8499_v10 = vld [vmem:[#allocation7 + $0x6e0] sm:$0xf0]  ;;  %2305 = vmatpush.bf16.msra.mxu0 %v5790_v3  ;;  %v5985_v14 = vld [vmem:[#allocation7 + $0x310] sm:$0xf]  ;;  %v5762_v16 = vor.u32 %v8324_v13, %v5761_v11 }
  0x23   :  { %v6462_v12 = vor.u32 %v8499_v10, %v6461_v9  ;;  %v8380_v15 = vld [vmem:[#allocation7 + $0x328] sm:$0xf0]  ;;  %2318 = vmatpush.bf16.msra.mxu1 %v6014_v7  ;;  %v6209_v18 = vld [vmem:[#allocation7 + $0x4d0] sm:$0xf]  ;;  %v5733_v23 = vld [vmem:[#allocation7 + $0x118] sm:$0xf] }
  0x24   :  { %2331 = vmatpush.bf16.msra.mxu2 %v6238_v8  ;;  %v5986_v17 = vor.u32 %v8380_v15, %v5985_v14  ;;  %v8436_v19 = vld [vmem:[#allocation7 + $0x4e8] sm:$0xf0]  ;;  %v6433_v20 = vld [vmem:[#allocation7 + $0x690] sm:$0xf]  ;;  %v8317_v24 = vld [vmem:[#allocation7 + $0x130] sm:$0xf0] }
  0x25   :  { %2344 = vmatpush.bf16.msra.mxu3 %v6462_v12  ;;  %v6210_v21 = vor.u32 %v8436_v19, %v6209_v18  ;;  %v8492_v22 = vld [vmem:[#allocation7 + $0x6a8] sm:$0xf0]  ;;  %v5957_v26 = vld [vmem:[#allocation7 + $0x2d8] sm:$0xf]  ;;  %v8373_v27 = vld [vmem:[#allocation7 + $0x2f0] sm:$0xf0]  ;;  %v5734_v29 = vor.u32 %v8317_v24, %v5733_v23 }
  0x26   :  { %v6434_v25 = vor.u32 %v8492_v22, %v6433_v20  ;;  %v6181_v28 = vld [vmem:[#allocation7 + $0x498] sm:$0xf]  ;;  %2306 = vmatpush.bf16.msra.mxu0 %v5762_v16  ;;  %v8429_v30 = vld [vmem:[#allocation7 + $0x4b0] sm:$0xf0]  ;;  %v5958_v33 = vor.u32 %v8373_v27, %v5957_v26  ;;  %v5705_v35 = vld [vmem:[#allocation7 + $0xe0] sm:$0xf] }
  0x27   :  { %v6405_v31 = vld [vmem:[#allocation7 + $0x658] sm:$0xf]  ;;  %v8485_v32 = vld [vmem:[#allocation7 + $0x670] sm:$0xf0]  ;;  %2319 = vmatpush.bf16.msra.mxu1 %v5986_v17  ;;  %v6182_v34 = vor.u32 %v8429_v30, %v6181_v28  ;;  %v8310_v36 = vld [vmem:[#allocation7 + $0xf8] sm:$0xf0] }
  0x28   :  { %2332 = vmatpush.bf16.msra.mxu2 %v6210_v21  ;;  %v5929_v37 = vld [vmem:[#allocation7 + $0x2a0] sm:$0xf]  ;;  %v6406_v38 = vor.u32 %v8485_v32, %v6405_v31  ;;  %v8366_v39 = vld [vmem:[#allocation7 + $0x2b8] sm:$0xf0]  ;;  %v5706_v44 = vor.u32 %v8310_v36, %v5705_v35  ;;  %v5677_v47 = vld [vmem:[#allocation7 + $0xa8] sm:$0xf] }
  0x29   :  { %2345 = vmatpush.bf16.msra.mxu3 %v6434_v25  ;;  %v6153_v40 = vld [vmem:[#allocation7 + $0x460] sm:$0xf]  ;;  %v8422_v41 = vld [vmem:[#allocation7 + $0x478] sm:$0xf0]  ;;  %v5930_v45 = vor.u32 %v8366_v39, %v5929_v37  ;;  %v8303_v48 = vld [vmem:[#allocation7 + $0xc0] sm:$0xf0] }
  0x2a   :  { %v6377_v42 = vld [vmem:[#allocation7 + $0x620] sm:$0xf]  ;;  %v8478_v43 = vld [vmem:[#allocation7 + $0x638] sm:$0xf0]  ;;  %2307 = vmatpush.bf16.msra.mxu0 %v5734_v29  ;;  %v6154_v46 = vor.u32 %v8422_v41, %v6153_v40  ;;  %v5901_v49 = vld [vmem:[#allocation7 + $0x268] sm:$0xf]  ;;  %v5678_v56 = vor.u32 %v8303_v48, %v5677_v47 }
  0x2b   :  { %2320 = vmatpush.bf16.msra.mxu1 %v5958_v33  ;;  %v6378_v50 = vor.u32 %v8478_v43, %v6377_v42  ;;  %v8359_v51 = vld [vmem:[#allocation7 + $0x280] sm:$0xf0]  ;;  %v6125_v52 = vld [vmem:[#allocation7 + $0x428] sm:$0xf]  ;;  %v5649_v59 = vld [vmem:[#allocation7 + $0x70] sm:$0xf] }
  0x2c   :  { %2333 = vmatpush.bf16.msra.mxu2 %v6182_v34  ;;  %v8415_v53 = vld [vmem:[#allocation7 + $0x440] sm:$0xf0]  ;;  %v6349_v54 = vld [vmem:[#allocation7 + $0x5e8] sm:$0xf]  ;;  %v5902_v57 = vor.u32 %v8359_v51, %v5901_v49  ;;  %v8296_v60 = vld [vmem:[#allocation7 + $0x88] sm:$0xf0] }
  0x2d   :  { %2346 = vmatpush.bf16.msra.mxu3 %v6406_v38  ;;  %v8471_v55 = vld [vmem:[#allocation7 + $0x600] sm:$0xf0]  ;;  %v6126_v58 = vor.u32 %v8415_v53, %v6125_v52  ;;  %v5873_v61 = vld [vmem:[#allocation7 + $0x230] sm:$0xf]  ;;  %v8352_v63 = vld [vmem:[#allocation7 + $0x248] sm:$0xf0]  ;;  %v5650_v4 = vor.u32 %v8296_v60, %v5649_v59 }
  0x2e   :  { %2308 = vmatpush.bf16.msra.mxu0 %v5706_v44  ;;  %v6350_v62 = vor.u32 %v8471_v55, %v6349_v54  ;;  %v6097_v0 = vld [vmem:[#allocation7 + $0x3f0] sm:$0xf]  ;;  %v8408_v1 = vld [vmem:[#allocation7 + $0x408] sm:$0xf0]  ;;  %v5874_v5 = vor.u32 %v8352_v63, %v5873_v61  ;;  %v5621_v7 = vld [vmem:[#allocation7 + $0x38] sm:$0xf] }
  0x2f   :  { %2321 = vmatpush.bf16.msra.mxu1 %v5930_v45  ;;  %v6321_v2 = vld [vmem:[#allocation7 + $0x5b0] sm:$0xf]  ;;  %v8464_v3 = vld [vmem:[#allocation7 + $0x5c8] sm:$0xf0]  ;;  %v6098_v6 = vor.u32 %v8408_v1, %v6097_v0  ;;  %v8289_v8 = vld [vmem:[#allocation7 + $0x50] sm:$0xf0] }
  0x30   :  { %2334 = vmatpush.bf16.msra.mxu2 %v6154_v46  ;;  %v5845_v9 = vld [vmem:[#allocation7 + $0x1f8] sm:$0xf]  ;;  %v6322_v10 = vor.u32 %v8464_v3, %v6321_v2  ;;  %v8345_v11 = vld [vmem:[#allocation7 + $0x210] sm:$0xf0]  ;;  %v5622_v16 = vor.u32 %v8289_v8, %v5621_v7  ;;  %v5593_v17 = vld [vmem:[#allocation7] sm:$0xf] }
  0x31   :  { %2347 = vmatpush.bf16.msra.mxu3 %v6378_v50  ;;  %v6069_v12 = vld [vmem:[#allocation7 + $0x3b8] sm:$0xf]  ;;  %v8401_v13 = vld [vmem:[#allocation7 + $0x3d0] sm:$0xf0]  ;;  %v8282_v18 = vld [vmem:[#allocation7 + $0x18] sm:$0xf0]  ;;  %v5846_v19 = vor.u32 %v8345_v11, %v5845_v9 }
  0x32   :  { %2309 = vmatpush.bf16.msra.mxu0 %v5678_v56  ;;  %v6293_v14 = vld [vmem:[#allocation7 + $0x578] sm:$0xf]  ;;  %v8457_v15 = vld [vmem:[#allocation7 + $0x590] sm:$0xf0]  ;;  %v6070_v20 = vor.u32 %v8401_v13, %v6069_v12  ;;  %v5817_v21 = vld [vmem:[#allocation7 + $0x1c0] sm:$0xf]  ;;  %v5594_v31 = vor.u32 %v8282_v18, %v5593_v17 }
  0x33   :  { %2322 = vmatpush.bf16.msra.mxu1 %v5902_v57  ;;  %v8338_v22 = vld [vmem:[#allocation7 + $0x1d8] sm:$0xf0]  ;;  %v6041_v23 = vld [vmem:[#allocation7 + $0x380] sm:$0xf]  ;;  %v6294_v24 = vor.u32 %v8457_v15, %v6293_v14  ;;  %v6685_v28 = vld [vmem:[#allocation7 + $0x888] sm:$0xf] }
  0x34   :  { %2335 = vmatpush.bf16.msra.mxu2 %v6126_v58  ;;  %v8394_v25 = vld [vmem:[#allocation7 + $0x398] sm:$0xf0]  ;;  %v6265_v26 = vld [vmem:[#allocation7 + $0x540] sm:$0xf]  ;;  %v8555_v29 = vld [vmem:[#allocation7 + $0x8a0] sm:$0xf0]  ;;  %v5818_v35 = vor.u32 %v8338_v22, %v5817_v21 }
  0x35   :  { %2348 = vmatpush.bf16.msra.mxu3 %v6350_v62  ;;  %v8450_v27 = vld [vmem:[#allocation7 + $0x558] sm:$0xf0]  ;;  %v6909_v30 = vld [vmem:[#allocation7 + $0xa48] sm:$0xf]  ;;  %v8611_v32 = vld [vmem:[#allocation7 + $0xa60] sm:$0xf0]  ;;  %v6042_v36 = vor.u32 %v8394_v25, %v6041_v23  ;;  %v6686_v40 = vor.u32 %v8555_v29, %v6685_v28 }
  0x36   :  { %2310 = vmatpush.bf16.msra.mxu0 %v5650_v4  ;;  %v8328_v33 = vld [vmem:[#allocation7 + $0x18c] sm:$0xf]  ;;  %v5791_v34 = vld [vmem:[#allocation7 + $0x1a4] sm:$0xf0]  ;;  %v6266_v39 = vor.u32 %v8450_v27, %v6265_v26  ;;  %v6910_v41 = vor.u32 %v8611_v32, %v6909_v30  ;;  %v6657_v43 = vld [vmem:[#allocation7 + $0x850] sm:$0xf] }
  0x37   :  { %2323 = vmatpush.bf16.msra.mxu1 %v5874_v5  ;;  %v8384_v37 = vld [vmem:[#allocation7 + $0x34c] sm:$0xf]  ;;  %v6015_v38 = vld [vmem:[#allocation7 + $0x364] sm:$0xf0]  ;;  %v5794_v42 = vor.u32 %v8328_v33, %v5791_v34  ;;  %v6881_v45 = vld [vmem:[#allocation7 + $0xa10] sm:$0xf] }
  0x38   :  { %2336 = vmatpush.bf16.msra.mxu2 %v6098_v6  ;;  %v8548_v44 = vld [vmem:[#allocation7 + $0x868] sm:$0xf0]  ;;  %v6018_v46 = vor.u32 %v8384_v37, %v6015_v38  ;;  %v8321_v48 = vld [vmem:[#allocation7 + $0x154] sm:$0xf]  ;;  %v5763_v49 = vld [vmem:[#allocation7 + $0x16c] sm:$0xf0] }
  0x39   :  { %2349 = vmatpush.bf16.msra.mxu3 %v6322_v10  ;;  %v8604_v47 = vld [vmem:[#allocation7 + $0xa28] sm:$0xf0]  ;;  %v8377_v50 = vld [vmem:[#allocation7 + $0x314] sm:$0xf]  ;;  %v5987_v51 = vld [vmem:[#allocation7 + $0x32c] sm:$0xf0]  ;;  %v6658_v52 = vor.u32 %v8548_v44, %v6657_v43  ;;  %v5766_v54 = vor.u32 %v8321_v48, %v5763_v49 }
  0x3a   :  { %2311 = vmatpush.bf16.msra.mxu0 %v5622_v16  ;;  %v6882_v53 = vor.u32 %v8604_v47, %v6881_v45  ;;  %v6629_v55 = vld [vmem:[#allocation7 + $0x818] sm:$0xf]  ;;  %v8541_v56 = vld [vmem:[#allocation7 + $0x830] sm:$0xf0]  ;;  %v5990_v58 = vor.u32 %v8377_v50, %v5987_v51  ;;  %v8314_v60 = vld [vmem:[#allocation7 + $0x11c] sm:$0xf] }
  0x3b   :  { %2324 = vmatpush.bf16.msra.mxu1 %v5846_v19  ;;  %v6853_v57 = vld [vmem:[#allocation7 + $0x9d8] sm:$0xf]  ;;  %v8597_v59 = vld [vmem:[#allocation7 + $0x9f0] sm:$0xf0]  ;;  %v8370_v62 = vld [vmem:[#allocation7 + $0x2dc] sm:$0xf]  ;;  %v6630_v0 = vor.u32 %v8541_v56, %v6629_v55 }
  0x3c   :  { %2337 = vmatpush.bf16.msra.mxu2 %v6070_v20  ;;  %v5735_v61 = vld [vmem:[#allocation7 + $0x134] sm:$0xf0]  ;;  %v6601_v1 = vld [vmem:[#allocation7 + $0x7e0] sm:$0xf]  ;;  %v6854_v3 = vor.u32 %v8597_v59, %v6853_v57  ;;  %v8534_v5 = vld [vmem:[#allocation7 + $0x7f8] sm:$0xf0] }
  0x3d   :  { %2350 = vmatpush.bf16.msra.mxu3 %v6294_v24  ;;  %v5959_v63 = vld [vmem:[#allocation7 + $0x2f4] sm:$0xf0]  ;;  %v5738_v4 = vor.u32 %v8314_v60, %v5735_v61  ;;  %v6825_v6 = vld [vmem:[#allocation7 + $0x9a0] sm:$0xf]  ;;  %v8590_v8 = vld [vmem:[#allocation7 + $0x9b8] sm:$0xf0]  ;;  %v6602_v14 = vor.u32 %v8534_v5, %v6601_v1 }
  0x3e   :  { %2312 = vmatpush.bf16.msra.mxu0 %v5594_v31  ;;  %v126_v2 = vld [vmem:[#allocation2] sm:$0xff]  ;;  %v5962_v7 = vor.u32 %v8370_v62, %v5959_v63  ;;  %v8307_v9 = vld [vmem:[#allocation7 + $0xe4] sm:$0xf]  ;;  %v5707_v10 = vld [vmem:[#allocation7 + $0xfc] sm:$0xf0]  ;;  %v9186_v11 = vmov 0   ;;  %v6826_v16 = vor.u32 %v8590_v8, %v6825_v6 }
  0x3f   :  { %2325 = vmatpush.bf16.msra.mxu1 %v5818_v35  ;;  %130 = vst [vmem:[#allocation1] ss:$4 sm:$0xff] %v126_v2  ;;  %8966 = vset.pattern.permute.xlu0 %v9186_v11  ;;  %v8363_v12 = vld [vmem:[#allocation7 + $0x2a4] sm:$0xf]  ;;  %v5931_v13 = vld [vmem:[#allocation7 + $0x2bc] sm:$0xf0]  ;;  %v5710_v17 = vor.u32 %v8307_v9, %v5707_v10 }
  0x40   :  { %2338 = vmatpush.bf16.msra.mxu2 %v6042_v36  ;;  %v6573_v15 = vld [vmem:[#allocation7 + $0x7a8] sm:$0xf]  ;;  %v8527_v18 = vld [vmem:[#allocation7 + $0x7c0] sm:$0xf0]  ;;  %v5934_v21 = vor.u32 %v8363_v12, %v5931_v13  ;;  %v8300_v22 = vld [vmem:[#allocation7 + $0xac] sm:$0xf] }
  0x41   :  { %2351 = vmatpush.bf16.msra.mxu3 %v6266_v39  ;;  %v6797_v19 = vld [vmem:[#allocation7 + $0x968] sm:$0xf]  ;;  %v8583_v20 = vld [vmem:[#allocation7 + $0x980] sm:$0xf0]  ;;  %v8356_v24 = vld [vmem:[#allocation7 + $0x26c] sm:$0xf]  ;;  %v6574_v28 = vor.u32 %v8527_v18, %v6573_v15 }
  0x42   :  { %2357 = vmatpush.bf16.msrb.mxu0 %v6686_v40  ;;  %v5679_v23 = vld [vmem:[#allocation7 + $0xc4] sm:$0xf0]  ;;  %v6545_v26 = vld [vmem:[#allocation7 + $0x770] sm:$0xf]  ;;  %v8520_v27 = vld [vmem:[#allocation7 + $0x788] sm:$0xf0]  ;;  %v6798_v29 = vor.u32 %v8583_v20, %v6797_v19 }
  0x43   :  { %2370 = vmatpush.bf16.msrb.mxu1 %v6910_v41  ;;  %v5903_v25 = vld [vmem:[#allocation7 + $0x284] sm:$0xf0]  ;;  %v6769_v30 = vld [vmem:[#allocation7 + $0x930] sm:$0xf]  ;;  %v5682_v33 = vor.u32 %v8300_v22, %v5679_v23  ;;  %v8576_v39 = vld [vmem:[#allocation7 + $0x948] sm:$0xf0] }
  0x44   :  { %2383 = vmatpush.bf16.msrb.mxu2 %v5794_v42  ;;  %v5906_v38 = vor.u32 %v8356_v24, %v5903_v25  ;;  %v8293_v40 = vld [vmem:[#allocation7 + $0x74] sm:$0xf]  ;;  %v5651_v41 = vld [vmem:[#allocation7 + $0x8c] sm:$0xf0]  ;;  %v6517_v47 = vld [vmem:[#allocation7 + $0x738] sm:$0xf]  ;;  %v6770_v49 = vor.u32 %v8576_v39, %v6769_v30 }
  0x45   :  { %2396 = vmatpush.bf16.msrb.mxu3 %v6018_v46  ;;  %v8349_v43 = vld [vmem:[#allocation7 + $0x234] sm:$0xf]  ;;  %v5875_v44 = vld [vmem:[#allocation7 + $0x24c] sm:$0xf0]  ;;  %v6546_v46 = vor.u32 %v8520_v27, %v6545_v26  ;;  %v5654_v50 = vor.u32 %v8293_v40, %v5651_v41  ;;  %v6741_v51 = vld [vmem:[#allocation7 + $0x8f8] sm:$0xf] }
  0x46   :  { %2358 = vmatpush.bf16.msrb.mxu0 %v6658_v52  ;;  %v133_v31 = vld.sshfl [vmem:[#allocation1] sm:$0xff pattern:$0x73625140]  ;;  %v134_v32 = vld.sshfl [vmem:[#allocation1 + $0x8] sm:$0xff pattern:$0x73625140] }
  0x47   :  { %2371 = vmatpush.bf16.msrb.mxu1 %v6882_v53  ;;  %v9251_v34 = vpack.c.bf16 %v133_v31, %v133_v31  ;;  %v9253_v35 = vpack.c.bf16 %v134_v32, %v134_v32  ;;  %v135_v36 = vld.sshfl [vmem:[#allocation1 + $0x10] sm:$0xff pattern:$0x73625140]  ;;  %v136_v37 = vld.sshfl [vmem:[#allocation1 + $0x18] sm:$0xff pattern:$0x73625140] }
  0x48   :  { %2384 = vmatpush.bf16.msrb.mxu2 %v5766_v54  ;;  %v9255_v42 = vpack.c.bf16 %v135_v36, %v135_v36  ;;  %v9259_v45 = vpack.c.bf16 %v136_v37, %v136_v37  ;;  %v8513_v48 = vld [vmem:[#allocation7 + $0x750] sm:$0xf0]  ;;  %v127_v53 = vld [vmem:[#allocation2 + $0x8] sm:$0xf]  ;;  %v5878_v54 = vor.u32 %v8349_v43, %v5875_v44  ;;  %v6489_v59 = vld [vmem:[#allocation7 + $0x700] sm:$0xf] }
  0x49   :  { %2397 = vmatpush.bf16.msrb.mxu3 %v5990_v58  ;;  %2313 = vmatmul.bf16.vlgmr.msra.gmra.mxu0 %v9251_v34  ;;  %v8569_v52 = vld [vmem:[#allocation7 + $0x910] sm:$0xf0]  ;;  %v8286_v55 = vld [vmem:[#allocation7 + $0x3c] sm:$0xf]  ;;  %v5623_v56 = vld [vmem:[#allocation7 + $0x54] sm:$0xf0]  ;;  %v6518_v60 = vor.u32 %v8513_v48, %v6517_v47 }
  0x4a   :  { %2359 = vmatpush.bf16.msrb.mxu0 %v6630_v0  ;;  %2326 = vmatmul.bf16.vlgmr.msra.gmra.mxu1 %v9253_v35  ;;  %132 = vst [vmem:[#allocation1 + $0x20] ss:$4 sm:$0xff] %v127_v53  ;;  %v8342_v57 = vld [vmem:[#allocation7 + $0x1fc] sm:$0xf]  ;;  %v5847_v58 = vld [vmem:[#allocation7 + $0x214] sm:$0xf0]  ;;  %v6742_v0 = vor.u32 %v8569_v52, %v6741_v51  ;;  %v5626_v1 = vor.u32 %v8286_v55, %v5623_v56 }
  0x4b   :  { %2372 = vmatpush.bf16.msrb.mxu1 %v6854_v3  ;;  %2339 = vmatmul.bf16.vlgmr.msra.gmra.mxu2 %v9255_v42  ;;  %v8506_v61 = vld [vmem:[#allocation7 + $0x718] sm:$0xf0]  ;;  %v6713_v62 = vld [vmem:[#allocation7 + $0x8c0] sm:$0xf]  ;;  %v8279_v2 = vld [vmem:[#allocation7 + $0x4] sm:$0xf]  ;;  %v5850_v5 = vor.u32 %v8342_v57, %v5847_v58 }
  0x4c   :  { %2385 = vmatpush.bf16.msrb.mxu2 %v5738_v4  ;;  %2352 = vmatmul.bf16.vlgmr.msra.gmra.mxu3 %v9259_v45  ;;  %v8562_v63 = vld [vmem:[#allocation7 + $0x8d8] sm:$0xf0]  ;;  %v5595_v3 = vld [vmem:[#allocation7 + $0x1c] sm:$0xf0]  ;;  %v8335_v6 = vld [vmem:[#allocation7 + $0x1c4] sm:$0xf]  ;;  %v6490_v12 = vor.u32 %v8506_v61, %v6489_v59 }
  0x4d   :  { %2398 = vmatpush.bf16.msrb.mxu3 %v5962_v7  ;;  %v9263_v4 = vld [vmem:[#allocation5] sm:$0x3]  ;;  %v5819_v7 = vld [vmem:[#allocation7 + $0x1dc] sm:$0xf0]  ;;  %v8440_v8 = vld [vmem:[#allocation7 + $0x50c] sm:$0xf] }
  0x4e   :  { %2360 = vmatpush.bf16.msrb.mxu0 %v6602_v14  ;;  %542 = vperm.xlu0 %8966, %v9263_v4   ;;  %v6239_v9 = vld [vmem:[#allocation7 + $0x524] sm:$0xf0]  ;;  %v8496_v10 = vld [vmem:[#allocation7 + $0x6cc] sm:$0xf]  ;;  %v5822_v20 = vor.u32 %v8335_v6, %v5819_v7  ;;  %v8433_v22 = vld [vmem:[#allocation7 + $0x4d4] sm:$0xf] }
  0x4f   :  { %2373 = vmatpush.bf16.msrb.mxu1 %v6826_v16  ;;  %v6463_v11 = vld [vmem:[#allocation7 + $0x6e4] sm:$0xf0]  ;;  %v8552_v13 = vld [vmem:[#allocation7 + $0x88c] sm:$0xf]  ;;  %v6714_v16 = vor.u32 %v8562_v63, %v6713_v62  ;;  %v6211_v26 = vld [vmem:[#allocation7 + $0x4ec] sm:$0xf0] }
  0x50   :  { %2386 = vmatpush.bf16.msrb.mxu2 %v5710_v17  ;;  %v6687_v14 = vld [vmem:[#allocation7 + $0x8a4] sm:$0xf0]  ;;  %v8608_v15 = vld [vmem:[#allocation7 + $0xa4c] sm:$0xf]  ;;  %v5598_v17 = vor.u32 %v8279_v2, %v5595_v3  ;;  %v6466_v24 = vor.u32 %v8496_v10, %v6463_v11  ;;  %v8489_v27 = vld [vmem:[#allocation7 + $0x694] sm:$0xf]  ;;  %v6214_v39 = vor.u32 %v8433_v22, %v6211_v26 }
  0x51   :  { %2399 = vmatpush.bf16.msrb.mxu3 %v5934_v21  ;;  %v6911_v18 = vld [vmem:[#allocation7 + $0xa64] sm:$0xf0]  ;;  %v6242_v21 = vor.u32 %v8440_v8, %v6239_v9  ;;  %v138_v23 = vld.sshfl [vmem:[#allocation1 + $0x28] sm:$0xff pattern:$0x73625140]  ;;  %v6690_v25 = vor.u32 %v8552_v13, %v6687_v14  ;;  %v9188_v53 = vmov 1  }
  0x52   :  { %2361 = vmatpush.bf16.msrb.mxu0 %v6574_v28  ;;  %v137_v19 = vld.sshfl [vmem:[#allocation1 + $0x20] sm:$0xff pattern:$0x73625140]  ;;  %v6914_v28 = vor.u32 %v8608_v15, %v6911_v18  ;;  %v8545_v30 = vld [vmem:[#allocation7 + $0x854] sm:$0xf]  ;;  %vm5553_vm0 = vcmask 1040384  }
  0x53   :  { %2374 = vmatpush.bf16.msrb.mxu1 %v6798_v29  ;;  %v6435_v29 = vld [vmem:[#allocation7 + $0x6ac] sm:$0xf0]  ;;  %v9266_v32 = vpack.c.bf16 %v137_v19, %v137_v19  ;;  %v8601_v36 = vld [vmem:[#allocation7 + $0xa14] sm:$0xf]  ;;  %v8426_v43 = vld [vmem:[#allocation7 + $0x49c] sm:$0xf] }
  0x54   :  { %2387 = vmatpush.bf16.msrb.mxu2 %v5682_v33  ;;  %v6659_v31 = vld [vmem:[#allocation7 + $0x86c] sm:$0xf0]  ;;  %v9187_v33 = vmov 2   ;;  %v6438_v40 = vor.u32 %v8489_v27, %v6435_v29  ;;  %v6183_v44 = vld [vmem:[#allocation7 + $0x4b4] sm:$0xf0]  ;;  %vm5557_vm1 = vcmask 1041408  }
  0x55   :  { %2400 = vmatpush.bf16.msrb.mxu3 %v5906_v38  ;;  %8968 = vset.pattern.permute.xlu1 %v9187_v33  ;;  %v6883_v37 = vld [vmem:[#allocation7 + $0xa2c] sm:$0xf0]  ;;  %v9269_v38 = vpack.c.bf16 %v138_v23, %v138_v23  ;;  %v6662_v41 = vor.u32 %v8545_v30, %v6659_v31  ;;  %v6407_v48 = vld [vmem:[#allocation7 + $0x674] sm:$0xf0]  ;;  %v8594_v51 = vld [vmem:[#allocation7 + $0x9dc] sm:$0xf] }
  0x56   :  { %2362 = vmatpush.bf16.msrb.mxu0 %v6546_v46  ;;  %v8482_v46 = vld [vmem:[#allocation7 + $0x65c] sm:$0xf]  ;;  %v6886_v47 = vor.u32 %v8601_v36, %v6883_v37  ;;  %v6855_v52 = vld [vmem:[#allocation7 + $0x9f4] sm:$0xf0]  ;;  %8967 = vset.pattern.permute.xlu0 %v9188_v53  ;;  %v8419_v57 = vld [vmem:[#allocation7 + $0x464] sm:$0xf] }
  0x57   :  { %2375 = vmatpush.bf16.msrb.mxu1 %v6770_v49  ;;  %v8538_v49 = vld [vmem:[#allocation7 + $0x81c] sm:$0xf]  ;;  %2852 = vperm.xlu0 %8967, %v9263_v4   ;;  %v6410_v55 = vor.u32 %v8482_v46, %v6407_v48  ;;  %v6155_v58 = vld [vmem:[#allocation7 + $0x47c] sm:$0xf0]  ;;  %v8475_v59 = vld [vmem:[#allocation7 + $0x624] sm:$0xf] }
  0x58   :  { %2388 = vmatpush.bf16.msrb.mxu2 %v5654_v50  ;;  %v6631_v50 = vld [vmem:[#allocation7 + $0x834] sm:$0xf0]  ;;  %v6379_v61 = vld [vmem:[#allocation7 + $0x63c] sm:$0xf0]  ;;  %v8531_v62 = vld [vmem:[#allocation7 + $0x7e4] sm:$0xf]  ;;  %2891 = vperm.xlu1 %8968, %v9263_v4   ;;  %v6158_v2 = vor.u32 %v8419_v57, %v6155_v58 }
  0x59   :  { %2401 = vmatpush.bf16.msrb.mxu3 %v5878_v54  ;;  %v6186_v54 = vor.u32 %v8426_v43, %v6183_v44  ;;  %v6634_v56 = vor.u32 %v8538_v49, %v6631_v50  ;;  %v6603_v63 = vld [vmem:[#allocation7 + $0x7fc] sm:$0xf0]  ;;  %v6382_v3 = vor.u32 %v8475_v59, %v6379_v61  ;;  %v8412_v6 = vld [vmem:[#allocation7 + $0x42c] sm:$0xf]  ;;  %v6127_v7 = vld [vmem:[#allocation7 + $0x444] sm:$0xf0] }
  0x5a   :  { %2363 = vmatpush.bf16.msrb.mxu0 %v6518_v60  ;;  %v6858_v60 = vor.u32 %v8594_v51, %v6855_v52  ;;  %v8468_v8 = vld [vmem:[#allocation7 + $0x5ec] sm:$0xf]  ;;  %v6351_v10 = vld [vmem:[#allocation7 + $0x604] sm:$0xf0]  ;;  %v6130_v14 = vor.u32 %v8412_v6, %v6127_v7  ;;  %v6099_v18 = vld [vmem:[#allocation7 + $0x40c] sm:$0xf0] }
  0x5b   :  { %2376 = vmatpush.bf16.msrb.mxu1 %v6742_v0  ;;  %v8587_v0 = vld [vmem:[#allocation7 + $0x9a4] sm:$0xf]  ;;  %v8524_v11 = vld [vmem:[#allocation7 + $0x7ac] sm:$0xf]  ;;  %v6575_v4 = vld [vmem:[#allocation7 + $0x7c4] sm:$0xf0]  ;;  %v6354_v15 = vor.u32 %v8468_v8, %v6351_v10 }
  0x5c   :  { %2389 = vmatpush.bf16.msrb.mxu2 %v5626_v1  ;;  %v6827_v1 = vld [vmem:[#allocation7 + $0x9bc] sm:$0xf0]  ;;  %v6799_v13 = vld [vmem:[#allocation7 + $0x984] sm:$0xf0]  ;;  %v8461_v19 = vld [vmem:[#allocation7 + $0x5b4] sm:$0xf] }
  0x5d   :  { %2402 = vmatpush.bf16.msrb.mxu3 %v5850_v5  ;;  %v6606_v5 = vor.u32 %v8531_v62, %v6603_v63  ;;  %v6830_v9 = vor.u32 %v8587_v0, %v6827_v1  ;;  %v8517_v22 = vld [vmem:[#allocation7 + $0x774] sm:$0xf]  ;;  %v6547_v23 = vld [vmem:[#allocation7 + $0x78c] sm:$0xf0]  ;;  %v8398_v29 = vld [vmem:[#allocation7 + $0x3bc] sm:$0xf] }
  0x5e   :  { %2364 = vmatpush.bf16.msrb.mxu0 %v6490_v12  ;;  %v8580_v12 = vld [vmem:[#allocation7 + $0x96c] sm:$0xf]  ;;  %v6071_v30 = vld [vmem:[#allocation7 + $0x3d4] sm:$0xf0]  ;;  %v8454_v31 = vld [vmem:[#allocation7 + $0x57c] sm:$0xf] }
  0x5f   :  { %2377 = vmatpush.bf16.msrb.mxu1 %v6714_v16  ;;  %8969 = vset.pattern.permute.xlu0 %v9187_v33  ;;  %v6578_v16 = vor.u32 %v8524_v11, %v6575_v4  ;;  %v6295_v36 = vld [vmem:[#allocation7 + $0x594] sm:$0xf0]  ;;  %v8510_v37 = vld [vmem:[#allocation7 + $0x73c] sm:$0xf]  ;;  %v6074_v43 = vor.u32 %v8398_v29, %v6071_v30  ;;  %v8391_v44 = vld [vmem:[#allocation7 + $0x384] sm:$0xf] }
  0x60   :  { %2390 = vmatpush.bf16.msrb.mxu2 %v5598_v17  ;;  %v8405_v17 = vld [vmem:[#allocation7 + $0x3f4] sm:$0xf]  ;;  %v6043_v46 = vld [vmem:[#allocation7 + $0x39c] sm:$0xf0]  ;;  %v8447_v49 = vld [vmem:[#allocation7 + $0x544] sm:$0xf] }
  0x61   :  { %2403 = vmatpush.bf16.msrb.mxu3 %v5822_v20  ;;  %2365 = vmatmul.bf16.vlgmr.msrb.gmra.mxu0 %v9266_v32  ;;  %v6802_v20 = vor.u32 %v8580_v12, %v6799_v13  ;;  %v6102_v26 = vor.u32 %v8405_v17, %v6099_v18  ;;  %v6267_v50 = vld [vmem:[#allocation7 + $0x55c] sm:$0xf0]  ;;  %v8503_v51 = vld [vmem:[#allocation7 + $0x704] sm:$0xf]  ;;  %v8332_v57 = vld [vmem:[#allocation7 + $0x1a8] sm:$0xf0]  ;;  %v6046_v59 = vor.u32 %v8391_v44, %v6043_v46 }
  0x62   :  { %2409 = vmatpush.bf16.msra.mxu0 %v6242_v21  ;;  %2378 = vmatmul.bf16.vlgmr.msrb.gmra.mxu1 %v9269_v38  ;;  %v6323_v21 = vld [vmem:[#allocation7 + $0x5cc] sm:$0xf0]  ;;  %v6491_v53 = vld [vmem:[#allocation7 + $0x71c] sm:$0xf0]  ;;  %v8444_v62 = vld [vmem:[#allocation7 + $0x528] sm:$0xf0]  ;;  %v6270_v63 = vor.u32 %v8447_v49, %v6267_v50 }
  0x63   :  { %2422 = vmatpush.bf16.msra.mxu1 %v6466_v24  ;;  %2391 = vmatmul.bf16.vlgmr.msrb.gmra.mxu2 %v9251_v34  ;;  %v8573_v24 = vld [vmem:[#allocation7 + $0x934] sm:$0xf]  ;;  %v6326_v27 = vor.u32 %v8461_v19, %v6323_v21  ;;  %v6021_v58 = vld [vmem:[#allocation7 + $0x350] sm:$0xf]  ;;  %v6494_v0 = vor.u32 %v8503_v51, %v6491_v53  ;;  %v5769_v8 = vld [vmem:[#allocation7 + $0x158] sm:$0xf] }
  0x64   :  { %2435 = vmatpush.bf16.msra.mxu2 %v6690_v25  ;;  %2404 = vmatmul.bf16.vlgmr.msrb.gmra.mxu3 %v9253_v35  ;;  %v6771_v25 = vld [vmem:[#allocation7 + $0x94c] sm:$0xf0]  ;;  %v5993_v10 = vld [vmem:[#allocation7 + $0x318] sm:$0xf]  ;;  %v8381_v4 = vld [vmem:[#allocation7 + $0x330] sm:$0xf0] }
  0x65   :  { %2448 = vmatpush.bf16.msra.mxu3 %v6914_v28  ;;  %v6550_v28 = vor.u32 %v8517_v22, %v6547_v23  ;;  %v6774_v33 = vor.u32 %v8573_v24, %v6771_v25  ;;  %v6245_v61 = vld [vmem:[#allocation7 + $0x510] sm:$0xf]  ;;  %v6217_v12 = vld [vmem:[#allocation7 + $0x4d8] sm:$0xf]  ;;  %v8437_v13 = vld [vmem:[#allocation7 + $0x4f0] sm:$0xf0]  ;;  %v5994_v17 = vor.u32 %v8381_v4, %v5993_v10 }
  0x66   :  { %2410 = vmatpush.bf16.msra.mxu0 %v6214_v39  ;;  %v6519_v39 = vld [vmem:[#allocation7 + $0x754] sm:$0xf0]  ;;  %v6469_v1 = vld [vmem:[#allocation7 + $0x6d0] sm:$0xf]  ;;  %v6246_v7 = vor.u32 %v8444_v62, %v6245_v61  ;;  %v6218_v18 = vor.u32 %v8437_v13, %v6217_v12  ;;  %v5741_v19 = vld [vmem:[#allocation7 + $0x120] sm:$0xf] }
  0x67   :  { %2423 = vmatpush.bf16.msra.mxu1 %v6438_v40  ;;  %v8566_v40 = vld [vmem:[#allocation7 + $0x8fc] sm:$0xf]  ;;  %v6522_v48 = vor.u32 %v8510_v37, %v6519_v39  ;;  %v5965_v21 = vld [vmem:[#allocation7 + $0x2e0] sm:$0xf]  ;;  %v8367_v39 = vld [vmem:[#allocation7 + $0x2c0] sm:$0xf0] }
  0x68   :  { %2436 = vmatpush.bf16.msra.mxu2 %v6662_v41  ;;  %v6743_v41 = vld [vmem:[#allocation7 + $0x914] sm:$0xf0]  ;;  %v8374_v23 = vld [vmem:[#allocation7 + $0x2f8] sm:$0xf0]  ;;  %v6189_v24 = vld [vmem:[#allocation7 + $0x4a0] sm:$0xf] }
  0x69   :  { %2449 = vmatpush.bf16.msra.mxu3 %v6886_v47  ;;  %v6298_v47 = vor.u32 %v8454_v31, %v6295_v36  ;;  %v6746_v52 = vor.u32 %v8566_v40, %v6743_v41  ;;  %v8430_v25 = vld [vmem:[#allocation7 + $0x4b8] sm:$0xf0]  ;;  %v5966_v29 = vor.u32 %v8374_v23, %v5965_v21  ;;  %v5713_v31 = vld [vmem:[#allocation7 + $0xe8] sm:$0xf]  ;;  %v8423_v41 = vld [vmem:[#allocation7 + $0x480] sm:$0xf0] }
  0x6a   :  { %2411 = vmatpush.bf16.msra.mxu0 %v6186_v54  ;;  %v8559_v54 = vld [vmem:[#allocation7 + $0x8c4] sm:$0xf]  ;;  %v6190_v30 = vor.u32 %v8430_v25, %v6189_v24  ;;  %v5937_v36 = vld [vmem:[#allocation7 + $0x2a8] sm:$0xf]  ;;  %v5685_v49 = vld [vmem:[#allocation7 + $0xb0] sm:$0xf] }
  0x6b   :  { %2424 = vmatpush.bf16.msra.mxu1 %v6410_v55  ;;  %v6715_v55 = vld [vmem:[#allocation7 + $0x8dc] sm:$0xf0]  ;;  %v6161_v40 = vld [vmem:[#allocation7 + $0x468] sm:$0xf]  ;;  %v8479_v44 = vld [vmem:[#allocation7 + $0x640] sm:$0xf0] }
  0x6c   :  { %2437 = vmatpush.bf16.msra.mxu2 %v6634_v56  ;;  %v5797_v56 = vld [vmem:[#allocation7 + $0x190] sm:$0xf]  ;;  %v8304_v50 = vld [vmem:[#allocation7 + $0xc8] sm:$0xf0]  ;;  %v5657_v61 = vld [vmem:[#allocation7 + $0x78] sm:$0xf] }
  0x6d   :  { %2450 = vmatpush.bf16.msra.mxu3 %v6858_v60  ;;  %v8388_v60 = vld [vmem:[#allocation7 + $0x368] sm:$0xf0]  ;;  %v5909_v51 = vld [vmem:[#allocation7 + $0x270] sm:$0xf]  ;;  %v8297_v62 = vld [vmem:[#allocation7 + $0x90] sm:$0xf0] }
  0x6e   :  { %2412 = vmatpush.bf16.msra.mxu0 %v6158_v2  ;;  %v8500_v2 = vld [vmem:[#allocation7 + $0x6e8] sm:$0xf0]  ;;  %v6022_v6 = vor.u32 %v8388_v60, %v6021_v58  ;;  %v5686_v58 = vor.u32 %v8304_v50, %v5685_v49  ;;  %v5629_v10 = vld [vmem:[#allocation7 + $0x40] sm:$0xf]  ;;  %v8346_v13 = vld [vmem:[#allocation7 + $0x218] sm:$0xf0] }
  0x6f   :  { %2425 = vmatpush.bf16.msra.mxu1 %v6382_v3  ;;  %v6718_v3 = vor.u32 %v8559_v54, %v6715_v55  ;;  %v6470_v11 = vor.u32 %v8500_v2, %v6469_v1  ;;  %v8360_v53 = vld [vmem:[#allocation7 + $0x288] sm:$0xf0]  ;;  %v6133_v54 = vld [vmem:[#allocation7 + $0x430] sm:$0xf]  ;;  %v8353_v1 = vld [vmem:[#allocation7 + $0x250] sm:$0xf0] }
  0x70   :  { %2438 = vmatpush.bf16.msra.mxu2 %v6606_v5  ;;  %v5798_v5 = vor.u32 %v8332_v57, %v5797_v56  ;;  %v8416_v55 = vld [vmem:[#allocation7 + $0x448] sm:$0xf0]  ;;  %v6357_v56 = vld [vmem:[#allocation7 + $0x5f0] sm:$0xf]  ;;  %v6105_v2 = vld [vmem:[#allocation7 + $0x3f8] sm:$0xf] }
  0x71   :  { %2451 = vmatpush.bf16.msra.mxu3 %v6830_v9  ;;  %v8325_v9 = vld [vmem:[#allocation7 + $0x170] sm:$0xf0]  ;;  %v8472_v57 = vld [vmem:[#allocation7 + $0x608] sm:$0xf0]  ;;  %v6134_v60 = vor.u32 %v8416_v55, %v6133_v54  ;;  %v5853_v4 = vld [vmem:[#allocation7 + $0x200] sm:$0xf] }
  0x72   :  { %2413 = vmatpush.bf16.msra.mxu0 %v6130_v14  ;;  %v6441_v14 = vld [vmem:[#allocation7 + $0x698] sm:$0xf]  ;;  %v5854_v21 = vor.u32 %v8346_v13, %v5853_v4  ;;  %v5825_v23 = vld [vmem:[#allocation7 + $0x1c8] sm:$0xf]  ;;  %v8339_v24 = vld [vmem:[#allocation7 + $0x1e0] sm:$0xf0] }
  0x73   :  { %2426 = vmatpush.bf16.msra.mxu1 %v6354_v15  ;;  %v8493_v15 = vld [vmem:[#allocation7 + $0x6b0] sm:$0xf0]  ;;  %v6049_v25 = vld [vmem:[#allocation7 + $0x388] sm:$0xf]  ;;  %vm5560_vm2 = vcmask 1043459   ;;  %vm5564_vm3 = vcmask 1044483  }
  0x74   :  { %2439 = vmatpush.bf16.msra.mxu2 %v6578_v16  ;;  %v5770_v16 = vor.u32 %v8325_v9, %v5769_v8  ;;  %v6442_v22 = vor.u32 %v8493_v15, %v6441_v14  ;;  %v6077_v14 = vld [vmem:[#allocation7 + $0x3c0] sm:$0xf]  ;;  %v8402_v15 = vld [vmem:[#allocation7 + $0x3d8] sm:$0xf0]  ;;  %v8605_v55 = vld [vmem:[#allocation7 + $0xa30] sm:$0xf0] }
  0x75   :  { %2452 = vmatpush.bf16.msra.mxu3 %v6802_v20  ;;  %v8318_v20 = vld [vmem:[#allocation7 + $0x138] sm:$0xf0]  ;;  %v6609_v4 = vld [vmem:[#allocation7 + $0x7e8] sm:$0xf]  ;;  %s9189_s4 = smov [#allocation14]   ;;  %s5578_s1 = sshll.u32 %s9563_s7, 4  ;;  %s5579_s1 = int_to_ptr.hbm [resolvable:$true] %s5578_s1 }
  0x76   :  { %2414 = vmatpush.bf16.msra.mxu0 %v6102_v26  ;;  %v6413_v26 = vld [vmem:[#allocation7 + $0x660] sm:$0xf]  ;;  %v6833_v13 = vld [vmem:[#allocation7 + $0x9a8] sm:$0xf]  ;;  %s5576_s6 = sshll.u32 %s9189_s4, 4  ;;  %vm5567_vm4 = vcmask 1042432   ;;  %s5577_s6 = int_to_ptr.vmem [resolvable:$true] %s5576_s6 }
  0x77   :  { %2427 = vmatpush.bf16.msra.mxu1 %v6326_v27  ;;  %v8486_v27 = vld [vmem:[#allocation7 + $0x678] sm:$0xf0] }
  0x78   :  { %2440 = vmatpush.bf16.msra.mxu2 %v6550_v28  ;;  %v5742_v28 = vor.u32 %v8318_v20, %v5741_v19  ;;  %v6414_v37 = vor.u32 %v8486_v27, %v6413_v26  ;;  %v5601_v19 = vld [vmem:[#allocation7 + $0x8] sm:$0xf]  ;;  %v8283_v20 = vld [vmem:[#allocation7 + $0x20] sm:$0xf0] }
  0x79   :  { %2453 = vmatpush.bf16.msra.mxu3 %v6774_v33  ;;  %v8311_v33 = vld [vmem:[#allocation7 + $0x100] sm:$0xf0] }
  0x7a   :  { %2415 = vmatpush.bf16.msra.mxu0 %v6074_v43  ;;  %v6385_v43 = vld [vmem:[#allocation7 + $0x628] sm:$0xf]  ;;  %v5714_v46 = vor.u32 %v8311_v33, %v5713_v31  ;;  %v8395_v27 = vld [vmem:[#allocation7 + $0x3a0] sm:$0xf0]  ;;  %v8556_v31 = vld [vmem:[#allocation7 + $0x8a8] sm:$0xf0] }
  0x7b   :  { %2428 = vmatpush.bf16.msra.mxu1 %v6298_v47  ;;  %v5938_v47 = vor.u32 %v8367_v39, %v5937_v36  ;;  %v6917_v33 = vld [vmem:[#allocation7 + $0xa50] sm:$0xf]  ;;  %v5602_v36 = vor.u32 %v8283_v20, %v5601_v19  ;;  %v8329_v39 = vld [vmem:[#allocation7 + $0x194] sm:$0xf]  ;;  %v5939_v19 = vld [vmem:[#allocation7 + $0x2c4] sm:$0xf0] }
  0x7c   :  { %2441 = vmatpush.bf16.msra.mxu2 %v6522_v48  ;;  %v6162_v48 = vor.u32 %v8423_v41, %v6161_v40  ;;  %v5799_v40 = vld [vmem:[#allocation7 + $0x1ac] sm:$0xf0]  ;;  %v5826_v41 = vor.u32 %v8339_v24, %v5825_v23  ;;  %v8528_v24 = vld [vmem:[#allocation7 + $0x7c8] sm:$0xf0] }
  0x7d   :  { %2454 = vmatpush.bf16.msra.mxu3 %v6746_v52  ;;  %v6386_v52 = vor.u32 %v8479_v44, %v6385_v43  ;;  %v6050_v43 = vor.u32 %v8395_v27, %v6049_v25  ;;  %v8385_v44 = vld [vmem:[#allocation7 + $0x354] sm:$0xf]  ;;  %v5802_v50 = vor.u32 %v8329_v39, %v5799_v40  ;;  %v6581_v23 = vld [vmem:[#allocation7 + $0x7b0] sm:$0xf]  ;;  %v8584_v27 = vld [vmem:[#allocation7 + $0x988] sm:$0xf0] }
  0x7e   :  { %2416 = vmatpush.bf16.msra.mxu0 %v6046_v59  ;;  %v5910_v59 = vor.u32 %v8360_v53, %v5909_v51  ;;  %v6665_v51 = vld [vmem:[#allocation7 + $0x858] sm:$0xf]  ;;  %v6805_v25 = vld [vmem:[#allocation7 + $0x970] sm:$0xf]  ;;  %v8521_v40 = vld [vmem:[#allocation7 + $0x790] sm:$0xf0] }
  0x7f   :  { %2429 = vmatpush.bf16.msra.mxu1 %v6270_v63  ;;  %v5881_v63 = vld [vmem:[#allocation7 + $0x238] sm:$0xf] }
  0x80   :  { %2442 = vmatpush.bf16.msra.mxu2 %v6494_v0  ;;  %v6358_v0 = vor.u32 %v8472_v57, %v6357_v56  ;;  %v5882_v8 = vor.u32 %v8353_v1, %v5881_v63  ;;  %v6889_v53 = vld [vmem:[#allocation7 + $0xa18] sm:$0xf]  ;;  %v8322_v56 = vld [vmem:[#allocation7 + $0x15c] sm:$0xf]  ;;  %v6637_v63 = vld [vmem:[#allocation7 + $0x820] sm:$0xf] }
  0x81   :  { %2455 = vmatpush.bf16.msra.mxu3 %v6718_v3  ;;  %2417 = vmatmul.bf16.vlgmr.msra.gmra.mxu0 %v9255_v42  ;;  %v8409_v3 = vld [vmem:[#allocation7 + $0x410] sm:$0xf0]  ;;  %v5771_v57 = vld [vmem:[#allocation7 + $0x174] sm:$0xf0]  ;;  %v6861_v1 = vld [vmem:[#allocation7 + $0x9e0] sm:$0xf] }
  0x82   :  { %2461 = vmatpush.bf16.msrb.mxu0 %v5798_v5  ;;  %2430 = vmatmul.bf16.vlgmr.msra.gmra.mxu1 %v9259_v45  ;;  %v6329_v5 = vld [vmem:[#allocation7 + $0x5b8] sm:$0xf]  ;;  %v6106_v9 = vor.u32 %v8409_v3, %v6105_v2  ;;  %v8598_v3 = vld [vmem:[#allocation7 + $0x9f8] sm:$0xf0] }
  0x83   :  { %2474 = vmatpush.bf16.msrb.mxu1 %v6022_v6  ;;  %2443 = vmatmul.bf16.vlgmr.msra.gmra.mxu2 %v9266_v32  ;;  %v8465_v6 = vld [vmem:[#allocation7 + $0x5d0] sm:$0xf0]  ;;  %v6553_v39 = vld [vmem:[#allocation7 + $0x778] sm:$0xf] }
  0x84   :  { %2487 = vmatpush.bf16.msrb.mxu2 %v6246_v7  ;;  %2456 = vmatmul.bf16.vlgmr.msra.gmra.mxu3 %v9269_v38  ;;  %v5658_v7 = vor.u32 %v8297_v62, %v5657_v61  ;;  %v6330_v12 = vor.u32 %v8465_v6, %v6329_v5  ;;  %v6890_v61 = vor.u32 %v8605_v55, %v6889_v53  ;;  %v8315_v5 = vld [vmem:[#allocation7 + $0x124] sm:$0xf]  ;;  %v5743_v6 = vld [vmem:[#allocation7 + $0x13c] sm:$0xf0] }
  0x85   :  { %2500 = vmatpush.bf16.msrb.mxu3 %v6470_v11  ;;  %v8290_v11 = vld [vmem:[#allocation7 + $0x58] sm:$0xf0]  ;;  %v5774_v62 = vor.u32 %v8322_v56, %v5771_v57  ;;  %v6525_v53 = vld [vmem:[#allocation7 + $0x740] sm:$0xf] }
  0x86   :  { %2462 = vmatpush.bf16.msrb.mxu0 %v5770_v16  ;;  %v6301_v16 = vld [vmem:[#allocation7 + $0x580] sm:$0xf]  ;;  %v8570_v57 = vld [vmem:[#allocation7 + $0x918] sm:$0xf0] }
  0x87   :  { %2475 = vmatpush.bf16.msrb.mxu1 %v5994_v17  ;;  %v8458_v17 = vld [vmem:[#allocation7 + $0x598] sm:$0xf0]  ;;  %v6749_v55 = vld [vmem:[#allocation7 + $0x900] sm:$0xf] }
  0x88   :  { %2488 = vmatpush.bf16.msrb.mxu2 %v6218_v18  ;;  %v5630_v18 = vor.u32 %v8290_v11, %v5629_v10  ;;  %v6302_v26 = vor.u32 %v8458_v17, %v6301_v16  ;;  %v6862_v10 = vor.u32 %v8598_v3, %v6861_v1  ;;  %v5746_v11 = vor.u32 %v8315_v5, %v5743_v6  ;;  %v8308_v16 = vld [vmem:[#allocation7 + $0xec] sm:$0xf]  ;;  %v5715_v17 = vld [vmem:[#allocation7 + $0x104] sm:$0xf0]  ;;  %v8563_v5 = vld [vmem:[#allocation7 + $0x8e0] sm:$0xf0] }
  0x89   :  { %2501 = vmatpush.bf16.msrb.mxu3 %v6442_v22  ;;  %v6078_v22 = vor.u32 %v8402_v15, %v6077_v14  ;;  %v8591_v15 = vld [vmem:[#allocation7 + $0x9c0] sm:$0xf0]  ;;  %v6750_v1 = vor.u32 %v8570_v57, %v6749_v55  ;;  %v6721_v3 = vld [vmem:[#allocation7 + $0x8c8] sm:$0xf]  ;;  %v8280_v6 = vld [vmem:[#allocation7 + $0xc] sm:$0xf] }
  0x8a   :  { %2463 = vmatpush.bf16.msrb.mxu0 %v5742_v28  ;;  %v6273_v28 = vld [vmem:[#allocation7 + $0x548] sm:$0xf]  ;;  %v8476_v57 = vld [vmem:[#allocation7 + $0x62c] sm:$0xf] }
  0x8b   :  { %2476 = vmatpush.bf16.msrb.mxu1 %v5966_v29  ;;  %v8451_v29 = vld [vmem:[#allocation7 + $0x560] sm:$0xf0] }
  0x8c   :  { %2489 = vmatpush.bf16.msrb.mxu2 %v6190_v30  ;;  %v6693_v30 = vld [vmem:[#allocation7 + $0x890] sm:$0xf] }
  0x8d   :  { %2502 = vmatpush.bf16.msrb.mxu3 %v6414_v37  ;;  %v8612_v37 = vld [vmem:[#allocation7 + $0xa68] sm:$0xf0] }
  0x8e   :  { %2464 = vmatpush.bf16.msrb.mxu0 %v5714_v46  ;;  %v6023_v46 = vld [vmem:[#allocation7 + $0x36c] sm:$0xf0]  ;;  %v6918_v49 = vor.u32 %v8612_v37, %v6917_v33  ;;  %v6582_v33 = vor.u32 %v8528_v24, %v6581_v23 }
  0x8f   :  { %2477 = vmatpush.bf16.msrb.mxu1 %v5938_v47  ;;  %v6274_v47 = vor.u32 %v8451_v29, %v6273_v28  ;;  %v6026_v54 = vor.u32 %v8385_v44, %v6023_v46  ;;  %v8301_v28 = vld [vmem:[#allocation7 + $0xb4] sm:$0xf]  ;;  %v5687_v29 = vld [vmem:[#allocation7 + $0xcc] sm:$0xf0]  ;;  %v8294_v46 = vld [vmem:[#allocation7 + $0x7c] sm:$0xf] }
  0x90   :  { %2490 = vmatpush.bf16.msrb.mxu2 %v6162_v48  ;;  %v6694_v48 = vor.u32 %v8556_v31, %v6693_v30  ;;  %v8357_v30 = vld [vmem:[#allocation7 + $0x274] sm:$0xf]  ;;  %v5911_v31 = vld [vmem:[#allocation7 + $0x28c] sm:$0xf0]  ;;  %v5690_v37 = vor.u32 %v8301_v28, %v5687_v29  ;;  %v6443_v29 = vld [vmem:[#allocation7 + $0x6b4] sm:$0xf0] }
  0x91   :  { %2503 = vmatpush.bf16.msrb.mxu3 %v6386_v52  ;;  %v8549_v52 = vld [vmem:[#allocation7 + $0x870] sm:$0xf0] }
  0x92   :  { %2465 = vmatpush.bf16.msrb.mxu0 %v5686_v58  ;;  %v8378_v58 = vld [vmem:[#allocation7 + $0x31c] sm:$0xf]  ;;  %v8577_v44 = vld [vmem:[#allocation7 + $0x950] sm:$0xf0] }
  0x93   :  { %2478 = vmatpush.bf16.msrb.mxu1 %v5910_v59  ;;  %v5995_v59 = vld [vmem:[#allocation7 + $0x334] sm:$0xf0] }
  0x94   :  { %2491 = vmatpush.bf16.msrb.mxu2 %v6134_v60  ;;  %v6666_v60 = vor.u32 %v8549_v52, %v6665_v51  ;;  %v5998_v2 = vor.u32 %v8378_v58, %v5995_v59  ;;  %v8287_v58 = vld [vmem:[#allocation7 + $0x44] sm:$0xf]  ;;  %v5631_v59 = vld [vmem:[#allocation7 + $0x5c] sm:$0xf0] }
  0x95   :  { %2504 = vmatpush.bf16.msrb.mxu3 %v6358_v0  ;;  %v8542_v0 = vld [vmem:[#allocation7 + $0x838] sm:$0xf0] }
  0x96   :  { %2466 = vmatpush.bf16.msrb.mxu0 %v5658_v7  ;;  %v8371_v7 = vld [vmem:[#allocation7 + $0x2e4] sm:$0xf] }
  0x97   :  { %2479 = vmatpush.bf16.msrb.mxu1 %v5882_v8  ;;  %v5967_v8 = vld [vmem:[#allocation7 + $0x2fc] sm:$0xf0] }
  0x98   :  { %2492 = vmatpush.bf16.msrb.mxu2 %v6106_v9  ;;  %v6638_v9 = vor.u32 %v8542_v0, %v6637_v63  ;;  %v5970_v14 = vor.u32 %v8371_v7, %v5967_v8  ;;  %v6497_v63 = vld [vmem:[#allocation7 + $0x708] sm:$0xf]  ;;  %v8507_v0 = vld [vmem:[#allocation7 + $0x720] sm:$0xf0] }
  0x99   :  { %2505 = vmatpush.bf16.msrb.mxu3 %v6330_v12  ;;  %v8535_v12 = vld [vmem:[#allocation7 + $0x800] sm:$0xf0]  ;;  %v5603_v8 = vld [vmem:[#allocation7 + $0x24] sm:$0xf0] }
  0x9a   :  { %2467 = vmatpush.bf16.msrb.mxu0 %v5630_v18  ;;  %v8364_v18 = vld [vmem:[#allocation7 + $0x2ac] sm:$0xf]  ;;  %v6610_v20 = vor.u32 %v8535_v12, %v6609_v4  ;;  %v6247_v4 = vld [vmem:[#allocation7 + $0x52c] sm:$0xf0]  ;;  %v8497_v12 = vld [vmem:[#allocation7 + $0x6d4] sm:$0xf] }
  0x9b   :  { %2480 = vmatpush.bf16.msrb.mxu1 %v5854_v21  ;;  %v6834_v21 = vor.u32 %v8591_v15, %v6833_v13  ;;  %v6498_v13 = vor.u32 %v8507_v0, %v6497_v63  ;;  %v8553_v15 = vld [vmem:[#allocation7 + $0x894] sm:$0xf]  ;;  %v8588_v63 = vld [vmem:[#allocation7 + $0x9ac] sm:$0xf]  ;;  %v6835_v0 = vld [vmem:[#allocation7 + $0x9c4] sm:$0xf0] }
  0x9c   :  { %2493 = vmatpush.bf16.msrb.mxu2 %v6078_v22  ;;  %v5718_v22 = vor.u32 %v8308_v16, %v5715_v17  ;;  %v6695_v16 = vld [vmem:[#allocation7 + $0x8ac] sm:$0xf0]  ;;  %v6722_v17 = vor.u32 %v8563_v5, %v6721_v3 }
  0x9d   :  { %2506 = vmatpush.bf16.msrb.mxu3 %v6302_v26  ;;  %v5942_v26 = vor.u32 %v8364_v18, %v5939_v19  ;;  %v5606_v18 = vor.u32 %v8280_v6, %v5603_v8  ;;  %v8609_v19 = vld [vmem:[#allocation7 + $0xa54] sm:$0xf]  ;;  %v6698_v24 = vor.u32 %v8553_v15, %v6695_v16  ;;  %v6135_v6 = vld [vmem:[#allocation7 + $0x44c] sm:$0xf0]  ;;  %v8406_v15 = vld [vmem:[#allocation7 + $0x3fc] sm:$0xf] }
  0x9e   :  { %2468 = vmatpush.bf16.msrb.mxu0 %v5602_v36  ;;  %v6806_v36 = vor.u32 %v8584_v27, %v6805_v25  ;;  %v8434_v25 = vld [vmem:[#allocation7 + $0x4dc] sm:$0xf] }
  0x9f   :  { %2481 = vmatpush.bf16.msrb.mxu1 %v5826_v41  ;;  %v6777_v41 = vld [vmem:[#allocation7 + $0x938] sm:$0xf]  ;;  %v8490_v27 = vld [vmem:[#allocation7 + $0x69c] sm:$0xf] }
  0xa0   :  { %2494 = vmatpush.bf16.msrb.mxu2 %v6050_v43  ;;  %v5914_v43 = vor.u32 %v8357_v30, %v5911_v31  ;;  %v6778_v51 = vor.u32 %v8577_v44, %v6777_v41  ;;  %v8546_v30 = vld [vmem:[#allocation7 + $0x85c] sm:$0xf]  ;;  %v6667_v31 = vld [vmem:[#allocation7 + $0x874] sm:$0xf0]  ;;  %v8427_v41 = vld [vmem:[#allocation7 + $0x4a4] sm:$0xf] }
  0xa1   :  { %2507 = vmatpush.bf16.msrb.mxu3 %v6274_v47  ;;  %2469 = vmatmul.bf16.vlgmr.msrb.gmra.mxu0 %v9251_v34  ;;  %v5659_v47 = vld [vmem:[#allocation7 + $0x94] sm:$0xf0]  ;;  %v8483_v44 = vld [vmem:[#allocation7 + $0x664] sm:$0xf] }
  0xa2   :  { %2513 = vmatpush.bf16.msra.mxu0 %v6694_v48  ;;  %2482 = vmatmul.bf16.vlgmr.msrb.gmra.mxu1 %v9253_v35  ;;  %v8350_v48 = vld [vmem:[#allocation7 + $0x23c] sm:$0xf]  ;;  %v5662_v52 = vor.u32 %v8294_v46, %v5659_v47  ;;  %v6415_v47 = vld [vmem:[#allocation7 + $0x67c] sm:$0xf0] }
  0xa3   :  { %2526 = vmatpush.bf16.msra.mxu1 %v6918_v49  ;;  %2495 = vmatmul.bf16.vlgmr.msrb.gmra.mxu2 %v9255_v42  ;;  %v5883_v49 = vld [vmem:[#allocation7 + $0x254] sm:$0xf0] }
  0xa4   :  { %2539 = vmatpush.bf16.msra.mxu2 %v5802_v50  ;;  %2508 = vmatmul.bf16.vlgmr.msrb.gmra.mxu3 %v9259_v45  ;;  %v6554_v50 = vor.u32 %v8521_v40, %v6553_v39  ;;  %v5886_v56 = vor.u32 %v8350_v48, %v5883_v49  ;;  %v6446_v39 = vor.u32 %v8490_v27, %v6443_v29  ;;  %v8539_v48 = vld [vmem:[#allocation7 + $0x824] sm:$0xf]  ;;  %v6639_v49 = vld [vmem:[#allocation7 + $0x83c] sm:$0xf0] }
  0xa5   :  { %2552 = vmatpush.bf16.msra.mxu3 %v6026_v54  ;;  %v8514_v54 = vld [vmem:[#allocation7 + $0x758] sm:$0xf0]  ;;  %v6670_v40 = vor.u32 %v8546_v30, %v6667_v31  ;;  %v6642_v55 = vor.u32 %v8539_v48, %v6639_v49  ;;  %v8399_v31 = vld [vmem:[#allocation7 + $0x3c4] sm:$0xf]  ;;  %v8392_v48 = vld [vmem:[#allocation7 + $0x38c] sm:$0xf] }
  0xa6   :  { %2514 = vmatpush.bf16.msra.mxu0 %v6666_v60  ;;  %v8343_v60 = vld [vmem:[#allocation7 + $0x204] sm:$0xf]  ;;  %v6051_v49 = vld [vmem:[#allocation7 + $0x3a4] sm:$0xf0] }
  0xa7   :  { %2527 = vmatpush.bf16.msra.mxu1 %v6890_v61  ;;  %v5855_v61 = vld [vmem:[#allocation7 + $0x21c] sm:$0xf0] }
  0xa8   :  { %2540 = vmatpush.bf16.msra.mxu2 %v5774_v62  ;;  %v6526_v62 = vor.u32 %v8514_v54, %v6525_v53  ;;  %v5858_v7 = vor.u32 %v8343_v60, %v5855_v61  ;;  %v8420_v53 = vld [vmem:[#allocation7 + $0x46c] sm:$0xf]  ;;  %v6418_v54 = vor.u32 %v8483_v44, %v6415_v47  ;;  %v6611_v61 = vld [vmem:[#allocation7 + $0x804] sm:$0xf0]  ;;  %v8567_v44 = vld [vmem:[#allocation7 + $0x904] sm:$0xf] }
  0xa9   :  { %2553 = vmatpush.bf16.msra.mxu3 %v5998_v2  ;;  %v5634_v2 = vor.u32 %v8287_v58, %v5631_v59  ;;  %v6387_v58 = vld [vmem:[#allocation7 + $0x644] sm:$0xf0]  ;;  %v8532_v60 = vld [vmem:[#allocation7 + $0x7ec] sm:$0xf] }
  0xaa   :  { %2515 = vmatpush.bf16.msra.mxu0 %v6638_v9  ;;  %v8336_v9 = vld [vmem:[#allocation7 + $0x1cc] sm:$0xf]  ;;  %v6390_v3 = vor.u32 %v8476_v57, %v6387_v58  ;;  %v6614_v5 = vor.u32 %v8532_v60, %v6611_v61  ;;  %v6723_v61 = vld [vmem:[#allocation7 + $0x8e4] sm:$0xf0] }
  0xab   :  { %2528 = vmatpush.bf16.msra.mxu1 %v6862_v10  ;;  %v5827_v10 = vld [vmem:[#allocation7 + $0x1e4] sm:$0xf0]  ;;  %v8560_v60 = vld [vmem:[#allocation7 + $0x8cc] sm:$0xf] }
  0xac   :  { %2541 = vmatpush.bf16.msra.mxu2 %v5746_v11  ;;  %v8441_v11 = vld [vmem:[#allocation7 + $0x514] sm:$0xf] }
  0xad   :  { %2554 = vmatpush.bf16.msra.mxu3 %v5970_v14  ;;  %v6471_v14 = vld [vmem:[#allocation7 + $0x6ec] sm:$0xf0] }
  0xae   :  { %2516 = vmatpush.bf16.msra.mxu0 %v6610_v20  ;;  %v6919_v20 = vld [vmem:[#allocation7 + $0xa6c] sm:$0xf0]  ;;  %v6474_v23 = vor.u32 %v8497_v12, %v6471_v14  ;;  %v8581_v12 = vld [vmem:[#allocation7 + $0x974] sm:$0xf] }
  0xaf   :  { %2529 = vmatpush.bf16.msra.mxu1 %v6834_v21  ;;  %v5830_v21 = vor.u32 %v8336_v9, %v5827_v10  ;;  %v6922_v28 = vor.u32 %v8609_v19, %v6919_v20  ;;  %v6838_v9 = vor.u32 %v8588_v63, %v6835_v0  ;;  %v6359_v10 = vld [vmem:[#allocation7 + $0x60c] sm:$0xf0]  ;;  %v8462_v19 = vld [vmem:[#allocation7 + $0x5bc] sm:$0xf]  ;;  %v5805_v63 = vld [vmem:[#allocation7 + $0x198] sm:$0xf] }
  0xb0   :  { %2542 = vmatpush.bf16.msra.mxu2 %v5718_v22  ;;  %v6250_v22 = vor.u32 %v8441_v11, %v6247_v4  ;;  %v8525_v11 = vld [vmem:[#allocation7 + $0x7b4] sm:$0xf]  ;;  %v6583_v4 = vld [vmem:[#allocation7 + $0x7cc] sm:$0xf0] }
  0xb1   :  { %2555 = vmatpush.bf16.msra.mxu3 %v5942_v26  ;;  %v6219_v26 = vld [vmem:[#allocation7 + $0x4f4] sm:$0xf0]  ;;  %v8333_v0 = vld [vmem:[#allocation7 + $0x1b0] sm:$0xf0] }
  0xb2   :  { %2517 = vmatpush.bf16.msra.mxu0 %v6582_v33  ;;  %v8602_v33 = vld [vmem:[#allocation7 + $0xa1c] sm:$0xf] }
  0xb3   :  { %2530 = vmatpush.bf16.msra.mxu1 %v6806_v36  ;;  %v6891_v36 = vld [vmem:[#allocation7 + $0xa34] sm:$0xf0] }
  0xb4   :  { %2543 = vmatpush.bf16.msra.mxu2 %v5690_v37  ;;  %v6222_v37 = vor.u32 %v8434_v25, %v6219_v26  ;;  %v6894_v46 = vor.u32 %v8602_v33, %v6891_v36  ;;  %v8574_v25 = vld [vmem:[#allocation7 + $0x93c] sm:$0xf]  ;;  %v6779_v26 = vld [vmem:[#allocation7 + $0x954] sm:$0xf0]  ;;  %v6079_v33 = vld [vmem:[#allocation7 + $0x3dc] sm:$0xf0] }
  0xb5   :  { %2556 = vmatpush.bf16.msra.mxu3 %v5914_v43  ;;  %v6191_v43 = vld [vmem:[#allocation7 + $0x4bc] sm:$0xf0]  ;;  %v8455_v36 = vld [vmem:[#allocation7 + $0x584] sm:$0xf]  ;;  %v6082_v47 = vor.u32 %v8399_v31, %v6079_v33 }
  0xb6   :  { %2518 = vmatpush.bf16.msra.mxu0 %v6554_v50  ;;  %v8595_v50 = vld [vmem:[#allocation7 + $0x9e4] sm:$0xf] }
  0xb7   :  { %2531 = vmatpush.bf16.msra.mxu1 %v6778_v51  ;;  %v6863_v51 = vld [vmem:[#allocation7 + $0x9fc] sm:$0xf0] }
  0xb8   :  { %2544 = vmatpush.bf16.msra.mxu2 %v5662_v52  ;;  %v6194_v52 = vor.u32 %v8427_v41, %v6191_v43  ;;  %v6866_v59 = vor.u32 %v8595_v50, %v6863_v51  ;;  %v8511_v41 = vld [vmem:[#allocation7 + $0x744] sm:$0xf]  ;;  %v6527_v43 = vld [vmem:[#allocation7 + $0x75c] sm:$0xf0] }
  0xb9   :  { %2557 = vmatpush.bf16.msra.mxu3 %v5886_v56  ;;  %v6163_v56 = vld [vmem:[#allocation7 + $0x484] sm:$0xf0] }
  0xba   :  { %2519 = vmatpush.bf16.msra.mxu0 %v6526_v62  ;;  %v9290_v62 = vld [vmem:[#allocation8] sm:$0x77] }
  0xbb   :  { %2532 = vmatpush.bf16.msra.mxu1 %v6750_v1  ;;  %v6166_v1 = vor.u32 %v8420_v53, %v6163_v56  ;;  %v549_v8 = vperm.slane %v9290_v62, 0  ;;  %v6530_v53 = vor.u32 %v8511_v41, %v6527_v43  ;;  %v8504_v56 = vld [vmem:[#allocation7 + $0x70c] sm:$0xf]  ;;  %v8375_v43 = vld [vmem:[#allocation7 + $0x300] sm:$0xf0] }
  0xbc   :  { %2545 = vmatpush.bf16.msra.mxu2 %v5634_v2  ;;  %v8413_v2 = vld [vmem:[#allocation7 + $0x434] sm:$0xf] }
  0xbd   :  { %2558 = vmatpush.bf16.msra.mxu3 %v5858_v7  ;;  %v8469_v7 = vld [vmem:[#allocation7 + $0x5f4] sm:$0xf]  ;;  %v6138_v14 = vor.u32 %v8413_v2, %v6135_v6  ;;  %v563_v20 = vperm.slane %v549_v8, 0  ;;  %v6253_v6 = vld [vmem:[#allocation7 + $0x518] sm:$0xf] }
  0xbe   :  { %2520 = vmatpush.bf16.msra.mxu0 %v6498_v13  ;;  %v6807_v13 = vld [vmem:[#allocation7 + $0x98c] sm:$0xf0]  ;;  %v6362_v16 = vor.u32 %v8469_v7, %v6359_v10  ;;  %v8445_v7 = vld [vmem:[#allocation7 + $0x530] sm:$0xf0]  ;;  %v6477_v10 = vld [vmem:[#allocation7 + $0x6d8] sm:$0xf] }
  0xbf   :  { %2533 = vmatpush.bf16.msra.mxu1 %v6722_v17  ;;  %v6586_v17 = vor.u32 %v8525_v11, %v6583_v4  ;;  %v8501_v11 = vld [vmem:[#allocation7 + $0x6f0] sm:$0xf0]  ;;  %v6726_v4 = vor.u32 %v8560_v60, %v6723_v61  ;;  %v6393_v60 = vld [vmem:[#allocation7 + $0x630] sm:$0xf]  ;;  %v8480_v61 = vld [vmem:[#allocation7 + $0x648] sm:$0xf0] }
  0xc0   :  { %2546 = vmatpush.bf16.msra.mxu2 %v5606_v18  ;;  %v6107_v18 = vld [vmem:[#allocation7 + $0x414] sm:$0xf0] }
  0xc1   :  { %2559 = vmatpush.bf16.msra.mxu3 %v5830_v21  ;;  %2521 = vmatmul.bf16.vlgmr.msra.gmra.mxu0 %v9266_v32  ;;  %v6810_v21 = vor.u32 %v8581_v12, %v6807_v13  ;;  %v6110_v27 = vor.u32 %v8406_v15, %v6107_v18  ;;  %v5806_v12 = vor.u32 %v8333_v0, %v5805_v63  ;;  %v5777_v15 = vld [vmem:[#allocation7 + $0x160] sm:$0xf] }
  0xc2   :  { %2565 = vmatpush.bf16.msrb.mxu0 %v6250_v22  ;;  %2534 = vmatmul.bf16.vlgmr.msra.gmra.mxu1 %v9269_v38  ;;  %v6331_v22 = vld [vmem:[#allocation7 + $0x5d4] sm:$0xf0] }
  0xc3   :  { %2578 = vmatpush.bf16.msrb.mxu1 %v6474_v23  ;;  %2547 = vmatmul.bf16.vlgmr.msra.gmra.mxu2 %v9251_v34  ;;  %v8518_v23 = vld [vmem:[#allocation7 + $0x77c] sm:$0xf]  ;;  %v6334_v29 = vor.u32 %v8462_v19, %v6331_v22  ;;  %v6478_v19 = vor.u32 %v8501_v11, %v6477_v10  ;;  %v6394_v10 = vor.u32 %v8480_v61, %v6393_v60  ;;  %v8361_v11 = vld [vmem:[#allocation7 + $0x290] sm:$0xf0]  ;;  %v8452_v60 = vld [vmem:[#allocation7 + $0x568] sm:$0xf0] }
  0xc4   :  { %2591 = vmatpush.bf16.msrb.mxu2 %v6698_v24  ;;  %2560 = vmatmul.bf16.vlgmr.msra.gmra.mxu3 %v9253_v35  ;;  %v6555_v24 = vld [vmem:[#allocation7 + $0x794] sm:$0xf0]  ;;  %v8438_v22 = vld [vmem:[#allocation7 + $0x4f8] sm:$0xf0] }
  0xc5   :  { %2604 = vmatpush.bf16.msrb.mxu3 %v6922_v28  ;;  %v9293_v28 = vpop.permute.xlu0 %542  ;;  %v6558_v30 = vor.u32 %v8518_v23, %v6555_v24  ;;  %v6701_v61 = vld [vmem:[#allocation7 + $0x898] sm:$0xf] }
  0xc6   :  { %2566 = vmatpush.bf16.msrb.mxu0 %v6222_v37  ;;  %v570_v37 = vmul.f32 %v563_v20, %v9293_v28  ;;  %v2314_v50 = vpop.f32.mrf.mxu0  ;;  %v8382_v20 = vld [vmem:[#allocation7 + $0x338] sm:$0xf0] }
  0xc7   :  { %2579 = vmatpush.bf16.msrb.mxu1 %v6446_v39  ;;  %v6782_v39 = vor.u32 %v8574_v25, %v6779_v26  ;;  %v2327_v51 = vpop.f32.mrf.mxu1  ;;  %v6449_v26 = vld [vmem:[#allocation7 + $0x6a0] sm:$0xf] }
  0xc8   :  { %2592 = vmatpush.bf16.msrb.mxu2 %v6670_v40  ;;  %v6303_v40 = vld [vmem:[#allocation7 + $0x59c] sm:$0xf0]  ;;  %v2315_v57 = vadd.f32 %v2314_v50, %v570_v37  ;;  %v8319_v37 = vld [vmem:[#allocation7 + $0x140] sm:$0xf0] }
  0xc9   :  { %2605 = vmatpush.bf16.msrb.mxu3 %v6894_v46  ;;  %v6751_v46 = vld [vmem:[#allocation7 + $0x91c] sm:$0xf0] }
  0xca   :  { %2567 = vmatpush.bf16.msrb.mxu0 %v6194_v52  ;;  %v6306_v52 = vor.u32 %v8455_v36, %v6303_v40  ;;  %v6754_v58 = vor.u32 %v8567_v44, %v6751_v46  ;;  %v2328_v2 = vadd.f32 %v2327_v51, %v2315_v57  ;;  %v5749_v36 = vld [vmem:[#allocation7 + $0x128] sm:$0xf]  ;;  %v8431_v46 = vld [vmem:[#allocation7 + $0x4c0] sm:$0xf0]  ;;  %v8368_v57 = vld [vmem:[#allocation7 + $0x2c8] sm:$0xf0] }
  0xcb   :  { %2580 = vmatpush.bf16.msrb.mxu1 %v6418_v54  ;;  %v8448_v54 = vld [vmem:[#allocation7 + $0x54c] sm:$0xf]  ;;  %v6197_v44 = vld [vmem:[#allocation7 + $0x4a8] sm:$0xf] }
  0xcc   :  { %2593 = vmatpush.bf16.msrb.mxu2 %v6642_v55  ;;  %v6275_v55 = vld [vmem:[#allocation7 + $0x564] sm:$0xf0]  ;;  %v6198_v51 = vor.u32 %v8431_v46, %v6197_v44  ;;  %v8403_v46 = vld [vmem:[#allocation7 + $0x3e0] sm:$0xf0] }
  0xcd   :  { %2606 = vmatpush.bf16.msrb.mxu3 %v6866_v59  ;;  %v6499_v59 = vld [vmem:[#allocation7 + $0x724] sm:$0xf0]  ;;  %v6278_v8 = vor.u32 %v8448_v54, %v6275_v55  ;;  %v5945_v54 = vld [vmem:[#allocation7 + $0x2b0] sm:$0xf] }
  0xce   :  { %2568 = vmatpush.bf16.msrb.mxu0 %v6166_v1  ;;  %v6029_v1 = vld [vmem:[#allocation7 + $0x358] sm:$0xf]  ;;  %v2340_v18 = vpop.f32.mrf.mxu2  ;;  %v2316_v23 = vpop.f32.mrf.mxu0  ;;  %v6085_v44 = vld [vmem:[#allocation7 + $0x3c8] sm:$0xf] }
  0xcf   :  { %2581 = vmatpush.bf16.msrb.mxu1 %v6390_v3  ;;  %v6054_v3 = vor.u32 %v8392_v48, %v6051_v49  ;;  %v2329_v24 = vpop.f32.mrf.mxu1  ;;  %v2341_v25 = vadd.f32 %v2340_v18, %v2328_v2  ;;  %v8487_v48 = vld [vmem:[#allocation7 + $0x680] sm:$0xf0]  ;;  %v5750_v49 = vor.u32 %v8319_v37, %v5749_v36  ;;  %v8354_v23 = vld [vmem:[#allocation7 + $0x258] sm:$0xf0]  ;;  %v5637_v37 = vld [vmem:[#allocation7 + $0x48] sm:$0xf] }
  0xd0   :  { %2594 = vmatpush.bf16.msrb.mxu2 %v6614_v5  ;;  %v8389_v5 = vld [vmem:[#allocation7 + $0x370] sm:$0xf0]  ;;  %v6113_v24 = vld [vmem:[#allocation7 + $0x400] sm:$0xf] }
  0xd1   :  { %2607 = vmatpush.bf16.msrb.mxu3 %v6838_v9  ;;  %v6502_v9 = vor.u32 %v8504_v56, %v6499_v59  ;;  %v6030_v13 = vor.u32 %v8389_v5, %v6029_v1  ;;  %v8424_v59 = vld [vmem:[#allocation7 + $0x488] sm:$0xf0]  ;;  %v5946_v5 = vor.u32 %v8368_v57, %v5945_v54  ;;  %v6086_v54 = vor.u32 %v8403_v46, %v6085_v44 }
  0xd2   :  { %2569 = vmatpush.bf16.msrb.mxu0 %v6138_v14  ;;  %v6254_v14 = vor.u32 %v8445_v7, %v6253_v6  ;;  %v5693_v7 = vld [vmem:[#allocation7 + $0xb8] sm:$0xf]  ;;  %v8396_v57 = vld [vmem:[#allocation7 + $0x3a8] sm:$0xf0] }
  0xd3   :  { %2582 = vmatpush.bf16.msrb.mxu1 %v6362_v16  ;;  %v8326_v16 = vld [vmem:[#allocation7 + $0x178] sm:$0xf0] }
  0xd4   :  { %2595 = vmatpush.bf16.msrb.mxu2 %v6586_v17  ;;  %v6001_v17 = vld [vmem:[#allocation7 + $0x320] sm:$0xf] }
  0xd5   :  { %2608 = vmatpush.bf16.msrb.mxu3 %v6810_v21  ;;  %v6225_v21 = vld [vmem:[#allocation7 + $0x4e0] sm:$0xf]  ;;  %v6002_v31 = vor.u32 %v8382_v20, %v6001_v17  ;;  %v8298_v20 = vld [vmem:[#allocation7 + $0x98] sm:$0xf0] }
  0xd6   :  { %2570 = vmatpush.bf16.msrb.mxu0 %v6110_v27  ;;  %v8494_v27 = vld [vmem:[#allocation7 + $0x6b8] sm:$0xf0]  ;;  %v6226_v33 = vor.u32 %v8438_v22, %v6225_v21  ;;  %v2342_v55 = vpop.f32.mrf.mxu2  ;;  %v5889_v21 = vld [vmem:[#allocation7 + $0x240] sm:$0xf] }
  0xd7   :  { %2583 = vmatpush.bf16.msrb.mxu1 %v6334_v29  ;;  %v5778_v29 = vor.u32 %v8326_v16, %v5777_v15  ;;  %v6450_v41 = vor.u32 %v8494_v27, %v6449_v26  ;;  %v8473_v15 = vld [vmem:[#allocation7 + $0x610] sm:$0xf0]  ;;  %v6337_v26 = vld [vmem:[#allocation7 + $0x5c0] sm:$0xf]  ;;  %v8466_v27 = vld [vmem:[#allocation7 + $0x5d8] sm:$0xf0] }
  0xd8   :  { %2596 = vmatpush.bf16.msrb.mxu2 %v6558_v30  ;;  %v2353_v30 = vpop.f32.mrf.mxu3  ;;  %v8340_v55 = vld [vmem:[#allocation7 + $0x1e8] sm:$0xf0] }
  0xd9   :  { %2609 = vmatpush.bf16.msrb.mxu3 %v6782_v39  ;;  %v5973_v39 = vld [vmem:[#allocation7 + $0x2e8] sm:$0xf]  ;;  %v2354_v40 = vadd.f32 %v2353_v30, %v2341_v25  ;;  %v8410_v25 = vld [vmem:[#allocation7 + $0x418] sm:$0xf0] }
  0xda   :  { %2571 = vmatpush.bf16.msrb.mxu0 %v6082_v47  ;;  %v6421_v47 = vld [vmem:[#allocation7 + $0x668] sm:$0xf]  ;;  %v5974_v50 = vor.u32 %v8375_v43, %v5973_v39  ;;  %v6114_v36 = vor.u32 %v8410_v25, %v6113_v24  ;;  %v8291_v39 = vld [vmem:[#allocation7 + $0x60] sm:$0xf0] }
  0xdb   :  { %2584 = vmatpush.bf16.msrb.mxu1 %v6306_v52  ;;  %v5721_v52 = vld [vmem:[#allocation7 + $0xf0] sm:$0xf]  ;;  %v6422_v56 = vor.u32 %v8487_v48, %v6421_v47  ;;  %v8347_v43 = vld [vmem:[#allocation7 + $0x220] sm:$0xf0]  ;;  %v6309_v47 = vld [vmem:[#allocation7 + $0x588] sm:$0xf] }
  0xdc   :  { %2597 = vmatpush.bf16.msrb.mxu2 %v6530_v53  ;;  %v8312_v53 = vld [vmem:[#allocation7 + $0x108] sm:$0xf0]  ;;  %v8459_v48 = vld [vmem:[#allocation7 + $0x5a0] sm:$0xf0] }
  0xdd   :  { %2610 = vmatpush.bf16.msrb.mxu3 %v6754_v58  ;;  %v6169_v58 = vld [vmem:[#allocation7 + $0x470] sm:$0xf]  ;;  %v5722_v0 = vor.u32 %v8312_v53, %v5721_v52  ;;  %v8379_v25 = vld [vmem:[#allocation7 + $0x324] sm:$0xf] }
  0xde   :  { %2572 = vmatpush.bf16.msrb.mxu0 %v6054_v3  ;;  %v2366_v63 = vpop.f32.mrf.mxu0  ;;  %v6170_v6 = vor.u32 %v8424_v59, %v6169_v58  ;;  %v5833_v52 = vld [vmem:[#allocation7 + $0x1d0] sm:$0xf]  ;;  %v6310_v58 = vor.u32 %v8459_v48, %v6309_v47  ;;  %v8372_v48 = vld [vmem:[#allocation7 + $0x2ec] sm:$0xf] }
  0xdf   :  { %2585 = vmatpush.bf16.msrb.mxu1 %v6278_v8  ;;  %v2367_v1 = vadd.f32 %v2366_v63, %v2354_v40  ;;  %v2379_v2 = vpop.f32.mrf.mxu1  ;;  %v8305_v8 = vld [vmem:[#allocation7 + $0xd0] sm:$0xf0]  ;;  %v5861_v40 = vld [vmem:[#allocation7 + $0x208] sm:$0xf]  ;;  %v6281_v59 = vld [vmem:[#allocation7 + $0x550] sm:$0xf] }
  0xe0   :  { %2598 = vmatpush.bf16.msrb.mxu2 %v6502_v9  ;;  %v2355_v3 = vpop.f32.mrf.mxu3  ;;  %v5917_v9 = vld [vmem:[#allocation7 + $0x278] sm:$0xf]  ;;  %v5694_v16 = vor.u32 %v8305_v8, %v5693_v7  ;;  %v5862_v53 = vor.u32 %v8347_v43, %v5861_v40  ;;  %v8557_v63 = vld [vmem:[#allocation7 + $0x8b0] sm:$0xf0]  ;;  %v8599_v40 = vld [vmem:[#allocation7 + $0xa00] sm:$0xf0] }
  0xe1   :  { %2611 = vmatpush.bf16.msrb.mxu3 %v6726_v4  ;;  %2573 = vmatmul.bf16.vlgmr.msrb.gmra.mxu0 %v9255_v42  ;;  %v6141_v4 = vld [vmem:[#allocation7 + $0x438] sm:$0xf]  ;;  %v5918_v17 = vor.u32 %v8361_v11, %v5917_v9  ;;  %v8330_v3 = vld [vmem:[#allocation7 + $0x19c] sm:$0xf]  ;;  %v5834_v9 = vor.u32 %v8340_v55, %v5833_v52  ;;  %v5751_v43 = vld [vmem:[#allocation7 + $0x144] sm:$0xf0] }
  0xe2   :  { %2617 = vmatpush.bf16.msra.mxu0 %v5806_v12  ;;  %2586 = vmatmul.bf16.vlgmr.msrb.gmra.mxu1 %v9259_v45  ;;  %v8417_v12 = vld [vmem:[#allocation7 + $0x450] sm:$0xf0]  ;;  %v8386_v11 = vld [vmem:[#allocation7 + $0x35c] sm:$0xf]  ;;  %v6841_v55 = vld [vmem:[#allocation7 + $0x9b0] sm:$0xf] }
  0xe3   :  { %2630 = vmatpush.bf16.msra.mxu1 %v6030_v13  ;;  %2599 = vmatmul.bf16.vlgmr.msrb.gmra.mxu2 %v9266_v32  ;;  %v9300_v13 = vadd.f32 %v2379_v2, %v2367_v1  ;;  %v6142_v18 = vor.u32 %v8417_v12, %v6141_v4  ;;  %v8613_v1 = vld [vmem:[#allocation7 + $0xa70] sm:$0xf0]  ;;  %v6031_v4 = vld [vmem:[#allocation7 + $0x374] sm:$0xf0]  ;;  %v6282_v12 = vor.u32 %v8452_v60, %v6281_v59  ;;  %v5723_v59 = vld [vmem:[#allocation7 + $0x10c] sm:$0xf0] }
  0xe4   :  { %2643 = vmatpush.bf16.msra.mxu2 %v6254_v14  ;;  %2612 = vmatmul.bf16.vlgmr.msrb.gmra.mxu3 %v9269_v38  ;;  %v6365_v14 = vld [vmem:[#allocation7 + $0x5f8] sm:$0xf]  ;;  %v8365_v60 = vld [vmem:[#allocation7 + $0x2b4] sm:$0xf] }
  0xe5   :  { %2656 = vmatpush.bf16.msra.mxu3 %v6478_v19  ;;  %v5665_v19 = vld [vmem:[#allocation7 + $0x80] sm:$0xf]  ;;  %v6366_v22 = vor.u32 %v8473_v15, %v6365_v14  ;;  %v6702_v14 = vor.u32 %v8557_v63, %v6701_v61  ;;  %v5947_v61 = vld [vmem:[#allocation7 + $0x2cc] sm:$0xf0] }
  0xe6   :  { %2618 = vmatpush.bf16.msra.mxu0 %v5778_v29  ;;  %v2368_v29 = vpop.f32.mrf.mxu0  ;;  %v5666_v30 = vor.u32 %v8298_v20, %v5665_v19  ;;  %v2392_v7 = vpop.f32.mrf.mxu2  ;;  %v8550_v19 = vld [vmem:[#allocation7 + $0x878] sm:$0xf0]  ;;  %v6897_v20 = vld [vmem:[#allocation7 + $0xa20] sm:$0xf] }
  0xe7   :  { %2631 = vmatpush.bf16.msra.mxu1 %v6002_v31  ;;  %v2381_v31 = vpop.f32.mrf.mxu1 }
  0xe8   :  { %2644 = vmatpush.bf16.msra.mxu2 %v6226_v33  ;;  %v5890_v33 = vor.u32 %v8354_v23, %v5889_v21  ;;  %v2405_v8 = vpop.f32.mrf.mxu3  ;;  %v6034_v21 = vor.u32 %v8386_v11, %v6031_v4  ;;  %v5779_v23 = vld [vmem:[#allocation7 + $0x17c] sm:$0xf0]  ;;  %v8302_v11 = vld [vmem:[#allocation7 + $0xbc] sm:$0xf]  ;;  %v5695_v4 = vld [vmem:[#allocation7 + $0xd4] sm:$0xf0] }
  0xe9   :  { %2657 = vmatpush.bf16.msra.mxu3 %v6450_v41  ;;  %v6338_v41 = vor.u32 %v8466_v27, %v6337_v26  ;;  %v6003_v26 = vld [vmem:[#allocation7 + $0x33c] sm:$0xf0] }
  0xea   :  { %2619 = vmatpush.bf16.msra.mxu0 %v5750_v49  ;;  %v5638_v49 = vor.u32 %v8291_v39, %v5637_v37  ;;  %v6869_v37 = vld [vmem:[#allocation7 + $0x9e8] sm:$0xf]  ;;  %v6006_v39 = vor.u32 %v8379_v25, %v6003_v26  ;;  %v8351_v26 = vld [vmem:[#allocation7 + $0x244] sm:$0xf] }
  0xeb   :  { %2632 = vmatpush.bf16.msra.mxu1 %v5974_v50  ;;  %v5609_v50 = vld [vmem:[#allocation7 + $0x10] sm:$0xf] }
  0xec   :  { %2645 = vmatpush.bf16.msra.mxu2 %v6198_v51  ;;  %v8284_v51 = vld [vmem:[#allocation7 + $0x28] sm:$0xf0] }
  0xed   :  { %2658 = vmatpush.bf16.msra.mxu3 %v6422_v56  ;;  %v6057_v56 = vld [vmem:[#allocation7 + $0x390] sm:$0xf]  ;;  %v5610_v2 = vor.u32 %v8284_v51, %v5609_v50  ;;  %v6870_v51 = vor.u32 %v8599_v40, %v6869_v37  ;;  %v6533_v40 = vld [vmem:[#allocation7 + $0x748] sm:$0xf] }
  0xee   :  { %2620 = vmatpush.bf16.msra.mxu0 %v5722_v0  ;;  %v6925_v0 = vld [vmem:[#allocation7 + $0xa58] sm:$0xf]  ;;  %v2394_v46 = vpop.f32.mrf.mxu2 }
  0xef   :  { %2633 = vmatpush.bf16.msra.mxu1 %v5946_v5  ;;  %v5807_v5 = vld [vmem:[#allocation7 + $0x1b4] sm:$0xf0] }
  0xf0   :  { %2646 = vmatpush.bf16.msra.mxu2 %v6170_v6  ;;  %v550_v6 = vperm.slane %v9290_v62, 4  ;;  %v8606_v62 = vld [vmem:[#allocation7 + $0xa38] sm:$0xf0]  ;;  %v2407_v47 = vpop.f32.mrf.mxu3 }
  0xf1   :  { %2659 = vmatpush.bf16.msra.mxu3 %v6394_v10  ;;  %v6058_v10 = vor.u32 %v8396_v57, %v6057_v56  ;;  %v8592_v57 = vld [vmem:[#allocation7 + $0x9c8] sm:$0xf0]  ;;  %v8571_v47 = vld [vmem:[#allocation7 + $0x920] sm:$0xf0] }
  0xf2   :  { %2621 = vmatpush.bf16.msra.mxu0 %v5694_v16  ;;  %v564_v15 = vperm.slane %v550_v6, 0  ;;  %v6926_v16 = vor.u32 %v8613_v1, %v6925_v0  ;;  %v6589_v6 = vld [vmem:[#allocation7 + $0x7b8] sm:$0xf] }
  0xf3   :  { %2634 = vmatpush.bf16.msra.mxu1 %v5918_v17  ;;  %v5810_v17 = vor.u32 %v8330_v3, %v5807_v5  ;;  %v6842_v3 = vor.u32 %v8592_v57, %v6841_v55  ;;  %v6729_v57 = vld [vmem:[#allocation7 + $0x8d0] sm:$0xf] }
  0xf4   :  { %2647 = vmatpush.bf16.msra.mxu2 %v6142_v18  ;;  %v6673_v18 = vld [vmem:[#allocation7 + $0x860] sm:$0xf]  ;;  %v571_v24 = vmul.f32 %v564_v15, %v9293_v28  ;;  %v5919_v15 = vld [vmem:[#allocation7 + $0x294] sm:$0xf0] }
  0xf5   :  { %2660 = vmatpush.bf16.msra.mxu3 %v6366_v22  ;;  %v8323_v22 = vld [vmem:[#allocation7 + $0x164] sm:$0xf]  ;;  %v6674_v27 = vor.u32 %v8550_v19, %v6673_v18  ;;  %v5698_v18 = vor.u32 %v8302_v11, %v5695_v4  ;;  %v6561_v19 = vld [vmem:[#allocation7 + $0x780] sm:$0xf] }
  0xf6   :  { %2622 = vmatpush.bf16.msra.mxu0 %v5666_v30  ;;  %v2393_v29 = vadd.f32 %v2392_v7, %v571_v24  ;;  %v6898_v30 = vor.u32 %v8606_v62, %v6897_v20  ;;  %v5782_v31 = vor.u32 %v8323_v22, %v5779_v23  ;;  %v8529_v7 = vld [vmem:[#allocation7 + $0x7d0] sm:$0xf0]  ;;  %v8522_v20 = vld [vmem:[#allocation7 + $0x798] sm:$0xf0]  ;;  %v8295_v23 = vld [vmem:[#allocation7 + $0x84] sm:$0xf] }
  0xf7   :  { %2635 = vmatpush.bf16.msra.mxu1 %v5890_v33  ;;  %v6645_v33 = vld [vmem:[#allocation7 + $0x828] sm:$0xf]  ;;  %v8578_v22 = vld [vmem:[#allocation7 + $0x958] sm:$0xf0]  ;;  %v5667_v24 = vld [vmem:[#allocation7 + $0x9c] sm:$0xf0] }
  0xf8   :  { %2648 = vmatpush.bf16.msra.mxu2 %v6114_v36  ;;  %v8543_v36 = vld [vmem:[#allocation7 + $0x840] sm:$0xf0]  ;;  %v2406_v44 = vadd.f32 %v2405_v8, %v2393_v29  ;;  %v6813_v8 = vld [vmem:[#allocation7 + $0x978] sm:$0xf] }
  0xf9   :  { %2661 = vmatpush.bf16.msra.mxu3 %v6338_v41  ;;  %v8316_v41 = vld [vmem:[#allocation7 + $0x12c] sm:$0xf]  ;;  %v6646_v50 = vor.u32 %v8543_v36, %v6645_v33  ;;  %v6562_v33 = vor.u32 %v8522_v20, %v6561_v19  ;;  %v8435_v19 = vld [vmem:[#allocation7 + $0x4e4] sm:$0xf]  ;;  %v6227_v20 = vld [vmem:[#allocation7 + $0x4fc] sm:$0xf0] }
  0xfa   :  { %2623 = vmatpush.bf16.msra.mxu0 %v5638_v49  ;;  %v5975_v49 = vld [vmem:[#allocation7 + $0x304] sm:$0xf0]  ;;  %v5754_v52 = vor.u32 %v8316_v41, %v5751_v43  ;;  %v8515_v41 = vld [vmem:[#allocation7 + $0x760] sm:$0xf0] }
  0xfb   :  { %2636 = vmatpush.bf16.msra.mxu1 %v5862_v53  ;;  %v6617_v53 = vld [vmem:[#allocation7 + $0x7f0] sm:$0xf]  ;;  %v5978_v56 = vor.u32 %v8372_v48, %v5975_v49  ;;  %v6757_v43 = vld [vmem:[#allocation7 + $0x908] sm:$0xf]  ;;  %v8288_v48 = vld [vmem:[#allocation7 + $0x4c] sm:$0xf] }
  0xfc   :  { %2649 = vmatpush.bf16.msra.mxu2 %v6086_v54  ;;  %v8536_v54 = vld [vmem:[#allocation7 + $0x808] sm:$0xf0]  ;;  %v5639_v49 = vld [vmem:[#allocation7 + $0x64] sm:$0xf0]  ;;  %v6758_v55 = vor.u32 %v8571_v47, %v6757_v43 }
  0xfd   :  { %2662 = vmatpush.bf16.msra.mxu3 %v6310_v58  ;;  %v8309_v58 = vld [vmem:[#allocation7 + $0xf4] sm:$0xf]  ;;  %v6618_v0 = vor.u32 %v8536_v54, %v6617_v53  ;;  %v6505_v53 = vld [vmem:[#allocation7 + $0x710] sm:$0xf]  ;;  %v8508_v54 = vld [vmem:[#allocation7 + $0x728] sm:$0xf0] }
  0xfe   :  { %2624 = vmatpush.bf16.msra.mxu0 %v5610_v2  ;;  %v2418_v63 = vpop.f32.mrf.mxu0  ;;  %v5726_v5 = vor.u32 %v8309_v58, %v5723_v59  ;;  %v8564_v58 = vld [vmem:[#allocation7 + $0x8e8] sm:$0xf0]  ;;  %v8281_v59 = vld [vmem:[#allocation7 + $0x14] sm:$0xf] }
  0xff   :  { %2637 = vmatpush.bf16.msra.mxu1 %v5834_v9  ;;  %v2419_v1 = vadd.f32 %v2418_v63, %v2406_v44  ;;  %v2431_v2 = vpop.f32.mrf.mxu1  ;;  %v5950_v9 = vor.u32 %v8365_v60, %v5947_v61  ;;  %v5611_v61 = vld [vmem:[#allocation7 + $0x2c] sm:$0xf0]  ;;  %v8337_v63 = vld [vmem:[#allocation7 + $0x1d4] sm:$0xf]  ;;  %v6730_v11 = vor.u32 %v8564_v58, %v6729_v57  ;;  %v8540_v43 = vld [vmem:[#allocation7 + $0x82c] sm:$0xf] }
 0x100   :  { %2650 = vmatpush.bf16.msra.mxu2 %v6058_v10  ;;  %v8585_v10 = vld [vmem:[#allocation7 + $0x990] sm:$0xf0]  ;;  %v5614_v4 = vor.u32 %v8281_v59, %v5611_v61  ;;  %v8596_v47 = vld [vmem:[#allocation7 + $0x9ec] sm:$0xf]  ;;  %v6395_v58 = vld [vmem:[#allocation7 + $0x64c] sm:$0xf0] }
 0x101   :  { %2663 = vmatpush.bf16.msra.mxu3 %v6282_v12  ;;  %2625 = vmatmul.bf16.vlgmr.msra.gmra.mxu0 %v9251_v34  ;;  %v2432_v12 = vadd.f32 %v2431_v2, %v2419_v1  ;;  %v8442_v2 = vld [vmem:[#allocation7 + $0x51c] sm:$0xf]  ;;  %v8533_v59 = vld [vmem:[#allocation7 + $0x7f4] sm:$0xf] }
 0x102   :  { %2669 = vmatpush.bf16.msrb.mxu0 %v6702_v14  ;;  %2638 = vmatmul.bf16.vlgmr.msra.gmra.mxu1 %v9253_v35  ;;  %v8358_v14 = vld [vmem:[#allocation7 + $0x27c] sm:$0xf]  ;;  %v8589_v61 = vld [vmem:[#allocation7 + $0x9b4] sm:$0xf] }
 0x103   :  { %2682 = vmatpush.bf16.msrb.mxu1 %v6926_v16  ;;  %2651 = vmatmul.bf16.vlgmr.msra.gmra.mxu2 %v9255_v42  ;;  %v6590_v16 = vor.u32 %v8529_v7, %v6589_v6  ;;  %v5922_v62 = vor.u32 %v8358_v14, %v5919_v15  ;;  %v6506_v7 = vor.u32 %v8508_v54, %v6505_v53  ;;  %v6927_v14 = vld [vmem:[#allocation7 + $0xa74] sm:$0xf0]  ;;  %v8421_v53 = vld [vmem:[#allocation7 + $0x474] sm:$0xf]  ;;  %v6171_v54 = vld [vmem:[#allocation7 + $0x48c] sm:$0xf0] }
 0x104   :  { %2695 = vmatpush.bf16.msrb.mxu2 %v5810_v17  ;;  %2664 = vmatmul.bf16.vlgmr.msra.gmra.mxu3 %v9259_v45  ;;  %v6814_v17 = vor.u32 %v8585_v10, %v6813_v8  ;;  %v6479_v8 = vld [vmem:[#allocation7 + $0x6f4] sm:$0xf0] }
 0x105   :  { %2708 = vmatpush.bf16.msrb.mxu3 %v6034_v21  ;;  %v6785_v21 = vld [vmem:[#allocation7 + $0x940] sm:$0xf]  ;;  %v6703_v10 = vld [vmem:[#allocation7 + $0x8b4] sm:$0xf0] }
 0x106   :  { %2670 = vmatpush.bf16.msrb.mxu0 %v6674_v27  ;;  %v2444_v25 = vpop.f32.mrf.mxu2  ;;  %v5891_v27 = vld [vmem:[#allocation7 + $0x25c] sm:$0xf0]  ;;  %v2420_v29 = vpop.f32.mrf.mxu0  ;;  %v6786_v37 = vor.u32 %v8578_v22, %v6785_v21  ;;  %v8491_v21 = vld [vmem:[#allocation7 + $0x6a4] sm:$0xf] }
 0x107   :  { %2683 = vmatpush.bf16.msrb.mxu1 %v6898_v30  ;;  %v2445_v30 = vadd.f32 %v2444_v25, %v2432_v12  ;;  %v2433_v36 = vpop.f32.mrf.mxu1  ;;  %v5894_v46 = vor.u32 %v8351_v26, %v5891_v27  ;;  %v8610_v12 = vld [vmem:[#allocation7 + $0xa5c] sm:$0xf]  ;;  %v6451_v22 = vld [vmem:[#allocation7 + $0x6bc] sm:$0xf0]  ;;  %v8603_v25 = vld [vmem:[#allocation7 + $0xa24] sm:$0xf]  ;;  %v6230_v27 = vor.u32 %v8435_v19, %v6227_v20 }
 0x108   :  { %2696 = vmatpush.bf16.msrb.mxu2 %v5782_v31  ;;  %v2457_v31 = vpop.f32.mrf.mxu3  ;;  %v6899_v26 = vld [vmem:[#allocation7 + $0xa3c] sm:$0xf0]  ;;  %v8428_v29 = vld [vmem:[#allocation7 + $0x4ac] sm:$0xf]  ;;  %v6199_v36 = vld [vmem:[#allocation7 + $0x4c4] sm:$0xf0] }
 0x109   :  { %2709 = vmatpush.bf16.msrb.mxu3 %v6006_v39  ;;  %v5670_v39 = vor.u32 %v8295_v23, %v5667_v24  ;;  %v9308_v44 = vadd.f32 %v2457_v31, %v2445_v30  ;;  %v8547_v23 = vld [vmem:[#allocation7 + $0x864] sm:$0xf]  ;;  %v6675_v24 = vld [vmem:[#allocation7 + $0x87c] sm:$0xf0]  ;;  %v9310_v30 = vld [vmem:[#allocation8 + $0x8] sm:$0x77]  ;;  %v6454_v31 = vor.u32 %v8491_v21, %v6451_v22 }
 0x10a   :  { %2671 = vmatpush.bf16.msrb.mxu0 %v6646_v50  ;;  %v8344_v50 = vld [vmem:[#allocation7 + $0x20c] sm:$0xf]  ;;  %v8407_v20 = vld [vmem:[#allocation7 + $0x404] sm:$0xf]  ;;  %v6115_v21 = vld [vmem:[#allocation7 + $0x41c] sm:$0xf0] }
 0x10b   :  { %2684 = vmatpush.bf16.msrb.mxu1 %v6870_v51  ;;  %v5863_v51 = vld [vmem:[#allocation7 + $0x224] sm:$0xf0] }
 0x10c   :  { %2697 = vmatpush.bf16.msrb.mxu2 %v5754_v52  ;;  %v6534_v52 = vor.u32 %v8515_v41, %v6533_v40  ;;  %v5866_v60 = vor.u32 %v8344_v50, %v5863_v51  ;;  %v6902_v40 = vor.u32 %v8603_v25, %v6899_v26  ;;  %v6423_v41 = vld [vmem:[#allocation7 + $0x684] sm:$0xf0]  ;;  %v6202_v50 = vor.u32 %v8428_v29, %v6199_v36  ;;  %v6563_v25 = vld [vmem:[#allocation7 + $0x79c] sm:$0xf0] }
 0x10d   :  { %2710 = vmatpush.bf16.msrb.mxu3 %v5978_v56  ;;  %v5642_v56 = vor.u32 %v8288_v48, %v5639_v49  ;;  %v6871_v48 = vld [vmem:[#allocation7 + $0xa04] sm:$0xf0]  ;;  %v6787_v29 = vld [vmem:[#allocation7 + $0x95c] sm:$0xf0] }
 0x10e   :  { %2672 = vmatpush.bf16.msrb.mxu0 %v6618_v0  ;;  %v5835_v0 = vld [vmem:[#allocation7 + $0x1ec] sm:$0xf0]  ;;  %v2446_v1 = vpop.f32.mrf.mxu2  ;;  %v6874_v57 = vor.u32 %v8596_v47, %v6871_v48  ;;  %v8456_v47 = vld [vmem:[#allocation7 + $0x58c] sm:$0xf] }
 0x10f   :  { %2685 = vmatpush.bf16.msrb.mxu1 %v6842_v3  ;;  %v6255_v3 = vld [vmem:[#allocation7 + $0x534] sm:$0xf0]  ;;  %v5838_v15 = vor.u32 %v8337_v63, %v5835_v0  ;;  %v6843_v63 = vld [vmem:[#allocation7 + $0x9cc] sm:$0xf0]  ;;  %v6174_v1 = vor.u32 %v8421_v53, %v6171_v54  ;;  %v8568_v53 = vld [vmem:[#allocation7 + $0x90c] sm:$0xf] }
 0x110   :  { %2698 = vmatpush.bf16.msrb.mxu2 %v5726_v5  ;;  %v8498_v5 = vld [vmem:[#allocation7 + $0x6dc] sm:$0xf]  ;;  %v2459_v6 = vpop.f32.mrf.mxu3  ;;  %v6759_v54 = vld [vmem:[#allocation7 + $0x924] sm:$0xf0] }
 0x111   :  { %2711 = vmatpush.bf16.msrb.mxu3 %v5950_v9  ;;  %v8554_v9 = vld [vmem:[#allocation7 + $0x89c] sm:$0xf] }
 0x112   :  { %2673 = vmatpush.bf16.msrb.mxu0 %v6590_v16  ;;  %v6258_v16 = vor.u32 %v8442_v2, %v6255_v3 }
 0x113   :  { %2686 = vmatpush.bf16.msrb.mxu1 %v6814_v17  ;;  %v6482_v17 = vor.u32 %v8498_v5, %v6479_v8  ;;  %v6143_v8 = vld [vmem:[#allocation7 + $0x454] sm:$0xf0] }
 0x114   :  { %2699 = vmatpush.bf16.msrb.mxu2 %v5698_v18  ;;  %v6706_v18 = vor.u32 %v8554_v9, %v6703_v10  ;;  %v8470_v9 = vld [vmem:[#allocation7 + $0x5fc] sm:$0xf]  ;;  %v6846_v10 = vor.u32 %v8589_v61, %v6843_v63  ;;  %v6283_v61 = vld [vmem:[#allocation7 + $0x56c] sm:$0xf0]  ;;  %v8505_v63 = vld [vmem:[#allocation7 + $0x714] sm:$0xf] }
 0x115   :  { %2712 = vmatpush.bf16.msrb.mxu3 %v5922_v62  ;;  %v6930_v62 = vor.u32 %v8610_v12, %v6927_v14  ;;  %v6591_v12 = vld [vmem:[#allocation7 + $0x7d4] sm:$0xf0] }
 0x116   :  { %2674 = vmatpush.bf16.msrb.mxu0 %v6562_v33  ;;  %v6678_v33 = vor.u32 %v8547_v23, %v6675_v24  ;;  %v6339_v23 = vld [vmem:[#allocation7 + $0x5dc] sm:$0xf0]  ;;  %v8519_v24 = vld [vmem:[#allocation7 + $0x784] sm:$0xf] }
 0x117   :  { %2687 = vmatpush.bf16.msrb.mxu1 %v6786_v37  ;;  %v8484_v37 = vld [vmem:[#allocation7 + $0x66c] sm:$0xf] }
 0x118   :  { %2700 = vmatpush.bf16.msrb.mxu2 %v5670_v39  ;;  %v551_v39 = vperm.slane %v9310_v30, 0  ;;  %v6426_v51 = vor.u32 %v8484_v37, %v6423_v41  ;;  %v6118_v37 = vor.u32 %v8407_v20, %v6115_v21  ;;  %v6566_v41 = vor.u32 %v8519_v24, %v6563_v25  ;;  %v8383_v25 = vld [vmem:[#allocation7 + $0x340] sm:$0xf0] }
 0x119   :  { %2713 = vmatpush.bf16.msrb.mxu3 %v5894_v46  ;;  %v6647_v46 = vld [vmem:[#allocation7 + $0x844] sm:$0xf0] }
 0x11a   :  { %2675 = vmatpush.bf16.msrb.mxu0 %v6534_v52  ;;  %v565_v49 = vperm.slane %v551_v39, 0  ;;  %v6650_v52 = vor.u32 %v8540_v43, %v6647_v46  ;;  %v8400_v43 = vld [vmem:[#allocation7 + $0x3cc] sm:$0xf]  ;;  %v6087_v46 = vld [vmem:[#allocation7 + $0x3e4] sm:$0xf0] }
 0x11b   :  { %2688 = vmatpush.bf16.msrb.mxu1 %v6758_v55  ;;  %v8477_v55 = vld [vmem:[#allocation7 + $0x634] sm:$0xf] }
 0x11c   :  { %2701 = vmatpush.bf16.msrb.mxu2 %v5642_v56  ;;  %v572_v56 = vmul.f32 %v565_v49, %v9293_v28  ;;  %v6398_v5 = vor.u32 %v8477_v55, %v6395_v58  ;;  %v6090_v55 = vor.u32 %v8400_v43, %v6087_v46  ;;  %v8376_v46 = vld [vmem:[#allocation7 + $0x308] sm:$0xf0] }
 0x11d   :  { %2714 = vmatpush.bf16.msrb.mxu3 %v5866_v60  ;;  %v6619_v60 = vld [vmem:[#allocation7 + $0x80c] sm:$0xf0] }
 0x11e   :  { %2676 = vmatpush.bf16.msrb.mxu0 %v6506_v7  ;;  %v2470_v0 = vpop.f32.mrf.mxu0  ;;  %v6622_v6 = vor.u32 %v8533_v59, %v6619_v60  ;;  %v8414_v7 = vld [vmem:[#allocation7 + $0x43c] sm:$0xf]  ;;  %v8449_v60 = vld [vmem:[#allocation7 + $0x554] sm:$0xf] }
 0x11f   :  { %2689 = vmatpush.bf16.msrb.mxu1 %v6730_v11  ;;  %v2471_v2 = vadd.f32 %v2470_v0, %v572_v56  ;;  %v2483_v3 = vpop.f32.mrf.mxu1  ;;  %v6367_v11 = vld [vmem:[#allocation7 + $0x614] sm:$0xf0]  ;;  %v8393_v56 = vld [vmem:[#allocation7 + $0x394] sm:$0xf]  ;;  %v6762_v0 = vor.u32 %v8568_v53, %v6759_v54 }
 0x120   :  { %2702 = vmatpush.bf16.msrb.mxu2 %v5614_v4  ;;  %v8526_v4 = vld [vmem:[#allocation7 + $0x7bc] sm:$0xf] }
 0x121   :  { %2715 = vmatpush.bf16.msrb.mxu3 %v5838_v15  ;;  %2677 = vmatmul.bf16.vlgmr.msrb.gmra.mxu0 %v9266_v32  ;;  %v2484_v14 = vadd.f32 %v2483_v3, %v2471_v2  ;;  %v8582_v15 = vld [vmem:[#allocation7 + $0x97c] sm:$0xf]  ;;  %v6594_v19 = vor.u32 %v8526_v4, %v6591_v12  ;;  %v8561_v2 = vld [vmem:[#allocation7 + $0x8d4] sm:$0xf]  ;;  %v6731_v3 = vld [vmem:[#allocation7 + $0x8ec] sm:$0xf0] }
 0x122   :  { %2721 = vmatpush.bf16.msra.mxu0 %v6258_v16  ;;  %2690 = vmatmul.bf16.vlgmr.msrb.gmra.mxu1 %v9269_v38  ;;  %v6815_v16 = vld [vmem:[#allocation7 + $0x994] sm:$0xf0]  ;;  %v6261_v4 = vld [vmem:[#allocation7 + $0x520] sm:$0xf]  ;;  %v8446_v12 = vld [vmem:[#allocation7 + $0x538] sm:$0xf0] }
 0x123   :  { %2734 = vmatpush.bf16.msra.mxu1 %v6482_v17  ;;  %2703 = vmatmul.bf16.vlgmr.msrb.gmra.mxu2 %v9251_v34  ;;  %v6146_v17 = vor.u32 %v8414_v7, %v6143_v8  ;;  %v6818_v22 = vor.u32 %v8582_v15, %v6815_v16  ;;  %v8334_v7 = vld [vmem:[#allocation7 + $0x1b8] sm:$0xf0]  ;;  %v6037_v8 = vld [vmem:[#allocation7 + $0x360] sm:$0xf]  ;;  %v6262_v21 = vor.u32 %v8446_v12, %v6261_v4 }
 0x124   :  { %2747 = vmatpush.bf16.msra.mxu2 %v6706_v18  ;;  %2716 = vmatmul.bf16.vlgmr.msrb.gmra.mxu3 %v9253_v35  ;;  %v6370_v18 = vor.u32 %v8470_v9, %v6367_v11  ;;  %v8390_v11 = vld [vmem:[#allocation7 + $0x378] sm:$0xf0]  ;;  %v6485_v16 = vld [vmem:[#allocation7 + $0x6e0] sm:$0xf] }
 0x125   :  { %2760 = vmatpush.bf16.msra.mxu3 %v6930_v62  ;;  %v8463_v62 = vld [vmem:[#allocation7 + $0x5c4] sm:$0xf]  ;;  %v6038_v20 = vor.u32 %v8390_v11, %v6037_v8  ;;  %v5701_v8 = vld [vmem:[#allocation7 + $0xc0] sm:$0xf]  ;;  %v8362_v4 = vld [vmem:[#allocation7 + $0x298] sm:$0xf0] }
 0x126   :  { %2722 = vmatpush.bf16.msra.mxu0 %v6230_v27  ;;  %v2496_v26 = vpop.f32.mrf.mxu2  ;;  %v8575_v27 = vld [vmem:[#allocation7 + $0x944] sm:$0xf]  ;;  %v6149_v12 = vld [vmem:[#allocation7 + $0x440] sm:$0xf] }
 0x127   :  { %2735 = vmatpush.bf16.msra.mxu1 %v6454_v31  ;;  %v2472_v31 = vpop.f32.mrf.mxu0  ;;  %v2509_v36 = vpop.f32.mrf.mxu3  ;;  %v6790_v49 = vor.u32 %v8575_v27, %v6787_v29  ;;  %v8439_v27 = vld [vmem:[#allocation7 + $0x500] sm:$0xf0]  ;;  %v6457_v29 = vld [vmem:[#allocation7 + $0x6a8] sm:$0xf] }
 0x128   :  { %2748 = vmatpush.bf16.msra.mxu2 %v6678_v33  ;;  %v2497_v33 = vadd.f32 %v2496_v26, %v2484_v14  ;;  %v2485_v39 = vpop.f32.mrf.mxu1  ;;  %v6286_v14 = vor.u32 %v8449_v60, %v6283_v61  ;;  %v6233_v26 = vld [vmem:[#allocation7 + $0x4e8] sm:$0xf]  ;;  %v8495_v31 = vld [vmem:[#allocation7 + $0x6c0] sm:$0xf0]  ;;  %v6177_v60 = vld [vmem:[#allocation7 + $0x478] sm:$0xf] }
 0x129   :  { %2761 = vmatpush.bf16.msra.mxu3 %v6902_v40  ;;  %v6342_v40 = vor.u32 %v8463_v62, %v6339_v23  ;;  %v5785_v62 = vld [vmem:[#allocation7 + $0x168] sm:$0xf]  ;;  %v5757_v39 = vld [vmem:[#allocation7 + $0x130] sm:$0xf]  ;;  %v6458_v43 = vor.u32 %v8495_v31, %v6457_v29  ;;  %v8425_v61 = vld [vmem:[#allocation7 + $0x490] sm:$0xf0] }
 0x12a   :  { %2723 = vmatpush.bf16.msra.mxu0 %v6202_v50  ;;  %v9318_v48 = vadd.f32 %v2509_v36, %v2497_v33  ;;  %v6311_v50 = vld [vmem:[#allocation7 + $0x5a4] sm:$0xf0] }
 0x12b   :  { %2736 = vmatpush.bf16.msra.mxu1 %v6426_v51  ;;  %v8512_v51 = vld [vmem:[#allocation7 + $0x74c] sm:$0xf]  ;;  %v6314_v58 = vor.u32 %v8456_v47, %v6311_v50  ;;  %v6009_v23 = vld [vmem:[#allocation7 + $0x328] sm:$0xf]  ;;  %v6205_v47 = vld [vmem:[#allocation7 + $0x4b0] sm:$0xf] }
 0x12c   :  { %2749 = vmatpush.bf16.msra.mxu2 %v6650_v52  ;;  %v6535_v52 = vld [vmem:[#allocation7 + $0x764] sm:$0xf0]  ;;  %v6010_v36 = vor.u32 %v8383_v25, %v6009_v23  ;;  %v6429_v50 = vld [vmem:[#allocation7 + $0x670] sm:$0xf]  ;;  %v8355_v23 = vld [vmem:[#allocation7 + $0x260] sm:$0xf0] }
 0x12d   :  { %2762 = vmatpush.bf16.msra.mxu3 %v6874_v57  ;;  %v6059_v57 = vld [vmem:[#allocation7 + $0x3ac] sm:$0xf0]  ;;  %v6538_v59 = vor.u32 %v8512_v51, %v6535_v52  ;;  %v8488_v51 = vld [vmem:[#allocation7 + $0x688] sm:$0xf0]  ;;  %v8411_v25 = vld [vmem:[#allocation7 + $0x420] sm:$0xf0] }
 0x12e   :  { %2724 = vmatpush.bf16.msra.mxu0 %v6174_v1  ;;  %v6507_v1 = vld [vmem:[#allocation7 + $0x72c] sm:$0xf0] }
 0x12f   :  { %2737 = vmatpush.bf16.msra.mxu1 %v6398_v5  ;;  %v2498_v5 = vpop.f32.mrf.mxu2  ;;  %v2511_v9 = vpop.f32.mrf.mxu3  ;;  %v6510_v15 = vor.u32 %v8505_v63, %v6507_v1  ;;  %v6401_v63 = vld [vmem:[#allocation7 + $0x638] sm:$0xf] }
 0x130   :  { %2750 = vmatpush.bf16.msra.mxu2 %v6622_v6  ;;  %v5813_v6 = vld [vmem:[#allocation7 + $0x1a0] sm:$0xf]  ;;  %v8306_v9 = vld [vmem:[#allocation7 + $0xd8] sm:$0xf0] }
 0x131   :  { %2763 = vmatpush.bf16.msra.mxu3 %v6846_v10  ;;  %v6062_v10 = vor.u32 %v8393_v56, %v6059_v57  ;;  %v8313_v56 = vld [vmem:[#allocation7 + $0x110] sm:$0xf0]  ;;  %v5953_v57 = vld [vmem:[#allocation7 + $0x2b8] sm:$0xf] }
 0x132   :  { %2725 = vmatpush.bf16.msra.mxu0 %v6146_v17  ;;  %v8502_v17 = vld [vmem:[#allocation7 + $0x6f8] sm:$0xf0] }
 0x133   :  { %2738 = vmatpush.bf16.msra.mxu1 %v6370_v18  ;;  %v6734_v18 = vor.u32 %v8561_v2, %v6731_v3  ;;  %v6486_v24 = vor.u32 %v8502_v17, %v6485_v16  ;;  %v6373_v16 = vld [vmem:[#allocation7 + $0x600] sm:$0xf]  ;;  %v8474_v17 = vld [vmem:[#allocation7 + $0x618] sm:$0xf0] }
 0x134   :  { %2751 = vmatpush.bf16.msra.mxu2 %v6594_v19  ;;  %v5814_v19 = vor.u32 %v8334_v7, %v5813_v6  ;;  %v6178_v7 = vor.u32 %v8425_v61, %v6177_v60  ;;  %v8397_v61 = vld [vmem:[#allocation7 + $0x3b0] sm:$0xf0] }
 0x135   :  { %2764 = vmatpush.bf16.msra.mxu3 %v6818_v22  ;;  %v8327_v22 = vld [vmem:[#allocation7 + $0x180] sm:$0xf0] }
 0x136   :  { %2726 = vmatpush.bf16.msra.mxu0 %v6118_v37  ;;  %v5786_v33 = vor.u32 %v8327_v22, %v5785_v62  ;;  %v6234_v37 = vor.u32 %v8439_v27, %v6233_v26  ;;  %v5897_v62 = vld [vmem:[#allocation7 + $0x248] sm:$0xf]  ;;  %v6374_v22 = vor.u32 %v8474_v17, %v6373_v16  ;;  %v8467_v27 = vld [vmem:[#allocation7 + $0x5e0] sm:$0xf0] }
 0x137   :  { %2739 = vmatpush.bf16.msra.mxu1 %v6342_v40  ;;  %v8320_v40 = vld [vmem:[#allocation7 + $0x148] sm:$0xf0]  ;;  %v6345_v26 = vld [vmem:[#allocation7 + $0x5c8] sm:$0xf] }
 0x138   :  { %2752 = vmatpush.bf16.msra.mxu2 %v6566_v41  ;;  %v5981_v41 = vld [vmem:[#allocation7 + $0x2f0] sm:$0xf]  ;;  %v5758_v52 = vor.u32 %v8320_v40, %v5757_v39  ;;  %v8292_v40 = vld [vmem:[#allocation7 + $0x68] sm:$0xf0] }
 0x139   :  { %2765 = vmatpush.bf16.msra.mxu3 %v6790_v49  ;;  %v8432_v49 = vld [vmem:[#allocation7 + $0x4c8] sm:$0xf0]  ;;  %v5982_v53 = vor.u32 %v8376_v46, %v5981_v41  ;;  %v5645_v39 = vld [vmem:[#allocation7 + $0x50] sm:$0xf] }
 0x13a   :  { %2727 = vmatpush.bf16.msra.mxu0 %v6090_v55  ;;  %v6206_v54 = vor.u32 %v8432_v49, %v6205_v47  ;;  %v5729_v55 = vld [vmem:[#allocation7 + $0xf8] sm:$0xf]  ;;  %v5869_v41 = vld [vmem:[#allocation7 + $0x210] sm:$0xf]  ;;  %v8348_v46 = vld [vmem:[#allocation7 + $0x228] sm:$0xf0] }
 0x13b   :  { %2740 = vmatpush.bf16.msra.mxu1 %v6314_v58  ;;  %v6430_v58 = vor.u32 %v8488_v51, %v6429_v50  ;;  %v5730_v2 = vor.u32 %v8313_v56, %v5729_v55  ;;  %v6093_v47 = vld [vmem:[#allocation7 + $0x3d0] sm:$0xf]  ;;  %v8404_v49 = vld [vmem:[#allocation7 + $0x3e8] sm:$0xf0]  ;;  %v5870_v55 = vor.u32 %v8348_v46, %v5869_v41 }
 0x13c   :  { %2753 = vmatpush.bf16.msra.mxu2 %v6538_v59  ;;  %v8369_v59 = vld [vmem:[#allocation7 + $0x2d0] sm:$0xf0]  ;;  %v6317_v50 = vld [vmem:[#allocation7 + $0x590] sm:$0xf]  ;;  %v8460_v51 = vld [vmem:[#allocation7 + $0x5a8] sm:$0xf0]  ;;  %v6094_v56 = vor.u32 %v8404_v49, %v6093_v47 }
 0x13d   :  { %2766 = vmatpush.bf16.msra.mxu3 %v6762_v0  ;;  %v8481_v0 = vld [vmem:[#allocation7 + $0x650] sm:$0xf0]  ;;  %v5954_v6 = vor.u32 %v8369_v59, %v5953_v57  ;;  %v5841_v57 = vld [vmem:[#allocation7 + $0x1d8] sm:$0xf]  ;;  %v6318_v60 = vor.u32 %v8460_v51, %v6317_v50  ;;  %v6877_v41 = vld [vmem:[#allocation7 + $0x9f0] sm:$0xf] }
 0x13e   :  { %2728 = vmatpush.bf16.msra.mxu0 %v6062_v10  ;;  %v2522_v1 = vpop.f32.mrf.mxu0  ;;  %v5925_v10 = vld [vmem:[#allocation7 + $0x280] sm:$0xf]  ;;  %v6402_v11 = vor.u32 %v8481_v0, %v6401_v63  ;;  %v6065_v59 = vld [vmem:[#allocation7 + $0x398] sm:$0xf]  ;;  %v8453_v0 = vld [vmem:[#allocation7 + $0x570] sm:$0xf0] }
 0x13f   :  { %2741 = vmatpush.bf16.msra.mxu1 %v6286_v14  ;;  %v2523_v3 = vadd.f32 %v2522_v1, %v9318_v48  ;;  %v2535_v5 = vpop.f32.mrf.mxu1  ;;  %v8418_v14 = vld [vmem:[#allocation7 + $0x458] sm:$0xf0]  ;;  %v5926_v48 = vor.u32 %v8362_v4, %v5925_v10  ;;  %v6289_v63 = vld [vmem:[#allocation7 + $0x558] sm:$0xf]  ;;  %v6709_v1 = vld [vmem:[#allocation7 + $0x8a0] sm:$0xf]  ;;  %v6066_v4 = vor.u32 %v8397_v61, %v6065_v59 }
 0x140   :  { %2754 = vmatpush.bf16.msra.mxu2 %v6510_v15  ;;  %v6290_v16 = vor.u32 %v8453_v0, %v6289_v63  ;;  %v8600_v46 = vld [vmem:[#allocation7 + $0xa08] sm:$0xf0]  ;;  %v7057_v47 = vld [vmem:[#allocation11 + $0xf0] sm:$0xf]  ;;  %v6849_v63 = vld [vmem:[#allocation7 + $0x9b8] sm:$0xf]  ;;  %v9335_v0 = vpop.permute.xlu0 %2852 }
 0x141   :  { %2767 = vmatpush.bf16.msra.mxu3 %v6734_v18  ;;  %2729 = vmatmul.bf16.vlgmr.msra.gmra.mxu0 %v9255_v42  ;;  %v9325_v15 = vadd.f32 %v2535_v5, %v2523_v3  ;;  %v5702_v18 = vor.u32 %v8306_v9, %v5701_v8  ;;  %v6933_v3 = vld [vmem:[#allocation7 + $0xa60] sm:$0xf]  ;;  %v8660_v8 = vld [vmem:[#allocation11 + $0x164] sm:$0xf0]  ;;  %v8537_v61 = vld [vmem:[#allocation7 + $0x810] sm:$0xf0] }
 0x142   :  { %2773 = vmatpush.bf16.msrb.mxu0 %v5814_v19  ;;  %2742 = vmatmul.bf16.vlgmr.msra.gmra.mxu1 %v9259_v45  ;;  %v6150_v19 = vor.u32 %v8418_v14, %v6149_v12  ;;  %v7297_v12 = vld [vmem:[#allocation11 + $0x2d0] sm:$0xf]  ;;  %v8708_v14 = vld [vmem:[#allocation11 + $0x2e4] sm:$0xf0] }
 0x143   :  { %2786 = vmatpush.bf16.msrb.mxu1 %v6038_v20  ;;  %2755 = vmatmul.bf16.vlgmr.msra.gmra.mxu2 %v9266_v32  ;;  %v5673_v20 = vld [vmem:[#allocation7 + $0x88] sm:$0xf]  ;;  %v8648_v49 = vld [vmem:[#allocation11 + $0x104] sm:$0xf0] }
 0x144   :  { %2799 = vmatpush.bf16.msrb.mxu2 %v6262_v21  ;;  %2768 = vmatmul.bf16.vlgmr.msra.gmra.mxu3 %v9269_v38  ;;  %v8299_v21 = vld [vmem:[#allocation7 + $0xa0] sm:$0xf0]  ;;  %v7058_v59 = vor.u32 %v8648_v49, %v7057_v47 }
 0x145   :  { %2812 = vmatpush.bf16.msrb.mxu3 %v6486_v24  ;;  %v6121_v24 = vld [vmem:[#allocation7 + $0x408] sm:$0xf]  ;;  %v5674_v31 = vor.u32 %v8299_v21, %v5673_v20  ;;  %v8551_v20 = vld [vmem:[#allocation7 + $0x880] sm:$0xf0] }
 0x146   :  { %2774 = vmatpush.bf16.msrb.mxu0 %v5786_v33  ;;  %v2524_v29 = vpop.f32.mrf.mxu0  ;;  %v9327_v9 = vpop.f32.mrf.mxu2  ;;  %v6905_v21 = vld [vmem:[#allocation7 + $0xa28] sm:$0xf]  ;;  %v8579_v49 = vld [vmem:[#allocation7 + $0x960] sm:$0xf0] }
 0x147   :  { %2787 = vmatpush.bf16.msrb.mxu1 %v6010_v36  ;;  %v2537_v33 = vpop.f32.mrf.mxu1  ;;  %v5898_v36 = vor.u32 %v8355_v23, %v5897_v62  ;;  %v9329_v10 = vpop.f32.mrf.mxu3  ;;  %v7298_v62 = vor.u32 %v8708_v14, %v7297_v12  ;;  %v7081_v23 = vld [vmem:[#allocation11 + $0x120] sm:$0xf]  ;;  %v8702_v29 = vld [vmem:[#allocation11 + $0x2b4] sm:$0xf0] }
 0x148   :  { %2800 = vmatpush.bf16.msrb.mxu2 %v6234_v37  ;;  %v6122_v37 = vor.u32 %v8411_v25, %v6121_v24  ;;  %v8654_v24 = vld [vmem:[#allocation11 + $0x134] sm:$0xf0]  ;;  %v8970_v25 = vld [vmem:[#allocation8] sm:$0x77]  ;;  %v9343_v14 = vpop.permute.xlu1 %2891 }
 0x149   :  { %2813 = vmatpush.bf16.msrb.mxu3 %v6458_v43  ;;  %v6346_v43 = vor.u32 %v8467_v27, %v6345_v26  ;;  %v2855_v26 = vperm.slane %v8970_v25, 1  ;;  %v7273_v27 = vld [vmem:[#allocation11 + $0x2a0] sm:$0xf] }
 0x14a   :  { %2775 = vmatpush.bf16.msrb.mxu0 %v5758_v52  ;;  %v5646_v52 = vor.u32 %v8292_v40, %v5645_v39  ;;  %v6653_v39 = vld [vmem:[#allocation7 + $0x830] sm:$0xf]  ;;  %v8544_v40 = vld [vmem:[#allocation7 + $0x848] sm:$0xf0] }
 0x14b   :  { %2788 = vmatpush.bf16.msrb.mxu1 %v5982_v53  ;;  %v5617_v53 = vld [vmem:[#allocation7 + $0x18] sm:$0xf] }
 0x14c   :  { %2801 = vmatpush.bf16.msrb.mxu2 %v6206_v54  ;;  %v8285_v54 = vld [vmem:[#allocation7 + $0x30] sm:$0xf0] }
 0x14d   :  { %2814 = vmatpush.bf16.msrb.mxu3 %v6430_v58  ;;  %v8341_v58 = vld [vmem:[#allocation7 + $0x1f0] sm:$0xf0]  ;;  %v5618_v5 = vor.u32 %v8285_v54, %v5617_v53  ;;  %v8696_v54 = vld [vmem:[#allocation11 + $0x284] sm:$0xf0] }
 0x14e   :  { %2776 = vmatpush.bf16.msrb.mxu0 %v5730_v2  ;;  %v8558_v2 = vld [vmem:[#allocation7 + $0x8b8] sm:$0xf0]  ;;  %v2550_v50 = vpop.f32.mrf.mxu2  ;;  %v7249_v53 = vld [vmem:[#allocation11 + $0x270] sm:$0xf] }
 0x14f   :  { %2789 = vmatpush.bf16.msrb.mxu1 %v5954_v6  ;;  %v8614_v6 = vld [vmem:[#allocation7 + $0xa78] sm:$0xf0]  ;;  %v6710_v17 = vor.u32 %v8558_v2, %v6709_v1  ;;  %v2563_v51 = vpop.f32.mrf.mxu3  ;;  %v7033_v1 = vld [vmem:[#allocation11 + $0xc0] sm:$0xf] }
 0x150   :  { %2802 = vmatpush.bf16.msrb.mxu2 %v6178_v7  ;;  %v7105_v7 = vld [vmem:[#allocation11 + $0x150] sm:$0xf]  ;;  %v8642_v2 = vld [vmem:[#allocation11 + $0xd4] sm:$0xf0]  ;;  %v6985_v50 = vld [vmem:[#allocation11 + $0x60] sm:$0xf] }
 0x151   :  { %2815 = vmatpush.bf16.msrb.mxu3 %v6402_v11  ;;  %v5842_v11 = vor.u32 %v8341_v58, %v5841_v57  ;;  %v2895_v57 = vperm.slane %v8970_v25, 6  ;;  %v6878_v58 = vor.u32 %v8600_v46, %v6877_v41  ;;  %v6793_v41 = vld [vmem:[#allocation7 + $0x948] sm:$0xf]  ;;  %v8630_v51 = vld [vmem:[#allocation11 + $0x74] sm:$0xf0] }
 0x152   :  { %2777 = vmatpush.bf16.msrb.mxu0 %v5702_v18  ;;  %v6934_v18 = vor.u32 %v8614_v6, %v6933_v3  ;;  %v7225_v3 = vld [vmem:[#allocation11 + $0x240] sm:$0xf] }
 0x153   :  { %2790 = vmatpush.bf16.msrb.mxu1 %v5926_v48  ;;  %v7106_v48 = vor.u32 %v8660_v8, %v7105_v7  ;;  %v2909_v8 = vperm.slane %v2895_v57, 2 }
 0x154   :  { %2803 = vmatpush.bf16.msrb.mxu2 %v6150_v19  ;;  %v6681_v19 = vld [vmem:[#allocation7 + $0x868] sm:$0xf] }
 0x155   :  { %2816 = vmatpush.bf16.msrb.mxu3 %v6374_v22  ;;  %v8607_v22 = vld [vmem:[#allocation7 + $0xa40] sm:$0xf0]  ;;  %v6682_v33 = vor.u32 %v8551_v20, %v6681_v19  ;;  %v6821_v19 = vld [vmem:[#allocation7 + $0x980] sm:$0xf]  ;;  %v2916_v46 = vmul.f32 %v2909_v8, %v9343_v14  ;;  %v8672_v8 = vld [vmem:[#allocation11 + $0x1c4] sm:$0xf0] }
 0x156   :  { %2778 = vmatpush.bf16.msrb.mxu0 %v5674_v31  ;;  %v2856_v31 = vperm.slane %v8970_v25, 5 }
 0x157   :  { %2791 = vmatpush.bf16.msrb.mxu1 %v5898_v36  ;;  %v6906_v36 = vor.u32 %v8607_v22, %v6905_v21  ;;  %v7009_v22 = vld [vmem:[#allocation11 + $0x90] sm:$0xf] }
 0x158   :  { %2804 = vmatpush.bf16.msrb.mxu2 %v6122_v37  ;;  %v7082_v37 = vor.u32 %v8654_v24, %v7081_v23  ;;  %v8636_v23 = vld [vmem:[#allocation11 + $0xa4] sm:$0xf0]  ;;  %v7201_v24 = vld [vmem:[#allocation11 + $0x210] sm:$0xf] }
 0x159   :  { %2817 = vmatpush.bf16.msrb.mxu3 %v6346_v43  ;;  %v7274_v43 = vor.u32 %v8702_v29, %v7273_v27  ;;  %v9346_v27 = vld [vmem:[#allocation10] sm:$0xff] }
 0x15a   :  { %2779 = vmatpush.bf16.msrb.mxu0 %v5646_v52  ;;  %v2869_v52 = vperm.slane %v2855_v26, 1  ;;  %v2931_v57 = vperm.slane %v9346_v27, 0 }
 0x15b   :  { %2792 = vmatpush.bf16.msrb.mxu1 %v5870_v55  ;;  %v2894_v55 = vperm.slane %v8970_v25, 2  ;;  %v8684_v25 = vld [vmem:[#allocation11 + $0x224] sm:$0xf0] }
 0x15c   :  { %2805 = vmatpush.bf16.msrb.mxu2 %v6094_v56  ;;  %v2870_v56 = vperm.slane %v2856_v31, 1  ;;  %v2876_v12 = vmul.f32 %v2869_v52, %v9335_v0  ;;  %v7202_v47 = vor.u32 %v8684_v25, %v7201_v24  ;;  %v8618_v24 = vld [vmem:[#allocation11 + $0x14] sm:$0xf0]  ;;  %v7129_v25 = vld [vmem:[#allocation11 + $0x180] sm:$0xf] }
 0x15d   :  { %2818 = vmatpush.bf16.msrb.mxu3 %v6318_v60  ;;  %v6625_v60 = vld [vmem:[#allocation7 + $0x7f8] sm:$0xf]  ;;  %v2908_v7 = vperm.slane %v2894_v55, 2 }
 0x15e   :  { %2780 = vmatpush.bf16.msrb.mxu0 %v5618_v5  ;;  %v8690_v5 = vld [vmem:[#allocation11 + $0x254] sm:$0xf0]  ;;  %v9338_v6 = vpop.f32.mrf.mxu0  ;;  %v2877_v20 = vmul.f32 %v2870_v56, %v9335_v0 }
 0x15f   :  { %2793 = vmatpush.bf16.msrb.mxu1 %v5842_v11  ;;  %v6626_v11 = vor.u32 %v8537_v61, %v6625_v60  ;;  %v7226_v21 = vor.u32 %v8690_v5, %v7225_v3  ;;  %v2915_v29 = vmul.f32 %v2908_v7, %v9343_v14  ;;  %v6794_v60 = vor.u32 %v8579_v49, %v6793_v41  ;;  %v8572_v3 = vld [vmem:[#allocation7 + $0x928] sm:$0xf0]  ;;  %v6961_v5 = vld [vmem:[#allocation11 + $0x30] sm:$0xf] }
 0x160   :  { %2806 = vmatpush.bf16.msrb.mxu2 %v6066_v4  ;;  %v9340_v4 = vpop.f32.mrf.mxu1  ;;  %v6986_v61 = vor.u32 %v8630_v51, %v6985_v50  ;;  %v7153_v7 = vld [vmem:[#allocation11 + $0x1b0] sm:$0xf] }
 0x161   :  { %2819 = vmatpush.bf16.msrb.mxu3 %v6290_v16  ;;  %2781 = vmatmul.bf16.vlgmr.msrb.gmra.mxu0 %v9251_v34  ;;  %v6654_v34 = vor.u32 %v8544_v40, %v6653_v39  ;;  %v6569_v39 = vld [vmem:[#allocation7 + $0x788] sm:$0xf]  ;;  %v8523_v40 = vld [vmem:[#allocation7 + $0x7a0] sm:$0xf0]  ;;  %v7873_v41 = vld [vmem:[#allocation11 + $0x750] sm:$0xf] }
 0x162   :  { %2825 = vmatpush.bf16.msra.mxu0 %v6710_v17  ;;  %2794 = vmatmul.bf16.vlgmr.msrb.gmra.mxu1 %v9253_v35  ;;  %v7250_v35 = vor.u32 %v8696_v54, %v7249_v53  ;;  %v7034_v17 = vor.u32 %v8642_v2, %v7033_v1  ;;  %v7177_v53 = vld [vmem:[#allocation11 + $0x1e0] sm:$0xf] }
 0x163   :  { %2838 = vmatpush.bf16.msra.mxu1 %v6934_v18  ;;  %2807 = vmatmul.bf16.vlgmr.msrb.gmra.mxu2 %v9255_v42  ;;  %v8593_v42 = vld [vmem:[#allocation7 + $0x9d0] sm:$0xf0]  ;;  %v6597_v18 = vld [vmem:[#allocation7 + $0x7c0] sm:$0xf] }
 0x164   :  { %4996 = vmatpush.bf16.msra.mxu2 %v7106_v48  ;;  %2820 = vmatmul.bf16.vlgmr.msrb.gmra.mxu3 %v9259_v45  ;;  %v552_v45 = vperm.slane %v9310_v30, 4  ;;  %v6850_v16 = vor.u32 %v8593_v42, %v6849_v63  ;;  %v8530_v48 = vld [vmem:[#allocation7 + $0x7d8] sm:$0xf0]  ;;  %v6541_v63 = vld [vmem:[#allocation7 + $0x750] sm:$0xf] }
 0x165   :  { %5009 = vmatpush.bf16.msra.mxu3 %v7298_v62  ;;  %v8586_v62 = vld [vmem:[#allocation7 + $0x998] sm:$0xf0]  ;;  %v6598_v31 = vor.u32 %v8530_v48, %v6597_v18  ;;  %v6765_v42 = vld [vmem:[#allocation7 + $0x910] sm:$0xf] }
 0x166   :  { %2826 = vmatpush.bf16.msra.mxu0 %v6682_v33  ;;  %v566_v26 = vperm.slane %v552_v45, 0  ;;  %v2883_v33 = vadd.f32 %v2876_v12, %v9300_v13  ;;  %v9352_v52 = vpop.f32.mrf.mxu2  ;;  %v8678_v13 = vld [vmem:[#allocation11 + $0x1f4] sm:$0xf0]  ;;  %v2576_v55 = vpop.f32.mrf.mxu0  ;;  %v8624_v45 = vld [vmem:[#allocation11 + $0x44] sm:$0xf0]  ;;  %v6766_v48 = vor.u32 %v8572_v3, %v6765_v42 }
 0x167   :  { %2839 = vmatpush.bf16.msra.mxu1 %v6906_v36  ;;  %v6822_v36 = vor.u32 %v8586_v62, %v6821_v19  ;;  %v9355_v56 = vpop.f32.mrf.mxu3  ;;  %v7178_v2 = vor.u32 %v8678_v13, %v7177_v53  ;;  %v6962_v19 = vor.u32 %v8624_v45, %v6961_v5  ;;  %v6937_v62 = vld [vmem:[#allocation11] sm:$0xf]  ;;  %v7633_v3 = vld [vmem:[#allocation11 + $0x570] sm:$0xf] }
 0x168   :  { %4997 = vmatpush.bf16.msra.mxu2 %v7082_v37  ;;  %v7010_v37 = vor.u32 %v8636_v23, %v7009_v22  ;;  %v573_v54 = vmul.f32 %v566_v26, %v9293_v28  ;;  %v7154_v23 = vor.u32 %v8672_v8, %v7153_v7  ;;  %v8666_v26 = vld [vmem:[#allocation11 + $0x194] sm:$0xf0]  ;;  %v6938_v49 = vor.u32 %v8618_v24, %v6937_v62  ;;  %v7465_v13 = vld [vmem:[#allocation11 + $0x420] sm:$0xf] }
 0x169   :  { %5010 = vmatpush.bf16.msra.mxu3 %v7274_v43  ;;  %v2884_v43 = vadd.f32 %v2877_v20, %v9308_v44  ;;  %v2932_v44 = vperm.slane %v9346_v27, 1  ;;  %v6737_v20 = vld [vmem:[#allocation7 + $0x8d8] sm:$0xf]  ;;  %v7130_v51 = vor.u32 %v8666_v26, %v7129_v25  ;;  %v7417_v62 = vld [vmem:[#allocation11 + $0x3c0] sm:$0xf] }
 0x16a   :  { %2827 = vmatpush.bf16.msra.mxu0 %v6654_v34  ;;  %v6570_v34 = vor.u32 %v8523_v40, %v6569_v39  ;;  %v8804_v40 = vld [vmem:[#allocation11 + $0x5e4] sm:$0xf0]  ;;  %v8786_v24 = vld [vmem:[#allocation11 + $0x554] sm:$0xf0]  ;;  %v7801_v25 = vld [vmem:[#allocation11 + $0x6c0] sm:$0xf] }
 0x16b   :  { %2840 = vmatpush.bf16.msra.mxu1 %v6878_v58  ;;  %v2589_v58 = vpop.f32.mrf.mxu1  ;;  %v2923_v1 = vadd.f32 %v2916_v46, %v2884_v43  ;;  %v8852_v43 = vld [vmem:[#allocation11 + $0x764] sm:$0xf0] }
 0x16c   :  { %4998 = vmatpush.bf16.msra.mxu2 %v7058_v59  ;;  %v2922_v59 = vadd.f32 %v2915_v29, %v2883_v33  ;;  %v8756_v33 = vld [vmem:[#allocation11 + $0x464] sm:$0xf0]  ;;  %v7874_v55 = vor.u32 %v8852_v43, %v7873_v41  ;;  %v7849_v58 = vld [vmem:[#allocation11 + $0x720] sm:$0xf]  ;;  %v9377_v41 = vld [vmem:[#allocation8 + $0x10] sm:$0x77] }
 0x16d   :  { %5011 = vmatpush.bf16.msra.mxu3 %v7250_v35  ;;  %v8516_v35 = vld [vmem:[#allocation7 + $0x768] sm:$0xf0]  ;;  %v2946_v22 = vadd.f32 %v2932_v44, %v2923_v1  ;;  %v7657_v44 = vld [vmem:[#allocation11 + $0x5a0] sm:$0xf] }
 0x16e   :  { %2828 = vmatpush.bf16.msra.mxu0 %v6626_v11  ;;  %v2549_v11 = vadd.f32 %v9327_v9, %v573_v54  ;;  %v6542_v12 = vor.u32 %v8516_v35, %v6541_v63  ;;  %v2945_v18 = vadd.f32 %v2931_v57, %v2922_v59  ;;  %v2602_v29 = vpop.f32.mrf.mxu2  ;;  %v8846_v59 = vld [vmem:[#allocation11 + $0x734] sm:$0xf0]  ;;  %v2857_v35 = vperm.slane %v9310_v30, 1 }
 0x16f   :  { %2841 = vmatpush.bf16.msra.mxu1 %v6850_v16  ;;  %v6513_v16 = vld [vmem:[#allocation7 + $0x718] sm:$0xf]  ;;  %v2953_v50 = vmax.f32 %v2946_v22, 0.0  ;;  %v7850_v8 = vor.u32 %v8846_v59, %v7849_v58  ;;  %v8738_v22 = vld [vmem:[#allocation11 + $0x3d4] sm:$0xf0] }
 0x170   :  { %4999 = vmatpush.bf16.msra.mxu2 %v7034_v17  ;;  %v8509_v17 = vld [vmem:[#allocation7 + $0x730] sm:$0xf0]  ;;  %v2562_v9 = vadd.f32 %v9329_v10, %v2549_v11  ;;  %v2952_v46 = vmax.f32 %v2945_v18, 0.0  ;;  %v8750_v10 = vld [vmem:[#allocation11 + $0x434] sm:$0xf0] }
 0x171   :  { %5012 = vmatpush.bf16.msra.mxu3 %v7226_v21  ;;  %v8565_v21 = vld [vmem:[#allocation7 + $0x8f0] sm:$0xf0]  ;;  %v6514_v39 = vor.u32 %v8509_v17, %v6513_v16  ;;  %v9365_v42 = vpack.c.bf16 %v2953_v50, %v2953_v50  ;;  %v7466_v1 = vor.u32 %v8750_v10, %v7465_v13  ;;  %v8792_v11 = vld [vmem:[#allocation11 + $0x584] sm:$0xf0]  ;;  %v2858_v16 = vperm.slane %v9310_v30, 5 }
 0x172   :  { %2829 = vmatpush.bf16.msra.mxu0 %v6598_v31  ;;  %v7489_v31 = vld [vmem:[#allocation11 + $0x450] sm:$0xf]  ;;  %v2575_v57 = vadd.f32 %v9338_v6, %v2562_v9  ;;  %v9362_v63 = vpack.c.bf16 %v2952_v46, %v2952_v46  ;;  %v8744_v6 = vld [vmem:[#allocation11 + $0x404] sm:$0xf0]  ;;  %v8041_v18 = vld [vmem:[#allocation11 + $0x8a0] sm:$0xf]  ;;  %v7418_v46 = vor.u32 %v8738_v22, %v7417_v62 }
 0x173   :  { %2842 = vmatpush.bf16.msra.mxu1 %v6822_v36  ;;  %v7681_v36 = vld [vmem:[#allocation11 + $0x5d0] sm:$0xf]  ;;  %v7490_v53 = vor.u32 %v8756_v33, %v7489_v31  ;;  %v8840_v17 = vld [vmem:[#allocation11 + $0x704] sm:$0xf0]  ;;  %v2872_v29 = vperm.slane %v2858_v16, 1  ;;  %v2897_v9 = vperm.slane %v9310_v30, 6 }
 0x174   :  { %5000 = vmatpush.bf16.msra.mxu2 %v7010_v37  ;;  %v2615_v37 = vpop.f32.mrf.mxu3  ;;  %v7682_v54 = vor.u32 %v8804_v40, %v7681_v36  ;;  %v2588_v45 = vadd.f32 %v9340_v4, %v2575_v57  ;;  %v8834_v31 = vld [vmem:[#allocation11 + $0x6d4] sm:$0xf0]  ;;  %v8017_v33 = vld [vmem:[#allocation11 + $0x870] sm:$0xf]  ;;  %v8888_v36 = vld [vmem:[#allocation11 + $0x884] sm:$0xf0] }
 0x175   :  { %5013 = vmatpush.bf16.msra.mxu3 %v7202_v47  ;;  %v6738_v47 = vor.u32 %v8565_v21, %v6737_v20  ;;  %v2896_v20 = vperm.slane %v9310_v30, 2  ;;  %v7634_v21 = vor.u32 %v8792_v11, %v7633_v3  ;;  %v7393_v40 = vld [vmem:[#allocation11 + $0x390] sm:$0xf]  ;;  %v8018_v30 = vor.u32 %v8888_v36, %v8017_v33  ;;  %v8828_v57 = vld [vmem:[#allocation11 + $0x6a4] sm:$0xf0] }
 0x176   :  { %2830 = vmatpush.bf16.msra.mxu0 %v6570_v34  ;;  %v8798_v34 = vld [vmem:[#allocation11 + $0x5b4] sm:$0xf0]  ;;  %v2601_v26 = vadd.f32 %v9352_v52, %v2588_v45  ;;  %v7585_v50 = vld [vmem:[#allocation11 + $0x510] sm:$0xf]  ;;  %v8780_v52 = vld [vmem:[#allocation11 + $0x524] sm:$0xf0]  ;;  %v2879_v10 = vmul.f32 %v2872_v29, %v9335_v0 }
 0x177   :  { %2843 = vmatpush.bf16.msra.mxu1 %v6794_v60  ;;  %v8065_v60 = vld [vmem:[#allocation11 + $0x8d0] sm:$0xf]  ;;  %v7658_v7 = vor.u32 %v8798_v34, %v7657_v44  ;;  %v553_v44 = vperm.slane %v9377_v41, 0  ;;  %v7993_v34 = vld [vmem:[#allocation11 + $0x840] sm:$0xf] }
 0x178   :  { %5001 = vmatpush.bf16.msra.mxu2 %v6986_v61  ;;  %v8900_v61 = vld [vmem:[#allocation11 + $0x8e4] sm:$0xf0]  ;;  %v2614_v13 = vadd.f32 %v9355_v56, %v2601_v26  ;;  %v8882_v58 = vld [vmem:[#allocation11 + $0x854] sm:$0xf0]  ;;  %v7969_v16 = vld [vmem:[#allocation11 + $0x810] sm:$0xf] }
 0x179   :  { %5014 = vmatpush.bf16.msra.mxu3 %v7178_v2  ;;  %v7441_v2 = vld [vmem:[#allocation11 + $0x3f0] sm:$0xf]  ;;  %v8066_v5 = vor.u32 %v8900_v61, %v8065_v60  ;;  %v7994_v56 = vor.u32 %v8882_v58, %v7993_v34  ;;  %v8822_v11 = vld [vmem:[#allocation11 + $0x674] sm:$0xf0]  ;;  %v8720_v22 = vld [vmem:[#allocation11 + $0x344] sm:$0xf0] }
 0x17a   :  { %2831 = vmatpush.bf16.msra.mxu0 %v6542_v12  ;;  %v7825_v12 = vld [vmem:[#allocation11 + $0x6f0] sm:$0xf]  ;;  %v7442_v4 = vor.u32 %v8744_v6, %v7441_v2  ;;  %v8726_v2 = vld [vmem:[#allocation11 + $0x374] sm:$0xf0]  ;;  %v7561_v6 = vld [vmem:[#allocation11 + $0x4e0] sm:$0xf]  ;;  %v2886_v3 = vadd.f32 %v2879_v10, %v2614_v13 }
 0x17b   :  { %2844 = vmatpush.bf16.msra.mxu1 %v6766_v48  ;;  %v8894_v48 = vld [vmem:[#allocation11 + $0x8b4] sm:$0xf0]  ;;  %v7345_v62 = vld [vmem:[#allocation11 + $0x330] sm:$0xf]  ;;  %v8768_v29 = vld [vmem:[#allocation11 + $0x4c4] sm:$0xf0] }
 0x17c   :  { %5002 = vmatpush.bf16.msra.mxu2 %v6962_v19  ;;  %v2871_v19 = vperm.slane %v2857_v35, 1  ;;  %v7586_v35 = vor.u32 %v8780_v52, %v7585_v50  ;;  %v7537_v26 = vld [vmem:[#allocation11 + $0x4b0] sm:$0xf]  ;;  %v8816_v33 = vld [vmem:[#allocation11 + $0x644] sm:$0xf0] }
 0x17d   :  { %5015 = vmatpush.bf16.msra.mxu3 %v7154_v23  ;;  %v7609_v23 = vld [vmem:[#allocation11 + $0x540] sm:$0xf]  ;;  %v8762_v13 = vld [vmem:[#allocation11 + $0x494] sm:$0xf0]  ;;  %v7921_v34 = vld [vmem:[#allocation11 + $0x7b0] sm:$0xf] }
 0x17e   :  { %2832 = vmatpush.bf16.msra.mxu0 %v6514_v39  ;;  %v2878_v37 = vmul.f32 %v2871_v19, %v9335_v0  ;;  %v2910_v39 = vperm.slane %v2896_v20, 2  ;;  %v9379_v43 = vpop.f32.mrf.mxu0  ;;  %v7945_v36 = vld [vmem:[#allocation11 + $0x7e0] sm:$0xf]  ;;  %v8864_v58 = vld [vmem:[#allocation11 + $0x7c4] sm:$0xf0] }
 0x17f   :  { %2845 = vmatpush.bf16.msra.mxu1 %v6738_v47  ;;  %v7610_v47 = vor.u32 %v8786_v24, %v7609_v23  ;;  %v7705_v10 = vld [vmem:[#allocation11 + $0x600] sm:$0xf] }
 0x180   :  { %5003 = vmatpush.bf16.msra.mxu2 %v6938_v49  ;;  %v8732_v49 = vld [vmem:[#allocation11 + $0x3a4] sm:$0xf0]  ;;  %v2885_v59 = vadd.f32 %v2878_v37, %v9325_v15  ;;  %v2917_v60 = vmul.f32 %v2910_v39, %v9343_v14  ;;  %v567_v15 = vperm.slane %v553_v44, 0  ;;  %v8870_v37 = vld [vmem:[#allocation11 + $0x7f4] sm:$0xf0] }
 0x181   :  { %5016 = vmatpush.bf16.msra.mxu3 %v7130_v51  ;;  %2833 = vmatmul.bf16.vlgmr.msra.gmra.mxu0 %v9266_v32  ;;  %v8042_v32 = vor.u32 %v8894_v48, %v8041_v18  ;;  %v9381_v51 = vpop.f32.mrf.mxu1  ;;  %v7394_v61 = vor.u32 %v8732_v49, %v7393_v40  ;;  %v2933_v18 = vperm.slane %v9346_v27, 2  ;;  %v7346_v40 = vor.u32 %v8720_v22, %v7345_v62  ;;  %v7513_v49 = vld [vmem:[#allocation11 + $0x480] sm:$0xf]  ;;  %v8645_v22 = vld [vmem:[#allocation11 + $0xf4] sm:$0xf] }
 0x182   :  { %5022 = vmatpush.bf16.msrb.mxu0 %v7490_v53  ;;  %2846 = vmatmul.bf16.vlgmr.msra.gmra.mxu1 %v9269_v38  ;;  %v7826_v38 = vor.u32 %v8840_v17, %v7825_v12  ;;  %v7802_v53 = vor.u32 %v8834_v31, %v7801_v25  ;;  %v8876_v17 = vld [vmem:[#allocation11 + $0x824] sm:$0xf0]  ;;  %v2924_v20 = vadd.f32 %v2917_v60, %v2885_v59  ;;  %v7107_v59 = vld [vmem:[#allocation11 + $0x168] sm:$0xf0]  ;;  %v8705_v60 = vld [vmem:[#allocation11 + $0x2d4] sm:$0xf] }
 0x183   :  { %5035 = vmatpush.bf16.msrb.mxu1 %v7682_v54  ;;  %5004 = vmatmul.bf16.vlgmr.msra.gmra.mxu2 %v9362_v63  ;;  %v2911_v54 = vperm.slane %v2897_v9, 2  ;;  %v7729_v9 = vld [vmem:[#allocation11 + $0x630] sm:$0xf]  ;;  %v574_v31 = vmul.f32 %v567_v15, %v9293_v28  ;;  %v7946_v50 = vor.u32 %v8870_v37, %v7945_v36  ;;  %v8699_v15 = vld [vmem:[#allocation11 + $0x2a4] sm:$0xf] }
 0x184   :  { %5048 = vmatpush.bf16.msrb.mxu2 %v7874_v55  ;;  %5017 = vmatmul.bf16.vlgmr.msra.gmra.mxu3 %v9365_v42  ;;  %v7777_v55 = vld [vmem:[#allocation11 + $0x690] sm:$0xf]  ;;  %v2947_v39 = vadd.f32 %v2933_v18, %v2924_v20  ;;  %v7275_v18 = vld [vmem:[#allocation11 + $0x2b8] sm:$0xf0]  ;;  %v7491_v20 = vld [vmem:[#allocation11 + $0x468] sm:$0xf0] }
 0x185   :  { %5061 = vmatpush.bf16.msrb.mxu3 %v8066_v5  ;;  %v2918_v5 = vmul.f32 %v2911_v54, %v9343_v14  ;;  %v7778_v45 = vor.u32 %v8828_v57, %v7777_v55  ;;  %v8810_v54 = vld [vmem:[#allocation11 + $0x614] sm:$0xf0]  ;;  %v2627_v55 = vadd.f32 %v9379_v43, %v574_v31  ;;  %v8657_v57 = vld [vmem:[#allocation11 + $0x154] sm:$0xf]  ;;  %v7083_v43 = vld [vmem:[#allocation11 + $0x138] sm:$0xf0] }
 0x186   :  { %5023 = vmatpush.bf16.msrb.mxu0 %v7466_v1  ;;  %v7369_v1 = vld [vmem:[#allocation11 + $0x360] sm:$0xf]  ;;  %v9389_v12 = vpop.f32.mrf.mxu2  ;;  %v2628_v48 = vpop.f32.mrf.mxu0  ;;  %v7467_v31 = vld [vmem:[#allocation11 + $0x438] sm:$0xf0]  ;;  %v8639_v36 = vld [vmem:[#allocation11 + $0xc4] sm:$0xf] }
 0x187   :  { %5036 = vmatpush.bf16.msrb.mxu1 %v7658_v7  ;;  %v8774_v7 = vld [vmem:[#allocation11 + $0x4f4] sm:$0xf0]  ;;  %v9392_v19 = vpop.f32.mrf.mxu3  ;;  %v8753_v48 = vld [vmem:[#allocation11 + $0x454] sm:$0xf] }
 0x188   :  { %5049 = vmatpush.bf16.msrb.mxu2 %v7850_v8  ;;  %v7753_v8 = vld [vmem:[#allocation11 + $0x660] sm:$0xf]  ;;  %v7562_v24 = vor.u32 %v8774_v7, %v7561_v6  ;;  %v2954_v6 = vmax.f32 %v2947_v39, 0.0  ;;  %v2640_v7 = vadd.f32 %v9381_v51, %v2627_v55 }
 0x189   :  { %5062 = vmatpush.bf16.msrb.mxu3 %v8042_v32  ;;  %v2641_v23 = vpop.f32.mrf.mxu1  ;;  %v7970_v32 = vor.u32 %v8876_v17, %v7969_v16  ;;  %v7754_v25 = vor.u32 %v8822_v11, %v7753_v8  ;;  %v7110_v8 = vor.u32 %v8657_v57, %v7107_v59  ;;  %v7897_v16 = vld [vmem:[#allocation11 + $0x780] sm:$0xf]  ;;  %v8858_v17 = vld [vmem:[#allocation11 + $0x794] sm:$0xf0]  ;;  %v8681_v59 = vld [vmem:[#allocation11 + $0x214] sm:$0xf] }
 0x18a   :  { %5024 = vmatpush.bf16.msrb.mxu0 %v7442_v4  ;;  %v2934_v4 = vperm.slane %v9346_v27, 3  ;;  %v7494_v23 = vor.u32 %v8753_v48, %v7491_v20 }
 0x18b   :  { %5037 = vmatpush.bf16.msrb.mxu1 %v7634_v21  ;;  %v7370_v21 = vor.u32 %v8726_v2, %v7369_v1  ;;  %v7922_v2 = vor.u32 %v8864_v58, %v7921_v34  ;;  %v8633_v58 = vld [vmem:[#allocation11 + $0x94] sm:$0xf] }
 0x18c   :  { %5050 = vmatpush.bf16.msrb.mxu2 %v7826_v38  ;;  %v2925_v38 = vadd.f32 %v2918_v5, %v2886_v3  ;;  %v7514_v3 = vor.u32 %v8762_v13, %v7513_v49  ;;  %v7706_v5 = vor.u32 %v8810_v54, %v7705_v10 }
 0x18d   :  { %5063 = vmatpush.bf16.msrb.mxu3 %v8018_v30  ;;  %v7538_v30 = vor.u32 %v8768_v29, %v7537_v26  ;;  %v2859_v26 = vperm.slane %v9377_v41, 1  ;;  %v7251_v29 = vld [vmem:[#allocation11 + $0x288] sm:$0xf0] }
 0x18e   :  { %5025 = vmatpush.bf16.msrb.mxu0 %v7418_v46  ;;  %v7321_v46 = vld [vmem:[#allocation11 + $0x300] sm:$0xf]  ;;  %v2948_v52 = vadd.f32 %v2934_v4, %v2925_v38  ;;  %v2654_v44 = vpop.f32.mrf.mxu2  ;;  %v7898_v4 = vor.u32 %v8858_v17, %v7897_v16  ;;  %v2653_v38 = vadd.f32 %v9389_v12, %v2640_v7  ;;  %v6987_v7 = vld [vmem:[#allocation11 + $0x78] sm:$0xf0]  ;;  %v7395_v16 = vld [vmem:[#allocation11 + $0x3a8] sm:$0xf0] }
 0x18f   :  { %5038 = vmatpush.bf16.msrb.mxu1 %v7610_v47  ;;  %v8714_v47 = vld [vmem:[#allocation11 + $0x314] sm:$0xf0]  ;;  %v2873_v49 = vperm.slane %v2859_v26, 1  ;;  %v7155_v26 = vld [vmem:[#allocation11 + $0x1c8] sm:$0xf0] }
 0x190   :  { %5051 = vmatpush.bf16.msrb.mxu2 %v7802_v53  ;;  %v7730_v53 = vor.u32 %v8816_v33, %v7729_v9  ;;  %v7322_v1 = vor.u32 %v8714_v47, %v7321_v46  ;;  %v8747_v9 = vld [vmem:[#allocation11 + $0x424] sm:$0xf]  ;;  %v2898_v33 = vperm.slane %v9377_v41, 2  ;;  %v7035_v46 = vld [vmem:[#allocation11 + $0xd8] sm:$0xf0] }
 0x191   :  { %5064 = vmatpush.bf16.msrb.mxu3 %v7994_v56  ;;  %v2955_v56 = vmax.f32 %v2948_v52, 0.0  ;;  %v7470_v37 = vor.u32 %v8747_v9, %v7467_v31  ;;  %v8687_v47 = vld [vmem:[#allocation11 + $0x244] sm:$0xf]  ;;  %v8741_v52 = vld [vmem:[#allocation11 + $0x3f4] sm:$0xf]  ;;  %v7038_v10 = vor.u32 %v8639_v36, %v7035_v46  ;;  %v2880_v34 = vmul.f32 %v2873_v49, %v9335_v0 }
 0x192   :  { %5026 = vmatpush.bf16.msrb.mxu0 %v7394_v61  ;;  %v7299_v61 = vld [vmem:[#allocation11 + $0x2e8] sm:$0xf0]  ;;  %v7371_v9 = vld [vmem:[#allocation11 + $0x378] sm:$0xf0]  ;;  %v554_v49 = vperm.slane %v9377_v41, 4 }
 0x193   :  { %5039 = vmatpush.bf16.msrb.mxu1 %v7586_v35  ;;  %v2667_v35 = vpop.f32.mrf.mxu3  ;;  %v7302_v11 = vor.u32 %v8705_v60, %v7299_v61  ;;  %v9400_v62 = vpack.c.bf16 %v2955_v56, %v2955_v56  ;;  %v7203_v60 = vld [vmem:[#allocation11 + $0x228] sm:$0xf0]  ;;  %v8735_v61 = vld [vmem:[#allocation11 + $0x3c4] sm:$0xf]  ;;  %v6939_v36 = vld [vmem:[#allocation11 + $0x18] sm:$0xf0] }
 0x194   :  { %5052 = vmatpush.bf16.msrb.mxu2 %v7778_v45  ;;  %v8651_v45 = vld [vmem:[#allocation11 + $0x124] sm:$0xf]  ;;  %v7419_v35 = vld [vmem:[#allocation11 + $0x3d8] sm:$0xf0] }
 0x195   :  { %5065 = vmatpush.bf16.msrb.mxu3 %v7970_v32  ;;  %v7086_v51 = vor.u32 %v8651_v45, %v7083_v43  ;;  %v7278_v32 = vor.u32 %v8699_v15, %v7275_v18  ;;  %v7422_v56 = vor.u32 %v8735_v61, %v7419_v35  ;;  %v7206_v45 = vor.u32 %v8681_v59, %v7203_v60  ;;  %v8627_v43 = vld [vmem:[#allocation11 + $0x64] sm:$0xf]  ;;  %v8729_v15 = vld [vmem:[#allocation11 + $0x394] sm:$0xf]  ;;  %v8233_v35 = vld [vmem:[#allocation11 + $0xa20] sm:$0xf] }
 0x196   :  { %5027 = vmatpush.bf16.msrb.mxu0 %v7370_v21  ;;  %v9398_v21 = vpack.c.bf16 %v2954_v6, %v2954_v6  ;;  %v2935_v6 = vperm.slane %v9346_v27, 4  ;;  %v568_v60 = vperm.slane %v554_v49, 0  ;;  %v8843_v61 = vld [vmem:[#allocation11 + $0x724] sm:$0xf] }
 0x197   :  { %5040 = vmatpush.bf16.msrb.mxu1 %v7562_v24  ;;  %v7059_v24 = vld [vmem:[#allocation11 + $0x108] sm:$0xf0] }
 0x198   :  { %5053 = vmatpush.bf16.msrb.mxu2 %v7754_v25  ;;  %v8693_v25 = vld [vmem:[#allocation11 + $0x274] sm:$0xf]  ;;  %v7062_v12 = vor.u32 %v8645_v22, %v7059_v24 }
 0x199   :  { %5066 = vmatpush.bf16.msrb.mxu3 %v7946_v50  ;;  %v7254_v39 = vor.u32 %v8693_v25, %v7251_v29  ;;  %v7227_v50 = vld [vmem:[#allocation11 + $0x258] sm:$0xf0]  ;;  %v8669_v24 = vld [vmem:[#allocation11 + $0x1b4] sm:$0xf]  ;;  %v8723_v29 = vld [vmem:[#allocation11 + $0x364] sm:$0xf] }
 0x19a   :  { %5028 = vmatpush.bf16.msrb.mxu0 %v7346_v40  ;;  %v2666_v40 = vadd.f32 %v9392_v19, %v2653_v38  ;;  %v7230_v57 = vor.u32 %v8687_v47, %v7227_v50  ;;  %v7011_v19 = vld [vmem:[#allocation11 + $0xa8] sm:$0xf0]  ;;  %v7158_v47 = vor.u32 %v8669_v24, %v7155_v26  ;;  %v8257_v50 = vld [vmem:[#allocation11 + $0xa50] sm:$0xf]  ;;  %v8930_v24 = vld [vmem:[#allocation11 + $0x9d4] sm:$0xf0] }
 0x19b   :  { %5041 = vmatpush.bf16.msrb.mxu1 %v7538_v30  ;;  %v7443_v30 = vld [vmem:[#allocation11 + $0x408] sm:$0xf0] }
 0x19c   :  { %5054 = vmatpush.bf16.msrb.mxu2 %v7730_v53  ;;  %v2912_v53 = vperm.slane %v2898_v33, 2  ;;  %v7446_v54 = vor.u32 %v8741_v52, %v7443_v30  ;;  %v6963_v38 = vld [vmem:[#allocation11 + $0x48] sm:$0xf0]  ;;  %v8615_v33 = vld [vmem:[#allocation11 + $0x4] sm:$0xf] }
 0x19d   :  { %5067 = vmatpush.bf16.msrb.mxu3 %v7922_v2  ;;  %v8948_v52 = vld [vmem:[#allocation11 + $0xa64] sm:$0xf0]  ;;  %v8849_v30 = vld [vmem:[#allocation11 + $0x754] sm:$0xf] }
 0x19e   :  { %5029 = vmatpush.bf16.msrb.mxu0 %v7322_v1  ;;  %v2678_v13 = vpop.f32.mrf.mxu0  ;;  %v2919_v2 = vmul.f32 %v2912_v53, %v9343_v14  ;;  %v8258_v53 = vor.u32 %v8948_v52, %v8257_v50 }
 0x19f   :  { %5042 = vmatpush.bf16.msrb.mxu1 %v7514_v3  ;;  %v2679_v55 = vadd.f32 %v2678_v13, %v2666_v40  ;;  %v2691_v44 = vpop.f32.mrf.mxu1  ;;  %v8717_v13 = vld [vmem:[#allocation11 + $0x334] sm:$0xf] }
 0x1a0   :  { %5055 = vmatpush.bf16.msrb.mxu2 %v7706_v5  ;;  %v7014_v5 = vor.u32 %v8633_v58, %v7011_v19  ;;  %v6942_v19 = vor.u32 %v8615_v33, %v6939_v36  ;;  %v8879_v33 = vld [vmem:[#allocation11 + $0x844] sm:$0xf]  ;;  %v7995_v36 = vld [vmem:[#allocation11 + $0x858] sm:$0xf0] }
 0x1a1   :  { %5030 = vmatmul.bf16.vlgmr.msrb.gmra.mxu0 %v9398_v21  ;;  %5068 = vmatpush.bf16.msrb.mxu3 %v7898_v4  ;;  %v2692_v1 = vadd.f32 %v2691_v44, %v2679_v55  ;;  %v7398_v4 = vor.u32 %v8729_v15, %v7395_v16  ;;  %v8897_v55 = vld [vmem:[#allocation11 + $0x8d4] sm:$0xf]  ;;  %v8936_v15 = vld [vmem:[#allocation11 + $0xa04] sm:$0xf0]  ;;  %v575_v16 = vmul.f32 %v568_v60, %v9293_v28  ;;  %v8867_v60 = vld [vmem:[#allocation11 + $0x7e4] sm:$0xf] }
 0x1a2   :  { %5043 = vmatmul.bf16.vlgmr.msrb.gmra.mxu1 %v9400_v62  ;;  %5074 = vmatpush.bf16.msra.mxu0 %v8258_v53  ;;  %v7998_v50 = vor.u32 %v8879_v33, %v7995_v36  ;;  %v8873_v53 = vld [vmem:[#allocation11 + $0x814] sm:$0xf]  ;;  %v7683_v36 = vld [vmem:[#allocation11 + $0x5e8] sm:$0xf0] }
 0x1a3   :  { %5087 = vmatpush.bf16.msra.mxu1 %v7110_v8  ;;  %v2887_v3 = vadd.f32 %v2880_v34, %v2692_v1  ;;  %v8675_v8 = vld [vmem:[#allocation11 + $0x1e4] sm:$0xf]  ;;  %v8801_v33 = vld [vmem:[#allocation11 + $0x5d4] sm:$0xf] }
 0x1a4   :  { %5100 = vmatpush.bf16.msra.mxu2 %v7302_v11  ;;  %v7179_v11 = vld [vmem:[#allocation11 + $0x1f8] sm:$0xf0] }
 0x1a5   :  { %5113 = vmatpush.bf16.msra.mxu3 %v7494_v23  ;;  %v2926_v17 = vadd.f32 %v2919_v2, %v2887_v3  ;;  %v6990_v23 = vor.u32 %v8627_v43, %v6987_v7  ;;  %v7323_v3 = vld [vmem:[#allocation11 + $0x318] sm:$0xf0] }
 0x1a6   :  { %v9411_v18 = vpop.f32.mrf.mxu2  ;;  %v2680_v48 = vpop.f32.mrf.mxu0  ;;  %v8043_v43 = vld [vmem:[#allocation11 + $0x8b8] sm:$0xf0] }
 0x1a7   :  { %5088 = vmatpush.bf16.msra.mxu1 %v7086_v51  ;;  %v9413_v20 = vpop.f32.mrf.mxu3  ;;  %v2949_v22 = vadd.f32 %v2935_v6, %v2926_v17  ;;  %v7182_v51 = vor.u32 %v8675_v8, %v7179_v11  ;;  %v2693_v25 = vpop.f32.mrf.mxu1  ;;  %v8942_v6 = vld [vmem:[#allocation11 + $0xa34] sm:$0xf0]  ;;  %v8209_v11 = vld [vmem:[#allocation11 + $0x9f0] sm:$0xf] }
 0x1a8   :  { %5101 = vmatpush.bf16.msra.mxu2 %v7278_v32  ;;  %v8621_v32 = vld [vmem:[#allocation11 + $0x34] sm:$0xf]  ;;  %v8234_v7 = vor.u32 %v8942_v6, %v8233_v35  ;;  %v2705_v25 = vadd.f32 %v9411_v18, %v575_v16 }
 0x1a9   :  { %5114 = vmatpush.bf16.msra.mxu3 %v7470_v37  ;;  %v2956_v31 = vmax.f32 %v2949_v22, 0.0  ;;  %v8663_v37 = vld [vmem:[#allocation11 + $0x184] sm:$0xf]  ;;  %v6966_v46 = vor.u32 %v8621_v32, %v6963_v38  ;;  %v7827_v22 = vld [vmem:[#allocation11 + $0x708] sm:$0xf0]  ;;  %v8210_v32 = vor.u32 %v8936_v15, %v8209_v11 }
 0x1aa   :  { %5075 = vmatpush.bf16.msra.mxu0 %v8234_v7  ;;  %v8185_v38 = vld [vmem:[#allocation11 + $0x9c0] sm:$0xf]  ;;  %v8825_v18 = vld [vmem:[#allocation11 + $0x694] sm:$0xf]  ;;  %v7731_v15 = vld [vmem:[#allocation11 + $0x648] sm:$0xf0] }
 0x1ab   :  { %5089 = vmatpush.bf16.msra.mxu1 %v7062_v12  ;;  %v7131_v12 = vld [vmem:[#allocation11 + $0x198] sm:$0xf0]  ;;  %v9415_v40 = vpack.c.bf16 %v2956_v31, %v2956_v31  ;;  %v8861_v16 = vld [vmem:[#allocation11 + $0x7b4] sm:$0xf] }
 0x1ac   :  { %5102 = vmatpush.bf16.msra.mxu2 %v7254_v39  ;;  %v7374_v39 = vor.u32 %v8723_v29, %v7371_v9  ;;  %v7134_v59 = vor.u32 %v8663_v37, %v7131_v12  ;;  %v8831_v9 = vld [vmem:[#allocation11 + $0x6c4] sm:$0xf]  ;;  %v7803_v31 = vld [vmem:[#allocation11 + $0x6d8] sm:$0xf0]  ;;  %v8186_v37 = vor.u32 %v8930_v24, %v8185_v38  ;;  %v8161_v12 = vld [vmem:[#allocation11 + $0x990] sm:$0xf] }
 0x1ad   :  { %5115 = vmatpush.bf16.msra.mxu3 %v7446_v54  ;;  %5056 = vmatmul.bf16.vlgmr.msrb.gmra.mxu2 %v9415_v40  ;;  %v7875_v54 = vld [vmem:[#allocation11 + $0x768] sm:$0xf0]  ;;  %v7806_v49 = vor.u32 %v8831_v9, %v7803_v31  ;;  %v8807_v38 = vld [vmem:[#allocation11 + $0x604] sm:$0xf]  ;;  %v8089_v24 = vld [vmem:[#allocation11 + $0x900] sm:$0xf] }
 0x1ae   :  { %v2706_v44 = vpop.f32.mrf.mxu2  ;;  %v7878_v1 = vor.u32 %v8849_v30, %v7875_v54  ;;  %5076 = vmatpush.bf16.msra.mxu0 %v8210_v32  ;;  %v7779_v30 = vld [vmem:[#allocation11 + $0x6a8] sm:$0xf0]  ;;  %v7707_v31 = vld [vmem:[#allocation11 + $0x618] sm:$0xf0] }
 0x1af   :  { %5090 = vmatpush.bf16.msra.mxu1 %v7038_v10  ;;  %v7347_v10 = vld [vmem:[#allocation11 + $0x348] sm:$0xf0]  ;;  %v2719_v34 = vpop.f32.mrf.mxu3  ;;  %v8918_v44 = vld [vmem:[#allocation11 + $0x974] sm:$0xf0] }
 0x1b0   :  { %5103 = vmatpush.bf16.msra.mxu2 %v7230_v57  ;;  %v8067_v57 = vld [vmem:[#allocation11 + $0x8e8] sm:$0xf0]  ;;  %v7350_v58 = vor.u32 %v8717_v13, %v7347_v10  ;;  %v7782_v34 = vor.u32 %v8825_v18, %v7779_v30  ;;  %v7686_v18 = vor.u32 %v8801_v33, %v7683_v36 }
 0x1b1   :  { %5116 = vmatpush.bf16.msra.mxu3 %v7422_v56  ;;  %v8070_v2 = vor.u32 %v8897_v55, %v8067_v57  ;;  %v8711_v56 = vld [vmem:[#allocation11 + $0x304] sm:$0xf]  ;;  %v7971_v13 = vld [vmem:[#allocation11 + $0x828] sm:$0xf0]  ;;  %v2860_v55 = vperm.slane %v9377_v41, 5  ;;  %v2899_v57 = vperm.slane %v9377_v41, 6 }
 0x1b2   :  { %v7326_v8 = vor.u32 %v8711_v56, %v7323_v3  ;;  %5077 = vmatpush.bf16.msra.mxu0 %v8186_v37  ;;  %v8113_v3 = vld [vmem:[#allocation11 + $0x930] sm:$0xf]  ;;  %v8855_v37 = vld [vmem:[#allocation11 + $0x784] sm:$0xf] }
 0x1b3   :  { %5091 = vmatpush.bf16.msra.mxu1 %v7014_v5  ;;  %v7851_v5 = vld [vmem:[#allocation11 + $0x738] sm:$0xf0]  ;;  %v2913_v56 = vperm.slane %v2899_v57, 2  ;;  %v8795_v57 = vld [vmem:[#allocation11 + $0x5a4] sm:$0xf] }
 0x1b4   :  { %5104 = vmatpush.bf16.msra.mxu2 %v7206_v45  ;;  %v8891_v45 = vld [vmem:[#allocation11 + $0x8a4] sm:$0xf]  ;;  %v7854_v17 = vor.u32 %v8843_v61, %v7851_v5  ;;  %v7947_v61 = vld [vmem:[#allocation11 + $0x7f8] sm:$0xf0]  ;;  %v8912_v5 = vld [vmem:[#allocation11 + $0x944] sm:$0xf0] }
 0x1b5   :  { %5117 = vmatpush.bf16.msra.mxu3 %v7398_v4  ;;  %v8046_v48 = vor.u32 %v8891_v45, %v8043_v43  ;;  %v8837_v4 = vld [vmem:[#allocation11 + $0x6f4] sm:$0xf]  ;;  %v7950_v7 = vor.u32 %v8867_v60, %v7947_v61  ;;  %v2920_v32 = vmul.f32 %v2913_v56, %v9343_v14  ;;  %v7473_v60 = vld [vmem:[#allocation11 + $0x428] sm:$0xf]  ;;  %v8751_v61 = vld [vmem:[#allocation11 + $0x43c] sm:$0xf0] }
 0x1b6   :  { %v7830_v26 = vor.u32 %v8837_v4, %v7827_v22  ;;  %v8114_v4 = vor.u32 %v8912_v5, %v8113_v3  ;;  %v8235_v56 = vld [vmem:[#allocation11 + $0xa38] sm:$0xf0]  ;;  %v7474_v5 = vor.u32 %v8751_v61, %v7473_v60  ;;  %v8915_v61 = vld [vmem:[#allocation11 + $0x964] sm:$0xf] }
 0x1b7   :  { %5092 = vmatpush.bf16.msra.mxu1 %v6990_v23  ;;  %v8885_v23 = vld [vmem:[#allocation11 + $0x874] sm:$0xf] }
 0x1b8   :  { %5105 = vmatpush.bf16.msra.mxu2 %v7182_v51  ;;  %v8019_v51 = vld [vmem:[#allocation11 + $0x888] sm:$0xf0] }
 0x1b9   :  { %5118 = vmatpush.bf16.msra.mxu3 %v7374_v39  ;;  %v8022_v29 = vor.u32 %v8885_v23, %v8019_v51  ;;  %v8924_v39 = vld [vmem:[#allocation11 + $0x9a4] sm:$0xf0]  ;;  %v2936_v51 = vperm.slane %v9346_v27, 5  ;;  %v8709_v27 = vld [vmem:[#allocation11 + $0x2ec] sm:$0xf0] }
 0x1ba   :  { %v8162_v10 = vor.u32 %v8924_v39, %v8161_v12  ;;  %v7899_v12 = vld [vmem:[#allocation11 + $0x798] sm:$0xf0]  ;;  %v7305_v39 = vld [vmem:[#allocation11 + $0x2d8] sm:$0xf] }
 0x1bb   :  { %5093 = vmatpush.bf16.msra.mxu1 %v6966_v46  ;;  %v2718_v46 = vadd.f32 %v9413_v20, %v2705_v25  ;;  %v8137_v20 = vld [vmem:[#allocation11 + $0x960] sm:$0xf]  ;;  %v8906_v25 = vld [vmem:[#allocation11 + $0x914] sm:$0xf0] }
 0x1bc   :  { %5106 = vmatpush.bf16.msra.mxu2 %v7158_v47  ;;  %5078 = vmatpush.bf16.msra.mxu0 %v8162_v10  ;;  %v8138_v35 = vor.u32 %v8918_v44, %v8137_v20  ;;  %v8945_v10 = vld [vmem:[#allocation11 + $0xa54] sm:$0xf]  ;;  %v7306_v20 = vor.u32 %v8709_v27, %v7305_v39  ;;  %v7587_v39 = vld [vmem:[#allocation11 + $0x528] sm:$0xf0]  ;;  %v7401_v27 = vld [vmem:[#allocation11 + $0x398] sm:$0xf] }
 0x1bd   :  { %5119 = vmatpush.bf16.msra.mxu3 %v7350_v58  ;;  %v7974_v58 = vor.u32 %v8873_v53, %v7971_v13  ;;  %v7710_v53 = vor.u32 %v8807_v38, %v7707_v31  ;;  %v7902_v13 = vor.u32 %v8855_v37, %v7899_v12  ;;  %v8691_v38 = vld [vmem:[#allocation11 + $0x25c] sm:$0xf0]  ;;  %v8187_v31 = vld [vmem:[#allocation11 + $0x9d8] sm:$0xf0]  ;;  %v7209_v37 = vld [vmem:[#allocation11 + $0x218] sm:$0xf] }
 0x1be   :  { %v2730_v47 = vpop.f32.mrf.mxu0  ;;  %v8777_v12 = vld [vmem:[#allocation11 + $0x514] sm:$0xf] }
 0x1bf   :  { %5094 = vmatpush.bf16.msra.mxu1 %v6942_v19  ;;  %v2743_v52 = vpop.f32.mrf.mxu1  ;;  %v2731_v54 = vadd.f32 %v2730_v47, %v2718_v46  ;;  %v8819_v19 = vld [vmem:[#allocation11 + $0x664] sm:$0xf]  ;;  %v8090_v46 = vor.u32 %v8906_v25, %v8089_v24  ;;  %v7425_v24 = vld [vmem:[#allocation11 + $0x3c8] sm:$0xf]  ;;  %v8739_v25 = vld [vmem:[#allocation11 + $0x3dc] sm:$0xf0] }
 0x1c0   :  { %5107 = vmatpush.bf16.msra.mxu2 %v7134_v59  ;;  %v7755_v59 = vld [vmem:[#allocation11 + $0x678] sm:$0xf0]  ;;  %5079 = vmatpush.bf16.msra.mxu0 %v8138_v35  ;;  %v7426_v36 = vor.u32 %v8739_v25, %v7425_v24  ;;  %v8759_v24 = vld [vmem:[#allocation11 + $0x484] sm:$0xf] }
 0x1c1   :  { %5120 = vmatpush.bf16.msra.mxu3 %v7326_v8  ;;  %v7758_v43 = vor.u32 %v8819_v19, %v7755_v59  ;;  %v8813_v8 = vld [vmem:[#allocation11 + $0x634] sm:$0xf]  ;;  %v7659_v19 = vld [vmem:[#allocation11 + $0x5b8] sm:$0xf0] }
 0x1c2   :  { %5095 = vmatmul.bf16.vlgmr.msra.gmra.mxu1 %v9362_v63  ;;  %v7662_v35 = vor.u32 %v8795_v57, %v7659_v19  ;;  %v8771_v57 = vld [vmem:[#allocation11 + $0x4e4] sm:$0xf]  ;;  %v7515_v25 = vld [vmem:[#allocation11 + $0x498] sm:$0xf0] }
 0x1c3   :  { %5139 = vmatpush.bf16.msrb.mxu1 %v7878_v1  ;;  %5108 = vmatmul.bf16.vlgmr.msra.gmra.mxu2 %v9365_v42  ;;  %v2744_v1 = vadd.f32 %v2743_v52, %v2731_v54  ;;  %v8259_v54 = vld [vmem:[#allocation11 + $0xa68] sm:$0xf0] }
 0x1c4   :  { %5152 = vmatpush.bf16.msrb.mxu2 %v8070_v2  ;;  %v2874_v2 = vperm.slane %v2860_v55, 1  ;;  %5080 = vmatpush.bf16.msra.mxu0 %v8114_v4 }
 0x1c6   :  { %v2756_v6 = vpop.f32.mrf.mxu2  ;;  %v2732_v11 = vpop.f32.mrf.mxu0  ;;  %v2881_v23 = vmul.f32 %v2874_v2, %v9335_v0  ;;  %v8262_v2 = vor.u32 %v8945_v10, %v8259_v54 }
 0x1c7   :  { %5140 = vmatpush.bf16.msrb.mxu1 %v7854_v17  ;;  %v2757_v41 = vadd.f32 %v2756_v6, %v2744_v1  ;;  %v2769_v45 = vpop.f32.mrf.mxu3  ;;  %v7923_v17 = vld [vmem:[#allocation11 + $0x7c8] sm:$0xf0]  ;;  %v8939_v6 = vld [vmem:[#allocation11 + $0xa24] sm:$0xf]  ;;  %v8745_v11 = vld [vmem:[#allocation11 + $0x40c] sm:$0xf0] }
 0x1c8   :  { %5153 = vmatpush.bf16.msrb.mxu2 %v8046_v48  ;;  %v2745_v48 = vpop.f32.mrf.mxu1  ;;  %v7926_v9 = vor.u32 %v8861_v16, %v7923_v17  ;;  %5081 = vmatpush.bf16.msra.mxu0 %v8090_v46  ;;  %v8238_v16 = vor.u32 %v8939_v6, %v8235_v56  ;;  %v8933_v17 = vld [vmem:[#allocation11 + $0x9f4] sm:$0xf] }
 0x1c9   :  { %v2770_v22 = vadd.f32 %v2769_v45, %v2757_v41  ;;  %v7257_v41 = vld [vmem:[#allocation11 + $0x278] sm:$0xf]  ;;  %v8789_v45 = vld [vmem:[#allocation11 + $0x574] sm:$0xf]  ;;  %v8211_v48 = vld [vmem:[#allocation11 + $0xa08] sm:$0xf0] }
 0x1cb   :  { %5141 = vmatpush.bf16.msrb.mxu1 %v7830_v26  ;;  %v2888_v26 = vadd.f32 %v2881_v23, %v2770_v22  ;;  %v7233_v23 = vld [vmem:[#allocation11 + $0x248] sm:$0xf] }
 0x1cc   :  { %5154 = vmatpush.bf16.msrb.mxu2 %v8022_v29  ;;  %v7734_v29 = vor.u32 %v8813_v8, %v7731_v15  ;;  %5126 = vmatpush.bf16.msrb.mxu0 %v7686_v18  ;;  %v7449_v8 = vld [vmem:[#allocation11 + $0x3f8] sm:$0xf]  ;;  %v7234_v33 = vor.u32 %v8691_v38, %v7233_v23  ;;  %v7137_v23 = vld [vmem:[#allocation11 + $0x188] sm:$0xf]  ;;  %v8667_v38 = vld [vmem:[#allocation11 + $0x19c] sm:$0xf0] }
 0x1cd   :  { %v2927_v47 = vadd.f32 %v2920_v32, %v2888_v26  ;;  %v7450_v22 = vor.u32 %v8745_v11, %v7449_v8  ;;  %v7611_v32 = vld [vmem:[#allocation11 + $0x558] sm:$0xf0]  ;;  %v7353_v8 = vld [vmem:[#allocation11 + $0x338] sm:$0xf]  ;;  %v8721_v11 = vld [vmem:[#allocation11 + $0x34c] sm:$0xf0] }
 0x1ce   :  { %v2758_v52 = vpop.f32.mrf.mxu2 }
 0x1cf   :  { %5142 = vmatpush.bf16.msrb.mxu1 %v7806_v49  ;;  %v7497_v49 = vld [vmem:[#allocation11 + $0x458] sm:$0xf]  ;;  %v2950_v30 = vadd.f32 %v2936_v51, %v2927_v47  ;;  %v2771_v55 = vpop.f32.mrf.mxu3  ;;  %v8783_v51 = vld [vmem:[#allocation11 + $0x544] sm:$0xf]  ;;  %v8685_v47 = vld [vmem:[#allocation11 + $0x22c] sm:$0xf0] }
 0x1d0   :  { %5155 = vmatpush.bf16.msrb.mxu2 %v7998_v50  ;;  %v8757_v50 = vld [vmem:[#allocation11 + $0x46c] sm:$0xf0]  ;;  %5127 = vmatpush.bf16.msrb.mxu0 %v7662_v35  ;;  %v7614_v26 = vor.u32 %v8783_v51, %v7611_v32  ;;  %v9438_v52 = vld [vmem:[#allocation8 + $0x18] sm:$0x7]  ;;  %v7210_v10 = vor.u32 %v8685_v47, %v7209_v37  ;;  %v7185_v55 = vld [vmem:[#allocation11 + $0x1e8] sm:$0xf]  ;;  %v7354_v32 = vor.u32 %v8721_v11, %v7353_v8 }
 0x1d1   :  { %v7498_v44 = vor.u32 %v8757_v50, %v7497_v49  ;;  %v2957_v59 = vmax.f32 %v2950_v30, 0.0  ;;  %v8733_v49 = vld [vmem:[#allocation11 + $0x3ac] sm:$0xf0]  ;;  %v7590_v50 = vor.u32 %v8777_v12, %v7587_v39  ;;  %v8139_v35 = vld [vmem:[#allocation11 + $0x978] sm:$0xf0]  ;;  %v7138_v39 = vor.u32 %v8667_v38, %v7137_v23 }
 0x1d2   :  { %v7402_v54 = vor.u32 %v8733_v49, %v7401_v27  ;;  %v8949_v37 = vld [vmem:[#allocation11 + $0xa6c] sm:$0xf0]  ;;  %v8903_v27 = vld [vmem:[#allocation11 + $0x904] sm:$0xf]  ;;  %v8091_v49 = vld [vmem:[#allocation11 + $0x918] sm:$0xf0] }
 0x1d3   :  { %5143 = vmatpush.bf16.msrb.mxu1 %v7782_v34  ;;  %v7281_v34 = vld [vmem:[#allocation11 + $0x2a8] sm:$0xf]  ;;  %v9429_v1 = vpack.c.bf16 %v2957_v59, %v2957_v59  ;;  %v555_v59 = vperm.slane %v9438_v52, 0  ;;  %v7641_v11 = vld [vmem:[#allocation11 + $0x578] sm:$0xf]  ;;  %v2900_v23 = vperm.slane %v9438_v52, 2 }
 0x1d4   :  { %5156 = vmatpush.bf16.msrb.mxu2 %v7974_v58  ;;  %v8703_v58 = vld [vmem:[#allocation11 + $0x2bc] sm:$0xf0] }
 0x1d5   :  { %v7282_v3 = vor.u32 %v8703_v58, %v7281_v34  ;;  %5069 = vmatmul.bf16.vlgmr.msrb.gmra.mxu3 %v9429_v1  ;;  %v7377_v34 = vld [vmem:[#allocation11 + $0x368] sm:$0xf]  ;;  %v8727_v58 = vld [vmem:[#allocation11 + $0x37c] sm:$0xf0] }
 0x1d6   :  { %5165 = vmatpush.bf16.msrb.mxu3 %v8262_v2  ;;  %v7378_v56 = vor.u32 %v8727_v58, %v7377_v34  ;;  %v8943_v34 = vld [vmem:[#allocation11 + $0xa3c] sm:$0xf0]  ;;  %v8094_v58 = vor.u32 %v8903_v27, %v8091_v49  ;;  %v7593_v49 = vld [vmem:[#allocation11 + $0x518] sm:$0xf] }
 0x1d7   :  { %5144 = vmatpush.bf16.msrb.mxu1 %v7758_v43  ;;  %v7635_v43 = vld [vmem:[#allocation11 + $0x588] sm:$0xf0] }
 0x1d8   :  { %5157 = vmatpush.bf16.msrb.mxu2 %v7950_v7  ;;  %v8697_v7 = vld [vmem:[#allocation11 + $0x28c] sm:$0xf0]  ;;  %v7638_v15 = vor.u32 %v8789_v45, %v7635_v43 }
 0x1d9   :  { %v7258_v4 = vor.u32 %v8697_v7, %v7257_v41  ;;  %v7539_v41 = vld [vmem:[#allocation11 + $0x4c8] sm:$0xf0]  ;;  %v8673_v7 = vld [vmem:[#allocation11 + $0x1cc] sm:$0xf0] }
 0x1da   :  { %5128 = vmatpush.bf16.msrb.mxu0 %v7638_v15  ;;  %5166 = vmatpush.bf16.msrb.mxu3 %v8238_v16  ;;  %v569_v16 = vperm.slane %v555_v59, 0 }
 0x1db   :  { %5145 = vmatpush.bf16.msrb.mxu1 %v7734_v29  ;;  %v8214_v29 = vor.u32 %v8933_v17, %v8211_v48  ;;  %v8142_v48 = vor.u32 %v8915_v61, %v8139_v35  ;;  %v7665_v35 = vld [vmem:[#allocation11 + $0x5a8] sm:$0xf] }
 0x1dc   :  { %5158 = vmatpush.bf16.msrb.mxu2 %v7926_v9  ;;  %v8927_v9 = vld [vmem:[#allocation11 + $0x9c4] sm:$0xf] }
 0x1dd   :  { %v8190_v30 = vor.u32 %v8927_v9, %v8187_v31  ;;  %v8073_v9 = vld [vmem:[#allocation11 + $0x8d8] sm:$0xf]  ;;  %v7518_v31 = vor.u32 %v8759_v24, %v7515_v25  ;;  %v7617_v24 = vld [vmem:[#allocation11 + $0x548] sm:$0xf]  ;;  %v8787_v25 = vld [vmem:[#allocation11 + $0x55c] sm:$0xf0] }
 0x1de   :  { %v9434_v46 = vpop.f32.mrf.mxu0  ;;  %5129 = vmatpush.bf16.msrb.mxu0 %v7614_v26  ;;  %5167 = vmatpush.bf16.msrb.mxu3 %v8214_v29  ;;  %v7329_v26 = vld [vmem:[#allocation11 + $0x308] sm:$0xf]  ;;  %v8715_v29 = vld [vmem:[#allocation11 + $0x31c] sm:$0xf0] }
 0x1df   :  { %5146 = vmatpush.bf16.msrb.mxu1 %v7710_v53  ;;  %v9436_v18 = vpop.f32.mrf.mxu1  ;;  %v8921_v53 = vld [vmem:[#allocation11 + $0x994] sm:$0xf]  ;;  %v7330_v47 = vor.u32 %v8715_v29, %v7329_v26  ;;  %v7977_v26 = vld [vmem:[#allocation11 + $0x818] sm:$0xf] }
 0x1e0   :  { %5159 = vmatpush.bf16.msrb.mxu2 %v7902_v13  ;;  %v8163_v13 = vld [vmem:[#allocation11 + $0x9a8] sm:$0xf0] }
 0x1e1   :  { %v8166_v60 = vor.u32 %v8921_v53, %v8163_v13  ;;  %v7689_v13 = vld [vmem:[#allocation11 + $0x5d8] sm:$0xf] }
 0x1e2   :  { %5147 = vmatmul.bf16.vlgmr.msrb.gmra.mxu1 %v9415_v40  ;;  %5130 = vmatpush.bf16.msrb.mxu0 %v7590_v50 }
 0x1e3   :  { %5191 = vmatpush.bf16.msra.mxu1 %v7306_v20  ;;  %5160 = vmatmul.bf16.vlgmr.msrb.gmra.mxu2 %v9429_v1  ;;  %v7563_v20 = vld [vmem:[#allocation11 + $0x4f8] sm:$0xf0] }
 0x1e4   :  { %5204 = vmatpush.bf16.msra.mxu2 %v7498_v44  ;;  %v8679_v44 = vld [vmem:[#allocation11 + $0x1fc] sm:$0xf0]  ;;  %v7566_v19 = vor.u32 %v8771_v57, %v7563_v20  ;;  %5168 = vmatpush.bf16.msrb.mxu3 %v8190_v30  ;;  %v576_v57 = vmul.f32 %v569_v16, %v9293_v28  ;;  %v8937_v28 = vld [vmem:[#allocation11 + $0xa0c] sm:$0xf0]  ;;  %v8001_v16 = vld [vmem:[#allocation11 + $0x848] sm:$0xf] }
 0x1e5   :  { %v7186_v6 = vor.u32 %v8679_v44, %v7185_v55  ;;  %5121 = vmatmul.bf16.vlgmr.msra.gmra.mxu3 %v9398_v21  ;;  %v8895_v20 = vld [vmem:[#allocation11 + $0x8bc] sm:$0xf0]  ;;  %v8241_v44 = vld [vmem:[#allocation11 + $0xa28] sm:$0xf] }
 0x1e6   :  { %v9441_v2 = vpop.f32.mrf.mxu2  ;;  %v2784_v43 = vpop.f32.mrf.mxu0  ;;  %5131 = vmatpush.bf16.msrb.mxu0 %v7566_v19  ;;  %v2783_v19 = vadd.f32 %v9434_v46, %v576_v57  ;;  %v8242_v61 = vor.u32 %v8943_v34, %v8241_v44  ;;  %v8971_v44 = vld [vmem:[#allocation10] sm:$0xff] }
 0x1e7   :  { %5192 = vmatpush.bf16.msra.mxu1 %v7282_v3  ;;  %v7161_v3 = vld [vmem:[#allocation11 + $0x1b8] sm:$0xf]  ;;  %v9443_v45 = vpop.f32.mrf.mxu3  ;;  %v2797_v17 = vpop.f32.mrf.mxu1  ;;  %v2861_v43 = vperm.slane %v9438_v52, 1  ;;  %v9455_v52 = vld [vmem:[#allocation13] sm:$0x3f]  ;;  %v2937_v34 = vperm.slane %v8971_v44, 6 }
 0x1e8   :  { %5205 = vmatpush.bf16.msra.mxu2 %v7474_v5  ;;  %v8765_v5 = vld [vmem:[#allocation11 + $0x4b4] sm:$0xf]  ;;  %5169 = vmatpush.bf16.msrb.mxu3 %v8166_v60  ;;  %v7162_v51 = vor.u32 %v8673_v7, %v7161_v3  ;;  %v8889_v3 = vld [vmem:[#allocation11 + $0x88c] sm:$0xf0] }
 0x1e9   :  { %v7542_v15 = vor.u32 %v8765_v5, %v7539_v41  ;;  %v8217_v5 = vld [vmem:[#allocation11 + $0x9f8] sm:$0xf]  ;;  %v2796_v41 = vadd.f32 %v9436_v18, %v2783_v19  ;;  %v2875_v18 = vperm.slane %v2861_v43, 1  ;;  %v8649_v44 = vld [vmem:[#allocation11 + $0x10c] sm:$0xf0] }
 0x1ea   :  { %v8218_v8 = vor.u32 %v8937_v28, %v8217_v5  ;;  %v8121_v5 = vld [vmem:[#allocation11 + $0x938] sm:$0xf]  ;;  %v8913_v28 = vld [vmem:[#allocation11 + $0x94c] sm:$0xf0] }
 0x1eb   :  { %5193 = vmatpush.bf16.msra.mxu1 %v7258_v4  ;;  %v8909_v4 = vld [vmem:[#allocation11 + $0x934] sm:$0xf]  ;;  %5132 = vmatpush.bf16.msrb.mxu0 %v7542_v15  ;;  %v8793_v15 = vld [vmem:[#allocation11 + $0x58c] sm:$0xf0]  ;;  %v2809_v17 = vadd.f32 %v9441_v2, %v2796_v41  ;;  %v7113_v43 = vld [vmem:[#allocation11 + $0x158] sm:$0xf] }
 0x1ec   :  { %5206 = vmatpush.bf16.msra.mxu2 %v7450_v22  ;;  %v8115_v22 = vld [vmem:[#allocation11 + $0x948] sm:$0xf0]  ;;  %5170 = vmatpush.bf16.msrb.mxu3 %v8142_v48  ;;  %v8883_v48 = vld [vmem:[#allocation11 + $0x85c] sm:$0xf0]  ;;  %v8925_v2 = vld [vmem:[#allocation11 + $0x9ac] sm:$0xf0] }
 0x1ed   :  { %v8118_v12 = vor.u32 %v8909_v4, %v8115_v22  ;;  %v8193_v4 = vld [vmem:[#allocation11 + $0x9c8] sm:$0xf]  ;;  %v8931_v22 = vld [vmem:[#allocation11 + $0x9dc] sm:$0xf0]  ;;  %v2822_v29 = vadd.f32 %v9443_v45, %v2809_v17  ;;  %v2882_v45 = vmul.f32 %v2875_v18, %v9335_v0 }
 0x1ee   :  { %v2810_v50 = vpop.f32.mrf.mxu2  ;;  %v8194_v38 = vor.u32 %v8931_v22, %v8193_v4  ;;  %v8122_v4 = vor.u32 %v8913_v28, %v8121_v5  ;;  %v7905_v22 = vld [vmem:[#allocation11 + $0x788] sm:$0xf]  ;;  %v8859_v18 = vld [vmem:[#allocation11 + $0x79c] sm:$0xf0] }
 0x1ef   :  { %5194 = vmatpush.bf16.msra.mxu1 %v7234_v33  ;;  %v8901_v33 = vld [vmem:[#allocation11 + $0x8ec] sm:$0xf0]  ;;  %v2823_v55 = vpop.f32.mrf.mxu3  ;;  %5133 = vmatpush.bf16.msrb.mxu0 %v7518_v31  ;;  %v8169_v31 = vld [vmem:[#allocation11 + $0x998] sm:$0xf]  ;;  %v8643_v5 = vld [vmem:[#allocation11 + $0xdc] sm:$0xf0] }
 0x1f0   :  { %5207 = vmatpush.bf16.msra.mxu2 %v7426_v36  ;;  %v8265_v36 = vld [vmem:[#allocation11 + $0xa58] sm:$0xf]  ;;  %v8074_v30 = vor.u32 %v8901_v33, %v8073_v9  ;;  %5171 = vmatpush.bf16.msrb.mxu3 %v8118_v12  ;;  %v8877_v9 = vld [vmem:[#allocation11 + $0x82c] sm:$0xf0]  ;;  %v2914_v12 = vperm.slane %v2900_v23, 2  ;;  %v8170_v27 = vor.u32 %v8925_v2, %v8169_v31  ;;  %v3304_v55 = vperm.slane %v9455_v52, 0 }
 0x1f1   :  { %v8266_v53 = vor.u32 %v8949_v37, %v8265_v36  ;;  %v8781_v50 = vld [vmem:[#allocation11 + $0x52c] sm:$0xf0]  ;;  %v8097_v23 = vld [vmem:[#allocation11 + $0x908] sm:$0xf] }
 0x1f2   :  { %v7089_v2 = vld [vmem:[#allocation11 + $0x128] sm:$0xf] }
 0x1f3   :  { %5195 = vmatpush.bf16.msra.mxu1 %v7210_v10  ;;  %v8805_v10 = vld [vmem:[#allocation11 + $0x5ec] sm:$0xf0] }
 0x1f4   :  { %5208 = vmatpush.bf16.msra.mxu2 %v7402_v54  ;;  %v8049_v54 = vld [vmem:[#allocation11 + $0x8a8] sm:$0xf]  ;;  %v7690_v59 = vor.u32 %v8805_v10, %v7689_v13  ;;  %5172 = vmatpush.bf16.msrb.mxu3 %v8094_v58  ;;  %v8871_v13 = vld [vmem:[#allocation11 + $0x7fc] sm:$0xf0]  ;;  %v7594_v58 = vor.u32 %v8781_v50, %v7593_v49 }
 0x1f5   :  { %v8050_v60 = vor.u32 %v8895_v20, %v8049_v54  ;;  %v8145_v10 = vld [vmem:[#allocation11 + $0x968] sm:$0xf]  ;;  %v8919_v54 = vld [vmem:[#allocation11 + $0x97c] sm:$0xf0]  ;;  %v2921_v20 = vmul.f32 %v2914_v12, %v9343_v14 }
 0x1f6   :  { %v7521_v12 = vld [vmem:[#allocation11 + $0x488] sm:$0xf] }
 0x1f7   :  { %5196 = vmatpush.bf16.msra.mxu1 %v7186_v6  ;;  %v8799_v6 = vld [vmem:[#allocation11 + $0x5bc] sm:$0xf0] }
 0x1f8   :  { %5209 = vmatpush.bf16.msra.mxu2 %v7378_v56  ;;  %v8025_v56 = vld [vmem:[#allocation11 + $0x878] sm:$0xf]  ;;  %5217 = vmatpush.bf16.msra.mxu3 %v7690_v59  ;;  %v7666_v46 = vor.u32 %v8799_v6, %v7665_v35  ;;  %v8146_v59 = vor.u32 %v8919_v54, %v8145_v10  ;;  %v7475_v10 = vld [vmem:[#allocation11 + $0x440] sm:$0xf0]  ;;  %v8796_v54 = vld [vmem:[#allocation11 + $0x5ac] sm:$0xf] }
 0x1f9   :  { %v8026_v7 = vor.u32 %v8889_v3, %v8025_v56  ;;  %v7929_v35 = vld [vmem:[#allocation11 + $0x7b8] sm:$0xf]  ;;  %v8865_v3 = vld [vmem:[#allocation11 + $0x7cc] sm:$0xf0] }
 0x1fb   :  { %5197 = vmatpush.bf16.msra.mxu1 %v7162_v51  ;;  %v7642_v51 = vor.u32 %v8793_v15, %v7641_v11  ;;  %v8661_v11 = vld [vmem:[#allocation11 + $0x16c] sm:$0xf0]  ;;  %v7545_v15 = vld [vmem:[#allocation11 + $0x4b8] sm:$0xf] }
 0x1fc   :  { %5210 = vmatpush.bf16.msra.mxu2 %v7354_v32  ;;  %5218 = vmatpush.bf16.msra.mxu3 %v7666_v46  ;;  %v8002_v32 = vor.u32 %v8883_v48, %v8001_v16  ;;  %v8769_v16 = vld [vmem:[#allocation11 + $0x4cc] sm:$0xf0]  ;;  %v7930_v48 = vor.u32 %v8865_v3, %v7929_v35  ;;  %v7041_v3 = vld [vmem:[#allocation11 + $0xc8] sm:$0xf] }
 0x1fd   :  { %v7546_v31 = vor.u32 %v8769_v16, %v7545_v15  ;;  %v8784_v15 = vld [vmem:[#allocation11 + $0x54c] sm:$0xf]  ;;  %v7619_v16 = vld [vmem:[#allocation11 + $0x560] sm:$0xf0] }
 0x1fe   :  { %v2834_v33 = vpop.f32.mrf.mxu0 }
 0x1ff   :  { %5198 = vmatpush.bf16.msra.mxu1 %v7138_v39  ;;  %v2847_v36 = vpop.f32.mrf.mxu1  ;;  %v2835_v37 = vadd.f32 %v2834_v33, %v2822_v29  ;;  %v7618_v39 = vor.u32 %v8787_v25, %v7617_v24  ;;  %v7114_v24 = vor.u32 %v8661_v11, %v7113_v43  ;;  %v7499_v25 = vld [vmem:[#allocation11 + $0x470] sm:$0xf0]  ;;  %v8655_v33 = vld [vmem:[#allocation11 + $0x13c] sm:$0xf0]  ;;  %v7427_v11 = vld [vmem:[#allocation11 + $0x3e0] sm:$0xf0] }
 0x200   :  { %5211 = vmatpush.bf16.msra.mxu2 %v7330_v47  ;;  %5219 = vmatpush.bf16.msra.mxu3 %v7642_v51  ;;  %v7978_v47 = vor.u32 %v8877_v9, %v7977_v26  ;;  %v8802_v26 = vld [vmem:[#allocation11 + $0x5dc] sm:$0xf]  ;;  %v7691_v29 = vld [vmem:[#allocation11 + $0x5f0] sm:$0xf0] }
 0x201   :  { %v7694_v50 = vor.u32 %v8802_v26, %v7691_v29  ;;  %v7067_v43 = vld [vmem:[#allocation11 + $0x110] sm:$0xf0] }
 0x202   :  { %5199 = vmatmul.bf16.vlgmr.msra.gmra.mxu1 %v9365_v42  ;;  %v7595_v26 = vld [vmem:[#allocation11 + $0x530] sm:$0xf0] }
 0x203   :  { %5243 = vmatpush.bf16.msrb.mxu1 %v8074_v30  ;;  %5212 = vmatmul.bf16.vlgmr.msra.gmra.mxu2 %v9398_v21  ;;  %v7953_v30 = vld [vmem:[#allocation11 + $0x7e8] sm:$0xf] }
 0x204   :  { %5256 = vmatpush.bf16.msrb.mxu2 %v8266_v53  ;;  %v2848_v53 = vadd.f32 %v2847_v36, %v2835_v37  ;;  %5220 = vmatpush.bf16.msra.mxu3 %v7618_v39  ;;  %v7954_v19 = vor.u32 %v8871_v13, %v7953_v30  ;;  %v7906_v36 = vor.u32 %v8859_v18, %v7905_v22  ;;  %v8763_v39 = vld [vmem:[#allocation11 + $0x49c] sm:$0xf0]  ;;  %v8658_v30 = vld [vmem:[#allocation11 + $0x15c] sm:$0xf]  ;;  %v8637_v22 = vld [vmem:[#allocation11 + $0xac] sm:$0xf0] }
 0x205   :  { %v7090_v13 = vor.u32 %v8655_v33, %v7089_v2 }
 0x206   :  { %v2889_v57 = vadd.f32 %v2882_v45, %v2848_v53  ;;  %v5005_v6 = vpop.f32.mrf.mxu2  ;;  %v2836_v46 = vpop.f32.mrf.mxu0  ;;  %v7115_v53 = vld [vmem:[#allocation11 + $0x170] sm:$0xf0]  ;;  %v8748_v45 = vld [vmem:[#allocation11 + $0x42c] sm:$0xf] }
 0x207   :  { %5244 = vmatpush.bf16.msrb.mxu1 %v8050_v60  ;;  %v7569_v60 = vld [vmem:[#allocation11 + $0x4e8] sm:$0xf]  ;;  %v5018_v56 = vpop.f32.mrf.mxu3  ;;  %v5006_v41 = vadd.f32 %v5005_v6, %v3304_v55  ;;  %v2849_v14 = vpop.f32.mrf.mxu1  ;;  %v7667_v55 = vld [vmem:[#allocation11 + $0x5c0] sm:$0xf0]  ;;  %v8790_v6 = vld [vmem:[#allocation11 + $0x57c] sm:$0xf] }
 0x208   :  { %5257 = vmatpush.bf16.msrb.mxu2 %v8242_v61  ;;  %v8775_v61 = vld [vmem:[#allocation11 + $0x4fc] sm:$0xf0]  ;;  %v2928_v0 = vadd.f32 %v2921_v20, %v2889_v57  ;;  %5221 = vmatpush.bf16.msra.mxu3 %v7594_v58  ;;  %v7522_v57 = vor.u32 %v8763_v39, %v7521_v12  ;;  %v7065_v20 = vld [vmem:[#allocation11 + $0xf8] sm:$0xf]  ;;  %v7478_v58 = vor.u32 %v8748_v45, %v7475_v10  ;;  %v8646_v14 = vld [vmem:[#allocation11 + $0xfc] sm:$0xf] }
 0x209   :  { %v9460_v17 = vadd.f32 %v5018_v56, %v5006_v41  ;;  %v7066_v35 = vor.u32 %v8649_v44, %v7065_v20  ;;  %v7643_v56 = vld [vmem:[#allocation11 + $0x590] sm:$0xf0]  ;;  %v8631_v12 = vld [vmem:[#allocation11 + $0x7c] sm:$0xf0]  ;;  %v7571_v45 = vld [vmem:[#allocation11 + $0x500] sm:$0xf0] }
 0x20a   :  { %v7646_v46 = vor.u32 %v8790_v6, %v7643_v56  ;;  %v8628_v44 = vld [vmem:[#allocation11 + $0x6c] sm:$0xf] }
 0x20b   :  { %5245 = vmatpush.bf16.msrb.mxu1 %v8026_v7  ;;  %v2951_v7 = vadd.f32 %v2937_v34, %v2928_v0  ;;  %v7118_v34 = vor.u32 %v8658_v30, %v7115_v53  ;;  %v7451_v0 = vld [vmem:[#allocation11 + $0x410] sm:$0xf0]  ;;  %v7379_v53 = vld [vmem:[#allocation11 + $0x380] sm:$0xf0] }
 0x20c   :  { %5258 = vmatpush.bf16.msrb.mxu2 %v8218_v8  ;;  %v7570_v8 = vor.u32 %v8775_v61, %v7569_v60  ;;  %v7091_v60 = vld [vmem:[#allocation11 + $0x140] sm:$0xf0]  ;;  %v8742_v61 = vld [vmem:[#allocation11 + $0x3fc] sm:$0xf] }
 0x20d   :  { %v2958_v51 = vmax.f32 %v2951_v7, 0.0  ;;  %v7454_v41 = vor.u32 %v8742_v61, %v7451_v0  ;;  %v8736_v7 = vld [vmem:[#allocation11 + $0x3cc] sm:$0xf]  ;;  %v6945_v0 = vld [vmem:[#allocation11 + $0x8] sm:$0xf] }
 0x20e   :  { %5222 = vmatpush.bf16.msra.mxu3 %v7570_v8  ;;  %v7042_v8 = vor.u32 %v8643_v5, %v7041_v3  ;;  %v7430_v18 = vor.u32 %v8736_v7, %v7427_v11  ;;  %v8619_v3 = vld [vmem:[#allocation11 + $0x1c] sm:$0xf0]  ;;  %v7881_v5 = vld [vmem:[#allocation11 + $0x758] sm:$0xf]  ;;  %v8712_v7 = vld [vmem:[#allocation11 + $0x30c] sm:$0xf] }
 0x20f   :  { %5246 = vmatpush.bf16.msrb.mxu1 %v8002_v32  ;;  %v8907_v32 = vld [vmem:[#allocation11 + $0x91c] sm:$0xf0]  ;;  %v9462_v9 = vpack.c.bf16 %v2958_v51, %v2958_v51  ;;  %v8640_v51 = vld [vmem:[#allocation11 + $0xcc] sm:$0xf] }
 0x210   :  { %5259 = vmatpush.bf16.msrb.mxu2 %v8194_v38  ;;  %v8754_v38 = vld [vmem:[#allocation11 + $0x45c] sm:$0xf]  ;;  %v8098_v37 = vor.u32 %v8907_v32, %v8097_v23  ;;  %v7622_v23 = vor.u32 %v8784_v15, %v7619_v16  ;;  %v7043_v32 = vld [vmem:[#allocation11 + $0xe0] sm:$0xf0]  ;;  %v8760_v11 = vld [vmem:[#allocation11 + $0x48c] sm:$0xf]  ;;  %v6946_v16 = vor.u32 %v8619_v3, %v6945_v0 }
 0x211   :  { %5082 = vmatmul.bf16.vlgmr.msra.gmra.mxu0 %v9462_v9  ;;  %5173 = vmatmul.bf16.vlgmr.msrb.gmra.mxu3 %v9462_v9  ;;  %v7502_v49 = vor.u32 %v8754_v38, %v7499_v25  ;;  %v8730_v38 = vld [vmem:[#allocation11 + $0x39c] sm:$0xf]  ;;  %v7523_v15 = vld [vmem:[#allocation11 + $0x4a0] sm:$0xf0]  ;;  %v7835_v0 = vld [vmem:[#allocation11 + $0x710] sm:$0xf0] }
 0x212   :  { %5178 = vmatpush.bf16.msra.mxu0 %v7114_v24  ;;  %5223 = vmatpush.bf16.msra.mxu3 %v7546_v31  ;;  %v7403_v24 = vld [vmem:[#allocation11 + $0x3b0] sm:$0xf0]  ;;  %v8778_v25 = vld [vmem:[#allocation11 + $0x51c] sm:$0xf] }
 0x213   :  { %5247 = vmatpush.bf16.msrb.mxu1 %v7978_v47  ;;  %v5007_v47 = vpop.f32.mrf.mxu2  ;;  %v7406_v39 = vor.u32 %v8730_v38, %v7403_v24  ;;  %v7526_v24 = vor.u32 %v8760_v11, %v7523_v15 }
 0x214   :  { %5260 = vmatpush.bf16.msrb.mxu2 %v8170_v27  ;;  %v5020_v27 = vpop.f32.mrf.mxu3  ;;  %v7598_v47 = vor.u32 %v8778_v25, %v7595_v26  ;;  %v8847_v25 = vld [vmem:[#allocation11 + $0x73c] sm:$0xf0]  ;;  %v8616_v26 = vld [vmem:[#allocation11 + $0xc] sm:$0xf] }
 0x215   :  { %v8634_v27 = vld [vmem:[#allocation11 + $0x9c] sm:$0xf] }
 0x216   :  { %5179 = vmatpush.bf16.msra.mxu0 %v7090_v13  ;;  %5224 = vmatpush.bf16.msra.mxu3 %v7522_v57 }
 0x217   :  { %5248 = vmatpush.bf16.msrb.mxu1 %v7954_v19  ;;  %v7670_v19 = vor.u32 %v8796_v54, %v7667_v55  ;;  %v6969_v54 = vld [vmem:[#allocation11 + $0x38] sm:$0xf]  ;;  %v8625_v55 = vld [vmem:[#allocation11 + $0x4c] sm:$0xf0] }
 0x218   :  { %5261 = vmatpush.bf16.msrb.mxu2 %v8146_v59  ;;  %v8652_v59 = vld [vmem:[#allocation11 + $0x12c] sm:$0xf] }
 0x219   :  { %v7094_v28 = vor.u32 %v8652_v59, %v7091_v60  ;;  %v8766_v59 = vld [vmem:[#allocation11 + $0x4bc] sm:$0xf]  ;;  %v7547_v60 = vld [vmem:[#allocation11 + $0x4d0] sm:$0xf0] }
 0x21a   :  { %5269 = vmatpush.bf16.msrb.mxu3 %v7118_v34  ;;  %5180 = vmatpush.bf16.msra.mxu0 %v7066_v35  ;;  %v6995_v34 = vld [vmem:[#allocation11 + $0x80] sm:$0xf0]  ;;  %v6970_v35 = vor.u32 %v8625_v55, %v6969_v54  ;;  %v8934_v55 = vld [vmem:[#allocation11 + $0x9fc] sm:$0xf] }
 0x21b   :  { %5249 = vmatpush.bf16.msrb.mxu1 %v7930_v48  ;;  %v7070_v48 = vor.u32 %v8646_v14, %v7067_v43  ;;  %v6998_v56 = vor.u32 %v8628_v44, %v6995_v34  ;;  %v8622_v14 = vld [vmem:[#allocation11 + $0x3c] sm:$0xf]  ;;  %v6971_v43 = vld [vmem:[#allocation11 + $0x50] sm:$0xf0]  ;;  %v7859_v54 = vld [vmem:[#allocation11 + $0x740] sm:$0xf0] }
 0x21c   :  { %5262 = vmatpush.bf16.msrb.mxu2 %v8122_v4  ;;  %v7017_v4 = vld [vmem:[#allocation11 + $0x98] sm:$0xf]  ;;  %v7073_v44 = vld [vmem:[#allocation11 + $0x100] sm:$0xf] }
 0x21d   :  { %v7018_v31 = vor.u32 %v8637_v22, %v7017_v4  ;;  %v8267_v4 = vld [vmem:[#allocation11 + $0xa70] sm:$0xf0]  ;;  %v8650_v34 = vld [vmem:[#allocation11 + $0x114] sm:$0xf0] }
 0x21e   :  { %5270 = vmatpush.bf16.msrb.mxu3 %v7094_v28  ;;  %5181 = vmatpush.bf16.msra.mxu0 %v7042_v8  ;;  %v5031_v29 = vpop.f32.mrf.mxu0  ;;  %v8853_v28 = vld [vmem:[#allocation11 + $0x76c] sm:$0xf0]  ;;  %v7331_v8 = vld [vmem:[#allocation11 + $0x320] sm:$0xf0] }
 0x21f   :  { %5250 = vmatpush.bf16.msrb.mxu1 %v7906_v36  ;;  %v5032_v2 = vadd.f32 %v5031_v29, %v9460_v17  ;;  %v5044_v33 = vpop.f32.mrf.mxu1  ;;  %v7046_v36 = vor.u32 %v8640_v51, %v7043_v32  ;;  %v8772_v17 = vld [vmem:[#allocation11 + $0x4ec] sm:$0xf]  ;;  %v7882_v22 = vor.u32 %v8853_v28, %v7881_v5  ;;  %v8662_v51 = vld [vmem:[#allocation11 + $0x174] sm:$0xf0]  ;;  %v7857_v32 = vld [vmem:[#allocation11 + $0x728] sm:$0xf]  ;;  %v7334_v38 = vor.u32 %v8712_v7, %v7331_v8 }
 0x220   :  { %5263 = vmatpush.bf16.msrb.mxu2 %v8098_v37  ;;  %v6993_v37 = vld [vmem:[#allocation11 + $0x68] sm:$0xf]  ;;  %v7574_v20 = vor.u32 %v8772_v17, %v7571_v45  ;;  %v6947_v29 = vld [vmem:[#allocation11 + $0x20] sm:$0xf0]  ;;  %v7049_v5 = vld [vmem:[#allocation11 + $0xd0] sm:$0xf] }
 0x221   :  { %v9469_v30 = vadd.f32 %v5044_v33, %v5032_v2  ;;  %5134 = vmatmul.bf16.vlgmr.msrb.gmra.mxu0 %v9400_v62  ;;  %5225 = vmatmul.bf16.vlgmr.msra.gmra.mxu3 %v9400_v62  ;;  %v6994_v13 = vor.u32 %v8631_v12, %v6993_v37  ;;  %v8850_v2 = vld [vmem:[#allocation11 + $0x75c] sm:$0xf]  ;;  %v8940_v37 = vld [vmem:[#allocation11 + $0xa2c] sm:$0xf]  ;;  %v8243_v12 = vld [vmem:[#allocation11 + $0xa40] sm:$0xf0] }
 0x222   :  { %5251 = vmatmul.bf16.vlgmr.msrb.gmra.mxu1 %v9429_v1  ;;  %5271 = vmatpush.bf16.msrb.mxu3 %v7070_v48  ;;  %v8946_v48 = vld [vmem:[#allocation11 + $0xa5c] sm:$0xf]  ;;  %v8246_v45 = vor.u32 %v8940_v37, %v8243_v12  ;;  %v8644_v28 = vld [vmem:[#allocation11 + $0xe4] sm:$0xf0]  ;;  %v8832_v8 = vld [vmem:[#allocation11 + $0x6cc] sm:$0xf] }
 0x223   :  { %5295 = vmatpush.bf16.msra.mxu1 %v7502_v49  ;;  %5264 = vmatmul.bf16.vlgmr.msrb.gmra.mxu2 %v9462_v9  ;;  %v7019_v49 = vld [vmem:[#allocation11 + $0xb0] sm:$0xf0]  ;;  %v7050_v15 = vor.u32 %v8644_v28, %v7049_v5  ;;  %v8632_v37 = vld [vmem:[#allocation11 + $0x84] sm:$0xf0]  ;;  %v7737_v12 = vld [vmem:[#allocation11 + $0x638] sm:$0xf] }
 0x224   :  { %5308 = vmatpush.bf16.msra.mxu2 %v7694_v50  ;;  %v8724_v50 = vld [vmem:[#allocation11 + $0x36c] sm:$0xf]  ;;  %5182 = vmatpush.bf16.msra.mxu0 %v7018_v31  ;;  %v7022_v10 = vor.u32 %v8634_v27, %v7019_v49  ;;  %v8270_v31 = vor.u32 %v8946_v48, %v8267_v4  ;;  %v7097_v27 = vld [vmem:[#allocation11 + $0x130] sm:$0xf]  ;;  %v8656_v49 = vld [vmem:[#allocation11 + $0x144] sm:$0xf0] }
 0x225   :  { %v7382_v57 = vor.u32 %v8724_v50, %v7379_v53  ;;  %v7833_v50 = vld [vmem:[#allocation11 + $0x6f8] sm:$0xf]  ;;  %v8841_v53 = vld [vmem:[#allocation11 + $0x70c] sm:$0xf0]  ;;  %v8922_v48 = vld [vmem:[#allocation11 + $0x99c] sm:$0xf] }
 0x226   :  { %5272 = vmatpush.bf16.msrb.mxu3 %v7046_v36  ;;  %v5033_v61 = vpop.f32.mrf.mxu0  ;;  %v7883_v36 = vld [vmem:[#allocation11 + $0x770] sm:$0xf0]  ;;  %v6953_v5 = vld [vmem:[#allocation11 + $0x10] sm:$0xf]  ;;  %v8620_v28 = vld [vmem:[#allocation11 + $0x24] sm:$0xf0] }
 0x227   :  { %5296 = vmatpush.bf16.msra.mxu1 %v7478_v58  ;;  %v8718_v58 = vld [vmem:[#allocation11 + $0x33c] sm:$0xf]  ;;  %v5046_v6 = vpop.f32.mrf.mxu1  ;;  %v7886_v17 = vor.u32 %v8850_v2, %v7883_v36  ;;  %v8171_v4 = vld [vmem:[#allocation11 + $0x9b0] sm:$0xf0]  ;;  %v8147_v2 = vld [vmem:[#allocation11 + $0x980] sm:$0xf0] }
 0x228   :  { %5309 = vmatpush.bf16.msra.mxu2 %v7670_v19  ;;  %v7355_v19 = vld [vmem:[#allocation11 + $0x350] sm:$0xf0]  ;;  %5183 = vmatpush.bf16.msra.mxu0 %v6994_v13  ;;  %v8844_v13 = vld [vmem:[#allocation11 + $0x72c] sm:$0xf]  ;;  %v8838_v61 = vld [vmem:[#allocation11 + $0x6fc] sm:$0xf] }
 0x229   :  { %v8928_v6 = vld [vmem:[#allocation11 + $0x9cc] sm:$0xf]  ;;  %v7001_v36 = vld [vmem:[#allocation11 + $0x70] sm:$0xf] }
 0x22a   :  { %5273 = vmatpush.bf16.msrb.mxu3 %v7022_v10  ;;  %v7098_v10 = vor.u32 %v8656_v49, %v7097_v27 }
 0x22b   :  { %5297 = vmatpush.bf16.msra.mxu1 %v7454_v41  ;;  %v7358_v41 = vor.u32 %v8718_v58, %v7355_v19  ;;  %v7809_v58 = vld [vmem:[#allocation11 + $0x6c8] sm:$0xf]  ;;  %v8835_v19 = vld [vmem:[#allocation11 + $0x6dc] sm:$0xf0] }
 0x22c   :  { %5310 = vmatpush.bf16.msra.mxu2 %v7646_v46  ;;  %v7550_v46 = vor.u32 %v8766_v59, %v7547_v60  ;;  %5184 = vmatpush.bf16.msra.mxu0 %v6970_v35  ;;  %v7862_v59 = vor.u32 %v8844_v13, %v7859_v54  ;;  %v7074_v35 = vor.u32 %v8650_v34, %v7073_v44  ;;  %v8123_v13 = vld [vmem:[#allocation11 + $0x950] sm:$0xf0]  ;;  %v6977_v54 = vld [vmem:[#allocation11 + $0x40] sm:$0xf]  ;;  %v7713_v44 = vld [vmem:[#allocation11 + $0x608] sm:$0xf] }
 0x22d   :  { %v7810_v3 = vor.u32 %v8835_v19, %v7809_v58  ;;  %v8811_v34 = vld [vmem:[#allocation11 + $0x61c] sm:$0xf0] }
 0x22e   :  { %5274 = vmatpush.bf16.msrb.mxu3 %v6998_v56  ;;  %v8195_v56 = vld [vmem:[#allocation11 + $0x9e0] sm:$0xf0] }
 0x22f   :  { %5298 = vmatpush.bf16.msra.mxu1 %v7430_v18  ;;  %v6974_v18 = vor.u32 %v8622_v14, %v6971_v43  ;;  %v7838_v14 = vor.u32 %v8838_v61, %v7835_v0  ;;  %v8198_v7 = vor.u32 %v8928_v6, %v8195_v56  ;;  %v8814_v61 = vld [vmem:[#allocation11 + $0x63c] sm:$0xf]  ;;  %v7739_v0 = vld [vmem:[#allocation11 + $0x650] sm:$0xf0]  ;;  %v8904_v6 = vld [vmem:[#allocation11 + $0x90c] sm:$0xf] }
 0x230   :  { %5311 = vmatpush.bf16.msra.mxu2 %v7622_v23  ;;  %v7121_v23 = vld [vmem:[#allocation11 + $0x160] sm:$0xf]  ;;  %5185 = vmatpush.bf16.msra.mxu0 %v6946_v16  ;;  %v5057_v43 = vpop.f32.mrf.mxu2  ;;  %v7811_v16 = vld [vmem:[#allocation11 + $0x6e0] sm:$0xf0] }
 0x231   :  { %v7122_v33 = vor.u32 %v8662_v51, %v7121_v23  ;;  %v9478_v11 = vadd.f32 %v5057_v43, %v9469_v30  ;;  %v8638_v23 = vld [vmem:[#allocation11 + $0xb4] sm:$0xf0]  ;;  %v7787_v30 = vld [vmem:[#allocation11 + $0x6b0] sm:$0xf0]  ;;  %v8099_v56 = vld [vmem:[#allocation11 + $0x920] sm:$0xf0] }
 0x232   :  { %5275 = vmatpush.bf16.msrb.mxu3 %v6974_v18  ;;  %v7025_v18 = vld [vmem:[#allocation11 + $0xa0] sm:$0xf] }
 0x233   :  { %5299 = vmatpush.bf16.msra.mxu1 %v7406_v39  ;;  %v7858_v39 = vor.u32 %v8847_v25, %v7857_v32  ;;  %5186 = vmatmul.bf16.vlgmr.msra.gmra.mxu0 %v9362_v63  ;;  %v7761_v32 = vld [vmem:[#allocation11 + $0x668] sm:$0xf]  ;;  %v8174_v25 = vor.u32 %v8922_v48, %v8171_v4  ;;  %v7889_v43 = vld [vmem:[#allocation11 + $0x760] sm:$0xf]  ;;  %v8700_v48 = vld [vmem:[#allocation11 + $0x2ac] sm:$0xf] }
 0x234   :  { %5312 = vmatpush.bf16.msra.mxu2 %v7598_v47  ;;  %5230 = vmatpush.bf16.msrb.mxu0 %v7882_v22  ;;  %v6950_v47 = vor.u32 %v8616_v26, %v6947_v29  ;;  %v8826_v26 = vld [vmem:[#allocation11 + $0x69c] sm:$0xf]  ;;  %v7026_v29 = vor.u32 %v8638_v23, %v7025_v18  ;;  %v7283_v4 = vld [vmem:[#allocation11 + $0x2c0] sm:$0xf0]  ;;  %v6954_v18 = vor.u32 %v8620_v28, %v6953_v5  ;;  %v8808_v23 = vld [vmem:[#allocation11 + $0x60c] sm:$0xf] }
 0x235   :  { %v7241_v28 = vld [vmem:[#allocation11 + $0x250] sm:$0xf] }
 0x236   :  { %5276 = vmatpush.bf16.msrb.mxu3 %v6950_v47  ;;  %v7790_v47 = vor.u32 %v8826_v26, %v7787_v30  ;;  %v7673_v26 = vld [vmem:[#allocation11 + $0x5b0] sm:$0xf]  ;;  %v8800_v30 = vld [vmem:[#allocation11 + $0x5c4] sm:$0xf0] }
 0x237   :  { %5300 = vmatpush.bf16.msra.mxu1 %v7382_v57  ;;  %v8219_v57 = vld [vmem:[#allocation11 + $0xa10] sm:$0xf0] }
 0x238   :  { %5313 = vmatpush.bf16.msra.mxu2 %v7574_v20  ;;  %5231 = vmatpush.bf16.msrb.mxu0 %v7858_v39  ;;  %v7834_v20 = vor.u32 %v8841_v53, %v7833_v50  ;;  %v8222_v60 = vor.u32 %v8934_v55, %v8219_v57  ;;  %v8817_v39 = vld [vmem:[#allocation11 + $0x64c] sm:$0xf0]  ;;  %v5059_v27 = vpop.f32.mrf.mxu2  ;;  %v8820_v50 = vld [vmem:[#allocation11 + $0x66c] sm:$0xf]  ;;  %v7002_v53 = vor.u32 %v8632_v37, %v7001_v36  ;;  %v8626_v55 = vld [vmem:[#allocation11 + $0x54] sm:$0xf0] }
 0x239   :  { %5277 = vmatmul.bf16.vlgmr.msrb.gmra.mxu3 %v9362_v63  ;;  %v3305_v57 = vperm.slane %v9455_v52, 1  ;;  %v7697_v52 = vld [vmem:[#allocation11 + $0x5e0] sm:$0xf]  ;;  %v8694_v36 = vld [vmem:[#allocation11 + $0x27c] sm:$0xf] }
 0x23a   :  { %5321 = vmatpush.bf16.msra.mxu3 %v7886_v17  ;;  %v7763_v17 = vld [vmem:[#allocation11 + $0x680] sm:$0xf0]  ;;  %v7259_v37 = vld [vmem:[#allocation11 + $0x290] sm:$0xf0]  ;;  %v7289_v27 = vld [vmem:[#allocation11 + $0x2b0] sm:$0xf] }
 0x23b   :  { %5301 = vmatpush.bf16.msra.mxu1 %v7358_v41  ;;  %v7785_v41 = vld [vmem:[#allocation11 + $0x698] sm:$0xf]  ;;  %v7766_v58 = vor.u32 %v8820_v50, %v7763_v17  ;;  %v7649_v50 = vld [vmem:[#allocation11 + $0x580] sm:$0xf] }
 0x23c   :  { %5314 = vmatpush.bf16.msra.mxu2 %v7550_v46  ;;  %5232 = vmatpush.bf16.msrb.mxu0 %v7834_v20  ;;  %v8829_v46 = vld [vmem:[#allocation11 + $0x6ac] sm:$0xf0]  ;;  %v8794_v17 = vld [vmem:[#allocation11 + $0x594] sm:$0xf0] }
 0x23d   :  { %v7786_v22 = vor.u32 %v8829_v46, %v7785_v41 }
 0x23e   :  { %5322 = vmatpush.bf16.msra.mxu3 %v7862_v59  ;;  %v8706_v59 = vld [vmem:[#allocation11 + $0x2dc] sm:$0xf] }
 0x23f   :  { %5302 = vmatpush.bf16.msra.mxu1 %v7334_v38  ;;  %v5096_v51 = vpop.f32.mrf.mxu1  ;;  %v8823_v38 = vld [vmem:[#allocation11 + $0x67c] sm:$0xf0] }
 0x240   :  { %5315 = vmatpush.bf16.msra.mxu2 %v7526_v24  ;;  %5233 = vmatpush.bf16.msrb.mxu0 %v7810_v3  ;;  %v7814_v24 = vor.u32 %v8832_v8, %v7811_v16  ;;  %v7714_v3 = vor.u32 %v8811_v34, %v7713_v44  ;;  %v5097_v41 = vadd.f32 %v5096_v51, %v3305_v57  ;;  %v7265_v34 = vld [vmem:[#allocation11 + $0x280] sm:$0xf] }
 0x241   :  { %v7742_v8 = vor.u32 %v8814_v61, %v7739_v0  ;;  %v8102_v16 = vor.u32 %v8904_v6, %v8099_v56  ;;  %v7817_v61 = vld [vmem:[#allocation11 + $0x6d0] sm:$0xf]  ;;  %v8682_v0 = vld [vmem:[#allocation11 + $0x21c] sm:$0xf]  ;;  %v7211_v6 = vld [vmem:[#allocation11 + $0x230] sm:$0xf0] }
 0x242   :  { %5303 = vmatmul.bf16.vlgmr.msra.gmra.mxu1 %v9398_v21  ;;  %5323 = vmatpush.bf16.msra.mxu3 %v7838_v14  ;;  %v8806_v14 = vld [vmem:[#allocation11 + $0x5f4] sm:$0xf0] }
 0x243   :  { %5347 = vmatpush.bf16.msrb.mxu1 %v8270_v31  ;;  %5316 = vmatmul.bf16.vlgmr.msra.gmra.mxu2 %v9400_v62  ;;  %v8916_v31 = vld [vmem:[#allocation11 + $0x96c] sm:$0xf] }
 0x244   :  { %5360 = vmatpush.bf16.msrb.mxu2 %v7122_v33  ;;  %5234 = vmatpush.bf16.msrb.mxu0 %v7786_v22  ;;  %v7762_v33 = vor.u32 %v8823_v38, %v7761_v32  ;;  %v8150_v49 = vor.u32 %v8916_v31, %v8147_v2  ;;  %v7715_v32 = vld [vmem:[#allocation11 + $0x620] sm:$0xf0]  ;;  %v7698_v38 = vor.u32 %v8806_v14, %v7697_v52  ;;  %v7865_v31 = vld [vmem:[#allocation11 + $0x730] sm:$0xf]  ;;  %v8848_v2 = vld [vmem:[#allocation11 + $0x744] sm:$0xf0] }
 0x245   :  { %v8692_v52 = vld [vmem:[#allocation11 + $0x264] sm:$0xf0]  ;;  %v8782_v14 = vld [vmem:[#allocation11 + $0x534] sm:$0xf0] }
 0x246   :  { %5324 = vmatpush.bf16.msra.mxu3 %v7814_v24  ;;  %v7313_v24 = vld [vmem:[#allocation11 + $0x2e0] sm:$0xf] }
 0x247   :  { %5348 = vmatpush.bf16.msrb.mxu1 %v8246_v45  ;;  %v8910_v45 = vld [vmem:[#allocation11 + $0x93c] sm:$0xf]  ;;  %v5098_v20 = vpop.f32.mrf.mxu1 }
 0x248   :  { %5361 = vmatpush.bf16.msrb.mxu2 %v7098_v10  ;;  %5235 = vmatpush.bf16.msrb.mxu0 %v7762_v33  ;;  %v7738_v10 = vor.u32 %v8817_v39, %v7737_v12  ;;  %v8126_v19 = vor.u32 %v8910_v45, %v8123_v13  ;;  %v7718_v33 = vor.u32 %v8808_v23, %v7715_v32  ;;  %v7841_v45 = vld [vmem:[#allocation11 + $0x700] sm:$0xf]  ;;  %v8842_v13 = vld [vmem:[#allocation11 + $0x714] sm:$0xf0] }
 0x249   :  { %v7674_v39 = vor.u32 %v8800_v30, %v7673_v26  ;;  %v7650_v20 = vor.u32 %v8794_v17, %v7649_v50  ;;  %v7842_v44 = vor.u32 %v8842_v13, %v7841_v45  ;;  %v7217_v23 = vld [vmem:[#allocation11 + $0x220] sm:$0xf]  ;;  %v8686_v32 = vld [vmem:[#allocation11 + $0x234] sm:$0xf0]  ;;  %v8824_v26 = vld [vmem:[#allocation11 + $0x684] sm:$0xf0] }
 0x24a   :  { %5325 = vmatpush.bf16.msra.mxu3 %v7790_v47  ;;  %v7866_v47 = vor.u32 %v8848_v2, %v7865_v31  ;;  %v7163_v30 = vld [vmem:[#allocation11 + $0x1d0] sm:$0xf0]  ;;  %v7218_v2 = vor.u32 %v8686_v32, %v7217_v23  ;;  %v8770_v50 = vld [vmem:[#allocation11 + $0x4d4] sm:$0xf0]  ;;  %v8664_v13 = vld [vmem:[#allocation11 + $0x18c] sm:$0xf] }
 0x24b   :  { %5349 = vmatpush.bf16.msrb.mxu1 %v8222_v60  ;;  %v7307_v60 = vld [vmem:[#allocation11 + $0x2f0] sm:$0xf0]  ;;  %v8818_v17 = vld [vmem:[#allocation11 + $0x654] sm:$0xf0] }
 0x24c   :  { %5362 = vmatpush.bf16.msrb.mxu2 %v7074_v35  ;;  %v6978_v35 = vor.u32 %v8626_v55, %v6977_v54  ;;  %5236 = vmatpush.bf16.msrb.mxu0 %v7738_v10  ;;  %v7310_v46 = vor.u32 %v8706_v59, %v7307_v60  ;;  %v8688_v54 = vld [vmem:[#allocation11 + $0x24c] sm:$0xf]  ;;  %v7235_v55 = vld [vmem:[#allocation11 + $0x260] sm:$0xf0]  ;;  %v8788_v60 = vld [vmem:[#allocation11 + $0x564] sm:$0xf0] }
 0x24d   :  { %v7238_v59 = vor.u32 %v8688_v54, %v7235_v55  ;;  %v8898_v55 = vld [vmem:[#allocation11 + $0x8dc] sm:$0xf]  ;;  %v8653_v32 = vld [vmem:[#allocation11 + $0x134] sm:$0xf] }
 0x24e   :  { %5326 = vmatpush.bf16.msra.mxu3 %v7766_v58  ;;  %v8698_v58 = vld [vmem:[#allocation11 + $0x294] sm:$0xf0] }
 0x24f   :  { %5350 = vmatpush.bf16.msrb.mxu1 %v8198_v7  ;;  %v8854_v7 = vld [vmem:[#allocation11 + $0x774] sm:$0xf0]  ;;  %v7266_v56 = vor.u32 %v8698_v58, %v7265_v34  ;;  %v7529_v58 = vld [vmem:[#allocation11 + $0x490] sm:$0xf] }
 0x250   :  { %5363 = vmatpush.bf16.msrb.mxu2 %v7050_v15  ;;  %v5109_v15 = vpop.f32.mrf.mxu2  ;;  %5237 = vmatpush.bf16.msrb.mxu0 %v7714_v3  ;;  %v7890_v51 = vor.u32 %v8854_v7, %v7889_v43  ;;  %v7793_v43 = vld [vmem:[#allocation11 + $0x6a0] sm:$0xf]  ;;  %v8830_v7 = vld [vmem:[#allocation11 + $0x6b4] sm:$0xf0] }
 0x251   :  { %v9481_v22 = vadd.f32 %v5109_v15, %v5097_v41  ;;  %v7601_v41 = vld [vmem:[#allocation11 + $0x520] sm:$0xf]  ;;  %v8676_v15 = vld [vmem:[#allocation11 + $0x1ec] sm:$0xf]  ;;  %v8674_v34 = vld [vmem:[#allocation11 + $0x1d4] sm:$0xf0] }
 0x252   :  { %5327 = vmatpush.bf16.msra.mxu3 %v7742_v8 }
 0x253   :  { %5351 = vmatpush.bf16.msrb.mxu1 %v8174_v25  ;;  %v8710_v25 = vld [vmem:[#allocation11 + $0x2f4] sm:$0xf0]  ;;  %5238 = vmatmul.bf16.vlgmr.msrb.gmra.mxu0 %v9415_v40 }
 0x254   :  { %5364 = vmatpush.bf16.msrb.mxu2 %v7026_v29  ;;  %5282 = vmatpush.bf16.msra.mxu0 %v7310_v46  ;;  %v7286_v29 = vor.u32 %v8700_v48, %v7283_v4  ;;  %v7314_v12 = vor.u32 %v8710_v25, %v7313_v24  ;;  %v7214_v46 = vor.u32 %v8682_v0, %v7211_v6  ;;  %v8776_v24 = vld [vmem:[#allocation11 + $0x504] sm:$0xf0]  ;;  %v7769_v25 = vld [vmem:[#allocation11 + $0x670] sm:$0xf]  ;;  %v8659_v0 = vld [vmem:[#allocation11 + $0x164] sm:$0xf] }
 0x255   :  { %v7242_v48 = vor.u32 %v8692_v52, %v7241_v28  ;;  %v7602_v4 = vor.u32 %v8782_v14, %v7601_v41  ;;  %v7123_v6 = vld [vmem:[#allocation11 + $0x178] sm:$0xf0]  ;;  %v8892_v52 = vld [vmem:[#allocation11 + $0x8ac] sm:$0xf]  ;;  %v8051_v41 = vld [vmem:[#allocation11 + $0x8c0] sm:$0xf0] }
 0x256   :  { %5328 = vmatpush.bf16.msra.mxu3 %v7718_v33  ;;  %v7315_v28 = vld [vmem:[#allocation11 + $0x2f8] sm:$0xf0]  ;;  %v8054_v23 = vor.u32 %v8892_v52, %v8051_v41 }
 0x257   :  { %5352 = vmatpush.bf16.msrb.mxu1 %v8150_v49  ;;  %v8704_v49 = vld [vmem:[#allocation11 + $0x2c4] sm:$0xf0] }
 0x258   :  { %5365 = vmatpush.bf16.msrb.mxu2 %v7002_v53  ;;  %5283 = vmatpush.bf16.msra.mxu0 %v7286_v29  ;;  %v7262_v53 = vor.u32 %v8694_v36, %v7259_v37  ;;  %v5111_v10 = vpop.f32.mrf.mxu2  ;;  %v7290_v57 = vor.u32 %v8704_v49, %v7289_v27  ;;  %v8670_v29 = vld [vmem:[#allocation11 + $0x1bc] sm:$0xf]  ;;  %v5070_v31 = vpop.f32.mrf.mxu3  ;;  %v7553_v27 = vld [vmem:[#allocation11 + $0x4c0] sm:$0xf] }
 0x259   :  { %5329 = vmatmul.bf16.vlgmr.msra.gmra.mxu3 %v9415_v40  ;;  %v9490_v33 = vadd.f32 %v5070_v31, %v9478_v11  ;;  %v7166_v49 = vor.u32 %v8670_v29, %v7163_v30  ;;  %v7139_v10 = vld [vmem:[#allocation11 + $0x1a0] sm:$0xf0]  ;;  %v8075_v11 = vld [vmem:[#allocation11 + $0x8f0] sm:$0xf0] }
 0x25a   :  { %5373 = vmatpush.bf16.msrb.mxu3 %v7314_v12  ;;  %v7770_v12 = vor.u32 %v8824_v26, %v7769_v25  ;;  %v7291_v25 = vld [vmem:[#allocation11 + $0x2c8] sm:$0xf0]  ;;  %v8886_v26 = vld [vmem:[#allocation11 + $0x87c] sm:$0xf]  ;;  %v8027_v29 = vld [vmem:[#allocation11 + $0x890] sm:$0xf0] }
 0x25b   :  { %5353 = vmatpush.bf16.msrb.mxu1 %v8126_v19  ;;  %v7625_v19 = vld [vmem:[#allocation11 + $0x550] sm:$0xf] }
 0x25c   :  { %5366 = vmatpush.bf16.msrb.mxu2 %v6978_v35  ;;  %5284 = vmatpush.bf16.msra.mxu0 %v7262_v53  ;;  %v8836_v35 = vld [vmem:[#allocation11 + $0x6e4] sm:$0xf0]  ;;  %v7626_v3 = vor.u32 %v8788_v60, %v7625_v19  ;;  %v7745_v53 = vld [vmem:[#allocation11 + $0x640] sm:$0xf]  ;;  %v7142_v19 = vor.u32 %v8664_v13, %v7139_v10  ;;  %v7721_v60 = vld [vmem:[#allocation11 + $0x610] sm:$0xf] }
 0x25d   :  { %v7818_v5 = vor.u32 %v8836_v35, %v7817_v61  ;;  %v8812_v61 = vld [vmem:[#allocation11 + $0x624] sm:$0xf0]  ;;  %v8078_v35 = vor.u32 %v8898_v55, %v8075_v11  ;;  %v8033_v55 = vld [vmem:[#allocation11 + $0x880] sm:$0xf]  ;;  %v8890_v11 = vld [vmem:[#allocation11 + $0x894] sm:$0xf0] }
 0x25e   :  { %5374 = vmatpush.bf16.msrb.mxu3 %v7290_v57  ;;  %v7554_v57 = vor.u32 %v8770_v50, %v7553_v27  ;;  %v7075_v27 = vld [vmem:[#allocation11 + $0x118] sm:$0xf0] }
 0x25f   :  { %5354 = vmatpush.bf16.msrb.mxu1 %v8102_v16  ;;  %v9487_v8 = vpop.f32.mrf.mxu1  ;;  %v7187_v16 = vld [vmem:[#allocation11 + $0x200] sm:$0xf0] }
 0x260   :  { %5367 = vmatpush.bf16.msrb.mxu2 %v6954_v18  ;;  %5285 = vmatpush.bf16.msra.mxu0 %v7238_v59  ;;  %v7794_v18 = vor.u32 %v8830_v7, %v7793_v43  ;;  %v8764_v59 = vld [vmem:[#allocation11 + $0x4a4] sm:$0xf0]  ;;  %v7145_v43 = vld [vmem:[#allocation11 + $0x190] sm:$0xf] }
 0x261   :  { %v7530_v14 = vor.u32 %v8764_v59, %v7529_v58  ;;  %v8668_v7 = vld [vmem:[#allocation11 + $0x1a4] sm:$0xf0]  ;;  %v8689_v58 = vld [vmem:[#allocation11 + $0x254] sm:$0xf]  ;;  %v8874_v59 = vld [vmem:[#allocation11 + $0x81c] sm:$0xf] }
 0x262   :  { %5355 = vmatmul.bf16.vlgmr.msrb.gmra.mxu1 %v9462_v9  ;;  %5375 = vmatpush.bf16.msrb.mxu3 %v7266_v56  ;;  %v8707_v56 = vld [vmem:[#allocation11 + $0x2e4] sm:$0xf] }
 0x263   :  { %5399 = vmatpush.bf16.msra.mxu1 %v7698_v38  ;;  %5368 = vmatmul.bf16.vlgmr.msrb.gmra.mxu2 %v9362_v63  ;;  %v7577_v38 = vld [vmem:[#allocation11 + $0x4f0] sm:$0xf] }
 0x264   :  { %5412 = vmatpush.bf16.msra.mxu2 %v7890_v51  ;;  %5286 = vmatpush.bf16.msra.mxu0 %v7214_v46  ;;  %v7190_v51 = vor.u32 %v8676_v15, %v7187_v16  ;;  %v7578_v37 = vor.u32 %v8776_v24, %v7577_v38  ;;  %v7722_v15 = vor.u32 %v8812_v61, %v7721_v60  ;;  %v7099_v38 = vld [vmem:[#allocation11 + $0x148] sm:$0xf0]  ;;  %v7979_v60 = vld [vmem:[#allocation11 + $0x830] sm:$0xf0] }
 0x265   :  { %v7126_v16 = vor.u32 %v8659_v0, %v7123_v6  ;;  %v7146_v24 = vor.u32 %v8668_v7, %v7145_v43  ;;  %v7102_v31 = vor.u32 %v8653_v32, %v7099_v38  ;;  %v8884_v0 = vld [vmem:[#allocation11 + $0x864] sm:$0xf0]  ;;  %v7955_v43 = vld [vmem:[#allocation11 + $0x800] sm:$0xf0]  ;;  %v7003_v32 = vld [vmem:[#allocation11 + $0x88] sm:$0xf0] }
 0x266   :  { %5376 = vmatpush.bf16.msrb.mxu3 %v7242_v48  ;;  %v9492_v36 = vpop.f32.mrf.mxu2  ;;  %v8081_v48 = vld [vmem:[#allocation11 + $0x8e0] sm:$0xf]  ;;  %v8677_v38 = vld [vmem:[#allocation11 + $0x1f4] sm:$0xf] }
 0x267   :  { %5400 = vmatpush.bf16.msra.mxu1 %v7674_v39  ;;  %v7193_v39 = vld [vmem:[#allocation11 + $0x1f0] sm:$0xf]  ;;  %v5150_v45 = vpop.f32.mrf.mxu1 }
 0x268   :  { %5413 = vmatpush.bf16.msra.mxu2 %v7866_v47  ;;  %v8680_v47 = vld [vmem:[#allocation11 + $0x204] sm:$0xf0]  ;;  %5287 = vmatpush.bf16.msra.mxu0 %v7190_v51  ;;  %v8701_v51 = vld [vmem:[#allocation11 + $0x2b4] sm:$0xf]  ;;  %v8003_v45 = vld [vmem:[#allocation11 + $0x860] sm:$0xf0] }
 0x269   :  { %v7194_v54 = vor.u32 %v8680_v47, %v7193_v39  ;;  %v8030_v39 = vor.u32 %v8886_v26, %v8027_v29  ;;  %v8647_v47 = vld [vmem:[#allocation11 + $0x104] sm:$0xf] }
 0x26a   :  { %5377 = vmatpush.bf16.msrb.mxu3 %v7218_v2  ;;  %v8057_v2 = vld [vmem:[#allocation11 + $0x8b0] sm:$0xf] }
 0x26b   :  { %5401 = vmatpush.bf16.msra.mxu1 %v7650_v20  ;;  %v7746_v20 = vor.u32 %v8818_v17, %v7745_v53  ;;  %v7267_v53 = vld [vmem:[#allocation11 + $0x298] sm:$0xf0]  ;;  %v8880_v17 = vld [vmem:[#allocation11 + $0x84c] sm:$0xf] }
 0x26c   :  { %5414 = vmatpush.bf16.msra.mxu2 %v7842_v44  ;;  %v7169_v44 = vld [vmem:[#allocation11 + $0x1c0] sm:$0xf]  ;;  %5288 = vmatpush.bf16.msra.mxu0 %v7166_v49  ;;  %v8695_v49 = vld [vmem:[#allocation11 + $0x284] sm:$0xf] }
 0x26e   :  { %5378 = vmatpush.bf16.msrb.mxu3 %v7194_v54  ;;  %v5163_v46 = vpop.f32.mrf.mxu2  ;;  %v7078_v54 = vor.u32 %v8647_v47, %v7075_v27  ;;  %v6979_v47 = vld [vmem:[#allocation11 + $0x58] sm:$0xf0]  ;;  %v8671_v27 = vld [vmem:[#allocation11 + $0x1c4] sm:$0xf] }
 0x26f   :  { %5402 = vmatpush.bf16.msra.mxu1 %v7626_v3  ;;  %v5072_v3 = vpop.f32.mrf.mxu3  ;;  %v7219_v46 = vld [vmem:[#allocation11 + $0x238] sm:$0xf0] }
 0x270   :  { %5415 = vmatpush.bf16.msra.mxu2 %v7818_v5  ;;  %v7170_v5 = vor.u32 %v8674_v34, %v7169_v44  ;;  %5289 = vmatpush.bf16.msra.mxu0 %v7142_v19  ;;  %v8641_v44 = vld [vmem:[#allocation11 + $0xd4] sm:$0xf]  ;;  %v7051_v34 = vld [vmem:[#allocation11 + $0xe8] sm:$0xf0]  ;;  %v8635_v3 = vld [vmem:[#allocation11 + $0xa4] sm:$0xf] }
 0x271   :  { %v7243_v19 = vld [vmem:[#allocation11 + $0x268] sm:$0xf0]  ;;  %v7054_v61 = vor.u32 %v8641_v44, %v7051_v34 }
 0x272   :  { %5379 = vmatpush.bf16.msrb.mxu3 %v7170_v5  ;;  %v7246_v6 = vor.u32 %v8689_v58, %v7243_v19  ;;  %v7027_v5 = vld [vmem:[#allocation11 + $0xb8] sm:$0xf0]  ;;  %v6955_v58 = vld [vmem:[#allocation11 + $0x28] sm:$0xf0]  ;;  %v8665_v19 = vld [vmem:[#allocation11 + $0x194] sm:$0xf] }
 0x273   :  { %5403 = vmatpush.bf16.msra.mxu1 %v7602_v4  ;;  %v8902_v4 = vld [vmem:[#allocation11 + $0x8f4] sm:$0xf0]  ;;  %5290 = vmatmul.bf16.vlgmr.msra.gmra.mxu0 %v9365_v42 }
 0x274   :  { %5416 = vmatpush.bf16.msra.mxu2 %v7794_v18  ;;  %5334 = vmatpush.bf16.msrb.mxu0 %v8078_v35  ;;  %v7318_v18 = vor.u32 %v8707_v56, %v7315_v28  ;;  %v8082_v30 = vor.u32 %v8902_v4, %v8081_v48  ;;  %v8009_v35 = vld [vmem:[#allocation11 + $0x850] sm:$0xf]  ;;  %v7982_v56 = vor.u32 %v8874_v59, %v7979_v60  ;;  %v8683_v28 = vld [vmem:[#allocation11 + $0x224] sm:$0xf]  ;;  %v8878_v48 = vld [vmem:[#allocation11 + $0x834] sm:$0xf0] }
 0x275   :  { %v8010_v7 = vor.u32 %v8884_v0, %v8009_v35  ;;  %v7222_v4 = vor.u32 %v8683_v28, %v7219_v46  ;;  %v7147_v59 = vld [vmem:[#allocation11 + $0x1a8] sm:$0xf0]  ;;  %v8899_v35 = vld [vmem:[#allocation11 + $0x8e4] sm:$0xf]  ;;  %v7913_v28 = vld [vmem:[#allocation11 + $0x790] sm:$0xf] }
 0x276   :  { %5380 = vmatpush.bf16.msrb.mxu3 %v7146_v24  ;;  %v8862_v24 = vld [vmem:[#allocation11 + $0x7bc] sm:$0xf] }
 0x277   :  { %5404 = vmatpush.bf16.msra.mxu1 %v7578_v37  ;;  %v8896_v37 = vld [vmem:[#allocation11 + $0x8c4] sm:$0xf0]  ;;  %v5122_v50 = vpop.f32.mrf.mxu3 }
 0x278   :  { %5417 = vmatpush.bf16.msra.mxu2 %v7770_v12  ;;  %5335 = vmatpush.bf16.msrb.mxu0 %v8054_v23  ;;  %v7294_v12 = vor.u32 %v8701_v51, %v7291_v25  ;;  %v9498_v13 = vadd.f32 %v5122_v50, %v9481_v22  ;;  %v8058_v10 = vor.u32 %v8896_v37, %v8057_v2  ;;  %v8629_v23 = vld [vmem:[#allocation11 + $0x74] sm:$0xf]  ;;  %v7195_v51 = vld [vmem:[#allocation11 + $0x208] sm:$0xf0]  ;;  %v7171_v50 = vld [vmem:[#allocation11 + $0x1d8] sm:$0xf0] }
 0x279   :  { %5381 = vmatmul.bf16.vlgmr.msrb.gmra.mxu3 %v9365_v42  ;;  %v8034_v22 = vor.u32 %v8890_v11, %v8033_v55  ;;  %v7931_v25 = vld [vmem:[#allocation11 + $0x7d0] sm:$0xf0]  ;;  %v7006_v29 = vor.u32 %v8629_v23, %v7003_v32  ;;  %v7198_v37 = vor.u32 %v8677_v38, %v7195_v51  ;;  %v7937_v11 = vld [vmem:[#allocation11 + $0x7c0] sm:$0xf]  ;;  %v7174_v44 = vor.u32 %v8671_v27, %v7171_v50  ;;  %v8059_v38 = vld [vmem:[#allocation11 + $0x8c8] sm:$0xf0] }
 0x27a   :  { %5425 = vmatpush.bf16.msra.mxu3 %v8082_v30  ;;  %v7961_v30 = vld [vmem:[#allocation11 + $0x7f0] sm:$0xf]  ;;  %v8893_v23 = vld [vmem:[#allocation11 + $0x8b4] sm:$0xf]  ;;  %v7457_v51 = vld [vmem:[#allocation11 + $0x400] sm:$0xf] }
 0x27b   :  { %5405 = vmatpush.bf16.msra.mxu1 %v7554_v57  ;;  %v7270_v57 = vor.u32 %v8695_v49, %v7267_v53  ;;  %v8856_v53 = vld [vmem:[#allocation11 + $0x78c] sm:$0xf]  ;;  %v8035_v27 = vld [vmem:[#allocation11 + $0x898] sm:$0xf0]  ;;  %v8740_v50 = vld [vmem:[#allocation11 + $0x3e4] sm:$0xf0] }
 0x27c   :  { %5418 = vmatpush.bf16.msra.mxu2 %v7746_v20  ;;  %5336 = vmatpush.bf16.msrb.mxu0 %v8030_v39  ;;  %v8006_v20 = vor.u32 %v8880_v17, %v8003_v45  ;;  %v8623_v39 = vld [vmem:[#allocation11 + $0x44] sm:$0xf] }
 0x27d   :  { %v7907_v17 = vld [vmem:[#allocation11 + $0x7a0] sm:$0xf0]  ;;  %v6982_v55 = vor.u32 %v8623_v39, %v6979_v47  ;;  %v7843_v39 = vld [vmem:[#allocation11 + $0x718] sm:$0xf0] }
 0x27e   :  { %5426 = vmatpush.bf16.msra.mxu3 %v8058_v10  ;;  %v7505_v10 = vld [vmem:[#allocation11 + $0x460] sm:$0xf]  ;;  %v7910_v34 = vor.u32 %v8856_v53, %v7907_v17  ;;  %v8887_v47 = vld [vmem:[#allocation11 + $0x884] sm:$0xf] }
 0x27f   :  { %5406 = vmatpush.bf16.msra.mxu1 %v7530_v14  ;;  %v9501_v52 = vpop.f32.mrf.mxu1  ;;  %v5124_v41 = vpop.f32.mrf.mxu3  ;;  %v8868_v14 = vld [vmem:[#allocation11 + $0x7ec] sm:$0xf] }
 0x280   :  { %5419 = vmatpush.bf16.msra.mxu2 %v7722_v15  ;;  %5337 = vmatpush.bf16.msrb.mxu0 %v8006_v20  ;;  %v7030_v15 = vor.u32 %v8635_v3, %v7027_v5  ;;  %v8617_v20 = vld [vmem:[#allocation11 + $0x14] sm:$0xf]  ;;  %v8752_v3 = vld [vmem:[#allocation11 + $0x444] sm:$0xf0] }
 0x281   :  { %v6958_v5 = vor.u32 %v8617_v20, %v6955_v58  ;;  %v8860_v41 = vld [vmem:[#allocation11 + $0x7a4] sm:$0xf0]  ;;  %v7819_v20 = vld [vmem:[#allocation11 + $0x6e8] sm:$0xf0]  ;;  %v8734_v58 = vld [vmem:[#allocation11 + $0x3b4] sm:$0xf0] }
 0x282   :  { %5407 = vmatmul.bf16.vlgmr.msra.gmra.mxu1 %v9400_v62  ;;  %5427 = vmatpush.bf16.msra.mxu3 %v8034_v22  ;;  %v8851_v22 = vld [vmem:[#allocation11 + $0x764] sm:$0xf]  ;;  %v7914_v32 = vor.u32 %v8860_v41, %v7913_v28  ;;  %v7385_v28 = vld [vmem:[#allocation11 + $0x370] sm:$0xf]  ;;  %v8728_v41 = vld [vmem:[#allocation11 + $0x384] sm:$0xf0] }
 0x283   :  { %5451 = vmatpush.bf16.msrb.mxu1 %v7126_v16  ;;  %5420 = vmatmul.bf16.vlgmr.msra.gmra.mxu2 %v9415_v40  ;;  %v7985_v16 = vld [vmem:[#allocation11 + $0x820] sm:$0xf] }
 0x284   :  { %5464 = vmatpush.bf16.msrb.mxu2 %v7318_v18  ;;  %5338 = vmatpush.bf16.msrb.mxu0 %v7982_v56  ;;  %v7958_v18 = vor.u32 %v8868_v14, %v7955_v43  ;;  %v7986_v26 = vor.u32 %v8878_v48, %v7985_v16  ;;  %v7481_v56 = vld [vmem:[#allocation11 + $0x430] sm:$0xf]  ;;  %v7150_v14 = vor.u32 %v8665_v19, %v7147_v59 }
 0x285   :  { %v7482_v48 = vor.u32 %v8752_v3, %v7481_v56 }
 0x286   :  { %5428 = vmatpush.bf16.msra.mxu3 %v8010_v7  ;;  %v9503_v2 = vpop.f32.mrf.mxu2  ;;  %v8755_v7 = vld [vmem:[#allocation11 + $0x464] sm:$0xf] }
 0x287   :  { %5452 = vmatpush.bf16.msrb.mxu1 %v7102_v31  ;;  %v8872_v31 = vld [vmem:[#allocation11 + $0x804] sm:$0xf0]  ;;  %v5202_v49 = vpop.f32.mrf.mxu1 }
 0x288   :  { %5465 = vmatpush.bf16.msrb.mxu2 %v7294_v12  ;;  %5339 = vmatpush.bf16.msrb.mxu0 %v7958_v18  ;;  %v7934_v12 = vor.u32 %v8862_v24, %v7931_v25  ;;  %v7962_v45 = vor.u32 %v8872_v31, %v7961_v30  ;;  %v7867_v18 = vld [vmem:[#allocation11 + $0x748] sm:$0xf0]  ;;  %v8746_v24 = vld [vmem:[#allocation11 + $0x414] sm:$0xf0]  ;;  %v8062_v31 = vor.u32 %v8893_v23, %v8059_v38  ;;  %v7433_v49 = vld [vmem:[#allocation11 + $0x3d0] sm:$0xf] }
 0x289   :  { %v7483_v30 = vld [vmem:[#allocation11 + $0x448] sm:$0xf0]  ;;  %v8869_v23 = vld [vmem:[#allocation11 + $0x7f4] sm:$0xf]  ;;  %v7361_v38 = vld [vmem:[#allocation11 + $0x340] sm:$0xf] }
 0x28a   :  { %5429 = vmatpush.bf16.msra.mxu3 %v7986_v26 }
 0x28b   :  { %5453 = vmatpush.bf16.msrb.mxu1 %v7078_v54  ;;  %v8758_v54 = vld [vmem:[#allocation11 + $0x474] sm:$0xf0] }
 0x28c   :  { %5466 = vmatpush.bf16.msrb.mxu2 %v7270_v57  ;;  %v8866_v57 = vld [vmem:[#allocation11 + $0x7d4] sm:$0xf0]  ;;  %5340 = vmatpush.bf16.msrb.mxu0 %v7934_v12  ;;  %v7506_v60 = vor.u32 %v8758_v54, %v7505_v10  ;;  %v8839_v12 = vld [vmem:[#allocation11 + $0x704] sm:$0xf]  ;;  %v7459_v54 = vld [vmem:[#allocation11 + $0x418] sm:$0xf0] }
 0x28d   :  { %v7938_v0 = vor.u32 %v8866_v57, %v7937_v11  ;;  %v8743_v10 = vld [vmem:[#allocation11 + $0x404] sm:$0xf]  ;;  %v8038_v11 = vor.u32 %v8887_v47, %v8035_v27  ;;  %v7434_v57 = vor.u32 %v8740_v50, %v7433_v49  ;;  %v7939_v50 = vld [vmem:[#allocation11 + $0x7d8] sm:$0xf0] }
 0x28e   :  { %5430 = vmatpush.bf16.msra.mxu3 %v7962_v45  ;;  %v5215_v46 = vpop.f32.mrf.mxu2  ;;  %v5083_v17 = vpop.f32.mrf.mxu0  ;;  %v7846_v45 = vor.u32 %v8839_v12, %v7843_v39  ;;  %v7462_v19 = vor.u32 %v8743_v10, %v7459_v54  ;;  %v8815_v12 = vld [vmem:[#allocation11 + $0x644] sm:$0xf]  ;;  %v7747_v39 = vld [vmem:[#allocation11 + $0x658] sm:$0xf0]  ;;  %v8273_v10 = vld [vmem:[#allocation11 + $0xa60] sm:$0xf] }
 0x28f   :  { %5454 = vmatpush.bf16.msrb.mxu1 %v7054_v61  ;;  %v7891_v61 = vld [vmem:[#allocation11 + $0x778] sm:$0xf0]  ;;  %v8863_v47 = vld [vmem:[#allocation11 + $0x7c4] sm:$0xf]  ;;  %v8950_v54 = vld [vmem:[#allocation11 + $0xa74] sm:$0xf0] }
 0x290   :  { %5467 = vmatpush.bf16.msrb.mxu2 %v7246_v6  ;;  %v8083_v6 = vld [vmem:[#allocation11 + $0x8f8] sm:$0xf0]  ;;  %5341 = vmatpush.bf16.msrb.mxu0 %v7910_v34  ;;  %v7894_v43 = vor.u32 %v8851_v22, %v7891_v61  ;;  %v7409_v34 = vld [vmem:[#allocation11 + $0x3a0] sm:$0xf]  ;;  %v7435_v22 = vld [vmem:[#allocation11 + $0x3e8] sm:$0xf0] }
 0x291   :  { %v8086_v16 = vor.u32 %v8899_v35, %v8083_v6  ;;  %v7410_v61 = vor.u32 %v8734_v58, %v7409_v34  ;;  %v8827_v35 = vld [vmem:[#allocation11 + $0x6a4] sm:$0xf]  ;;  %v8809_v34 = vld [vmem:[#allocation11 + $0x614] sm:$0xf]  ;;  %v7723_v58 = vld [vmem:[#allocation11 + $0x628] sm:$0xf0] }
 0x292   :  { %5431 = vmatpush.bf16.msra.mxu3 %v7938_v0  ;;  %v7795_v0 = vld [vmem:[#allocation11 + $0x6b8] sm:$0xf0]  ;;  %v8875_v6 = vld [vmem:[#allocation11 + $0x824] sm:$0xf] }
 0x293   :  { %5455 = vmatpush.bf16.msrb.mxu1 %v7030_v15  ;;  %v7507_v15 = vld [vmem:[#allocation11 + $0x478] sm:$0xf0]  ;;  %5342 = vmatmul.bf16.vlgmr.msrb.gmra.mxu0 %v9429_v1 }
 0x294   :  { %5468 = vmatpush.bf16.msrb.mxu2 %v7222_v4  ;;  %5386 = vmatpush.bf16.msra.mxu0 %v7506_v60  ;;  %v8845_v4 = vld [vmem:[#allocation11 + $0x734] sm:$0xf]  ;;  %v7510_v25 = vor.u32 %v8755_v7, %v7507_v15  ;;  %v9514_v3 = vpop.f32.mrf.mxu3  ;;  %v8731_v7 = vld [vmem:[#allocation11 + $0x3a4] sm:$0xf]  ;;  %v7411_v15 = vld [vmem:[#allocation11 + $0x3b8] sm:$0xf0] }
 0x295   :  { %v7870_v26 = vor.u32 %v8845_v4, %v7867_v18  ;;  %v8737_v60 = vld [vmem:[#allocation11 + $0x3d4] sm:$0xf]  ;;  %v7771_v18 = vld [vmem:[#allocation11 + $0x688] sm:$0xf0] }
 0x296   :  { %5432 = vmatpush.bf16.msra.mxu3 %v7914_v32  ;;  %v7438_v46 = vor.u32 %v8737_v60, %v7435_v22  ;;  %v8821_v4 = vld [vmem:[#allocation11 + $0x674] sm:$0xf]  ;;  %v7963_v32 = vld [vmem:[#allocation11 + $0x808] sm:$0xf0] }
 0x297   :  { %5456 = vmatpush.bf16.msrb.mxu1 %v7006_v29  ;;  %v8749_v29 = vld [vmem:[#allocation11 + $0x434] sm:$0xf]  ;;  %v7915_v22 = vld [vmem:[#allocation11 + $0x7a8] sm:$0xf0] }
 0x298   :  { %5469 = vmatpush.bf16.msrb.mxu2 %v7198_v37  ;;  %5387 = vmatpush.bf16.msra.mxu0 %v7482_v48  ;;  %v7458_v37 = vor.u32 %v8746_v24, %v7457_v51  ;;  %v7486_v53 = vor.u32 %v8749_v29, %v7483_v30  ;;  %v7386_v48 = vor.u32 %v8728_v41, %v7385_v28  ;;  %v8722_v51 = vld [vmem:[#allocation11 + $0x354] sm:$0xf0]  ;;  %v7387_v29 = vld [vmem:[#allocation11 + $0x388] sm:$0xf0]  ;;  %v8857_v60 = vld [vmem:[#allocation11 + $0x794] sm:$0xf] }
 0x299   :  { %5433 = vmatmul.bf16.vlgmr.msra.gmra.mxu3 %v9429_v1  ;;  %v7414_v24 = vor.u32 %v8731_v7, %v7411_v15  ;;  %v7339_v28 = vld [vmem:[#allocation11 + $0x328] sm:$0xf0] }
 0x29a   :  { %5477 = vmatpush.bf16.msrb.mxu3 %v7510_v25  ;;  %v7774_v25 = vor.u32 %v8821_v4, %v7771_v18  ;;  %v8938_v4 = vld [vmem:[#allocation11 + $0xa14] sm:$0xf0] }
 0x29b   :  { %5457 = vmatpush.bf16.msrb.mxu1 %v6982_v55  ;;  %v9509_v55 = vadd.f32 %v5083_v17, %v9490_v33  ;;  %v8716_v17 = vld [vmem:[#allocation11 + $0x324] sm:$0xf0] }
 0x29c   :  { %5470 = vmatpush.bf16.msrb.mxu2 %v7174_v44  ;;  %5388 = vmatpush.bf16.msra.mxu0 %v7458_v37  ;;  %v8881_v44 = vld [vmem:[#allocation11 + $0x854] sm:$0xf]  ;;  %v7362_v37 = vor.u32 %v8722_v51, %v7361_v38  ;;  %v5176_v49 = vpop.f32.mrf.mxu3  ;;  %v8251_v38 = vld [vmem:[#allocation11 + $0xa48] sm:$0xf0] }
 0x29d   :  { %v8929_v49 = vld [vmem:[#allocation11 + $0x9d4] sm:$0xf] }
 0x29e   :  { %5478 = vmatpush.bf16.msrb.mxu3 %v7486_v53  ;;  %v7337_v53 = vld [vmem:[#allocation11 + $0x310] sm:$0xf] }
 0x29f   :  { %5458 = vmatpush.bf16.msrb.mxu1 %v6958_v5  ;;  %v9512_v56 = vpop.f32.mrf.mxu1  ;;  %v7987_v5 = vld [vmem:[#allocation11 + $0x838] sm:$0xf0] }
 0x2a0   :  { %5471 = vmatpush.bf16.msrb.mxu2 %v7150_v14  ;;  %5389 = vmatpush.bf16.msra.mxu0 %v7434_v57  ;;  %v5085_v14 = vpop.f32.mrf.mxu0  ;;  %v8719_v57 = vld [vmem:[#allocation11 + $0x344] sm:$0xf] }
 0x2a1   :  { %v8947_v14 = vld [vmem:[#allocation11 + $0xa64] sm:$0xf] }
 0x2a2   :  { %5459 = vmatmul.bf16.vlgmr.msrb.gmra.mxu1 %v9362_v63  ;;  %v8833_v63 = vld [vmem:[#allocation11 + $0x6d4] sm:$0xf]  ;;  %5479 = vmatpush.bf16.msrb.mxu3 %v7462_v19 }
 0x2a3   :  { %5503 = vmatpush.bf16.msra.mxu1 %v7894_v43  ;;  %5472 = vmatmul.bf16.vlgmr.msrb.gmra.mxu2 %v9365_v42  ;;  %v8011_v42 = vld [vmem:[#allocation11 + $0x868] sm:$0xf0]  ;;  %v7822_v59 = vor.u32 %v8833_v63, %v7819_v20  ;;  %v7798_v43 = vor.u32 %v8827_v35, %v7795_v0  ;;  %v7363_v63 = vld [vmem:[#allocation11 + $0x358] sm:$0xf0]  ;;  %v8944_v35 = vld [vmem:[#allocation11 + $0xa44] sm:$0xf0] }
 0x2a4   :  { %5516 = vmatpush.bf16.msra.mxu2 %v8086_v16  ;;  %v8014_v33 = vor.u32 %v8881_v44, %v8011_v42  ;;  %5390 = vmatpush.bf16.msra.mxu0 %v7410_v61  ;;  %v7990_v16 = vor.u32 %v8875_v6, %v7987_v5  ;;  %v7942_v44 = vor.u32 %v8863_v47, %v7939_v50  ;;  %v8249_v61 = vld [vmem:[#allocation11 + $0xa30] sm:$0xf]  ;;  %v8713_v5 = vld [vmem:[#allocation11 + $0x314] sm:$0xf]  ;;  %v5226_v15 = vpop.f32.mrf.mxu3  ;;  %v8926_v47 = vld [vmem:[#allocation11 + $0x9b4] sm:$0xf0] }
 0x2a5   :  { %v7338_v42 = vor.u32 %v8716_v17, %v7337_v53  ;;  %v7726_v6 = vor.u32 %v8809_v34, %v7723_v58  ;;  %v8250_v7 = vor.u32 %v8944_v35, %v8249_v61  ;;  %v8153_v17 = vld [vmem:[#allocation11 + $0x970] sm:$0xf]  ;;  %v8908_v61 = vld [vmem:[#allocation11 + $0x924] sm:$0xf0] }
 0x2a6   :  { %5480 = vmatpush.bf16.msrb.mxu3 %v7438_v46  ;;  %v9516_v30 = vpop.f32.mrf.mxu2  ;;  %v7918_v46 = vor.u32 %v8857_v60, %v7915_v22  ;;  %v8155_v60 = vld [vmem:[#allocation11 + $0x988] sm:$0xf0] }
 0x2a7   :  { %5504 = vmatpush.bf16.msra.mxu1 %v7870_v26  ;;  %v8725_v26 = vld [vmem:[#allocation11 + $0x374] sm:$0xf]  ;;  %v5254_v27 = vpop.f32.mrf.mxu1 }
 0x2a8   :  { %5517 = vmatpush.bf16.msra.mxu2 %v8062_v31  ;;  %5391 = vmatpush.bf16.msra.mxu0 %v7386_v48  ;;  %v7966_v31 = vor.u32 %v8869_v23, %v7963_v32  ;;  %v5135_v20 = vpop.f32.mrf.mxu0  ;;  %v8225_v48 = vld [vmem:[#allocation11 + $0xa00] sm:$0xf]  ;;  %v8941_v32 = vld [vmem:[#allocation11 + $0xa34] sm:$0xf] }
 0x2a9   :  { %v5136_v19 = vadd.f32 %v5135_v20, %v9498_v13 }
 0x2aa   :  { %5481 = vmatpush.bf16.msrb.mxu3 %v7414_v24  ;;  %v8201_v24 = vld [vmem:[#allocation11 + $0x9d0] sm:$0xf] }
 0x2ab   :  { %5505 = vmatpush.bf16.msra.mxu1 %v7846_v45  ;;  %v7390_v45 = vor.u32 %v8725_v26, %v7387_v29  ;;  %v5149_v0 = vadd.f32 %v9487_v8, %v5136_v19  ;;  %v8935_v26 = vld [vmem:[#allocation11 + $0xa04] sm:$0xf]  ;;  %v8227_v29 = vld [vmem:[#allocation11 + $0xa18] sm:$0xf0] }
 0x2ac   :  { %5518 = vmatpush.bf16.msra.mxu2 %v8038_v11  ;;  %v7750_v11 = vor.u32 %v8815_v12, %v7747_v39  ;;  %5392 = vmatpush.bf16.msra.mxu0 %v7362_v37  ;;  %v5228_v12 = vpop.f32.mrf.mxu3  ;;  %v8177_v39 = vld [vmem:[#allocation11 + $0x9a0] sm:$0xf] }
 0x2ad   :  { %v5162_v13 = vadd.f32 %v9492_v36, %v5149_v0  ;;  %v8226_v36 = vor.u32 %v8938_v4, %v8225_v48  ;;  %v8178_v53 = vor.u32 %v8926_v47, %v8177_v39  ;;  %v8773_v39 = vld [vmem:[#allocation11 + $0x4f4] sm:$0xf]  ;;  %v7579_v47 = vld [vmem:[#allocation11 + $0x508] sm:$0xf0] }
 0x2ae   :  { %5482 = vmatpush.bf16.msrb.mxu3 %v7390_v45  ;;  %v5267_v41 = vpop.f32.mrf.mxu2  ;;  %v8920_v45 = vld [vmem:[#allocation11 + $0x984] sm:$0xf0] }
 0x2af   :  { %5506 = vmatpush.bf16.msra.mxu1 %v7822_v59  ;;  %v8274_v59 = vor.u32 %v8950_v54, %v8273_v10  ;;  %v5175_v8 = vadd.f32 %v9514_v3, %v5162_v13  ;;  %v8254_v3 = vor.u32 %v8941_v32, %v8251_v38  ;;  %v8131_v41 = vld [vmem:[#allocation11 + $0x958] sm:$0xf0]  ;;  %v8797_v13 = vld [vmem:[#allocation11 + $0x5b4] sm:$0xf] }
 0x2b0   :  { %5519 = vmatpush.bf16.msra.mxu2 %v8014_v33  ;;  %v7366_v33 = vor.u32 %v8719_v57, %v7363_v63  ;;  %5393 = vmatpush.bf16.msra.mxu0 %v7338_v42  ;;  %v5137_v23 = vpop.f32.mrf.mxu0  ;;  %v8179_v57 = vld [vmem:[#allocation11 + $0x9b8] sm:$0xf0]  ;;  %v8154_v63 = vor.u32 %v8920_v45, %v8153_v17  ;;  %v8914_v42 = vld [vmem:[#allocation11 + $0x954] sm:$0xf0] }
 0x2b1   :  { %v9524_v51 = vpack.c.bf16 %v5175_v8, %v9509_v55  ;;  %v8791_v23 = vld [vmem:[#allocation11 + $0x584] sm:$0xf]  ;;  %v7651_v32 = vld [vmem:[#allocation11 + $0x598] sm:$0xf0] }
 0x2b2   :  { %5483 = vmatpush.bf16.msrb.mxu3 %v7366_v33  ;;  %v8105_v33 = vld [vmem:[#allocation11 + $0x910] sm:$0xf]  ;;  %v7654_v38 = vor.u32 %v8791_v23, %v7651_v32 }
 0x2b3   :  { %5507 = vmatpush.bf16.msra.mxu1 %v7798_v43  ;;  %v8275_v43 = vld [vmem:[#allocation11 + $0xa78] sm:$0xf0]  ;;  %5394 = vmatmul.bf16.vlgmr.msra.gmra.mxu0 %v9398_v21 }
 0x2b4   :  { %5520 = vmatpush.bf16.msra.mxu2 %v7990_v16  ;;  %5438 = vmatpush.bf16.msrb.mxu0 %v8274_v59  ;;  %v7342_v16 = vor.u32 %v8713_v5, %v7339_v28  ;;  %v8278_v18 = vor.u32 %v8947_v14, %v8275_v43  ;;  %v8917_v59 = vld [vmem:[#allocation11 + $0x974] sm:$0xf]  ;;  %v7699_v5 = vld [vmem:[#allocation11 + $0x5f8] sm:$0xf0]  ;;  %v8911_v28 = vld [vmem:[#allocation11 + $0x944] sm:$0xf] }
 0x2b5   :  { %v8134_v43 = vor.u32 %v8911_v28, %v8131_v41 }
 0x2b6   :  { %5484 = vmatpush.bf16.msrb.mxu3 %v7342_v16  ;;  %v8107_v16 = vld [vmem:[#allocation11 + $0x928] sm:$0xf0] }
 0x2b7   :  { %5508 = vmatpush.bf16.msra.mxu1 %v7774_v25  ;;  %v8932_v25 = vld [vmem:[#allocation11 + $0x9e4] sm:$0xf0] }
 0x2b8   :  { %5521 = vmatpush.bf16.msra.mxu2 %v7966_v31  ;;  %5439 = vmatpush.bf16.msrb.mxu0 %v8250_v7  ;;  %v9529_v31 = vld [vmem:[#allocation13] sm:$0x3f]  ;;  %v8202_v37 = vor.u32 %v8932_v25, %v8201_v24  ;;  %v5187_v27 = vpop.f32.mrf.mxu0  ;;  %v7675_v7 = vld [vmem:[#allocation11 + $0x5c8] sm:$0xf0] }
 0x2b9   :  { %5485 = vmatmul.bf16.vlgmr.msrb.gmra.mxu3 %v9398_v21  ;;  %v3306_v55 = vperm.slane %v9529_v31, 2  ;;  %v7678_v4 = vor.u32 %v8797_v13, %v7675_v7  ;;  %v7627_v24 = vld [vmem:[#allocation11 + $0x568] sm:$0xf0] }
 0x2ba   :  { %5529 = vmatpush.bf16.msra.mxu3 %v8278_v18 }
 0x2bb   :  { %5509 = vmatpush.bf16.msra.mxu1 %v7750_v11  ;;  %v5188_v50 = vadd.f32 %v5187_v27, %v3306_v55  ;;  %v8923_v11 = vld [vmem:[#allocation11 + $0x9a4] sm:$0xf] }
 0x2bc   :  { %5522 = vmatpush.bf16.msra.mxu2 %v7942_v44  ;;  %5440 = vmatpush.bf16.msrb.mxu0 %v8226_v36  ;;  %v8129_v44 = vld [vmem:[#allocation11 + $0x940] sm:$0xf]  ;;  %v8182_v34 = vor.u32 %v8923_v11, %v8179_v57  ;;  %v9538_v0 = vpop.f32.mrf.mxu3  ;;  %v8785_v36 = vld [vmem:[#allocation11 + $0x554] sm:$0xf] }
 0x2bd   :  { %v5201_v21 = vadd.f32 %v9501_v52, %v5188_v50  ;;  %v8130_v52 = vor.u32 %v8914_v42, %v8129_v44  ;;  %v7630_v25 = vor.u32 %v8785_v36, %v7627_v24  ;;  %v7555_v50 = vld [vmem:[#allocation11 + $0x4d8] sm:$0xf0] }
 0x2be   :  { %5530 = vmatpush.bf16.msra.mxu3 %v8254_v3  ;;  %v8779_v3 = vld [vmem:[#allocation11 + $0x524] sm:$0xf] }
 0x2bf   :  { %5510 = vmatpush.bf16.msra.mxu1 %v7726_v6  ;;  %v9533_v10 = vpop.f32.mrf.mxu1  ;;  %v5214_v20 = vadd.f32 %v9503_v2, %v5201_v21  ;;  %v8158_v6 = vor.u32 %v8917_v59, %v8155_v60  ;;  %v8803_v2 = vld [vmem:[#allocation11 + $0x5e4] sm:$0xf]  ;;  %v8761_v21 = vld [vmem:[#allocation11 + $0x494] sm:$0xf]  ;;  %v3308_v60 = vperm.slane %v9529_v31, 4 }
 0x2c0   :  { %5523 = vmatpush.bf16.msra.mxu2 %v7918_v46  ;;  %5441 = vmatpush.bf16.msrb.mxu0 %v8202_v37  ;;  %v5189_v19 = vpop.f32.mrf.mxu0  ;;  %v8106_v46 = vor.u32 %v8908_v61, %v8105_v33  ;;  %v7702_v14 = vor.u32 %v8803_v2, %v7699_v5 }
 0x2c1   :  { %v5227_v58 = vadd.f32 %v5226_v15, %v5214_v20  ;;  %v8905_v15 = vld [vmem:[#allocation11 + $0x914] sm:$0xf] }
 0x2c2   :  { %5511 = vmatmul.bf16.vlgmr.msra.gmra.mxu1 %v9415_v40  ;;  %v8230_v40 = vor.u32 %v8935_v26, %v8227_v29  ;;  %v8110_v18 = vor.u32 %v8905_v15, %v8107_v16  ;;  %v7603_v26 = vld [vmem:[#allocation11 + $0x538] sm:$0xf0] }
 0x2c3   :  { %5524 = vmatmul.bf16.vlgmr.msra.gmra.mxu2 %v9429_v1  ;;  %v8203_v1 = vld [vmem:[#allocation11 + $0x9e8] sm:$0xf0]  ;;  %v7606_v37 = vor.u32 %v8779_v3, %v7603_v26 }
 0x2c4   :  { %5531 = vmatpush.bf16.msra.mxu3 %v8230_v40  ;;  %v8206_v54 = vor.u32 %v8929_v49, %v8203_v1  ;;  %5442 = vmatpush.bf16.msrb.mxu0 %v8178_v53  ;;  %v5280_v8 = vpop.f32.mrf.mxu3  ;;  %v7582_v49 = vor.u32 %v8773_v39, %v7579_v47  ;;  %v8767_v1 = vld [vmem:[#allocation11 + $0x4c4] sm:$0xf] }
 0x2c5   :  { %v7558_v17 = vor.u32 %v8767_v1, %v7555_v50 }
 0x2c6   :  { %v9536_v22 = vpop.f32.mrf.mxu2 }
 0x2c7   :  { %v5306_v35 = vpop.f32.mrf.mxu1 }
 0x2c8   :  { %5532 = vmatpush.bf16.msra.mxu3 %v8206_v54  ;;  %5443 = vmatpush.bf16.msrb.mxu0 %v8154_v63  ;;  %v7531_v54 = vld [vmem:[#allocation11 + $0x4a8] sm:$0xf0] }
 0x2c9   :  { %v7534_v57 = vor.u32 %v8761_v21, %v7531_v54 }
 0x2cc   :  { %5533 = vmatpush.bf16.msra.mxu3 %v8182_v34  ;;  %5444 = vmatpush.bf16.msrb.mxu0 %v8130_v52 }
 0x2ce   :  { %v5319_v48 = vpop.f32.mrf.mxu2 }
 0x2d0   :  { %5534 = vmatpush.bf16.msra.mxu3 %v8158_v6  ;;  %5445 = vmatpush.bf16.msrb.mxu0 %v8106_v46  ;;  %v5239_v29 = vpop.f32.mrf.mxu0 }
 0x2d1   :  { %v5240_v55 = vadd.f32 %v5239_v29, %v5227_v58 }
 0x2d3   :  { %5446 = vmatmul.bf16.vlgmr.msrb.gmra.mxu0 %v9462_v9  ;;  %v5253_v40 = vadd.f32 %v9512_v56, %v5240_v55  ;;  %v3307_v56 = vperm.slane %v9529_v31, 3 }
 0x2d4   :  { %5490 = vmatpush.bf16.msra.mxu0 %v7702_v14  ;;  %5535 = vmatpush.bf16.msra.mxu3 %v8134_v43 }
 0x2d5   :  { %v5266_v27 = vadd.f32 %v9516_v30, %v5253_v40  ;;  %v5279_v30 = vadd.f32 %v9538_v0, %v3307_v56 }
 0x2d8   :  { %5491 = vmatpush.bf16.msra.mxu0 %v7678_v4  ;;  %5536 = vmatpush.bf16.msra.mxu3 %v8110_v18  ;;  %v5241_v53 = vpop.f32.mrf.mxu0 }
 0x2db   :  { %5537 = vmatmul.bf16.vlgmr.msra.gmra.mxu3 %v9462_v9 }
 0x2dc   :  { %5492 = vmatpush.bf16.msra.mxu0 %v7654_v38  ;;  %v5330_v11 = vpop.f32.mrf.mxu3 }
 0x2df   :  { %v5356_v12 = vpop.f32.mrf.mxu1 }
 0x2e0   :  { %5493 = vmatpush.bf16.msra.mxu0 %v7630_v25 }
 0x2e4   :  { %5494 = vmatpush.bf16.msra.mxu0 %v7606_v37  ;;  %v5332_v20 = vpop.f32.mrf.mxu3 }
 0x2e6   :  { %v5369_v9 = vpop.f32.mrf.mxu2 }
 0x2e7   :  { %v5358_v45 = vpop.f32.mrf.mxu1  ;;  %v5370_v35 = vadd.f32 %v5369_v9, %v3308_v60 }
 0x2e8   :  { %5495 = vmatpush.bf16.msra.mxu0 %v7582_v49 }
 0x2ec   :  { %5496 = vmatpush.bf16.msra.mxu0 %v7558_v17 }
 0x2ee   :  { %v5371_v63 = vpop.f32.mrf.mxu2 }
 0x2f0   :  { %5497 = vmatpush.bf16.msra.mxu0 %v7534_v57  ;;  %v5291_v44 = vpop.f32.mrf.mxu0 }
 0x2f1   :  { %v5292_v42 = vadd.f32 %v5291_v44, %v5279_v30 }
 0x2f3   :  { %5498 = vmatmul.bf16.vlgmr.msra.gmra.mxu0 %v9400_v62  ;;  %v5305_v34 = vadd.f32 %v9533_v10, %v5292_v42  ;;  %v5548_v10 = vrot.slane %v9524_v51, 3 }
 0x2f5   :  { %v5318_v19 = vadd.f32 %v9536_v22, %v5305_v34  ;;  %v3309_v22 = vperm.slane %v9529_v31, 5  ;;  %v5556_v7 = vsel %vm5553_vm0, %v9524_v51, %v5548_v10 }
 0x2f7   :  { %v5331_v59 = vadd.f32 %v5330_v11, %v5318_v19 }
 0x2f8   :  { %v5293_v52 = vpop.f32.mrf.mxu0 }
 0x2fc   :  { %v5382_v6 = vpop.f32.mrf.mxu3 }
 0x2fd   :  { %v5383_v62 = vadd.f32 %v5382_v6, %v5370_v35 }
 0x2ff   :  { %v5408_v58 = vpop.f32.mrf.mxu1 }
 0x304   :  { %v5384_v5 = vpop.f32.mrf.mxu3 }
 0x306   :  { %v5421_v33 = vpop.f32.mrf.mxu2 }
 0x307   :  { %v5410_v61 = vpop.f32.mrf.mxu1 }
 0x30e   :  { %v5423_v2 = vpop.f32.mrf.mxu2 }
 0x310   :  { %v5343_v28 = vpop.f32.mrf.mxu0 }
 0x311   :  { %v5344_v0 = vadd.f32 %v5343_v28, %v5331_v59 }
 0x313   :  { %v5357_v41 = vadd.f32 %v5356_v12, %v5344_v0 }
 0x315   :  { %v5543_v14 = vpack.c.bf16 %v5357_v41, %v5266_v27 }
 0x317   :  { %v5549_v43 = vrot.slane %v5543_v14, 6  ;;  %v5550_v11 = vrot.slane %v5543_v14, 1 }
 0x318   :  { %v5345_v13 = vpop.f32.mrf.mxu0 }
 0x319   :  { %v5559_v16 = vsel %vm5557_vm1, %v5556_v7, %v5549_v43 }
 0x31c   :  { %v5434_v18 = vpop.f32.mrf.mxu3 }
 0x31f   :  { %v5460_v46 = vpop.f32.mrf.mxu1 }
 0x320   :  { %v5461_v15 = vadd.f32 %v5460_v46, %v3309_v22 }
 0x324   :  { %v5436_v32 = vpop.f32.mrf.mxu3 }
 0x326   :  { %v5473_v48 = vpop.f32.mrf.mxu2 }
 0x327   :  { %v5474_v4 = vadd.f32 %v5473_v48, %v5461_v15  ;;  %v5462_v8 = vpop.f32.mrf.mxu1 }
 0x32e   :  { %v5475_v23 = vpop.f32.mrf.mxu2 }
 0x330   :  { %v5395_v38 = vpop.f32.mrf.mxu0 }
 0x331   :  { %v5396_v36 = vadd.f32 %v5395_v38, %v5383_v62 }
 0x333   :  { %v5409_v24 = vadd.f32 %v5408_v58, %v5396_v36 }
 0x335   :  { %v5422_v3 = vadd.f32 %v5421_v33, %v5409_v24 }
 0x337   :  { %v5435_v31 = vadd.f32 %v5434_v18, %v5422_v3 }
 0x338   :  { %v5397_v26 = vpop.f32.mrf.mxu0 }
 0x33c   :  { %v5486_v37 = vpop.f32.mrf.mxu3 }
 0x33d   :  { %v5487_v49 = vadd.f32 %v5486_v37, %v5474_v4 }
 0x33f   :  { %v5512_v25 = vpop.f32.mrf.mxu1 }
 0x344   :  { %v5488_v51 = vpop.f32.mrf.mxu3 }
 0x346   :  { %v5525_v29 = vpop.f32.mrf.mxu2 }
 0x347   :  { %v5514_v55 = vpop.f32.mrf.mxu1 }
 0x34e   :  { %v5527_v12 = vpop.f32.mrf.mxu2 }
 0x350   :  { %v5447_v39 = vpop.f32.mrf.mxu0 }
 0x351   :  { %v5448_v17 = vadd.f32 %v5447_v39, %v5435_v31 }
 0x358   :  { %v5449_v47 = vpop.f32.mrf.mxu0 }
 0x35e   :  { %v5538_v40 = vpop.f32.mrf.mxu3 }
 0x366   :  { %v5540_v27 = vpop.f32.mrf.mxu3 }
 0x370   :  { %v5499_v1 = vpop.f32.mrf.mxu0 }
 0x371   :  { %v5500_v50 = vadd.f32 %v5499_v1, %v5487_v49 }
 0x373   :  { %v5513_v53 = vadd.f32 %v5512_v25, %v5500_v50 }
 0x375   :  { %v5526_v9 = vadd.f32 %v5525_v29, %v5513_v53 }
 0x377   :  { %v5539_v45 = vadd.f32 %v5538_v40, %v5526_v9 }
 0x378   :  { %v5501_v21 = vpop.f32.mrf.mxu0 }
 0x379   :  { %v5544_v54 = vpack.c.bf16 %v5539_v45, %v5448_v17 }
 0x37b   :  { %v5551_v57 = vrot.slane %v5544_v54, 4  ;;  %v5552_v63 = vrot.slane %v5544_v54, 7 }
 0x37d   :  { %v5563_v20 = vsel %vm5560_vm2, %v5550_v11, %v5551_v57 }
 0x37e   :  { %v5566_v56 = vsel %vm5564_vm3, %v5563_v20, %v5552_v63 }
 0x37f   :  { %v5568_v30 = vsel %vm5567_vm4, %v5559_v16, %v5566_v56 }
 0x380   :  { %5570 = vst [vmem:[#allocation14] sm:$0x3f] %v5568_v30 }
 0x381   :  { %5581 = dma.vmem_to_hbm [thread:$0]  %s5577_s6, 96, %s5579_s1, [#allocation4]  }
 0x382   :  { %9173 = dma.done.wait [#allocation4], 96  }
 0x383   :  { %9174 = vsyncadd [#allocation4], 4294967200 }
 0x384   :  { %5586 = vsyncpa [#allocation3], 1 }
 0x385   :  { %5587 = vsyncpa [#allocation6], 1 }
 0x386   :  { %5588 = vsyncpa [#allocation9], 1 }
 0x387   :  { %5589 = vsyncpa [#allocation12], 1 }
 0x388   :  { %5590 = vsyncpa [#allocation4], 1 }

</bundles_post_ra>
